<compile_context>
chip_gen: v6e
topology: v6e:2x2x1
jax: 0.10.0
libtpu: 0.0.40
codegen_flags: <defaults>
</compile_context>

<pallas_src>
import jax
import jax.numpy as jnp
from jax import lax
from jax.experimental import pallas as pl
from jax.experimental.pallas import tpu as pltpu


def _tree_max5(a, b, c, d, e):
    # depth-3 max tree instead of a serial 4-deep chain
    return jnp.maximum(jnp.maximum(jnp.maximum(a, b), jnp.maximum(c, d)), e)


def sppf_kernel(x_ref, w1_ref, b1_ref, w2_ref, b2_ref, o_ref, pad_ref, stage_ref):
    """Grid = (batch, c2_tile).  One batch element, one C2 slab per step.

    x_ref    : (1, H, W, C1)        bf16  input tile (NHWC)
    w1_ref   : (C1, C_)             bf16  folded cv1 weight (1x1 conv + BN)
    b1_ref   : (1, C_)              f32   folded cv1 bias
    w2_ref   : (4*C_, TC2)          bf16  folded cv2 weight slab
    b2_ref   : (1, TC2)             f32   folded cv2 bias slab
    o_ref    : (1, H, W, TC2)       bf16  output tile
    pad_ref  : (H+4, W+4, C_)       bf16/f32 pooling scratch with -inf frame
    stage_ref: (H*W, 4*C_)          bf16  staged [t, y1, y2, y3]
    """
    _, H, W, C1 = x_ref.shape
    HW = H * W
    c_ = w1_ref.shape[1]
    tc2 = w2_ref.shape[1]

    # cv1 + the three pools only run on the first C2 tile of each batch; the
    # pyramid is staged into persistent VMEM and reused by the other C2 tiles
    # of the same batch (the c2 axis is "arbitrary", so it runs in order).
    @pl.when(pl.program_id(1) == 0)
    def _stage_pyramid():
        # ---- cv1: 1x1 conv == channel matmul (bf16 MXU) + folded BN + SiLU.
        xb = x_ref[0].reshape(HW, C1)
        z1 = (jnp.dot(xb, w1_ref[...], preferred_element_type=jnp.float32)
              + b1_ref[...])
        # Exact reciprocal here: cv1 error would propagate through three pools
        # and cv2.  The epilogue keeps the approx EUP reciprocal.
        t16 = (z1 * pl.reciprocal(1.0 + jnp.exp(-z1), approx=False)
               ).astype(stage_ref.dtype)
        stage_ref[:, 0:c_] = t16

        # -inf frame for the pooling scratch (single splat store; the interior
        # is rewritten each pool, the border frame stays -inf because the
        # H-direction max re-derives -inf in the W-border columns).
        pad_ref[...] = jnp.full(pad_ref.shape, -jnp.inf, pad_ref.dtype)

        cur = t16.astype(pad_ref.dtype).reshape(H, W, c_)
        for i in range(1, 4):
            # store current tensor into the interior of the bordered scratch
            pad_ref[2:H + 2, 2:W + 2, :] = cur
            # H direction: 5 leading-axis slices of the scratch (layout-trivial)
            b = _tree_max5(
                pad_ref[0:H, :, :],
                pad_ref[1:H + 1, :, :],
                pad_ref[2:H + 2, :, :],
                pad_ref[3:H + 3, :, :],
                pad_ref[4:H + 4, :, :],
            )
            # b inherits -inf in its W-border columns; writing it back keeps
            # the scratch border invariant and lets the W direction read
            # shifted slices straight from VMEM (no padded value copy).
            pad_ref[2:H + 2, :, :] = b
            cur = _tree_max5(
                pad_ref[2:H + 2, 0:W, :],
                pad_ref[2:H + 2, 1:W + 1, :],
                pad_ref[2:H + 2, 2:W + 2, :],
                pad_ref[2:H + 2, 3:W + 3, :],
                pad_ref[2:H + 2, 4:W + 4, :],
            )
            # max of bf16-representable values -> cast to bf16 is exact
            stage_ref[:, i * c_:(i + 1) * c_] = (
                cur.reshape(HW, c_).astype(stage_ref.dtype))

    # ---- cv2 slab: one K=4*C_ matmul per step (fills the 256-wide MXU).
    acc = (jnp.dot(stage_ref[...], w2_ref[...],
                   preferred_element_type=jnp.float32) + b2_ref[...])
    z = acc * pl.reciprocal(1.0 + jnp.exp(-acc), approx=True)   # SiLU (EUP)
    o_ref[0] = z.reshape(H, W, tc2).astype(o_ref.dtype)


def _pick_c2_tile(c2):
    """Largest lane-aligned C2 tile that still yields >1 grid step per batch."""
    if c2 % 256 == 0 and c2 >= 512:
        return 256
    if c2 % 128 == 0 and c2 >= 256:
        return 128
    return c2


def _pool_dtype():
    # v5e has no native bf16 VALU: keep the max trees in f32 there.
    try:
        kind = jax.devices()[0].device_kind.lower()
    except Exception:
        kind = ""
    return jnp.float32 if "v5" in kind else jnp.bfloat16


@jax.jit
def sppf_forward_nhwc(x_nhwc, w1, b1, w2, b2):
    """NHWC in / NHWC out, bf16 at the kernel boundary.

    x_nhwc: (N, H, W, C1) bf16 (any float is cast)
    w1    : (C1, C_)      bf16 folded cv1 weight
    b1    : (1, C_)       f32
    w2    : (4*C_, C2)    bf16 folded cv2 weight (rows ordered [x, y1, y2, y3])
    b2    : (1, C2)       f32
    """
    x_nhwc = x_nhwc.astype(jnp.bfloat16)
    N, H, W, C1 = x_nhwc.shape
    C_ = w1.shape[1]
    C2 = w2.shape[1]

    TC2 = _pick_c2_tile(C2)
    n_c2 = C2 // TC2
    pool_dtype = _pool_dtype()
    pool_bpe = jnp.dtype(pool_dtype).itemsize

    # VMEM requirement (double-buffered tiles + weights + scratch + f32 temps),
    # with headroom, capped at 48 MiB so v7x (64 MiB physical) keeps margin.
    est = (2 * H * W * C1 * 2 + 2 * H * W * TC2 * 2
           + 2 * (C1 * C_ + 4 * C_ * TC2) * 2 + 2 * (C_ + TC2) * 4
           + (H + 4) * (W + 4) * C_ * pool_bpe
           + H * W * 4 * C_ * 2
           + 8 * H * W * max(C_, TC2) * 4)
    vmem_limit = int(min(48 * 1024 * 1024, max(16 * 1024 * 1024, est * 1.5)))

    cost = pl.CostEstimate(
        flops=2 * N * H * W * (C1 * C_ + 4 * C_ * C2),
        transcendentals=N * H * W * (C_ + C2),
        bytes_accessed=(N * H * W * (C1 + C2) * 2
                        + (C1 * C_ + 4 * C_ * C2) * 2 + (C_ + C2) * 4),
    )

    grid_spec = pltpu.PrefetchScalarGridSpec(
        num_scalar_prefetch=0,
        grid=(N, n_c2),
        in_specs=[
            pl.BlockSpec((1, H, W, C1), lambda n, j: (n, 0, 0, 0)),
            pl.BlockSpec((C1, C_), lambda n, j: (0, 0)),
            pl.BlockSpec((1, C_), lambda n, j: (0, 0)),
            pl.BlockSpec((4 * C_, TC2), lambda n, j: (0, j)),
            pl.BlockSpec((1, TC2), lambda n, j: (0, j)),
        ],
        out_specs=pl.BlockSpec((1, H, W, TC2), lambda n, j: (n, 0, 0, j)),
        scratch_shapes=[
            pltpu.VMEM((H + 4, W + 4, C_), pool_dtype),      # pooling scratch
            pltpu.VMEM((H * W, 4 * C_), jnp.bfloat16),       # staged pyramid
        ],
    )

    return pl.pallas_call(
        sppf_kernel,
        out_shape=jax.ShapeDtypeStruct((N, H, W, C2), jnp.bfloat16),
        grid_spec=grid_spec,
        compiler_params=pltpu.CompilerParams(
            dimension_semantics=("parallel", "arbitrary"),
            vmem_limit_bytes=vmem_limit,
        ),
        cost_estimate=cost,
    )(x_nhwc, w1, b1, w2, b2)


def sppf_forward_nchw(x_nchw, w1, b1, w2, b2):
    """Convenience wrapper for PyTorch-layout callers (pays two transposes)."""
    out = sppf_forward_nhwc(jnp.transpose(x_nchw, (0, 2, 3, 1)), w1, b1, w2, b2)
    return jnp.transpose(out, (0, 3, 1, 2))


# ----------------------------- parameter setup -------------------------------
def make_sppf_params(key, c1, c2):
    """Build Conv(1x1)+BN params, fold BN, return kernel-ready tensors."""
    c_ = c1 // 2

    def fold(key, cin, cout):
        kw, kg, kb, km, kv = jax.random.split(key, 5)
        w = jax.random.normal(kw, (cout, cin), jnp.float32) * 0.1  # conv, no bias
        gamma = 1.0 + 0.1 * jax.random.normal(kg, (cout,), jnp.float32)
        beta = 0.1 * jax.random.normal(kb, (cout,), jnp.float32)
        mean = 0.1 * jax.random.normal(km, (cout,), jnp.float32)
        var = jnp.abs(jax.random.normal(kv, (cout,), jnp.float32)) + 0.5
        eps = 1e-3  # PyTorch BatchNorm2d default eps in ultralytics Conv
        scale = gamma / jnp.sqrt(var + eps)
        w_eff = (w * scale[:, None]).T          # (cin, cout) for x @ W
        b_eff = (beta - mean * scale)[None, :]  # (1, cout)
        return w_eff, b_eff

    k1, k2 = jax.random.split(key)
    w1f, b1 = fold(k1, c1, c_)            # cv1: c1 -> c_
    w2f, b2 = fold(k2, 4 * c_, c2)        # cv2: 4*c_ -> c2 (rows = [x,y1,y2,y3])
    return (w1f.astype(jnp.bfloat16), b1,
            w2f.astype(jnp.bfloat16), b2)


# ------------------------------- reference -----------------------------------
def sppf_reference_nhwc(x_nhwc, w1, b1, w2, b2):
    """Pure-XLA reference mirroring the kernel's numeric recipe
    (bf16 matmul inputs, f32 accumulation, bf16 pooled intermediates)."""
    N, H, W, C1 = x_nhwc.shape
    c_ = w1.shape[1]

    xb = x_nhwc.astype(jnp.bfloat16).reshape(-1, C1)
    z1 = jnp.dot(xb, w1, preferred_element_type=jnp.float32) + b1
    t = (z1 * jax.nn.sigmoid(z1)).astype(jnp.bfloat16).reshape(N, H, W, c_)

    def pool(a):
        return lax.reduce_window(a, jnp.array(-jnp.inf, a.dtype), lax.max,
                                 (1, 5, 5, 1), (1, 1, 1, 1),
                                 ((0, 0), (2, 2), (2, 2), (0, 0)))

    y1 = pool(t)
    y2 = pool(y1)
    y3 = pool(y2)
    cat = jnp.concatenate([t, y1, y2, y3], axis=-1).reshape(-1, 4 * c_)
    z2 = jnp.dot(cat, w2, preferred_element_type=jnp.float32) + b2
    out = z2 * jax.nn.sigmoid(z2)
    return out.reshape(N, H, W, -1)


if __name__ == "__main__":
    key = jax.random.PRNGKey(0)
    kx, kp = jax.random.split(key)

    # Small but lane-aligned SPPF shapes: C_ = C1//2 = 128 and C2 multiples of
    # 128 (full 128-lane vregs, unmasked stores), W % 16 == 0 so the bf16
    # (H,W,C)->(H*W,C) views are layout no-ops.
    N, C1, C2, H, W = 2, 256, 256, 16, 16

    x_nchw = jax.random.normal(kx, (N, C1, H, W), jnp.float32)  # PyTorch layout
    x = jnp.transpose(x_nchw, (0, 2, 3, 1)).astype(jnp.bfloat16)  # NHWC bf16
    w1, b1, w2, b2 = make_sppf_params(kp, C1, C2)

    out = sppf_forward_nhwc(x, w1, b1, w2, b2)
    out = jax.block_until_ready(out)

    assert out.shape == (N, H, W, C2)
    ref = sppf_reference_nhwc(x, w1, b1, w2, b2)
    out_f32 = out.astype(jnp.float32)
    err = jnp.max(jnp.abs(out_f32 - ref))
    # Tolerance reflects the bf16 MXU path, bf16 output rounding and the
    # approx-reciprocal SiLU in the epilogue (outputs have std ~3-4).
    assert jnp.allclose(out_f32, ref, atol=1.5e-1, rtol=5e-2), f"max abs err = {err}"

    print("KERNEL_OK")
</pallas_src>

<mosaic_0001>
module attributes {stable_mosaic.version = 11 : i64} {
  func.func @sppf_kernel(%arg0: i32, %arg1: i32, %arg2: memref<1x16x16x256xbf16, #tpu.memory_space<vmem>>, %arg3: memref<256x128xbf16, #tpu.memory_space<vmem>>, %arg4: memref<1x128xf32, #tpu.memory_space<vmem>>, %arg5: memref<512x128xbf16, #tpu.memory_space<vmem>>, %arg6: memref<1x128xf32, #tpu.memory_space<vmem>>, %arg7: memref<1x16x16x128xbf16, #tpu.memory_space<vmem>>, %arg8: memref<20x20x128xbf16, #tpu.memory_space<vmem>>, %arg9: memref<256x512xbf16, #tpu.memory_space<vmem>>) attributes {dimension_semantics = [#tpu.dimension_semantics<parallel>, #tpu.dimension_semantics<arbitrary>], iteration_bounds = array<i64: 2, 2>, scalar_prefetch = 0 : i64, scratch_operands = 2 : i64, tpu.core_type = #tpu.core_type<tc>, window_params = [{transform_indices = @transform_0, window_bounds = array<i64: 1, 16, 16, 256>}, {pipeline_mode = #tpu.pipeline_mode<synchronous>, transform_indices = @transform_1, window_bounds = array<i64: 256, 128>}, {pipeline_mode = #tpu.pipeline_mode<synchronous>, transform_indices = @transform_2, window_bounds = array<i64: 1, 128>}, {transform_indices = @transform_3, window_bounds = array<i64: 512, 128>}, {transform_indices = @transform_4, window_bounds = array<i64: 1, 128>}, {transform_indices = @transform_5, window_bounds = array<i64: 1, 16, 16, 128>}]} {
    %c0_i32 = arith.constant 0 : i32
    %0 = arith.cmpi eq, %arg1, %c0_i32 : i32
    %1 = arith.extui %0 : i1 to i32
    %c0_i32_0 = arith.constant 0 : i32
    %2 = arith.cmpi ne, %1, %c0_i32_0 : i32
    scf.if %2 {
      %c0_12 = arith.constant 0 : index
      %c0_13 = arith.constant 0 : index
      %c0_14 = arith.constant 0 : index
      %c0_15 = arith.constant 0 : index
      %21 = vector.load %arg2[%c0_12, %c0_13, %c0_14, %c0_15] : memref<1x16x16x256xbf16, #tpu.memory_space<vmem>>, vector<1x16x16x256xbf16>
      %22 = vector.shape_cast %21 : vector<1x16x16x256xbf16> to vector<16x16x256xbf16>
      %23 = vector.shape_cast %22 : vector<16x16x256xbf16> to vector<256x256xbf16>
      %c0_16 = arith.constant 0 : index
      %c0_17 = arith.constant 0 : index
      %24 = vector.load %arg3[%c0_16, %c0_17] : memref<256x128xbf16, #tpu.memory_space<vmem>>, vector<256x128xbf16>
      %cst_18 = arith.constant dense<0.000000e+00> : vector<256x128xf32>
      %25 = tpu.matmul %23, %24, %cst_18 {dimension_numbers = #tpu.dot_dimension_numbers<[1], [0], [0], [1], [0, 0, 1, 1], [], []>} : vector<256x256xbf16>, vector<256x128xbf16>, vector<256x128xf32> -> vector<256x128xf32>
      %c0_19 = arith.constant 0 : index
      %c0_20 = arith.constant 0 : index
      %26 = vector.load %arg4[%c0_19, %c0_20] : memref<1x128xf32, #tpu.memory_space<vmem>>, vector<1x128xf32>
      %27 = vector.broadcast %26 : vector<1x128xf32> to vector<256x128xf32>
      %28 = arith.addf %25, %27 : vector<256x128xf32>
      %cst_21 = arith.constant 0.000000e+00 : f32
      %29 = vector.broadcast %cst_21 : f32 to vector<256x128xf32>
      %30 = arith.subf %29, %28 : vector<256x128xf32>
      %31 = math.exp %30 : vector<256x128xf32>
      %cst_22 = arith.constant 1.000000e+00 : f32
      %32 = vector.broadcast %cst_22 : f32 to vector<256x128xf32>
      %33 = arith.addf %32, %31 : vector<256x128xf32>
      %34 = tpu.reciprocal %33 : vector<256x128xf32> -> vector<256x128xf32>
      %35 = arith.mulf %28, %34 : vector<256x128xf32>
      %36 = arith.truncf %35 : vector<256x128xf32> to vector<256x128xbf16>
      %c0_23 = arith.constant 0 : index
      %c0_24 = arith.constant 0 : index
      %37 = vector.load %arg9[%c0_23, %c0_24] : memref<256x512xbf16, #tpu.memory_space<vmem>>, vector<256x128xbf16>
      tpu.vector_store %arg9[%c0_23, %c0_24], %36 {strides = array<i32>} : memref<256x512xbf16, #tpu.memory_space<vmem>>, vector<256x128xbf16>,
      %cst_25 = arith.constant 0xFF80 : bf16
      %38 = vector.broadcast %cst_25 : bf16 to vector<20x20x128xbf16>
      %c0_26 = arith.constant 0 : index
      %c0_27 = arith.constant 0 : index
      %c0_28 = arith.constant 0 : index
      %39 = vector.load %arg8[%c0_26, %c0_27, %c0_28] : memref<20x20x128xbf16, #tpu.memory_space<vmem>>, vector<20x20x128xbf16>
      tpu.vector_store %arg8[%c0_26, %c0_27, %c0_28], %38 {strides = array<i32>} : memref<20x20x128xbf16, #tpu.memory_space<vmem>>, vector<20x20x128xbf16>,
      %40 = vector.shape_cast %36 : vector<256x128xbf16> to vector<16x16x128xbf16>
      %c2 = arith.constant 2 : index
      %c2_29 = arith.constant 2 : index
      %c0_30 = arith.constant 0 : index
      %41 = vector.load %arg8[%c2, %c2_29, %c0_30] : memref<20x20x128xbf16, #tpu.memory_space<vmem>>, vector<16x16x128xbf16>
      tpu.vector_store %arg8[%c2, %c2_29, %c0_30], %40 {strides = array<i32>} : memref<20x20x128xbf16, #tpu.memory_space<vmem>>, vector<16x16x128xbf16>,
      %c0_31 = arith.constant 0 : index
      %c0_32 = arith.constant 0 : index
      %c0_33 = arith.constant 0 : index
      %42 = vector.load %arg8[%c0_31, %c0_32, %c0_33] : memref<20x20x128xbf16, #tpu.memory_space<vmem>>, vector<16x20x128xbf16>
      %c1 = arith.constant 1 : index
      %c0_34 = arith.constant 0 : index
      %c0_35 = arith.constant 0 : index
      %43 = vector.load %arg8[%c1, %c0_34, %c0_35] : memref<20x20x128xbf16, #tpu.memory_space<vmem>>, vector<16x20x128xbf16>
      %c2_36 = arith.constant 2 : index
      %c0_37 = arith.constant 0 : index
      %c0_38 = arith.constant 0 : index
      %44 = vector.load %arg8[%c2_36, %c0_37, %c0_38] : memref<20x20x128xbf16, #tpu.memory_space<vmem>>, vector<16x20x128xbf16>
      %c3 = arith.constant 3 : index
      %c0_39 = arith.constant 0 : index
      %c0_40 = arith.constant 0 : index
      %45 = vector.load %arg8[%c3, %c0_39, %c0_40] : memref<20x20x128xbf16, #tpu.memory_space<vmem>>, vector<16x20x128xbf16>
      %c4 = arith.constant 4 : index
      %c0_41 = arith.constant 0 : index
      %c0_42 = arith.constant 0 : index
      %46 = vector.load %arg8[%c4, %c0_41, %c0_42] : memref<20x20x128xbf16, #tpu.memory_space<vmem>>, vector<16x20x128xbf16>
      %47 = arith.maximumf %42, %43 : vector<16x20x128xbf16>
      %48 = arith.maximumf %44, %45 : vector<16x20x128xbf16>
      %49 = arith.maximumf %47, %48 : vector<16x20x128xbf16>
      %50 = arith.maximumf %49, %46 : vector<16x20x128xbf16>
      %c2_43 = arith.constant 2 : index
      %c0_44 = arith.constant 0 : index
      %c0_45 = arith.constant 0 : index
      %51 = vector.load %arg8[%c2_43, %c0_44, %c0_45] : memref<20x20x128xbf16, #tpu.memory_space<vmem>>, vector<16x20x128xbf16>
      tpu.vector_store %arg8[%c2_43, %c0_44, %c0_45], %50 {strides = array<i32>} : memref<20x20x128xbf16, #tpu.memory_space<vmem>>, vector<16x20x128xbf16>,
      %c2_46 = arith.constant 2 : index
      %c0_47 = arith.constant 0 : index
      %c0_48 = arith.constant 0 : index
      %52 = vector.load %arg8[%c2_46, %c0_47, %c0_48] : memref<20x20x128xbf16, #tpu.memory_space<vmem>>, vector<16x16x128xbf16>
      %c2_49 = arith.constant 2 : index
      %c1_50 = arith.constant 1 : index
      %c0_51 = arith.constant 0 : index
      %53 = vector.load %arg8[%c2_49, %c1_50, %c0_51] : memref<20x20x128xbf16, #tpu.memory_space<vmem>>, vector<16x16x128xbf16>
      %c2_52 = arith.constant 2 : index
      %c2_53 = arith.constant 2 : index
      %c0_54 = arith.constant 0 : index
      %54 = vector.load %arg8[%c2_52, %c2_53, %c0_54] : memref<20x20x128xbf16, #tpu.memory_space<vmem>>, vector<16x16x128xbf16>
      %c2_55 = arith.constant 2 : index
      %c3_56 = arith.constant 3 : index
      %c0_57 = arith.constant 0 : index
      %55 = vector.load %arg8[%c2_55, %c3_56, %c0_57] : memref<20x20x128xbf16, #tpu.memory_space<vmem>>, vector<16x16x128xbf16>
      %c2_58 = arith.constant 2 : index
      %c4_59 = arith.constant 4 : index
      %c0_60 = arith.constant 0 : index
      %56 = vector.load %arg8[%c2_58, %c4_59, %c0_60] : memref<20x20x128xbf16, #tpu.memory_space<vmem>>, vector<16x16x128xbf16>
      %57 = arith.maximumf %52, %53 : vector<16x16x128xbf16>
      %58 = arith.maximumf %54, %55 : vector<16x16x128xbf16>
      %59 = arith.maximumf %57, %58 : vector<16x16x128xbf16>
      %60 = arith.maximumf %59, %56 : vector<16x16x128xbf16>
      %61 = vector.shape_cast %60 : vector<16x16x128xbf16> to vector<256x128xbf16>
      %c0_61 = arith.constant 0 : index
      %c128 = arith.constant 128 : index
      %62 = vector.load %arg9[%c0_61, %c128] : memref<256x512xbf16, #tpu.memory_space<vmem>>, vector<256x128xbf16>
      tpu.vector_store %arg9[%c0_61, %c128], %61 {strides = array<i32>} : memref<256x512xbf16, #tpu.memory_space<vmem>>, vector<256x128xbf16>,
      %c2_62 = arith.constant 2 : index
      %c2_63 = arith.constant 2 : index
      %c0_64 = arith.constant 0 : index
      %63 = vector.load %arg8[%c2_62, %c2_63, %c0_64] : memref<20x20x128xbf16, #tpu.memory_space<vmem>>, vector<16x16x128xbf16>
      tpu.vector_store %arg8[%c2_62, %c2_63, %c0_64], %60 {strides = array<i32>} : memref<20x20x128xbf16, #tpu.memory_space<vmem>>, vector<16x16x128xbf16>,
      %c0_65 = arith.constant 0 : index
      %c0_66 = arith.constant 0 : index
      %c0_67 = arith.constant 0 : index
      %64 = vector.load %arg8[%c0_65, %c0_66, %c0_67] : memref<20x20x128xbf16, #tpu.memory_space<vmem>>, vector<16x20x128xbf16>
      %c1_68 = arith.constant 1 : index
      %c0_69 = arith.constant 0 : index
      %c0_70 = arith.constant 0 : index
      %65 = vector.load %arg8[%c1_68, %c0_69, %c0_70] : memref<20x20x128xbf16, #tpu.memory_space<vmem>>, vector<16x20x128xbf16>
      %c2_71 = arith.constant 2 : index
      %c0_72 = arith.constant 0 : index
      %c0_73 = arith.constant 0 : index
      %66 = vector.load %arg8[%c2_71, %c0_72, %c0_73] : memref<20x20x128xbf16, #tpu.memory_space<vmem>>, vector<16x20x128xbf16>
      %c3_74 = arith.constant 3 : index
      %c0_75 = arith.constant 0 : index
      %c0_76 = arith.constant 0 : index
      %67 = vector.load %arg8[%c3_74, %c0_75, %c0_76] : memref<20x20x128xbf16, #tpu.memory_space<vmem>>, vector<16x20x128xbf16>
      %c4_77 = arith.constant 4 : index
      %c0_78 = arith.constant 0 : index
      %c0_79 = arith.constant 0 : index
      %68 = vector.load %arg8[%c4_77, %c0_78, %c0_79] : memref<20x20x128xbf16, #tpu.memory_space<vmem>>, vector<16x20x128xbf16>
      %69 = arith.maximumf %64, %65 : vector<16x20x128xbf16>
      %70 = arith.maximumf %66, %67 : vector<16x20x128xbf16>
      %71 = arith.maximumf %69, %70 : vector<16x20x128xbf16>
      %72 = arith.maximumf %71, %68 : vector<16x20x128xbf16>
      %c2_80 = arith.constant 2 : index
      %c0_81 = arith.constant 0 : index
      %c0_82 = arith.constant 0 : index
      %73 = vector.load %arg8[%c2_80, %c0_81, %c0_82] : memref<20x20x128xbf16, #tpu.memory_space<vmem>>, vector<16x20x128xbf16>
      tpu.vector_store %arg8[%c2_80, %c0_81, %c0_82], %72 {strides = array<i32>} : memref<20x20x128xbf16, #tpu.memory_space<vmem>>, vector<16x20x128xbf16>,
      %c2_83 = arith.constant 2 : index
      %c0_84 = arith.constant 0 : index
      %c0_85 = arith.constant 0 : index
      %74 = vector.load %arg8[%c2_83, %c0_84, %c0_85] : memref<20x20x128xbf16, #tpu.memory_space<vmem>>, vector<16x16x128xbf16>
      %c2_86 = arith.constant 2 : index
      %c1_87 = arith.constant 1 : index
      %c0_88 = arith.constant 0 : index
      %75 = vector.load %arg8[%c2_86, %c1_87, %c0_88] : memref<20x20x128xbf16, #tpu.memory_space<vmem>>, vector<16x16x128xbf16>
      %c2_89 = arith.constant 2 : index
      %c2_90 = arith.constant 2 : index
      %c0_91 = arith.constant 0 : index
      %76 = vector.load %arg8[%c2_89, %c2_90, %c0_91] : memref<20x20x128xbf16, #tpu.memory_space<vmem>>, vector<16x16x128xbf16>
      %c2_92 = arith.constant 2 : index
      %c3_93 = arith.constant 3 : index
      %c0_94 = arith.constant 0 : index
      %77 = vector.load %arg8[%c2_92, %c3_93, %c0_94] : memref<20x20x128xbf16, #tpu.memory_space<vmem>>, vector<16x16x128xbf16>
      %c2_95 = arith.constant 2 : index
      %c4_96 = arith.constant 4 : index
      %c0_97 = arith.constant 0 : index
      %78 = vector.load %arg8[%c2_95, %c4_96, %c0_97] : memref<20x20x128xbf16, #tpu.memory_space<vmem>>, vector<16x16x128xbf16>
      %79 = arith.maximumf %74, %75 : vector<16x16x128xbf16>
      %80 = arith.maximumf %76, %77 : vector<16x16x128xbf16>
      %81 = arith.maximumf %79, %80 : vector<16x16x128xbf16>
      %82 = arith.maximumf %81, %78 : vector<16x16x128xbf16>
      %83 = vector.shape_cast %82 : vector<16x16x128xbf16> to vector<256x128xbf16>
      %c0_98 = arith.constant 0 : index
      %c256 = arith.constant 256 : index
      %84 = vector.load %arg9[%c0_98, %c256] : memref<256x512xbf16, #tpu.memory_space<vmem>>, vector<256x128xbf16>
      tpu.vector_store %arg9[%c0_98, %c256], %83 {strides = array<i32>} : memref<256x512xbf16, #tpu.memory_space<vmem>>, vector<256x128xbf16>,
      %c2_99 = arith.constant 2 : index
      %c2_100 = arith.constant 2 : index
      %c0_101 = arith.constant 0 : index
      %85 = vector.load %arg8[%c2_99, %c2_100, %c0_101] : memref<20x20x128xbf16, #tpu.memory_space<vmem>>, vector<16x16x128xbf16>
      tpu.vector_store %arg8[%c2_99, %c2_100, %c0_101], %82 {strides = array<i32>} : memref<20x20x128xbf16, #tpu.memory_space<vmem>>, vector<16x16x128xbf16>,
      %c0_102 = arith.constant 0 : index
      %c0_103 = arith.constant 0 : index
      %c0_104 = arith.constant 0 : index
      %86 = vector.load %arg8[%c0_102, %c0_103, %c0_104] : memref<20x20x128xbf16, #tpu.memory_space<vmem>>, vector<16x20x128xbf16>
      %c1_105 = arith.constant 1 : index
      %c0_106 = arith.constant 0 : index
      %c0_107 = arith.constant 0 : index
      %87 = vector.load %arg8[%c1_105, %c0_106, %c0_107] : memref<20x20x128xbf16, #tpu.memory_space<vmem>>, vector<16x20x128xbf16>
      %c2_108 = arith.constant 2 : index
      %c0_109 = arith.constant 0 : index
      %c0_110 = arith.constant 0 : index
      %88 = vector.load %arg8[%c2_108, %c0_109, %c0_110] : memref<20x20x128xbf16, #tpu.memory_space<vmem>>, vector<16x20x128xbf16>
      %c3_111 = arith.constant 3 : index
      %c0_112 = arith.constant 0 : index
      %c0_113 = arith.constant 0 : index
      %89 = vector.load %arg8[%c3_111, %c0_112, %c0_113] : memref<20x20x128xbf16, #tpu.memory_space<vmem>>, vector<16x20x128xbf16>
      %c4_114 = arith.constant 4 : index
      %c0_115 = arith.constant 0 : index
      %c0_116 = arith.constant 0 : index
      %90 = vector.load %arg8[%c4_114, %c0_115, %c0_116] : memref<20x20x128xbf16, #tpu.memory_space<vmem>>, vector<16x20x128xbf16>
      %91 = arith.maximumf %86, %87 : vector<16x20x128xbf16>
      %92 = arith.maximumf %88, %89 : vector<16x20x128xbf16>
      %93 = arith.maximumf %91, %92 : vector<16x20x128xbf16>
      %94 = arith.maximumf %93, %90 : vector<16x20x128xbf16>
      %c2_117 = arith.constant 2 : index
      %c0_118 = arith.constant 0 : index
      %c0_119 = arith.constant 0 : index
      %95 = vector.load %arg8[%c2_117, %c0_118, %c0_119] : memref<20x20x128xbf16, #tpu.memory_space<vmem>>, vector<16x20x128xbf16>
      tpu.vector_store %arg8[%c2_117, %c0_118, %c0_119], %94 {strides = array<i32>} : memref<20x20x128xbf16, #tpu.memory_space<vmem>>, vector<16x20x128xbf16>,
      %c2_120 = arith.constant 2 : index
      %c0_121 = arith.constant 0 : index
      %c0_122 = arith.constant 0 : index
      %96 = vector.load %arg8[%c2_120, %c0_121, %c0_122] : memref<20x20x128xbf16, #tpu.memory_space<vmem>>, vector<16x16x128xbf16>
      %c2_123 = arith.constant 2 : index
      %c1_124 = arith.constant 1 : index
      %c0_125 = arith.constant 0 : index
      %97 = vector.load %arg8[%c2_123, %c1_124, %c0_125] : memref<20x20x128xbf16, #tpu.memory_space<vmem>>, vector<16x16x128xbf16>
      %c2_126 = arith.constant 2 : index
      %c2_127 = arith.constant 2 : index
      %c0_128 = arith.constant 0 : index
      %98 = vector.load %arg8[%c2_126, %c2_127, %c0_128] : memref<20x20x128xbf16, #tpu.memory_space<vmem>>, vector<16x16x128xbf16>
      %c2_129 = arith.constant 2 : index
      %c3_130 = arith.constant 3 : index
      %c0_131 = arith.constant 0 : index
      %99 = vector.load %arg8[%c2_129, %c3_130, %c0_131] : memref<20x20x128xbf16, #tpu.memory_space<vmem>>, vector<16x16x128xbf16>
      %c2_132 = arith.constant 2 : index
      %c4_133 = arith.constant 4 : index
      %c0_134 = arith.constant 0 : index
      %100 = vector.load %arg8[%c2_132, %c4_133, %c0_134] : memref<20x20x128xbf16, #tpu.memory_space<vmem>>, vector<16x16x128xbf16>
      %101 = arith.maximumf %96, %97 : vector<16x16x128xbf16>
      %102 = arith.maximumf %98, %99 : vector<16x16x128xbf16>
      %103 = arith.maximumf %101, %102 : vector<16x16x128xbf16>
      %104 = arith.maximumf %103, %100 : vector<16x16x128xbf16>
      %105 = vector.shape_cast %104 : vector<16x16x128xbf16> to vector<256x128xbf16>
      %c0_135 = arith.constant 0 : index
      %c384 = arith.constant 384 : index
      %106 = vector.load %arg9[%c0_135, %c384] : memref<256x512xbf16, #tpu.memory_space<vmem>>, vector<256x128xbf16>
      tpu.vector_store %arg9[%c0_135, %c384], %105 {strides = array<i32>} : memref<256x512xbf16, #tpu.memory_space<vmem>>, vector<256x128xbf16>,
    } else {
    }
    %c0 = arith.constant 0 : index
    %c0_1 = arith.constant 0 : index
    %3 = vector.load %arg9[%c0, %c0_1] : memref<256x512xbf16, #tpu.memory_space<vmem>>, vector<256x512xbf16>
    %c0_2 = arith.constant 0 : index
    %c0_3 = arith.constant 0 : index
    %4 = vector.load %arg5[%c0_2, %c0_3] : memref<512x128xbf16, #tpu.memory_space<vmem>>, vector<512x128xbf16>
    %cst = arith.constant dense<0.000000e+00> : vector<256x128xf32>
    %5 = tpu.matmul %3, %4, %cst {dimension_numbers = #tpu.dot_dimension_numbers<[1], [0], [0], [1], [0, 0, 1, 1], [], []>} : vector<256x512xbf16>, vector<512x128xbf16>, vector<256x128xf32> -> vector<256x128xf32>
    %c0_4 = arith.constant 0 : index
    %c0_5 = arith.constant 0 : index
    %6 = vector.load %arg6[%c0_4, %c0_5] : memref<1x128xf32, #tpu.memory_space<vmem>>, vector<1x128xf32>
    %7 = vector.broadcast %6 : vector<1x128xf32> to vector<256x128xf32>
    %8 = arith.addf %5, %7 : vector<256x128xf32>
    %cst_6 = arith.constant 0.000000e+00 : f32
    %9 = vector.broadcast %cst_6 : f32 to vector<256x128xf32>
    %10 = arith.subf %9, %8 : vector<256x128xf32>
    %11 = math.exp %10 : vector<256x128xf32>
    %cst_7 = arith.constant 1.000000e+00 : f32
    %12 = vector.broadcast %cst_7 : f32 to vector<256x128xf32>
    %13 = arith.addf %12, %11 : vector<256x128xf32>
    %14 = tpu.reciprocal %13 {approx = true} : vector<256x128xf32> -> vector<256x128xf32>
    %15 = arith.mulf %8, %14 : vector<256x128xf32>
    %16 = vector.shape_cast %15 : vector<256x128xf32> to vector<16x16x128xf32>
    %17 = arith.truncf %16 : vector<16x16x128xf32> to vector<16x16x128xbf16>
    %c0_8 = arith.constant 0 : index
    %c0_9 = arith.constant 0 : index
    %c0_10 = arith.constant 0 : index
    %c0_11 = arith.constant 0 : index
    %18 = vector.load %arg7[%c0_8, %c0_9, %c0_10, %c0_11] : memref<1x16x16x128xbf16, #tpu.memory_space<vmem>>, vector<1x16x16x128xbf16>
    %19 = vector.shape_cast %18 : vector<1x16x16x128xbf16> to vector<16x16x128xbf16>
    %20 = vector.shape_cast %17 : vector<16x16x128xbf16> to vector<1x16x16x128xbf16>
    tpu.vector_store %arg7[%c0_8, %c0_9, %c0_10, %c0_11], %20 {strides = array<i32>} : memref<1x16x16x128xbf16, #tpu.memory_space<vmem>>, vector<1x16x16x128xbf16>,
    return
  }
  func.func @transform_0(%arg0: i32, %arg1: i32) -> (i32, i32, i32, i32) {
    %c0_i32 = arith.constant 0 : i32
    %c0_i32_0 = arith.constant 0 : i32
    %c0_i32_1 = arith.constant 0 : i32
    %c0_i32_2 = arith.constant 0 : i32
    return %arg0, %c0_i32, %c0_i32_0, %c0_i32_1 : i32, i32, i32, i32
  }
  func.func @transform_1(%arg0: i32, %arg1: i32) -> (i32, i32) {
    %c0_i32 = arith.constant 0 : i32
    %c0_i32_0 = arith.constant 0 : i32
    %c0_i32_1 = arith.constant 0 : i32
    return %c0_i32, %c0_i32_0 : i32, i32
  }
  func.func @transform_2(%arg0: i32, %arg1: i32) -> (i32, i32) {
    %c0_i32 = arith.constant 0 : i32
    %c0_i32_0 = arith.constant 0 : i32
    %c0_i32_1 = arith.constant 0 : i32
    return %c0_i32, %c0_i32_0 : i32, i32
  }
  func.func @transform_3(%arg0: i32, %arg1: i32) -> (i32, i32) {
    %c0_i32 = arith.constant 0 : i32
    %c0_i32_0 = arith.constant 0 : i32
    return %c0_i32, %arg1 : i32, i32
  }
  func.func @transform_4(%arg0: i32, %arg1: i32) -> (i32, i32) {
    %c0_i32 = arith.constant 0 : i32
    %c0_i32_0 = arith.constant 0 : i32
    return %c0_i32, %arg1 : i32, i32
  }
  func.func @transform_5(%arg0: i32, %arg1: i32) -> (i32, i32, i32, i32) {
    %c0_i32 = arith.constant 0 : i32
    %c0_i32_0 = arith.constant 0 : i32
    %c0_i32_1 = arith.constant 0 : i32
    return %arg0, %c0_i32, %c0_i32_0, %arg1 : i32, i32, i32, i32
  }
}

</mosaic_0001>

<bundles_post_ra>
// kernel: sppf_forward_nhwc.1
= control target key start
LH: loop header
LB: loop body
LE: loop exit
PB: predicated region body
PF: predicated region fallthrough
CT: control target
= control target key end

     0   :  { %s17158_s0 = inlined_call_operand.hbm [shape: bf16[2,16,16,256], index: 0, kind: input, shape index: {}]   ;;  %s17159_s1 = inlined_call_operand.hbm [shape: bf16[256,128], index: 1, kind: input, shape index: {}]   ;;  %s17160_s2 = inlined_call_operand.vmem [shape: f32[1,128], index: 2, kind: input, shape index: {}]   ;;  %s17161_s3 = inlined_call_operand.hbm [shape: bf16[512,256], index: 3, kind: input, shape index: {}]   ;;  %s17162_s4 = inlined_call_operand.vmem [shape: f32[1,256], index: 4, kind: input, shape index: {}]   ;;  %s17163_s5 = inlined_call_operand.hbm [shape: bf16[2,16,16,256], index: 5, kind: output, shape index: {}]  }
   0x1   :  { %17434 = sst [smem:[#allocation109_spill]] %s17158_s0 }
   0x2   :  { %17435 = sst [smem:[#allocation110_spill]] %s17159_s1 }
   0x3   :  { %17436 = sst [smem:[#allocation111_spill]] %s17160_s2 }
   0x4   :  { %17437 = sst [smem:[#allocation112_spill]] %s17161_s3 }
   0x5   :  { %17438 = sst [smem:[#allocation113_spill]] %s17162_s4 }
   0x6   :  { %17439 = sst [smem:[#allocation114_spill]] %s17163_s5 }
   0x7   :  { %10 = vsyncpa [#allocation5], 0 }
   0x8   :  { %12 = vsyncpa [#allocation5 + $0x1], 0 }
   0x9   :  { %13 = vsyncpa [#allocation8], 0 }
   0xa   :  { %14 = vsyncpa [#allocation6], 0 }
   0xb   :  { %16 = vsyncpa [#allocation6 + $0x1], 0  ;;  %s10942_s18 = smov 0   ;;  %s10944_s19 = smov 0  }
   0xc   :  { %s10946_s20 = smov 0   ;;  %s10948_s21 = smov 0  }
   0xd   :  { %s10950_s22 = smov 0   ;;  %s10952_s23 = smov 0  }
   0xe   :  { %s10954_s24 = smov 0   ;;  %s10956_s25 = smov 0  }
   0xf   :  { %s10958_s26 = smov 0   ;;  %s10960_s27 = smov 0  }
  0x10   :  { %s10962_s28 = smov 0   ;;  %s10964_s29 = smov 0  }
  0x11   :  { %s10966_s30 = smov 0   ;;  %s10968_s6 = smov 0  }
  0x12 LB: > { %17440 = sst [smem:[#allocation15_spill]] %s10854_s20  ;;  %s31_s7 = sadd.s32 1, %s10890_s29  ;;  %s10898_s6 = sphi %s10968_s6, %s22_s6   ;;  %s10894_s30 = sphi %s10966_s30, %s18319_s30   ;;  %s10890_s29 = sphi %s10964_s29, %s18318_s29   ;;  %s10886_s28 = sphi %s10962_s28, %s18317_s28   ;;  %s10882_s27 = sphi %s10960_s27, %s18316_s27   ;;  %s10878_s26 = sphi %s10958_s26, %s18327_s26   ;;  %s10874_s25 = sphi %s10956_s25, %s18326_s25   ;;  %s10870_s24 = sphi %s10954_s24, %s18325_s24   ;;  %s10866_s23 = sphi %s10952_s23, %s18313_s23   ;;  %s10862_s22 = sphi %s10950_s22, %s18324_s22   ;;  %s10858_s21 = sphi %s10948_s21, %s18323_s21   ;;  %s10854_s20 = sphi %s10946_s20, %s18311_s20   ;;  %s10850_s19 = sphi %s10944_s19, %s18322_s19   ;;  %s10846_s18 = sphi %s10942_s18, %s18321_s18  }
  0x13   : > { %17441 = sst [smem:[#allocation16_spill]] %s10866_s23  ;;  %s34_s8 = sadd.s32 1, %s10894_s30 }
  0x14   : > { %17442 = sst [smem:[#allocation17_spill]] %s10878_s26  ;;  %p32_p0 = scmp.ge.s32.totalorder %s31_s7, 2 }
  0x15   : > { %17443 = sst [smem:[#allocation18_spill]] %s10882_s27  ;;  %s41_s9 = sadd.s32 1, %s10878_s26 }
  0x16   : > { %17444 = sst [smem:[#allocation19_spill]] %s10886_s28  ;;  %p48_p1 = scmp.ne.s32.totalorder %s10878_s26, %s10874_s25 }
  0x17   : > { %17445 = sst [smem:[#allocation20_spill]] %s10890_s29  ;;  %p49_p2 = scmp.eq.s32.totalorder %s10898_s6, 0 }
  0x18   : > { %17446 = sst [smem:[#allocation21_spill]] %s10894_s30  ;;  %s18329_s7 = smov (%p32_p0, %s31_s7), 0 }
  0x19   : > { %17447 = sst [smem:[#allocation22_spill]] %s18329_s7  ;;  %s18331_s8 = smov (!%p32_p0, %s34_s8), %s10894_s30 }
  0x1a   : > { %p11023_p3 = por %p49_p2, %p48_p1  ;;  %s11029_s11 = ssub.s32 %s10890_s29, %s18329_s7 }
  0x1b   : > { %p36_p4 = scmp.ge.s32.totalorder %s18331_s8, 2  ;;  %p107_p5 = scmp.eq.s32.totalorder %s11029_s11, 0 }
  0x1c   : > { %s163_s12 = sadd.s32 1, %s10854_s20  ;;  %p10087_p6 = scmp.lt.s32.totalorder %s10898_s6, 4 }
  0x1d   : > { %s18333_s8 = smov (%p36_p4, %s18331_s8), 0  ;;  %s216_s13 = sand.u32 1, %s10898_s6  }
  0x1e   : > { %17449 = sst [smem:[#allocation23_spill]] %s18333_s8  ;;  %s38_s14 = ssub.s32 %s10894_s30, %s18333_s8 }
  0x1f   : > { %p39_p7 = scmp.eq.s32.totalorder %s38_s14, 0  ;;  %s160_s15 = sor.u32 %s11029_s11, %s38_s14 }
  0x20   : > { %p161_p8 = scmp.eq.s32.totalorder %s160_s15, 0  ;;  %s218_s16 = sand.u32 1, %s10878_s26  }
  0x21   : > { %s11042_s17 = scalar_select %p39_p7, %s10878_s26, %s41_s9  }
  0x22   : > { %s11045_s7 = scalar_select %p161_p8, %s10854_s20, %s163_s12  }
  0x23   : > { %17450 = sst [smem:[#allocation24_spill]] %s11042_s17  ;;  %s9062_s5 = sshll.u32 %s218_s16, 8 }
  0x24   : > { %17451 = sst [smem:[#allocation25_spill]] %s11045_s7  ;;  %s9384_s28 = sshll.u32 %s10894_s30, 12 }
  0x25   : > { %s17452_s0 = sld [smem:[#allocation109_spill]]  ;;  %s220_s3 = scalar_lea.vmem [#allocation4], %s9062_s5 }
  0x26   : > { %s227_s1 = sshll.u32 %s220_s3, 4  ;;  %p11055_p9 = pnand %p10087_p6, %p11023_p3  ;;  %s228_s1 = int_to_ptr.vmem [resolvable:$true] %s227_s1 }
  0x27   : > { %s11059_s9 = scalar_lea.sflag [#allocation5], %s216_s13  ;;  %s10677_s12 = scalar_lea.vmem %s228_s1, 4096 }
  0x28   : > { %p10666_p10 = pneg %p11055_p9  ;;  %p10678_p11 = scmp.ne.s32.totalorder %s228_s1, %s10677_s12 }
  0x29   : > { %s10900_s2 = smov [#allocation4]  }
  0x2a   : > { %p10680_p12 = pnand %p10678_p11, %p10666_p10  ;;  %s10682_s4 = sshll.u32 %s10900_s2, 4  ;;  %s10683_s4 = int_to_ptr.vmem [resolvable:$false] %s10682_s4 }
  0x2b   : > { %s226_s27 = scalar_lea.hbm %s17452_s0, %s9384_s28  ;;  %s10684_s3 = scalar_lea.vmem %s10683_s4, 8192 }
  0x2c   : > { %p10681_p13 = pneg %p10680_p12  ;;  %p10685_p0 = scmp.lt.s32.totalorder %s228_s1, %s10683_s4 }
  0x2d   : > { %p10686_p1 = scmp.lt.s32.totalorder %s10684_s3, %s10677_s12 }
  0x2f   : > { %p10687_p3 = por %p10686_p1, %p10685_p0 }
  0x31   : > { %p10688_p4 = pnand %p10687_p3, %p10681_p13 }
  0x33   : > { %10691 = shalt.err (!%p10688_p4)
}
  0x34   : > { %s17172_s5 = smov 128   ;;  %s10902_s28 = smov 8  }
  0x35   : > { %10078 = dma.hbm_to_vmem [thread:$0]  (!%p11055_p9), %s226_s27, 4096, %s228_s1, %s11059_s9, %s17172_s5, %s17172_s5, %s10902_s28  }
  0x36   : > { %s11069_s10 = sadd.s32 4294967295, %s10898_s6   ;;  %s9058_s13 = sadd.s32 4294967294, %s10898_s6  }
  0x37   : > { %p54_p7 = scmp.ne.s32.totalorder %s10874_s25, %s10870_s24  ;;  %p17169_p8 = scmp.eq.s32.totalorder %s11069_s10, 0 }
  0x38   : > { %s109_s14 = sadd.s32 1, %s10866_s23  ;;  %p116_p10 = scmp.ne.s32.totalorder %s10866_s23, %s10862_s22 }
  0x39   : > { %p11080_p11 = por %p17169_p8, %p54_p7  ;;  %p122_p12 = scmp.ne.s32.totalorder %s10862_s22, %s10858_s21 }
  0x3a   : > { %s11089_s1 = scalar_select %p107_p5, %s10866_s23, %s109_s14  }
  0x3b   : > { %p11093_p9 = por %p116_p10, %p49_p2  ;;  %p11099_p13 = por %p122_p12, %p17169_p8 }
  0x3c   : > { %17455 = sst [smem:[#allocation26_spill]] %s11089_s1  ;;  %p173_p0 = scmp.ne.s32.totalorder %s10854_s20, %s10850_s19 }
  0x3d   : > { %s17457_s24 = scalar_select %p11099_p13, 1, 0 }
  0x3e   : > { %p174_p1 = scmp.eq.s32.totalorder %s11069_s10, 3  ;;  %p179_p3 = scmp.ne.s32.totalorder %s10850_s19, %s10846_s18 }
  0x3f   : > { %p180_p5 = scmp.eq.s32.totalorder %s9058_s13, 3  ;;  %p9059_p2 = scmp.ge.s32.totalorder %s10898_s6, 1 }
  0x40   : > { %p11108_p4 = por %p174_p1, %p173_p0  ;;  %p187_p10 = scmp.lt.s32.totalorder %s10898_s6, 5 }
  0x41   : > { %p11113_p7 = por %p180_p5, %p179_p3  ;;  %s10903_s16 = smov [#allocation7]  }
  0x42   : > { %s17458_s21 = scalar_select %p11108_p4, 1, 0 }
  0x43   : > { %s17459_s8 = scalar_select %p11113_p7, 1, 0 }
  0x44   : > { %p11118_p12 = pnand %p9059_p2, %p187_p10  ;;  %s199_s12 = sshll.u32 %s10903_s16, 4  ;;  %s200_s12 = int_to_ptr.vmem [resolvable:$true] %s199_s12 }
  0x45   : > { %p11128_p0 = pnand %p10087_p6, %p11093_p9  ;;  %s239_s4 = sand.u32 1, %s10866_s23  }
  0x46   : > { %p10071_p8 = pneg %p11118_p12  ;;  %p17462_p1 = scmp.eq.s32.totalorder %s11069_s10, 0 }
  0x47   : > { %s9065_s28 = sshll.u32 %s239_s4, 8  ;;  %s9066_s13 = sshll.u32 %s10890_s29, 6 }
  0x48   : > { %p11135_p3 = pnand %p10071_p8, %p17462_p1  ;;  %s10703_s14 = scalar_lea.vmem %s200_s12, 2048 }
  0x49   : > { %p10704_p2 = scmp.ne.s32.totalorder %s200_s12, %s10703_s14  ;;  %p10711_p4 = scmp.lt.s32.totalorder %s200_s12, %s200_s12 }
  0x4a   : > { %p10694_p5 = pneg %p11135_p3  ;;  %p10712_p6 = scmp.lt.s32.totalorder %s10703_s14, %s10703_s14 }
  0x4c   : > { %p10706_p10 = pnand %p10704_p2, %p10694_p5  ;;  %p10713_p9 = por %p10712_p6, %p10711_p4 }
  0x4e   : > { %p10707_p7 = pneg %p10706_p10 }
  0x50   : > { %p10714_p13 = pnand %p10713_p9, %p10707_p7 }
  0x52   : > { %10717 = shalt.err (!%p10714_p13)
}
  0x53   : > { %s10904_s27 = smov 64   ;;  %s10905_s16 = smov 4  }
  0x54   : > { %s17464_s4 = sld [smem:[#allocation110_spill]]  ;;  %s241_s1 = scalar_lea.vmem [#allocation9], %s9065_s28 }
  0x55   : > { %s17465_s17 = sld [smem:[#allocation112_spill]]  ;;  %s247_s23 = sshll.u32 %s241_s1, 4  ;;  %s248_s23 = int_to_ptr.vmem [resolvable:$true] %s247_s23 }
  0x56   : > { %p10720_p8 = pneg %p11128_p0  ;;  %s10731_s14 = scalar_lea.vmem %s248_s23, 4096 }
  0x57   : > { %p10732_p13 = scmp.ne.s32.totalorder %s248_s23, %s10731_s14  ;;  %s10906_s7 = smov [#allocation9]  }
  0x58   : > { %s10736_s20 = sshll.u32 %s10906_s7, 4  ;;  %s10737_s20 = int_to_ptr.vmem [resolvable:$false] %s10736_s20 }
  0x59   : > { %p10734_p4 = pnand %p10732_p13, %p10720_p8  ;;  %s10738_s3 = scalar_lea.vmem %s10737_s20, 8192 }
  0x5a   : > { %10074 = dma.hbm_to_vmem [thread:$0]  (!%p11135_p3), %s17464_s4, 2048, %s200_s12, [#allocation8], %s10904_s27, %s10904_s27, %s10905_s16  }
  0x5b   : > { %s246_s26 = scalar_lea.hbm %s17465_s17, %s9066_s13  ;;  %p10735_p7 = pneg %p10734_p4 }
  0x5c   : > { %p10739_p1 = scmp.lt.s32.totalorder %s248_s23, %s10737_s20  ;;  %p10740_p5 = scmp.lt.s32.totalorder %s10738_s3, %s10731_s14 }
  0x5e   : > { %p10741_p3 = por %p10740_p5, %p10739_p1 }
  0x60   : > { %p10742_p2 = pnand %p10741_p3, %p10735_p7 }
  0x62   : > { %10745 = shalt.err (!%p10742_p2)
}
  0x63   : > { %s17466_s0 = smov 128   ;;  %265 = sbr.rel (%p11118_p12) target bundleno = 1894 (0x766), region = 40 }
  0x64   : > { %10081 = dma.hbm_to_vmem [thread:$0]  (!%p11128_p0), %s246_s26, 4096, %s248_s23, %s11059_s9, %s17466_s0, %s10904_s27, %s10905_s16  }
  0x65   : > { %s267_s29 = sand.u32 (!%p11118_p12), 1, %s11069_s10   ;;  %s269_s30 = sand.u32 (!%p11118_p12), 1, %s10874_s25  }
  0x66   : > { %s9068_s7 = sshll.u32 (!%p11118_p12), %s269_s30, 8  ;;  %s268_s17 = scalar_lea.sflag (!%p11118_p12), [#allocation5], %s267_s29 }
  0x67   : > { %s11160_s20 = scalar_lea.vmem (!%p11118_p12), [#allocation4], %s9068_s7 }
  0x68   : > { %10829 = dma.done.wait (%p11080_p11), %s268_s17, 4096  }
  0x69   : > { %10831 = vsyncadd (%p11080_p11), %s268_s17, 4294963200  ;;  %p17467_p10 = scmp.eq.s32.totalorder %s11069_s10, 0 }
  0x6b   : > { %10833 = dma.done.wait (%p17467_p10), [#allocation8], 2048   ;;  %p17468_p0 = pmov %p17467_p10 }
  0x6c   : > { %s282_s23 = sand.u32 1, %s10862_s22   ;;  %p17469_p12 = scmp.ne.s32.totalorder %s17457_s24, 0 }
  0x6d   : > { %10835 = vsyncadd (%p17468_p0), [#allocation8], 4294965248  ;;  %s9070_s26 = sshll.u32 %s282_s23, 8 }
  0x6e   : > { %s11171_s9 = scalar_lea.vmem [#allocation9], %s9070_s26 }
  0x6f   : > { %10837 = dma.done.wait (%p17469_p12), %s268_s17, 4096  }
  0x70   : > { %10839 = vsyncadd (%p17469_p12), %s268_s17, 4294963200  ;;  %s17470_s5 = sld [smem:[#allocation18_spill]]  ;;  %s316_s15 = sand.u32 1, %s10850_s19  }
  0x71   : > { %s9071_s10 = sshll.u32 %s316_s15, 7  ;;  %s17471_s2 = sld [smem:[#allocation113_spill]] }
  0x72   : > { %s11188_s13 = scalar_lea.vmem [#allocation10], %s9071_s10 }
  0x76   : > { %p319_p11 = scmp.lt.s32.totalorder %s17470_s5, 1  ;;  %p9072_p6 = scmp.ne.s32.totalorder %s17470_s5, 0 }
  0x78   : > { %s11182_s1 = scalar_select %p319_p11, %s17470_s5, 1 }
  0x79   : > { %327 = sbr.rel (%p9072_p6) target bundleno = 1481 (0x5c9), region = 56 }
  0x7a   : > { %s321_s28 = scalar_lea.vmem %s17471_s2, %s11182_s1 }
  0x7e   : > { %v10211_v0 = vld [vmem:[#allocation7 + $0x78] sm:$0xff]   ;;  %v10213_v2 = vld [vmem:[#allocation7 + $0x70] sm:$0xff]   ;;  %v10215_v4 = vld [vmem:[#allocation7 + $0x68] sm:$0xff]   ;;  %v10907_v48 = vmov 4286644096   ;;  %s17472_s16 = sld [smem:[#allocation111_spill]] }
  0x7f   : > { %v10212_v1 = vld [vmem:[#allocation7 + $0x38] sm:$0xff]   ;;  %9709 = vmatprep.subr.bf16.mxu0 %v10211_v0  ;;  %10045 = vmatprep.subr.bf16.mxu1 %v10211_v0  ;;  %v10214_v3 = vld [vmem:[#allocation7 + $0x30] sm:$0xff]   ;;  %v10216_v5 = vld [vmem:[#allocation7 + $0x28] sm:$0xff]   ;;  %1171 = vst [vmem:[#allocation2 + $0xc] sm:$0xf] %v10907_v48  ;;  %vm1228_vm0 = vcmask 1040384  }
  0x80   : > { %9710 = vmatpush3.bf16.msra.mxu0 %v10212_v1  ;;  %10053 = vmatpush3.bf16.msra.mxu1 %v10212_v1  ;;  %v10217_v6 = vld [vmem:[#allocation7 + $0x60] sm:$0xff]   ;;  %v10219_v8 = vld [vmem:[#allocation7 + $0x58] sm:$0xff]   ;;  %v10221_v10 = vld [vmem:[#allocation7 + $0x50] sm:$0xff]   ;;  %1174 = vst [vmem:[#allocation2 + $0x18] sm:$0xf] %v10907_v48  ;;  %vm1229_vm1 = vcmask 1044484  }
  0x81   : > { %9711 = vmatprep.subr.bf16.mxu0 %v10213_v2  ;;  %10046 = vmatprep.subr.bf16.mxu1 %v10213_v2  ;;  %v10218_v7 = vld [vmem:[#allocation7 + $0x20] sm:$0xff]   ;;  %v10220_v9 = vld [vmem:[#allocation7 + $0x18] sm:$0xff]   ;;  %v10222_v13 = vld [vmem:[#allocation7 + $0x10] sm:$0xff]   ;;  %1168 = vst [vmem:[#allocation2] sm:$0xf] %v10907_v48  ;;  %vm2902_vm5 = vcmask 1042432  }
  0x82   : > { %v10229_v11 = vld [vmem:[%s11160_s20 + $0x4] ss:$8 sps:$4 sm:$0xff]   ;;  %v10227_v18 = vld [vmem:[%s11160_s20] ss:$8 sps:$4 sm:$0xff]   ;;  %v10233_v20 = vld [vmem:[%s11160_s20 + $0x14] ss:$8 sps:$4 sm:$0xff]  }
  0x83   : > { %v10232_v12 = vld [vmem:[%s11160_s20 + $0x84] ss:$8 sps:$4 sm:$0xff]   ;;  %687 = vmatprep.mubr.bf16.mxu0 %v10229_v11  ;;  %v10230_v19 = vld [vmem:[%s11160_s20 + $0x80] ss:$8 sps:$4 sm:$0xff]   ;;  %v10235_v21 = vld [vmem:[%s11160_s20 + $0x94] ss:$8 sps:$4 sm:$0xff]  }
  0x84   : > { %9712 = vmatpush3.bf16.msra.mxu0 %v10214_v3  ;;  %10054 = vmatpush3.bf16.msra.mxu1 %v10214_v3  ;;  %v10223_v14 = vld [vmem:[#allocation7 + $0x48] sm:$0xff]   ;;  %v10225_v16 = vld [vmem:[#allocation7 + $0x40] sm:$0xff]   ;;  %v10237_v22 = vld [vmem:[%s11160_s20 + $0x10] ss:$8 sps:$4 sm:$0xff]   ;;  %1169 = vst [vmem:[#allocation2 + $0x4] sm:$0xf] %v10907_v48 }
  0x85   : > { %9713 = vmatprep.subr.bf16.mxu0 %v10215_v4  ;;  %10047 = vmatprep.subr.bf16.mxu1 %v10215_v4  ;;  %v10224_v15 = vld [vmem:[#allocation7 + $0x8] sm:$0xff]   ;;  %v10226_v17 = vld [vmem:[#allocation7] sm:$0xff]   ;;  %v10238_v23 = vld [vmem:[%s11160_s20 + $0x90] ss:$8 sps:$4 sm:$0xff]   ;;  %1170 = vst [vmem:[#allocation2 + $0x8] sm:$0x3] %v10907_v48 }
  0x86   : > { %751 = vmatprep.mubr.bf16.mxu1 %v10232_v12  ;;  %v10239_v24 = vld [vmem:[%s11160_s20 + $0x24] ss:$8 sps:$4 sm:$0xff]   ;;  %v10243_v26 = vld [vmem:[%s11160_s20 + $0x20] ss:$8 sps:$4 sm:$0xff]   ;;  %v10245_v28 = vld [vmem:[%s11160_s20 + $0x34] ss:$8 sps:$4 sm:$0xff]  }
  0x87   : > { %v10241_v25 = vld [vmem:[%s11160_s20 + $0xa4] ss:$8 sps:$4 sm:$0xff]   ;;  %v10244_v27 = vld [vmem:[%s11160_s20 + $0xa0] ss:$8 sps:$4 sm:$0xff]   ;;  %v10247_v29 = vld [vmem:[%s11160_s20 + $0xb4] ss:$8 sps:$4 sm:$0xff]  }
  0x88   : > { %9714 = vmatpush3.bf16.msra.mxu0 %v10216_v5  ;;  %10055 = vmatpush3.bf16.msra.mxu1 %v10216_v5  ;;  %v10249_v30 = vld [vmem:[%s11160_s20 + $0x30] ss:$8 sps:$4 sm:$0xff]   ;;  %v10251_v32 = vld [vmem:[%s11160_s20 + $0x44] ss:$8 sps:$4 sm:$0xff]   ;;  %v10255_v34 = vld [vmem:[%s11160_s20 + $0x40] ss:$8 sps:$4 sm:$0xff]  }
  0x89   : > { %9715 = vmatprep.subr.bf16.mxu0 %v10217_v6  ;;  %10048 = vmatprep.subr.bf16.mxu1 %v10217_v6  ;;  %v10250_v31 = vld [vmem:[%s11160_s20 + $0xb0] ss:$8 sps:$4 sm:$0xff]   ;;  %v10253_v33 = vld [vmem:[%s11160_s20 + $0xc4] ss:$8 sps:$4 sm:$0xff]   ;;  %v10256_v35 = vld [vmem:[%s11160_s20 + $0xc0] ss:$8 sps:$4 sm:$0xff]  }
  0x8a   : > { %v10257_v36 = vld [vmem:[%s11160_s20 + $0x54] ss:$8 sps:$4 sm:$0xff]   ;;  %v10261_v38 = vld [vmem:[%s11160_s20 + $0x50] ss:$8 sps:$4 sm:$0xff]   ;;  %v10263_v40 = vld [vmem:[%s11160_s20 + $0x64] ss:$8 sps:$4 sm:$0xff]  }
  0x8b   : > { %v10259_v37 = vld [vmem:[%s11160_s20 + $0xd4] ss:$8 sps:$4 sm:$0xff]   ;;  %v10262_v39 = vld [vmem:[%s11160_s20 + $0xd0] ss:$8 sps:$4 sm:$0xff]   ;;  %v10265_v41 = vld [vmem:[%s11160_s20 + $0xe4] ss:$8 sps:$4 sm:$0xff]  }
  0x8c   : > { %9716 = vmatpush3.bf16.msra.mxu0 %v10218_v7  ;;  %10056 = vmatpush3.bf16.msra.mxu1 %v10218_v7  ;;  %v10267_v42 = vld [vmem:[%s11160_s20 + $0x60] ss:$8 sps:$4 sm:$0xff]   ;;  %v10269_v44 = vld [vmem:[%s11160_s20 + $0x74] ss:$8 sps:$4 sm:$0xff]   ;;  %v10273_v46 = vld [vmem:[%s11160_s20 + $0x70] ss:$8 sps:$4 sm:$0xff]  }
  0x8d   : > { %9717 = vmatprep.subr.bf16.mxu0 %v10219_v8  ;;  %10049 = vmatprep.subr.bf16.mxu1 %v10219_v8  ;;  %v10268_v43 = vld [vmem:[%s11160_s20 + $0xe0] ss:$8 sps:$4 sm:$0xff]   ;;  %v10271_v45 = vld [vmem:[%s11160_s20 + $0xf4] ss:$8 sps:$4 sm:$0xff]   ;;  %v10274_v47 = vld [vmem:[%s11160_s20 + $0xf0] ss:$8 sps:$4 sm:$0xff]  }
  0x8e   : > { %1172 = vst [vmem:[#allocation2 + $0x10] sm:$0xf] %v10907_v48  ;;  %1173 = vst [vmem:[#allocation2 + $0x14] sm:$0x3] %v10907_v48  ;;  %v11226_v51 = vld [vmem:[%s17472_s16] ss:$0 sm:$0xff] }
  0x8f   : > { %1175 = vst [vmem:[#allocation2 + $0x1c] sm:$0xf] %v10907_v48  ;;  %1176 = vst [vmem:[#allocation2 + $0x20] sm:$0x3] %v10907_v48  ;;  %vm1987_vm3 = vsmask.f32 3328 }
  0x90   : > { %9718 = vmatpush3.bf16.msra.mxu0 %v10220_v9  ;;  %10057 = vmatpush3.bf16.msra.mxu1 %v10220_v9  ;;  %1177 = vst [vmem:[#allocation2 + $0x24] sm:$0xf] %v10907_v48  ;;  %1178 = vst [vmem:[#allocation2 + $0x28] sm:$0xf] %v10907_v48  ;;  %vm1988_vm4 = vsmask.f32 7440 }
  0x91   : > { %9719 = vmatprep.subr.bf16.mxu0 %v10221_v10  ;;  %10050 = vmatprep.subr.bf16.mxu1 %v10221_v10  ;;  %1179 = vst [vmem:[#allocation2 + $0x2c] sm:$0x3] %v10907_v48  ;;  %1180 = vst [vmem:[#allocation2 + $0x30] sm:$0xf] %v10907_v48  ;;  %vm3129_vm6 = vcmask 1041408   ;;  %vm3130_vm7 = vcmask 1045508  }
  0x92   : > { %1181 = vst [vmem:[#allocation2 + $0x34] sm:$0xf] %v10907_v48  ;;  %1182 = vst [vmem:[#allocation2 + $0x38] sm:$0x3] %v10907_v48  ;;  %vm2903_vm8 = vcmask 1046532  }
  0x93   : > { %1183 = vst [vmem:[#allocation2 + $0x3c] sm:$0xf] %v10907_v48  ;;  %1184 = vst [vmem:[#allocation2 + $0x40] sm:$0xf] %v10907_v48 }
  0x94   : > { %9720 = vmatpush3.bf16.msra.mxu0 %v10222_v13  ;;  %10058 = vmatpush3.bf16.msra.mxu1 %v10222_v13  ;;  %1185 = vst [vmem:[#allocation2 + $0x44] sm:$0x3] %v10907_v48  ;;  %1186 = vst [vmem:[#allocation2 + $0x48] sm:$0xf] %v10907_v48 }
  0x95   : > { %9721 = vmatprep.subr.bf16.mxu0 %v10223_v14  ;;  %10051 = vmatprep.subr.bf16.mxu1 %v10223_v14  ;;  %1187 = vst [vmem:[#allocation2 + $0x4c] sm:$0xf] %v10907_v48  ;;  %1188 = vst [vmem:[#allocation2 + $0x50] sm:$0x3] %v10907_v48 }
  0x96   : > { %1189 = vst [vmem:[#allocation2 + $0x54] sm:$0xf] %v10907_v48  ;;  %1190 = vst [vmem:[#allocation2 + $0x58] sm:$0xf] %v10907_v48 }
  0x97   : > { %1191 = vst [vmem:[#allocation2 + $0x5c] sm:$0x3] %v10907_v48  ;;  %1192 = vst [vmem:[#allocation2 + $0x60] sm:$0xf] %v10907_v48 }
  0x98   : > { %9722 = vmatpush3.bf16.msra.mxu0 %v10224_v15  ;;  %10059 = vmatpush3.bf16.msra.mxu1 %v10224_v15  ;;  %1193 = vst [vmem:[#allocation2 + $0x64] sm:$0xf] %v10907_v48  ;;  %1194 = vst [vmem:[#allocation2 + $0x68] sm:$0x3] %v10907_v48 }
  0x99   : > { %9723 = vmatprep.subr.bf16.mxu0 %v10225_v16  ;;  %10052 = vmatprep.subr.bf16.mxu1 %v10225_v16  ;;  %1195 = vst [vmem:[#allocation2 + $0x6c] sm:$0xf] %v10907_v48  ;;  %1196 = vst [vmem:[#allocation2 + $0x70] sm:$0xf] %v10907_v48 }
  0x9a   : > { %1197 = vst [vmem:[#allocation2 + $0x74] sm:$0x3] %v10907_v48  ;;  %1198 = vst [vmem:[#allocation2 + $0x78] sm:$0xf] %v10907_v48 }
  0x9b   : > { %1199 = vst [vmem:[#allocation2 + $0x7c] sm:$0xf] %v10907_v48  ;;  %1200 = vst [vmem:[#allocation2 + $0x80] sm:$0x3] %v10907_v48 }
  0x9c   : > { %9724 = vmatpush3.bf16.msra.mxu0 %v10226_v17  ;;  %10060 = vmatpush3.bf16.msra.mxu1 %v10226_v17  ;;  %1201 = vst [vmem:[#allocation2 + $0x84] sm:$0xf] %v10907_v48  ;;  %1202 = vst [vmem:[#allocation2 + $0x88] sm:$0xf] %v10907_v48 }
  0x9d   : > { %1203 = vst [vmem:[#allocation2 + $0x8c] sm:$0x3] %v10907_v48  ;;  %1204 = vst [vmem:[#allocation2 + $0x90] sm:$0xf] %v10907_v48 }
  0x9e   : > { %1205 = vst [vmem:[#allocation2 + $0x94] sm:$0xf] %v10907_v48  ;;  %1206 = vst [vmem:[#allocation2 + $0x98] sm:$0x3] %v10907_v48 }
  0x9f   : > { %688 = vmatmul.mubr.bf16.vlgmr.msra.gmra.mxu0 %v10227_v18  ;;  %752 = vmatmul.mubr.bf16.vlgmr.msra.gmra.mxu1 %v10230_v19  ;;  %1207 = vst [vmem:[#allocation2 + $0x9c] sm:$0xf] %v10907_v48  ;;  %1208 = vst [vmem:[#allocation2 + $0xa0] sm:$0xf] %v10907_v48 }
  0xa0   : > { %695 = vmatprep.mubr.bf16.mxu0 %v10233_v20  ;;  %759 = vmatprep.mubr.bf16.mxu1 %v10235_v21  ;;  %1209 = vst [vmem:[#allocation2 + $0xa4] sm:$0x3] %v10907_v48  ;;  %1210 = vst [vmem:[#allocation2 + $0xa8] sm:$0xf] %v10907_v48 }
  0xa1   : > { %1211 = vst [vmem:[#allocation2 + $0xac] sm:$0xf] %v10907_v48  ;;  %1212 = vst [vmem:[#allocation2 + $0xb0] sm:$0x3] %v10907_v48 }
  0xa2   : > { %1213 = vst [vmem:[#allocation2 + $0xb4] sm:$0xf] %v10907_v48  ;;  %1214 = vst [vmem:[#allocation2 + $0xb8] sm:$0xf] %v10907_v48 }
  0xa3   : > { %1215 = vst [vmem:[#allocation2 + $0xbc] sm:$0x3] %v10907_v48  ;;  %1216 = vst [vmem:[#allocation2 + $0xc0] sm:$0xf] %v10907_v48 }
  0xa4   : > { %1217 = vst [vmem:[#allocation2 + $0xc4] sm:$0xf] %v10907_v48  ;;  %1218 = vst [vmem:[#allocation2 + $0xc8] sm:$0x3] %v10907_v48 }
  0xa5   : > { %1219 = vst [vmem:[#allocation2 + $0xcc] sm:$0xf] %v10907_v48  ;;  %1220 = vst [vmem:[#allocation2 + $0xd0] sm:$0xf] %v10907_v48 }
  0xa6   : > { %1221 = vst [vmem:[#allocation2 + $0xd4] sm:$0x3] %v10907_v48  ;;  %1222 = vst [vmem:[#allocation2 + $0xd8] sm:$0xf] %v10907_v48 }
  0xa7   : > { %696 = vmatmul.mubr.bf16.gmra.mxu0 %v10237_v22  ;;  %760 = vmatmul.mubr.bf16.gmra.mxu1 %v10238_v23  ;;  %1223 = vst [vmem:[#allocation2 + $0xdc] sm:$0xf] %v10907_v48  ;;  %1224 = vst [vmem:[#allocation2 + $0xe0] sm:$0x3] %v10907_v48 }
  0xa8   : > { %703 = vmatprep.mubr.bf16.mxu0 %v10239_v24  ;;  %767 = vmatprep.mubr.bf16.mxu1 %v10241_v25  ;;  %1225 = vst [vmem:[#allocation2 + $0xe4] sm:$0xf] %v10907_v48  ;;  %1226 = vst [vmem:[#allocation2 + $0xe8] sm:$0xf] %v10907_v48 }
  0xa9   : > { %1227 = vst [vmem:[#allocation2 + $0xec] sm:$0x3] %v10907_v48  ;;  %vm11308_vm2 = vmor %vm1228_vm0, %vm1229_vm1 }
  0xaa   : > { %vm11433_vm9 = vmor %vm1987_vm3, %vm1988_vm4 }
  0xab   : > { %vm11463_vm10 = vmor %vm2902_vm5, %vm2903_vm8 }
  0xac   : > { %vm11478_vm11 = vmor %vm3129_vm6, %vm3130_vm7 }
  0xaf   : > { %704 = vmatmul.mubr.bf16.gmra.mxu0 %v10243_v26  ;;  %768 = vmatmul.mubr.bf16.gmra.mxu1 %v10244_v27 }
  0xb0   : > { %711 = vmatprep.mubr.bf16.mxu0 %v10245_v28  ;;  %775 = vmatprep.mubr.bf16.mxu1 %v10247_v29 }
  0xb7   : > { %712 = vmatmul.mubr.bf16.gmra.mxu0 %v10249_v30  ;;  %776 = vmatmul.mubr.bf16.gmra.mxu1 %v10250_v31 }
  0xb8   : > { %719 = vmatprep.mubr.bf16.mxu0 %v10251_v32  ;;  %783 = vmatprep.mubr.bf16.mxu1 %v10253_v33 }
  0xbf   : > { %720 = vmatmul.mubr.bf16.gmra.mxu0 %v10255_v34  ;;  %784 = vmatmul.mubr.bf16.gmra.mxu1 %v10256_v35 }
  0xc0   : > { %727 = vmatprep.mubr.bf16.mxu0 %v10257_v36  ;;  %791 = vmatprep.mubr.bf16.mxu1 %v10259_v37 }
  0xc7   : > { %728 = vmatmul.mubr.bf16.gmra.mxu0 %v10261_v38  ;;  %792 = vmatmul.mubr.bf16.gmra.mxu1 %v10262_v39 }
  0xc8   : > { %735 = vmatprep.mubr.bf16.mxu0 %v10263_v40  ;;  %799 = vmatprep.mubr.bf16.mxu1 %v10265_v41 }
  0xcf   : > { %736 = vmatmul.mubr.bf16.gmra.mxu0 %v10267_v42  ;;  %800 = vmatmul.mubr.bf16.gmra.mxu1 %v10268_v43 }
  0xd0   : > { %743 = vmatprep.mubr.bf16.mxu0 %v10269_v44  ;;  %807 = vmatprep.mubr.bf16.mxu1 %v10271_v45 }
  0xd7   : > { %744 = vmatmul.mubr.bf16.gmra.mxu0 %v10273_v46  ;;  %808 = vmatmul.mubr.bf16.gmra.mxu1 %v10274_v47 }
 0x15f   : > { %v9725_v49 = vpop.f32.mrf.mxu0  ;;  %v9773_v50 = vpop.f32.mrf.mxu1 }
 0x161   : > { %v9726_v52 = vpop.f32.mrf.mxu0  ;;  %v9774_v53 = vpop.f32.mrf.mxu1 }
 0x162   : > { %v9727_v54 = vadd.f32 %v9726_v52, %v9725_v49  ;;  %v9775_v55 = vadd.f32 %v9774_v53, %v9773_v50 }
 0x163   : > { %v9728_v56 = vpop.f32.mrf.mxu0  ;;  %v9776_v57 = vpop.f32.mrf.mxu1 }
 0x164   : > { %v11229_v58 = vadd.f32 %v9727_v54, %v11226_v51  ;;  %v11232_v59 = vadd.f32 %v9775_v55, %v11226_v51 }
 0x165   : > { %v9729_v60 = vpop.f32.mrf.mxu0  ;;  %v9777_v61 = vpop.f32.mrf.mxu1 }
 0x166   : > { %v816_v62 = vsub.f32 0.0, %v11229_v58  ;;  %v832_v63 = vsub.f32 0.0, %v11232_v59  ;;  %v9730_v0 = vadd.f32 %v9729_v60, %v9728_v56  ;;  %v9778_v1 = vadd.f32 %v9777_v61, %v9776_v57 }
 0x167   : > { %v9731_v2 = vpop.f32.mrf.mxu0  ;;  %v9779_v3 = vpop.f32.mrf.mxu1 }
 0x168   : > { %v848_v4 = vmul.f32 1.442695, %v816_v62  ;;  %v880_v5 = vmul.f32 1.442695, %v832_v63  ;;  %v11237_v6 = vadd.f32 %v9730_v0, %v11226_v51  ;;  %v11240_v7 = vadd.f32 %v9778_v1, %v11226_v51 }
 0x169   : > { %v9732_v8 = vpop.f32.mrf.mxu0  ;;  %v9780_v9 = vpop.f32.mrf.mxu1 }
 0x16a   : > { %10275 = vpow2.f32 %v848_v4  ;;  %v817_v10 = vsub.f32 0.0, %v11237_v6  ;;  %v833_v11 = vsub.f32 0.0, %v11240_v7  ;;  %v9733_v12 = vadd.f32 %v9732_v8, %v9731_v2 }
 0x16b   : > { %10277 = vpow2.f32 %v880_v5  ;;  %v9781_v13 = vadd.f32 %v9780_v9, %v9779_v3  ;;  %v9734_v14 = vpop.f32.mrf.mxu0  ;;  %v9782_v15 = vpop.f32.mrf.mxu1 }
 0x16c   : > { %v850_v16 = vmul.f32 1.442695, %v817_v10  ;;  %v882_v17 = vmul.f32 1.442695, %v833_v11  ;;  %v11245_v18 = vadd.f32 %v9733_v12, %v11226_v51 }
 0x16d   : > { %v11248_v19 = vadd.f32 %v9781_v13, %v11226_v51  ;;  %v9735_v20 = vpop.f32.mrf.mxu0  ;;  %v9783_v21 = vpop.f32.mrf.mxu1 }
 0x16e   : > { %10279 = vpow2.f32 %v850_v16  ;;  %v818_v22 = vsub.f32 0.0, %v11245_v18  ;;  %v9736_v23 = vadd.f32 %v9735_v20, %v9734_v14  ;;  %v9784_v24 = vadd.f32 %v9783_v21, %v9782_v15 }
 0x16f   : > { %10281 = vpow2.f32 %v882_v17  ;;  %v834_v25 = vsub.f32 0.0, %v11248_v19  ;;  %v9737_v26 = vpop.f32.mrf.mxu0  ;;  %v9785_v27 = vpop.f32.mrf.mxu1 }
 0x170   : > { %v852_v28 = vmul.f32 1.442695, %v818_v22  ;;  %v11253_v29 = vadd.f32 %v9736_v23, %v11226_v51  ;;  %v11256_v30 = vadd.f32 %v9784_v24, %v11226_v51 }
 0x171   : > { %v884_v31 = vmul.f32 1.442695, %v834_v25  ;;  %v9738_v32 = vpop.f32.mrf.mxu0  ;;  %v9786_v33 = vpop.f32.mrf.mxu1 }
 0x172   : > { %10283 = vpow2.f32 %v852_v28  ;;  %v819_v34 = vsub.f32 0.0, %v11253_v29  ;;  %v835_v35 = vsub.f32 0.0, %v11256_v30  ;;  %v9739_v36 = vadd.f32 %v9738_v32, %v9737_v26 }
 0x173   : > { %10285 = vpow2.f32 %v884_v31  ;;  %v9787_v37 = vadd.f32 %v9786_v33, %v9785_v27  ;;  %v9740_v38 = vpop.f32.mrf.mxu0  ;;  %v9788_v39 = vpop.f32.mrf.mxu1 }
 0x174   : > { %v854_v40 = vmul.f32 1.442695, %v819_v34  ;;  %v886_v41 = vmul.f32 1.442695, %v835_v35  ;;  %v11261_v42 = vadd.f32 %v9739_v36, %v11226_v51 }
 0x175   : > { %v11264_v43 = vadd.f32 %v9787_v37, %v11226_v51  ;;  %v9741_v44 = vpop.f32.mrf.mxu0  ;;  %v9789_v45 = vpop.f32.mrf.mxu1 }
 0x176   : > { %10287 = vpow2.f32 %v854_v40  ;;  %v820_v46 = vsub.f32 0.0, %v11261_v42  ;;  %v9742_v47 = vadd.f32 %v9741_v44, %v9740_v38  ;;  %v9790_v48 = vadd.f32 %v9789_v45, %v9788_v39 }
 0x177   : > { %v10276_v49 = vpop.eup %10275  ;;  %10289 = vpow2.f32 %v886_v41  ;;  %v836_v50 = vsub.f32 0.0, %v11264_v43  ;;  %v9743_v52 = vpop.f32.mrf.mxu0 }
 0x178   : > { %v9791_v53 = vpop.f32.mrf.mxu1  ;;  %v10278_v54 = vpop.eup %10277  ;;  %v912_v55 = vadd.f32 1.0, %v10276_v49  ;;  %v856_v56 = vmul.f32 1.442695, %v820_v46  ;;  %v11269_v57 = vadd.f32 %v9742_v47, %v11226_v51  ;;  %v11272_v60 = vadd.f32 %v9790_v48, %v11226_v51 }
 0x179   : > { %v928_v61 = vadd.f32 1.0, %v10278_v54  ;;  %v888_v62 = vmul.f32 1.442695, %v836_v50  ;;  %v9744_v63 = vpop.f32.mrf.mxu0 }
 0x17a   : > { %v9792_v0 = vpop.f32.mrf.mxu1  ;;  %10291 = vrcp.f32 %v912_v55  ;;  %v821_v1 = vsub.f32 0.0, %v11269_v57  ;;  %v837_v2 = vsub.f32 0.0, %v11272_v60  ;;  %v9745_v3 = vadd.f32 %v9744_v63, %v9743_v52 }
 0x17b   : > { %v10280_v4 = vpop.eup %10279  ;;  %10293 = vrcp.f32 %v928_v61  ;;  %v9793_v5 = vadd.f32 %v9792_v0, %v9791_v53  ;;  %v9746_v8 = vpop.f32.mrf.mxu0 }
 0x17c   : > { %v9794_v9 = vpop.f32.mrf.mxu1  ;;  %v10282_v10 = vpop.eup %10281  ;;  %v913_v11 = vadd.f32 1.0, %v10280_v4  ;;  %10295 = vpow2.f32 %v856_v56  ;;  %v858_v12 = vmul.f32 1.442695, %v821_v1  ;;  %v890_v13 = vmul.f32 1.442695, %v837_v2 }
 0x17d   : > { %v929_v14 = vadd.f32 1.0, %v10282_v10  ;;  %10297 = vpow2.f32 %v888_v62  ;;  %v11277_v15 = vadd.f32 %v9745_v3, %v11226_v51  ;;  %v11280_v16 = vadd.f32 %v9793_v5, %v11226_v51  ;;  %v9747_v17 = vpop.f32.mrf.mxu0 }
 0x17e   : > { %v9795_v20 = vpop.f32.mrf.mxu1  ;;  %10299 = vrcp.f32 %v913_v11  ;;  %v9748_v21 = vadd.f32 %v9747_v17, %v9746_v8 }
 0x17f   : > { %v9796_v22 = vadd.f32 %v9795_v20, %v9794_v9  ;;  %v10284_v23 = vpop.eup %10283  ;;  %10301 = vrcp.f32 %v929_v14  ;;  %v822_v24 = vsub.f32 0.0, %v11277_v15  ;;  %v838_v25 = vsub.f32 0.0, %v11280_v16  ;;  %v9749_v26 = vpop.f32.mrf.mxu0 }
 0x180   : > { %v9797_v27 = vpop.f32.mrf.mxu1  ;;  %v10286_v28 = vpop.eup %10285  ;;  %v914_v31 = vadd.f32 1.0, %v10284_v23  ;;  %10303 = vpow2.f32 %v858_v12  ;;  %v11285_v32 = vadd.f32 %v9748_v21, %v11226_v51 }
 0x181   : > { %v11288_v33 = vadd.f32 %v9796_v22, %v11226_v51  ;;  %v930_v34 = vadd.f32 1.0, %v10286_v28  ;;  %10305 = vpow2.f32 %v890_v13  ;;  %v860_v35 = vmul.f32 1.442695, %v822_v24  ;;  %v9750_v37 = vpop.f32.mrf.mxu0 }
 0x182   : > { %v892_v36 = vmul.f32 1.442695, %v838_v25  ;;  %v9798_v38 = vpop.f32.mrf.mxu1  ;;  %10307 = vrcp.f32 %v914_v31  ;;  %v823_v39 = vsub.f32 0.0, %v11285_v32  ;;  %v9751_v41 = vadd.f32 %v9750_v37, %v9749_v26 }
 0x183   : > { %v839_v40 = vsub.f32 0.0, %v11288_v33  ;;  %v10288_v44 = vpop.eup %10287  ;;  %10309 = vrcp.f32 %v930_v34  ;;  %v9799_v45 = vadd.f32 %v9798_v38, %v9797_v27  ;;  %v9752_v46 = vpop.f32.mrf.mxu0  ;;  %v17473_v26 = vmov 0 }
 0x184   : > { %v10290_v47 = vpop.eup %10289  ;;  %v915_v48 = vadd.f32 1.0, %v10288_v44  ;;  %10311 = vpow2.f32 %v860_v35  ;;  %v862_v49 = vmul.f32 1.442695, %v823_v39  ;;  %v11293_v53 = vadd.f32 %v9751_v41, %v11226_v51 }
 0x185   : > { %v931_v50 = vadd.f32 1.0, %v10290_v47  ;;  %10313 = vpow2.f32 %v892_v36  ;;  %v894_v52 = vmul.f32 1.442695, %v839_v40  ;;  %v9753_v54 = vpop.f32.mrf.mxu0  ;;  %v11296_v55 = vadd.f32 %v9799_v45, %v11226_v51 }
 0x186   : > { %10315 = vrcp.f32 %v915_v48  ;;  %v824_v61 = vsub.f32 0.0, %v11293_v53  ;;  %v9754_v62 = vadd.f32 %v9753_v54, %v9752_v46  ;;  %v17474_v26 = vsel %vm11308_vm2, 4294967295, %v17473_v26 }
 0x187   : > { %v10292_v56 = vpop.eup %10291  ;;  %10317 = vrcp.f32 %v931_v50  ;;  %v840_v9 = vsub.f32 0.0, %v11296_v55  ;;  %17475 = vst [vmem:[#allocation27_spill] sm:$0xff] %v17474_v26 }
 0x188   : > { %v10294_v63 = vpop.eup %10293  ;;  %v976_v0 = vmul.f32 %v10292_v56, %v11229_v58  ;;  %10319 = vpow2.f32 %v862_v49  ;;  %v864_v3 = vmul.f32 1.442695, %v824_v61  ;;  %v11303_v13 = vadd.f32 %v9754_v62, %v11226_v51 }
 0x189   : > { %v10296_v1 = vpop.eup %10295  ;;  %v992_v2 = vmul.f32 %v10294_v63, %v11232_v59  ;;  %10321 = vpow2.f32 %v894_v52  ;;  %v896_v28 = vmul.f32 1.442695, %v840_v9 }
 0x18a   : > { %v10298_v4 = vpop.eup %10297  ;;  %v9385_v5 = vpack.c.bf16 %v976_v0, %v976_v0  ;;  %v916_v8 = vadd.f32 1.0, %v10296_v1  ;;  %10323 = vpow2.f32 %v864_v3  ;;  %v825_v31 = vsub.f32 0.0, %v11303_v13 }
 0x18b   : > { %v10300_v10 = vpop.eup %10299  ;;  %v9401_v11 = vpack.c.bf16 %v992_v2, %v992_v2  ;;  %v932_v12 = vadd.f32 1.0, %v10298_v4 }
 0x18c   : > { %v10302_v58 = vpop.eup %10301  ;;  %1136 = vst [vmem:[#allocation3] sm:$0xf] %v9385_v5  ;;  %v1231_v14 = vrot.slane %v9385_v5, 7  ;;  %v977_v59 = vmul.f32 %v10300_v10, %v11237_v6  ;;  %10325 = vrcp.f32 %v916_v8  ;;  %v866_v63 = vmul.f32 1.442695, %v825_v31 }
 0x18d   : > { %v10304_v17 = vpop.eup %10303  ;;  %1152 = vst [vmem:[#allocation3 + $0x100] sm:$0xf] %v9401_v11  ;;  %v1271_v20 = vrot.slane %v9401_v11, 7  ;;  %v993_v21 = vmul.f32 %v10302_v58, %v11240_v7  ;;  %10327 = vrcp.f32 %v932_v12 }
 0x18e   : > { %v10306_v22 = vpop.eup %10305  ;;  %1360 = vst [vmem:[#allocation2 + $0x18] sm:$0xe] %v1231_v14  ;;  %v9386_v23 = vpack.c.bf16 %v977_v59, %v977_v59  ;;  %v917_v24 = vadd.f32 1.0, %v10304_v17  ;;  %v1232_v35 = vrot.slane %v1231_v14, 4 }
 0x18f   : > { %v10308_v25 = vpop.eup %10307  ;;  %1384 = vst [vmem:[#allocation2 + $0x78] sm:$0xe] %v1271_v20  ;;  %v9402_v6 = vpack.c.bf16 %v993_v21, %v993_v21  ;;  %v933_v27 = vadd.f32 1.0, %v10306_v22  ;;  %v1272_v38 = vrot.slane %v1271_v20, 4  ;;  %v9800_v21 = vpop.f32.mrf.mxu1 }
 0x190   : > { %v10310_v34 = vpop.eup %10309  ;;  %1137 = vst [vmem:[#allocation3 + $0x10] sm:$0xf] %v9386_v23  ;;  %v1233_v7 = vrot.slane %v9386_v23, 7  ;;  %v978_v36 = vmul.f32 %v10308_v25, %v11245_v18  ;;  %10329 = vrcp.f32 %v917_v24 }
 0x191   : > { %v10312_v37 = vpop.eup %10311  ;;  %1153 = vst [vmem:[#allocation3 + $0x110] sm:$0xf] %v9402_v6  ;;  %v1273_v39 = vrot.slane %v9402_v6, 7  ;;  %v994_v40 = vmul.f32 %v10310_v34, %v11248_v19  ;;  %10331 = vrcp.f32 %v933_v27  ;;  %v9801_v27 = vpop.f32.mrf.mxu1 }
 0x192   : > { %v10314_v41 = vpop.eup %10313  ;;  %v1234_v44 = vsel %vm11308_vm2, %v1232_v35, %v1233_v7  ;;  %v1235_v45 = vrot.slane %v1233_v7, 4  ;;  %v9387_v46 = vpack.c.bf16 %v978_v36, %v978_v36  ;;  %v918_v47 = vadd.f32 1.0, %v10312_v37 }
 0x193   : > { %v10316_v48 = vpop.eup %10315  ;;  %1361 = vst [vmem:[#allocation2 + $0x1c] sm:$0xf] %v1234_v44  ;;  %v1274_v18 = vsel %vm11308_vm2, %v1272_v38, %v1273_v39  ;;  %v1275_v49 = vrot.slane %v1273_v39, 4  ;;  %v9403_v50 = vpack.c.bf16 %v994_v40, %v994_v40  ;;  %v934_v52 = vadd.f32 1.0, %v10314_v41 }
 0x194   : > { %v10318_v54 = vpop.eup %10317  ;;  %1362 = vst [vmem:[#allocation2 + $0x20] sm:$0x1] %v1235_v45  ;;  %1385 = vst [vmem:[#allocation2 + $0x7c] sm:$0xf] %v1274_v18  ;;  %v1236_v19 = vrot.slane %v9387_v46, 7  ;;  %v979_v56 = vmul.f32 %v10316_v48, %v11253_v29  ;;  %10333 = vrcp.f32 %v918_v47  ;;  %v9802_v37 = vadd.f32 %v9801_v27, %v9800_v21 }
 0x195   : > { %1138 = vst [vmem:[#allocation3 + $0x20] sm:$0xf] %v9387_v46  ;;  %v10320_v61 = vpop.eup %10319  ;;  %1386 = vst [vmem:[#allocation2 + $0x80] sm:$0x1] %v1275_v49  ;;  %v995_v62 = vmul.f32 %v10318_v54, %v11256_v30  ;;  %10335 = vrcp.f32 %v934_v52  ;;  %v1276_v2 = vrot.slane %v9403_v50, 7 }
 0x196   : > { %1154 = vst [vmem:[#allocation3 + $0x120] sm:$0xf] %v9403_v50  ;;  %v10322_v0 = vpop.eup %10321  ;;  %1363 = vst [vmem:[#allocation2 + $0x24] sm:$0xe] %v1236_v19  ;;  %v9388_v1 = vpack.c.bf16 %v979_v56, %v979_v56  ;;  %10337 = vpow2.f32 %v896_v28  ;;  %v1237_v5 = vrot.slane %v1236_v19, 4  ;;  %v919_v9 = vadd.f32 1.0, %v10320_v61 }
 0x197   : > { %v9404_v3 = vpack.c.bf16 %v995_v62, %v995_v62  ;;  %v10324_v4 = vpop.eup %10323  ;;  %v935_v29 = vadd.f32 1.0, %v10322_v0  ;;  %v1277_v11 = vrot.slane %v1276_v2, 4  ;;  %1387 = vst [vmem:[#allocation2 + $0x84] sm:$0xe] %v1276_v2  ;;  %10339 = vpow2.f32 %v866_v63  ;;  %v1408_v62 = vld [vmem:[#allocation2] sm:$0xf] }
 0x198   : > { %1139 = vst [vmem:[#allocation3 + $0x30] sm:$0xf] %v9388_v1  ;;  %v1238_v8 = vrot.slane %v9388_v1, 7  ;;  %v920_v30 = vadd.f32 1.0, %v10324_v4  ;;  %10341 = vrcp.f32 %v919_v9  ;;  %v11338_v47 = vadd.f32 %v9802_v37, %v11226_v51  ;;  %v1457_v63 = vld [vmem:[#allocation2 + $0xc] sm:$0xf]  ;;  %v9755_v9 = vpop.f32.mrf.mxu0 }
 0x199   : > { %v10326_v10 = vpop.eup %10325  ;;  %1155 = vst [vmem:[#allocation3 + $0x130] sm:$0xf] %v9404_v3  ;;  %v1278_v12 = vrot.slane %v9404_v3, 7  ;;  %10343 = vrcp.f32 %v935_v29  ;;  %v1409_v3 = vld [vmem:[#allocation2 + $0x4] sm:$0xf] }
 0x19a   : > { %v10328_v58 = vpop.eup %10327  ;;  %v1239_v14 = vsel %vm11308_vm2, %v1237_v5, %v1238_v8  ;;  %v980_v59 = vmul.f32 %v10326_v10, %v11261_v42  ;;  %10345 = vrcp.f32 %v920_v30  ;;  %v1458_v4 = vld [vmem:[#allocation2 + $0x10] sm:$0xf]  ;;  %v1410_v29 = vld [vmem:[#allocation2 + $0x8] sm:$0x3]  ;;  %v1459_v10 = vld [vmem:[#allocation2 + $0x14] sm:$0x3] }
 0x19b   : > { %1364 = vst [vmem:[#allocation2 + $0x28] sm:$0xf] %v1239_v14  ;;  %v1279_v17 = vsel %vm11308_vm2, %v1277_v11, %v1278_v12  ;;  %v996_v20 = vmul.f32 %v10328_v58, %v11264_v43  ;;  %v1240_v43 = vrot.slane %v1238_v8, 4  ;;  %v1280_v7 = vrot.slane %v1278_v12, 4 }
 0x19c   : > { %1388 = vst [vmem:[#allocation2 + $0x88] sm:$0xf] %v1279_v17  ;;  %v9389_v22 = vpack.c.bf16 %v980_v59, %v980_v59  ;;  %v841_v12 = vsub.f32 0.0, %v11338_v47  ;;  %v1506_v59 = vld [vmem:[#allocation2 + $0x1c] sm:$0xf]  ;;  %v1652_v21 = vmax.bf16 %v1458_v4, %v1409_v3 }
 0x19d   : > { %v10330_v23 = vpop.eup %10329  ;;  %v9405_v24 = vpack.c.bf16 %v996_v20, %v996_v20  ;;  %1365 = vst [vmem:[#allocation2 + $0x2c] sm:$0x1] %v1240_v43  ;;  %1389 = vst [vmem:[#allocation2 + $0x8c] sm:$0x1] %v1280_v7  ;;  %v1507_v17 = vld [vmem:[#allocation2 + $0x20] sm:$0x3]  ;;  %v1651_v20 = vmax.bf16 %v1457_v63, %v1408_v62 }
 0x19e   : > { %v10332_v25 = vpop.eup %10331  ;;  %1140 = vst [vmem:[#allocation3 + $0x40] sm:$0xf] %v9389_v22  ;;  %v981_v6 = vmul.f32 %v10330_v23, %v11269_v57  ;;  %v1508_v43 = vld [vmem:[#allocation2 + $0x24] sm:$0xf] }
 0x19f   : > { %1156 = vst [vmem:[#allocation3 + $0x140] sm:$0xf] %v9405_v24  ;;  %v997_v42 = vmul.f32 %v10332_v25, %v11272_v60  ;;  %v1241_v60 = vrot.slane %v9389_v22, 7  ;;  %v1281_v40 = vrot.slane %v9405_v24, 7  ;;  %v9756_v22 = vpop.f32.mrf.mxu0 }
 0x1a0   : > { %v9390_v28 = vpack.c.bf16 %v981_v6, %v981_v6  ;;  %v1653_v6 = vmax.bf16 %v1459_v10, %v1410_v29 }
 0x1a1   : > { %v10334_v31 = vpop.eup %10333  ;;  %v9406_v34 = vpack.c.bf16 %v997_v42, %v997_v42  ;;  %v1242_v48 = vrot.slane %v1241_v60, 4  ;;  %1366 = vst [vmem:[#allocation2 + $0x30] sm:$0xe] %v1241_v60  ;;  %v1282_v18 = vrot.slane %v1281_v40, 4  ;;  %1390 = vst [vmem:[#allocation2 + $0x90] sm:$0xe] %v1281_v40 }
 0x1a2   : > { %v10336_v35 = vpop.eup %10335  ;;  %1141 = vst [vmem:[#allocation3 + $0x50] sm:$0xf] %v9390_v28  ;;  %v982_v36 = vmul.f32 %v10334_v31, %v11277_v15  ;;  %v1243_v45 = vrot.slane %v9390_v28, 7  ;;  %v1555_v30 = vld [vmem:[#allocation2 + $0x28] sm:$0xf]  ;;  %v9757_v28 = vadd.f32 %v9756_v22, %v9755_v9 }
 0x1a3   : > { %1157 = vst [vmem:[#allocation3 + $0x150] sm:$0xf] %v9406_v34  ;;  %v998_v38 = vmul.f32 %v10336_v35, %v11280_v16  ;;  %v10338_v39 = vpop.eup %10337  ;;  %v1283_v46 = vrot.slane %v9406_v34, 7  ;;  %v1700_v23 = vmax.bf16 %v1555_v30, %v1506_v59  ;;  %v898_v42 = vmul.f32 1.442695, %v841_v12 }
 0x1a4   : > { %v11331_v57 = vpack.c.bf16 %v982_v36, %v982_v36  ;;  %v10340_v44 = vpop.eup %10339  ;;  %v936_v50 = vadd.f32 1.0, %v10338_v39  ;;  %v1245_v54 = vrot.slane %v1243_v45, 4  ;;  %v1244_v0 = vsel %vm11308_vm2, %v1242_v48, %v1243_v45  ;;  %v1556_v58 = vld [vmem:[#allocation2 + $0x2c] sm:$0x3]  ;;  %v1460_v35 = vld [vmem:[#allocation2 + $0x18] sm:$0xf] }
 0x1a5   : > { %v11333_v41 = vpack.c.bf16 %v998_v38, %v998_v38  ;;  %v10342_v16 = vpop.eup %10341  ;;  %v1285_v19 = vrot.slane %v1283_v46, 4  ;;  %v1284_v1 = vsel %vm11308_vm2, %v1282_v18, %v1283_v46  ;;  %1367 = vst [vmem:[#allocation2 + $0x34] sm:$0xf] %v1244_v0  ;;  %v921_v8 = vadd.f32 1.0, %v10340_v44  ;;  %v1411_v34 = vld [vmem:[#allocation2 + $0xc] sm:$0xf] }
 0x1a6   : > { %1142 = vst [vmem:[#allocation3 + $0x60] sm:$0xf] %v11331_v57  ;;  %v1246_v15 = vrot.slane %v11331_v57, 7  ;;  %v10344_v52 = vpop.eup %10343  ;;  %v983_v56 = vmul.f32 %v10342_v16, %v11285_v32  ;;  %1368 = vst [vmem:[#allocation2 + $0x38] sm:$0x1] %v1245_v54  ;;  %10347 = vrcp.f32 %v936_v50  ;;  %v1701_v24 = vmax.bf16 %v1556_v58, %v1507_v17 }
 0x1a7   : > { %1158 = vst [vmem:[#allocation3 + $0x160] sm:$0xf] %v11333_v41  ;;  %v1286_v49 = vrot.slane %v11333_v41, 7  ;;  %v10346_v61 = vpop.eup %10345  ;;  %v999_v2 = vmul.f32 %v10344_v52, %v11288_v33  ;;  %1391 = vst [vmem:[#allocation2 + $0x94] sm:$0xf] %v1284_v1  ;;  %10349 = vrcp.f32 %v921_v8  ;;  %v1748_v36 = vmax.bf16 %v1700_v23, %v1652_v21 }
 0x1a8   : > { %1369 = vst [vmem:[#allocation2 + $0x3c] sm:$0xe] %v1246_v15  ;;  %1392 = vst [vmem:[#allocation2 + $0x98] sm:$0x1] %v1285_v19  ;;  %v11352_v32 = vpack.c.bf16 %v983_v56, %v983_v56  ;;  %v984_v5 = vmul.f32 %v10346_v61, %v11293_v53  ;;  %v1554_v33 = vld [vmem:[#allocation2 + $0x24] sm:$0xf]  ;;  %v1749_v37 = vmax.bf16 %v1701_v24, %v1653_v6  ;;  %10351 = vpow2.f32 %v898_v42 }
 0x1a9   : > { %1393 = vst [vmem:[#allocation2 + $0x9c] sm:$0xe] %v1286_v49  ;;  %v11355_v11 = vpack.c.bf16 %v999_v2, %v999_v2  ;;  %v1505_v53 = vld [vmem:[#allocation2 + $0x18] sm:$0xf]  ;;  %v1557_v27 = vld [vmem:[#allocation2 + $0x30] sm:$0xf]  ;;  %v11364_v46 = vadd.f32 %v9757_v28, %v11226_v51  ;;  %v1654_v16 = vmax.bf16 %v1460_v35, %v1411_v34 }
 0x1aa   : > { %1143 = vst [vmem:[#allocation3 + $0x70] sm:$0xf] %v11352_v32  ;;  %v11359_v14 = vpack.c.bf16 %v984_v5, %v984_v5  ;;  %v1699_v25 = vmax.bf16 %v1554_v33, %v1505_v53  ;;  %v1603_v31 = vld [vmem:[#allocation2 + $0x30] sm:$0xf]  ;;  %v1702_v38 = vmax.bf16 %v1557_v27, %v1508_v43  ;;  %v11366_v48 = vld [vmem:[#allocation2 + $0x20] sm:$0x3] }
 0x1ab   : > { %1159 = vst [vmem:[#allocation3 + $0x170] sm:$0xf] %v11355_v11  ;;  %v11368_v18 = vld [vmem:[#allocation2 + $0x20] sm:$0x3]  ;;  %v11370_v54 = vld [vmem:[#allocation2 + $0x18] sm:$0xf] }
 0x1ac   : > { %1144 = vst [vmem:[#allocation3 + $0x80] sm:$0xf] %v11359_v14  ;;  %v1747_v7 = vmax.bf16 %v1699_v25, %v1651_v20  ;;  %v1604_v39 = vld [vmem:[#allocation2 + $0x34] sm:$0xf]  ;;  %v11372_v19 = vld [vmem:[#allocation2 + $0x1c] sm:$0xf]  ;;  %v1750_v61 = vmax.bf16 %v1702_v38, %v1654_v16 }
 0x1ad   : > { %v1605_v60 = vld [vmem:[#allocation2 + $0x38] sm:$0x3]  ;;  %v1796_v44 = vmax.bf16 %v1748_v36, %v1604_v39  ;;  %v11374_v56 = vld [vmem:[#allocation2 + $0x1c] sm:$0xf]  ;;  %v826_v0 = vsub.f32 0.0, %v11364_v46  ;;  %v1247_v2 = vrot.slane %v1246_v15, 4  ;;  %v11425_v36 = vpop.f32.mrf.mxu1 }
 0x1ae   : > { %v1795_v40 = vmax.bf16 %v1747_v7, %v1603_v31  ;;  %v1797_v45 = vmax.bf16 %v1749_v37, %v1605_v60  ;;  %v11378_v1 = vld [vmem:[#allocation2 + $0x24] sm:$0xf]  ;;  %v1248_v9 = vrot.slane %v11352_v32, 7  ;;  %v1288_v29 = vrot.slane %v11355_v11, 7  ;;  %v1412_v20 = vld [vmem:[#allocation2 + $0x10] sm:$0xf] }
 0x1af   : > { %v1606_v51 = vld [vmem:[#allocation2 + $0x3c] sm:$0xf]  ;;  %v11385_v8 = vld [vmem:[#allocation2 + $0x24] sm:$0xf]  ;;  %v1251_v10 = vrot.slane %v11359_v14, 7 }
 0x1b0   : > { %v9649_v52 = vcombine.low %v1795_v40, %v1796_v44  ;;  %1845 = vst [vmem:[#allocation2 + $0x20] sm:$0x3] %v1797_v45  ;;  %v1798_v3 = vmax.bf16 %v1750_v61, %v1606_v51  ;;  %v1250_v12 = vrot.slane %v1248_v9, 4  ;;  %v868_v30 = vmul.f32 1.442695, %v826_v0  ;;  %v11427_v44 = vpop.f32.mrf.mxu0 }
 0x1b1   : > { %1372 = vst [vmem:[#allocation2 + $0x48] sm:$0xe] %v1251_v10  ;;  %v1509_v25 = vld [vmem:[#allocation2 + $0x28] sm:$0xf]  ;;  %v1558_v6 = vld [vmem:[#allocation2 + $0x34] sm:$0xf]  ;;  %v1655_v61 = vmax.bf16 %v11374_v56, %v1412_v20 }
 0x1b2   : > { %9453 = vst [vmem:[#allocation2 + $0x18] sm:$0xff] %v9649_v52   ;;  %1846 = vst [vmem:[#allocation2 + $0x24] sm:$0xf] %v1798_v3  ;;  %v1559_v37 = vld [vmem:[#allocation2 + $0x38] sm:$0x3]  ;;  %v1703_v16 = vmax.bf16 %v1558_v6, %v1509_v25  ;;  %10353 = vpow2.f32 %v868_v30 }
 0x1b3   : > { %v10348_v50 = vpop.eup %10347  ;;  %1371 = vst [vmem:[#allocation2 + $0x44] sm:$0x1] %v1250_v12  ;;  %v1413_v45 = vld [vmem:[#allocation2 + $0x14] sm:$0x3]  ;;  %v11450_v25 = vld [vmem:[#allocation2 + $0x28] sm:$0xf] }
 0x1b4   : > { %v1000_v62 = vmul.f32 %v10348_v50, %v11296_v55  ;;  %v10350_v63 = vpop.eup %10349  ;;  %v1287_v55 = vrot.slane %v1286_v49, 4  ;;  %v1290_v49 = vrot.slane %v1288_v29, 4  ;;  %v1656_v56 = vmax.bf16 %v11368_v18, %v1413_v45 }
 0x1b5   : > { %v985_v5 = vmul.f32 %v10350_v63, %v11303_v13  ;;  %v1249_v13 = vsel %vm11308_vm2, %v1247_v2, %v1248_v9  ;;  %v10352_v17 = vpop.eup %10351  ;;  %v17476_v63 = vmov 0  ;;  %v1751_v20 = vmax.bf16 %v1703_v16, %v1655_v61 }
 0x1b6   : > { %v11382_v4 = vpack.c.bf16 %v1000_v62, %v1000_v62  ;;  %v1289_v41 = vsel %vm11308_vm2, %v1287_v55, %v1288_v29  ;;  %1370 = vst [vmem:[#allocation2 + $0x40] sm:$0xf] %v1249_v13  ;;  %1395 = vst [vmem:[#allocation2 + $0xa4] sm:$0x1] %v1290_v49  ;;  %v937_v40 = vadd.f32 1.0, %v10352_v17  ;;  %v17477_v63 = vsel %vm11433_vm9, 4294967295, %v17476_v63  ;;  %v9804_v29 = vpop.f32.mrf.mxu1 }
 0x1b7   : > { %v11394_v15 = vpack.c.bf16 %v985_v5, %v985_v5  ;;  %v11402_v32 = vld [vmem:[#allocation2 + $0x20] sm:$0x3]  ;;  %1394 = vst [vmem:[#allocation2 + $0xa0] sm:$0xf] %v1289_v41  ;;  %v1510_v62 = vld [vmem:[#allocation2 + $0x2c] sm:$0x3]  ;;  %v9759_v41 = vpop.f32.mrf.mxu0 }
 0x1b8   : > { %1160 = vst [vmem:[#allocation3 + $0x180] sm:$0xf] %v11382_v4  ;;  %v1291_v57 = vrot.slane %v11382_v4, 7  ;;  %v2449_v11 = vshll.u32 %v11402_v32, 16  ;;  %v2453_v33 = vshrl.u32 %v11402_v32, 16  ;;  %17478 = vst [vmem:[#allocation28_spill] sm:$0xff] %v17477_v63  ;;  %v1704_v5 = vmax.bf16 %v1559_v37, %v1510_v62 }
 0x1b9   : > { %1145 = vst [vmem:[#allocation3 + $0x90] sm:$0xf] %v11394_v15  ;;  %v11409_v58 = vld [vmem:[#allocation2 + $0x18] sm:$0xf]  ;;  %v11411_v53 = vld [vmem:[#allocation2 + $0x1c] sm:$0xf]  ;;  %10355 = vrcp.f32 %v937_v40 }
 0x1ba   : > { %1396 = vst [vmem:[#allocation2 + $0xa8] sm:$0xe] %v1291_v57  ;;  %v11413_v59 = vld [vmem:[#allocation2 + $0x18] sm:$0xe]  ;;  %v1991_v21 = vshrl.u32 %v11409_v58, 16  ;;  %v1994_v22 = vshll.u32 %v11409_v58, 16 }
 0x1bb   : > { %v2000_v23 = vshll.u32 %v11411_v53, 16  ;;  %v2004_v24 = vshrl.u32 %v11411_v53, 16  ;;  %v2439_v42 = vshrl.u32 %v11413_v59, 16  ;;  %v2442_v27 = vshll.u32 %v11413_v59, 16  ;;  %v11421_v31 = vld [vmem:[#allocation2 + $0x20] sm:$0x1] }
 0x1bc   : > { %v2451_v28 = vrot.slane %v2449_v11, 5  ;;  %v1993_v34 = vrot.slane %v1991_v21, 4  ;;  %v1996_v35 = vrot.slane %v1994_v22, 5  ;;  %v2455_v60 = vrot.slane %v2453_v33, 4  ;;  %v11438_v3 = vld [vmem:[#allocation2 + $0x24] sm:$0xe] }
 0x1bd   : > { %v11423_v43 = vrot.slane %v2000_v23, 5  ;;  %v2006_v7 = vrot.slane %v2004_v24, 4  ;;  %v2441_v38 = vrot.slane %v2439_v42, 4  ;;  %v2444_v39 = vrot.slane %v2442_v27, 5  ;;  %v1971_v49 = vld [vmem:[#allocation2 + $0x18] sm:$0xc] }
 0x1be   : > { %v1997_v50 = vor.u32 %v1996_v35, %v1993_v34  ;;  %v2010_v51 = vshll.u32 %v11421_v31, 16  ;;  %v2456_v2 = vor.u32 %v2455_v60, %v2451_v28  ;;  %v3134_v33 = vrot.slane %v11411_v53, 6  ;;  %v1607_v23 = vld [vmem:[#allocation2 + $0x40] sm:$0xf]  ;;  %v1608_v24 = vld [vmem:[#allocation2 + $0x44] sm:$0x3]  ;;  %v9806_v34 = vpop.f32.mrf.mxu1  ;;  %v11469_v60 = vpop.f32.mrf.mxu0 }
 0x1bf   : > { %v2007_v52 = vor.u32 %v2006_v7, %v11423_v43  ;;  %v2445_v0 = vor.u32 %v2444_v39, %v2441_v38  ;;  %v2459_v17 = vshrl.u32 %v11438_v3, 16  ;;  %v2462_v22 = vshll.u32 %v11438_v3, 16  ;;  %v11457_v35 = vld [vmem:[#allocation2 + $0x28] sm:$0xf] }
 0x1c0   : > { %v1998_v55 = vrot.slane %v1997_v50, 4  ;;  %v2457_v12 = vrot.slane %v2456_v2, 4  ;;  %v2012_v21 = vrot.slane %v2010_v51, 5  ;;  %v17479_v37 = vmov 0 }
 0x1c1   : > { %v2008_v9 = vrot.slane %v2007_v52, 4  ;;  %v2446_v13 = vrot.slane %v2445_v0, 4  ;;  %v17480_v37 = vsel %vm11463_vm10, 4294967295, %v17479_v37  ;;  %v9170_v39 = vrot.slane %v1971_v49, 10  ;;  %v11473_v52 = vld [vmem:[#allocation2 + $0x2c] sm:$0x3] }
 0x1c2   : > { %v2003_v6 = vsel %vm11433_vm9, %v1998_v55, %v11423_v43  ;;  %v2808_v27 = vmax.bf16 %v2457_v12, %v11421_v31  ;;  %17481 = vst [vmem:[#allocation29_spill] sm:$0xff] %v17480_v37  ;;  %v11471_v31 = vld [vmem:[#allocation2 + $0x2c] sm:$0x3]  ;;  %v3136_v45 = vrot.slane %v3134_v33, 4  ;;  %v2461_v16 = vrot.slane %v2459_v17, 4  ;;  %v9762_v17 = vpop.f32.mrf.mxu0 }
 0x1c3   : > { %v2452_v11 = vsel %vm11433_vm9, %v2008_v9, %v2451_v28  ;;  %v2447_v30 = vsel %vm11433_vm9, %v2446_v13, %v11423_v43  ;;  %v1752_v28 = vmax.bf16 %v1704_v5, %v1656_v56  ;;  %v2013_v7 = vsel %vm11433_vm9, %v2008_v9, %v2012_v21  ;;  %v11467_v43 = vld [vmem:[#allocation2 + $0x24] sm:$0xf]  ;;  %v9807_v56 = vpop.f32.mrf.mxu1 }
 0x1c4   : > { %v2807_v18 = vmax.bf16 %v2452_v11, %v11411_v53  ;;  %v2806_v42 = vmax.bf16 %v2447_v30, %v11413_v59  ;;  %v1799_v59 = vmax.bf16 %v1751_v20, %v1607_v23  ;;  %v2406_v61 = vmax.bf16 %v2003_v6, %v11409_v58 }
 0x1c5   : > { %v1800_v50 = vmax.bf16 %v1752_v28, %v1608_v24  ;;  %v2910_v51 = vrot.slane %v2808_v27, 5  ;;  %v17482_v0 = vmov 0  ;;  %v2464_v2 = vrot.slane %v2462_v22, 5 }
 0x1c6   : > { %v2907_v38 = vrot.slane %v2807_v18, 5  ;;  %v9154_v40 = vrot.slane %v2806_v42, 9  ;;  %v17483_v0 = vsel %vm11478_vm11, 4294967295, %v17482_v0  ;;  %1847 = vst [vmem:[#allocation2 + $0x28] sm:$0xf] %v1799_v59  ;;  %v2407_v5 = vmax.bf16 %v2013_v7, %v11411_v53  ;;  %v10354_v42 = vpop.eup %10353 }
 0x1c7   : > { %17484 = vst [vmem:[#allocation30_spill] sm:$0xff] %v17483_v0  ;;  %1848 = vst [vmem:[#allocation2 + $0x2c] sm:$0x3] %v1800_v50  ;;  %v2015_v9 = vshrl.u32 %v11467_v43, 16  ;;  %v2018_v58 = vshll.u32 %v11467_v43, 16  ;;  %v3137_v49 = vrot.slane %v11402_v32, 6  ;;  %v9805_v11 = vadd.f32 %v9804_v29, %v11425_v36  ;;  %v9809_v29 = vpop.f32.mrf.mxu1  ;;  %v10356_v14 = vpop.eup %10355 }
 0x1c8   : > { %v2909_v62 = vrot.slane %v2907_v38, 4  ;;  %v2908_v55 = vsel %vm11463_vm10, %v9154_v40, %v2907_v38  ;;  %v3135_v53 = vsel %vm11478_vm11, %v9170_v39, %v3134_v33  ;;  %v9760_v21 = vadd.f32 %v9759_v41, %v11427_v44  ;;  %v11502_v44 = vld [vmem:[%s17472_s16] ss:$0 sm:$0xff]  ;;  %v9764_v33 = vpop.f32.mrf.mxu0 }
 0x1c9   : > { %v3049_v12 = vmax.bf16 %v2908_v55, %v2406_v61  ;;  %v3138_v30 = vsel %vm11478_vm11, %v3136_v45, %v3137_v49  ;;  %v2465_v22 = vor.u32 %v2464_v2, %v2461_v16  ;;  %v1252_v23 = vrot.slane %v1251_v10, 4  ;;  %v1560_v61 = vld [vmem:[#allocation2 + $0x3c] sm:$0xf] }
 0x1ca   : > { %v2911_v13 = vsel %vm11463_vm10, %v2909_v62, %v2910_v51  ;;  %v2017_v6 = vrot.slane %v2015_v9, 4  ;;  %v2020_v32 = vrot.slane %v2018_v58, 5  ;;  %v1253_v36 = vrot.slane %v11394_v15, 7 }
 0x1cb   : > { %v3050_v20 = vmax.bf16 %v2911_v13, %v2407_v5  ;;  %v3276_v18 = vmax.bf16 %v3135_v53, %v3049_v12  ;;  %v11505_v41 = vadd.f32 %v11502_v44, %v9805_v11  ;;  %v9808_v38 = vadd.f32 %v9807_v56, %v9806_v34  ;;  %v9810_v34 = vpop.f32.mrf.mxu1  ;;  %v9765_v56 = vpop.f32.mrf.mxu0  ;;  %v1511_v13 = vld [vmem:[#allocation2 + $0x30] sm:$0xf]  ;;  %v1561_v53 = vld [vmem:[#allocation2 + $0x40] sm:$0xf] }
 0x1cc   : > { %v1254_v15 = vsel %vm11308_vm2, %v1252_v23, %v1253_v36  ;;  %v1255_v7 = vrot.slane %v1253_v36, 4  ;;  %v2466_v45 = vrot.slane %v2465_v22, 4  ;;  %v11515_v16 = vadd.f32 %v11502_v44, %v9760_v21 }
 0x1cd   : > { %v3277_v24 = vmax.bf16 %v3138_v30, %v3050_v20  ;;  %3308 = vst [vmem:[#allocation3 + $0x4] sm:$0xf] %v3276_v18  ;;  %v3372_v27 = vrot.slane %v3276_v18, 7  ;;  %v11507_v28 = vld [vmem:[#allocation2 + $0x28] sm:$0xf]  ;;  %v2021_v62 = vor.u32 %v2020_v32, %v2017_v6  ;;  %v1001_v58 = vmul.f32 %v10356_v14, %v11338_v47 }
 0x1ce   : > { %v11511_v59 = vld [vmem:[#allocation2 + $0x2c] sm:$0x3]  ;;  %v2024_v40 = vshll.u32 %v11507_v28, 16  ;;  %1373 = vst [vmem:[#allocation2 + $0x4c] sm:$0xf] %v1254_v15  ;;  %v2028_v51 = vshrl.u32 %v11507_v28, 16  ;;  %v11525_v20 = vadd.f32 %v11502_v44, %v9808_v38  ;;  %v1705_v18 = vmax.bf16 %v1560_v61, %v1511_v13 }
 0x1cf   : > { %3309 = vst [vmem:[#allocation3 + $0x14] sm:$0xf] %v3277_v24  ;;  %v3374_v10 = vrot.slane %v3277_v24, 7  ;;  %v3373_v39 = vrot.slane %v3372_v27, 4  ;;  %3500 = vst [vmem:[#allocation2 + $0x18] sm:$0xe] %v3372_v27  ;;  %v9763_v22 = vadd.f32 %v9762_v17, %v11469_v60  ;;  %v11528_v23 = vadd.f32 %v9810_v34, %v9809_v29 }
 0x1d0   : > { %v2469_v2 = vshll.u32 %v11511_v59, 16  ;;  %1374 = vst [vmem:[#allocation2 + $0x50] sm:$0x1] %v1255_v7  ;;  %v2026_v55 = vrot.slane %v2024_v40, 5  ;;  %v2473_v9 = vshrl.u32 %v11511_v59, 16  ;;  %v2030_v12 = vrot.slane %v2028_v51, 4 }
 0x1d1   : > { %v3376_v50 = vrot.slane %v3374_v10, 4  ;;  %v3375_v5 = vsel %vm11308_vm2, %v3373_v39, %v3374_v10  ;;  %v842_v11 = vsub.f32 0.0, %v11505_v41  ;;  %v1924_v21 = vld [vmem:[#allocation2 + $0x2c] sm:$0x1]  ;;  %v1562_v47 = vld [vmem:[#allocation2 + $0x44] sm:$0x3]  ;;  %v1657_v32 = vmax.bf16 %v11385_v8, %v11370_v54 }
 0x1d2   : > { %3501 = vst [vmem:[#allocation2 + $0x1c] sm:$0xf] %v3375_v5  ;;  %v2471_v49 = vrot.slane %v2469_v2, 5  ;;  %v2475_v30 = vrot.slane %v2473_v9, 4  ;;  %v2022_v24 = vrot.slane %v2021_v62, 4  ;;  %v2031_v6 = vor.u32 %v2030_v12, %v2026_v55 }
 0x1d3   : > { %3502 = vst [vmem:[#allocation2 + $0x20] sm:$0x1] %v3376_v50  ;;  %v11532_v36 = vadd.f32 %v9765_v56, %v9764_v33  ;;  %v1512_v27 = vld [vmem:[#allocation2 + $0x34] sm:$0xf]  ;;  %v2467_v14 = vsel %vm11433_vm9, %v2466_v45, %v2026_v55  ;;  %v9410_v15 = vpack.c.bf16 %v1001_v58, %v1001_v58  ;;  %v922_v7 = vadd.f32 1.0, %v10354_v42 }
 0x1d4   : > { %v2476_v10 = vor.u32 %v2475_v30, %v2471_v49  ;;  %v1658_v60 = vmax.bf16 %v11457_v35, %v11372_v19  ;;  %v1659_v17 = vmax.bf16 %v11473_v52, %v11366_v48  ;;  %v1513_v29 = vld [vmem:[#allocation2 + $0x38] sm:$0x3]  ;;  %v1972_v38 = vld [vmem:[#allocation2 + $0x24] sm:$0xc]  ;;  %v1706_v39 = vmax.bf16 %v1561_v53, %v1512_v27  ;;  %v1609_v50 = vld [vmem:[#allocation2 + $0x48] sm:$0xf] }
 0x1d5   : > { %v2034_v40 = vshll.u32 %v1924_v21, 16  ;;  %v1707_v54 = vmax.bf16 %v1562_v47, %v1513_v29  ;;  %v2032_v8 = vrot.slane %v2031_v6, 4  ;;  %v1753_v61 = vmax.bf16 %v1705_v18, %v1657_v32  ;;  %1161 = vst [vmem:[#allocation3 + $0x190] sm:$0xf] %v9410_v15  ;;  %v1610_v53 = vld [vmem:[#allocation2 + $0x4c] sm:$0xf] }
 0x1d6   : > { %v2477_v33 = vrot.slane %v2476_v10, 4  ;;  %v2027_v45 = vsel %vm11433_vm9, %v2022_v24, %v2026_v55  ;;  %v2809_v42 = vmax.bf16 %v2467_v14, %v11438_v3  ;;  %v3141_v19 = vrot.slane %v11507_v28, 6  ;;  %v11558_v6 = vld [vmem:[#allocation2 + $0x30] sm:$0xf]  ;;  %v11560_v32 = vld [vmem:[#allocation2 + $0x38] sm:$0x3] }
 0x1d7   : > { %10357 = vrcp.f32 %v922_v7  ;;  %v2472_v48 = vsel %vm11433_vm9, %v2032_v8, %v2471_v49  ;;  %v9171_v52 = vrot.slane %v1972_v38, 10  ;;  %v1292_v62 = vrot.slane %v1291_v57, 4  ;;  %v1611_v57 = vld [vmem:[#allocation2 + $0x50] sm:$0x3]  ;;  %v11562_v27 = vld [vmem:[#allocation2 + $0x38] sm:$0x3] }
 0x1d8   : > { %v2811_v35 = vmax.bf16 %v2477_v33, %v1924_v21  ;;  %v2036_v51 = vrot.slane %v2034_v40, 5  ;;  %v2810_v2 = vmax.bf16 %v2472_v48, %v11507_v28  ;;  %v1801_v34 = vmax.bf16 %v1753_v61, %v1609_v50  ;;  %v11572_v29 = vld [vmem:[#allocation2 + $0x34] sm:$0xf] }
 0x1d9   : > { %v1754_v5 = vmax.bf16 %v1706_v39, %v1658_v60  ;;  %v2408_v55 = vmax.bf16 %v2027_v45, %v11467_v43  ;;  %v3144_v3 = vrot.slane %v11511_v59, 6  ;;  %v1755_v9 = vmax.bf16 %v1707_v54, %v1659_v17  ;;  %v11568_v60 = vld [vmem:[#allocation2 + $0x30] sm:$0xf]  ;;  %v11570_v17 = vld [vmem:[#allocation2 + $0x34] sm:$0xf] }
 0x1da   : > { %v1293_v58 = vrot.slane %v9410_v15, 7  ;;  %v2037_v56 = vsel %vm11433_vm9, %v2032_v8, %v2036_v51  ;;  %v9155_v13 = vrot.slane %v2809_v42, 9  ;;  %v2914_v12 = vrot.slane %v2810_v2, 5  ;;  %v11582_v8 = vld [vmem:[#allocation2 + $0x88] sm:$0xf] }
 0x1db   : > { %v3143_v49 = vrot.slane %v3141_v19, 4  ;;  %v2917_v4 = vrot.slane %v2811_v35, 5  ;;  %v1802_v21 = vmax.bf16 %v1754_v5, %v1610_v53  ;;  %v1803_v47 = vmax.bf16 %v1755_v9, %v1611_v57  ;;  %v1438_v42 = vld [vmem:[#allocation2 + $0x78] sm:$0xf]  ;;  %v1535_v5 = vld [vmem:[#allocation2 + $0x90] sm:$0xf] }
 0x1dc   : > { %v1294_v30 = vsel %vm11308_vm2, %v1292_v62, %v1293_v58  ;;  %v1295_v18 = vrot.slane %v1293_v58, 4  ;;  %v2915_v43 = vsel %vm11463_vm10, %v9155_v13, %v2914_v12  ;;  %v2916_v59 = vrot.slane %v2914_v12, 4  ;;  %v1584_v62 = vld [vmem:[#allocation2 + $0x9c] sm:$0xf]  ;;  %v1586_v9 = vld [vmem:[#allocation2 + $0xa4] sm:$0x3] }
 0x1dd   : > { %1397 = vst [vmem:[#allocation2 + $0xac] sm:$0xf] %v1294_v30  ;;  %v827_v24 = vsub.f32 0.0, %v11515_v16  ;;  %v2409_v14 = vmax.bf16 %v2037_v56, %v11507_v28  ;;  %v3051_v10 = vmax.bf16 %v2915_v43, %v2408_v55  ;;  %v9650_v15 = vcombine.low %v1801_v34, %v1802_v21  ;;  %1851 = vst [vmem:[#allocation2 + $0x38] sm:$0x3] %v1803_v47 }
 0x1de   : > { %1398 = vst [vmem:[#allocation2 + $0xb0] sm:$0x1] %v1295_v18  ;;  %v11566_v7 = vadd.f32 %v11502_v44, %v9763_v22  ;;  %v2918_v38 = vsel %vm11463_vm10, %v2916_v59, %v2917_v4  ;;  %v3142_v39 = vsel %vm11478_vm11, %v9171_v52, %v3141_v19  ;;  %v11578_v28 = vld [vmem:[#allocation2 + $0x84] sm:$0xf]  ;;  %v900_v22 = vmul.f32 1.442695, %v842_v11 }
 0x1df   : > { %v3052_v40 = vmax.bf16 %v2918_v38, %v2409_v14  ;;  %v3278_v54 = vmax.bf16 %v3142_v39, %v3051_v10  ;;  %9651 = vst [vmem:[#allocation2 + $0x30] sm:$0xff] %v9650_v15   ;;  %v3145_v33 = vsel %vm11478_vm11, %v3143_v49, %v3144_v3  ;;  %v870_v50 = vmul.f32 1.442695, %v827_v24  ;;  %v1439_v52 = vld [vmem:[#allocation2 + $0x7c] sm:$0xf] }
 0x1e0   : > { %v843_v61 = vsub.f32 0.0, %v11525_v20  ;;  %v11589_v45 = vadd.f32 %v11502_v44, %v11528_v23  ;;  %v828_v35 = vsub.f32 0.0, %v11566_v7  ;;  %v11594_v11 = vadd.f32 %v11502_v44, %v11532_v36  ;;  %v1585_v3 = vld [vmem:[#allocation2 + $0xa0] sm:$0xf]  ;;  %v1536_v58 = vld [vmem:[#allocation2 + $0x94] sm:$0xf] }
 0x1e1   : > { %v3279_v19 = vmax.bf16 %v3145_v33, %v3052_v40  ;;  %3310 = vst [vmem:[#allocation3 + $0x24] sm:$0xf] %v3278_v54  ;;  %v3377_v48 = vrot.slane %v3278_v54, 7  ;;  %v1681_v51 = vmax.bf16 %v11578_v28, %v1438_v42  ;;  %v1682_v34 = vmax.bf16 %v11582_v8, %v1439_v52  ;;  %v1537_v12 = vld [vmem:[#allocation2 + $0x98] sm:$0x3] }
 0x1e2   : > { %10359 = vpow2.f32 %v900_v22  ;;  %v902_v36 = vmul.f32 1.442695, %v843_v61  ;;  %v844_v13 = vsub.f32 0.0, %v11589_v45  ;;  %v872_v4 = vmul.f32 1.442695, %v828_v35 }
 0x1e3   : > { %3311 = vst [vmem:[#allocation3 + $0x34] sm:$0xf] %v3279_v19  ;;  %v3378_v23 = vrot.slane %v3377_v48, 4  ;;  %v3379_v55 = vrot.slane %v3279_v19, 7  ;;  %3503 = vst [vmem:[#allocation2 + $0x24] sm:$0xe] %v3377_v48  ;;  %10361 = vpow2.f32 %v870_v50  ;;  %v1730_v21 = vmax.bf16 %v1585_v3, %v1536_v58  ;;  %v9812_v19 = vpop.f32.mrf.mxu1 }
 0x1e4   : > { %v10358_v2 = vpop.eup %10357  ;;  %v829_v57 = vsub.f32 0.0, %v11594_v11  ;;  %v1731_v30 = vmax.bf16 %v1586_v9, %v1537_v12  ;;  %v1729_v18 = vmax.bf16 %v1584_v62, %v1535_v5  ;;  %v1440_v24 = vld [vmem:[#allocation2 + $0x80] sm:$0x3]  ;;  %v1489_v14 = vld [vmem:[#allocation2 + $0x8c] sm:$0x3]  ;;  %10363 = vpow2.f32 %v902_v36 }
 0x1e5   : > { %v986_v56 = vmul.f32 %v10358_v2, %v11364_v46  ;;  %v3380_v49 = vsel %vm11308_vm2, %v3378_v23, %v3379_v55  ;;  %v3381_v53 = vrot.slane %v3379_v55, 4  ;;  %v11615_v28 = vld [vmem:[#allocation2 + $0x38] sm:$0x3]  ;;  %v904_v22 = vmul.f32 1.442695, %v844_v13  ;;  %v9767_v13 = vpop.f32.mrf.mxu0 }
 0x1e6   : > { %3504 = vst [vmem:[#allocation2 + $0x28] sm:$0xf] %v3380_v49  ;;  %v11603_v43 = vld [vmem:[#allocation2 + $0x30] sm:$0xf]  ;;  %v11605_v59 = vld [vmem:[#allocation2 + $0x34] sm:$0xf]  ;;  %v1683_v35 = vmax.bf16 %v1489_v14, %v1440_v24  ;;  %v1777_v62 = vmax.bf16 %v1729_v18, %v1681_v51  ;;  %v1778_v5 = vmax.bf16 %v1730_v21, %v1682_v34  ;;  %10365 = vpow2.f32 %v872_v4 }
 0x1e7   : > { %v11607_v46 = vld [vmem:[#allocation2 + $0x30] sm:$0xe]  ;;  %v11609_v47 = vpack.c.bf16 %v986_v56, %v986_v56  ;;  %3505 = vst [vmem:[#allocation2 + $0x2c] sm:$0x1] %v3381_v53  ;;  %v2039_v10 = vshrl.u32 %v11603_v43, 16  ;;  %v2042_v15 = vshll.u32 %v11603_v43, 16  ;;  %10367 = vpow2.f32 %v904_v22 }
 0x1e8   : > { %v2048_v38 = vshll.u32 %v11605_v59, 16  ;;  %v2052_v39 = vshrl.u32 %v11605_v59, 16  ;;  %v2479_v40 = vshrl.u32 %v11607_v46, 16  ;;  %v2482_v54 = vshll.u32 %v11607_v46, 16  ;;  %v1633_v8 = vld [vmem:[#allocation2 + $0xa8] sm:$0xf] }
 0x1e9   : > { %1146 = vst [vmem:[#allocation3 + $0xa0] sm:$0xf] %v11609_v47  ;;  %v2041_v33 = vrot.slane %v2039_v10, 4  ;;  %v2044_v50 = vrot.slane %v2042_v15, 5  ;;  %v11622_v48 = vld [vmem:[#allocation2 + $0xc] sm:$0xf]  ;;  %v1825_v49 = vmax.bf16 %v1777_v62, %v1633_v8  ;;  %v1779_v18 = vmax.bf16 %v1731_v30, %v1683_v35 }
 0x1ea   : > { %v11620_v61 = vrot.slane %v2048_v38, 5  ;;  %v2054_v42 = vrot.slane %v2052_v39, 4  ;;  %v11624_v52 = vld [vmem:[#allocation2] sm:$0xf]  ;;  %v2481_v2 = vrot.slane %v2479_v40, 4  ;;  %v2484_v58 = vrot.slane %v2482_v54, 5  ;;  %v9813_v38 = vpop.f32.mrf.mxu1 }
 0x1eb   : > { %v11626_v23 = vld [vmem:[#allocation2 + $0x10] sm:$0xf]  ;;  %v11628_v55 = vld [vmem:[#allocation2 + $0x38] sm:$0x1]  ;;  %v2045_v3 = vor.u32 %v2044_v50, %v2041_v33  ;;  %v2489_v56 = vshll.u32 %v11615_v28, 16  ;;  %v2493_v53 = vshrl.u32 %v11615_v28, 16 }
 0x1ec   : > { %v2055_v9 = vor.u32 %v2054_v42, %v11620_v61  ;;  %v1634_v36 = vld [vmem:[#allocation2 + $0xac] sm:$0xf]  ;;  %v11632_v12 = vld [vmem:[#allocation2 + $0x4] sm:$0xf]  ;;  %v1635_v51 = vld [vmem:[#allocation2 + $0xb0] sm:$0x3]  ;;  %v2485_v14 = vor.u32 %v2484_v58, %v2481_v2 }
 0x1ed   : > { %v11635_v34 = vld [vmem:[#allocation2 + $0x98] sm:$0x3]  ;;  %v1826_v10 = vmax.bf16 %v1778_v5, %v1634_v36  ;;  %v874_v15 = vmul.f32 1.442695, %v829_v57  ;;  %v11643_v40 = vld [vmem:[#allocation2 + $0x90] sm:$0xf]  ;;  %v1827_v42 = vmax.bf16 %v1779_v18, %v1635_v51  ;;  %v9768_v36 = vpop.f32.mrf.mxu0 }
 0x1ee   : > { %17485 = vst [vmem:[#allocation31_spill] sm:$0xff] %v11635_v34  ;;  %v11637_v21 = vld [vmem:[#allocation2 + $0x98] sm:$0x3]  ;;  %v11645_v54 = vld [vmem:[#allocation2 + $0x90] sm:$0xf]  ;;  %v2058_v57 = vshll.u32 %v11628_v55, 16 }
 0x1ef   : > { %v11639_v24 = vld [vmem:[#allocation2 + $0x98] sm:$0x3]  ;;  %v11647_v30 = vld [vmem:[#allocation2 + $0x90] sm:$0xf]  ;;  %v11651_v8 = vld [vmem:[#allocation2 + $0x94] sm:$0xf]  ;;  %v9658_v58 = vcombine.low %v1825_v49, %v1826_v10  ;;  %v10360_v39 = vpop.eup %10359  ;;  %10369 = vpow2.f32 %v874_v15  ;;  %v1660_v49 = vmax.bf16 %v11568_v60, %v11378_v1 }
 0x1f0   : > { %17486 = vst [vmem:[#allocation32_spill] sm:$0xff] %v11639_v24  ;;  %17487 = vst [vmem:[#allocation33_spill] sm:$0xff] %v11647_v30  ;;  %v11649_v4 = vld [vmem:[#allocation2 + $0x90] sm:$0xf]  ;;  %v11653_v33 = vld [vmem:[#allocation2 + $0x94] sm:$0xf]  ;;  %v10362_v51 = vpop.eup %10361 }
 0x1f1   : > { %17488 = vst [vmem:[#allocation34_spill] sm:$0xff] %v11649_v4  ;;  %17489 = vst [vmem:[#allocation35_spill] sm:$0xff] %v11651_v8  ;;  %v11655_v50 = vld [vmem:[#allocation2 + $0x98] sm:$0x3]  ;;  %v1973_v22 = vld [vmem:[#allocation2 + $0x30] sm:$0xc]  ;;  %v11666_v8 = vadd.f32 %v9813_v38, %v9812_v19  ;;  %v11677_v19 = vadd.f32 %v9768_v36, %v9767_v13 }
 0x1f2   : > { %17490 = vst [vmem:[#allocation36_spill] sm:$0xff] %v11655_v50  ;;  %v11658_v35 = vld [vmem:[#allocation2 + $0x48] sm:$0xf]  ;;  %v2046_v62 = vrot.slane %v2045_v3, 4  ;;  %v2056_v2 = vrot.slane %v2055_v9, 4  ;;  %v2491_v5 = vrot.slane %v2489_v56, 5 }
 0x1f3   : > { %v11662_v24 = vld [vmem:[#allocation2 + $0x94] sm:$0xf]  ;;  %v2486_v50 = vrot.slane %v2485_v14, 4  ;;  %v2495_v34 = vrot.slane %v2493_v53, 4  ;;  %1875 = vst [vmem:[#allocation2 + $0x98] sm:$0x3] %v1827_v42 }
 0x1f4   : > { %17491 = vst [vmem:[#allocation37_spill] sm:$0xff] %v11662_v24  ;;  %v11664_v30 = vld [vmem:[#allocation2 + $0x94] sm:$0xf]  ;;  %v11668_v18 = vld [vmem:[#allocation2 + $0x3c] sm:$0xf]  ;;  %v2492_v3 = vsel %vm11433_vm9, %v2056_v2, %v2491_v5  ;;  %v9172_v9 = vrot.slane %v1973_v22, 10  ;;  %v2051_v10 = vsel %vm11433_vm9, %v2046_v62, %v11620_v61 }
 0x1f5   : > { %17492 = vst [vmem:[#allocation38_spill] sm:$0xff] %v11664_v30  ;;  %v3148_v56 = vrot.slane %v11605_v59, 6  ;;  %9659 = vst [vmem:[#allocation2 + $0x90] sm:$0xff] %v9658_v58   ;;  %v1708_v53 = vmax.bf16 %v11658_v35, %v11668_v18  ;;  %v2060_v14 = vrot.slane %v2058_v57, 5  ;;  %v2487_v38 = vsel %vm11433_vm9, %v2486_v50, %v11620_v61  ;;  %v10364_v57 = vpop.eup %10363  ;;  %v3694_v4 = vld [vmem:[#allocation2 + $0x2c] sm:$0x3] }
 0x1f6   : > { %v2496_v22 = vor.u32 %v2495_v34, %v2491_v5  ;;  %v2813_v15 = vmax.bf16 %v2492_v3, %v11605_v59  ;;  %v2812_v42 = vmax.bf16 %v2487_v38, %v11607_v46  ;;  %v17182_v1 = vrot.slane %v11609_v47, 7  ;;  %v3646_v30 = vld [vmem:[#allocation2 + $0x20] sm:$0x3] }
 0x1f7   : > { %v938_v60 = vadd.f32 1.0, %v10360_v39  ;;  %v923_v35 = vadd.f32 1.0, %v10362_v51  ;;  %v2061_v13 = vsel %vm11433_vm9, %v2056_v2, %v2060_v14  ;;  %v3149_v62 = vsel %vm11478_vm11, %v9172_v9, %v3148_v56 }
 0x1f8   : > { %v2497_v58 = vrot.slane %v2496_v22, 4  ;;  %v2921_v36 = vrot.slane %v2813_v15, 5  ;;  %v2410_v61 = vmax.bf16 %v2051_v10, %v11603_v43  ;;  %v9156_v34 = vrot.slane %v2812_v42, 9  ;;  %1375 = vst [vmem:[#allocation2 + $0x54] sm:$0xe] %v17182_v1 }
 0x1f9   : > { %v3150_v50 = vrot.slane %v3148_v56, 4  ;;  %10371 = vrcp.f32 %v938_v60  ;;  %v3151_v5 = vrot.slane %v11615_v28, 6  ;;  %v939_v9 = vadd.f32 1.0, %v10364_v57  ;;  %v10366_v56 = vpop.eup %10365  ;;  %v11714_v57 = vld [vmem:[#allocation2 + $0x8] sm:$0x3] }
 0x1fa   : > { %v2814_v46 = vmax.bf16 %v2497_v58, %v11628_v55  ;;  %v2923_v39 = vrot.slane %v2921_v36, 4  ;;  %v11697_v51 = vld [vmem:[#allocation2 + $0x98] sm:$0x3]  ;;  %10373 = vrcp.f32 %v923_v35  ;;  %v2922_v2 = vsel %vm11463_vm10, %v9156_v34, %v2921_v36  ;;  %v10368_v22 = vpop.eup %10367  ;;  %v11712_v58 = vld [vmem:[#allocation2 + $0x14] sm:$0x3] }
 0x1fb   : > { %v2649_v43 = vshll.u32 %v11697_v51, 16  ;;  %v2653_v3 = vshrl.u32 %v11697_v51, 16  ;;  %v3053_v10 = vmax.bf16 %v2922_v2, %v2410_v61  ;;  %v11705_v55 = vld [vmem:[#allocation2 + $0x98] sm:$0x1]  ;;  %v2411_v15 = vmax.bf16 %v2061_v13, %v11605_v59 }
 0x1fc   : > { %v11701_v18 = vld [vmem:[#allocation2 + $0x94] sm:$0xf]  ;;  %v2924_v14 = vrot.slane %v2814_v46, 5  ;;  %v3152_v42 = vsel %vm11478_vm11, %v3150_v50, %v3151_v5  ;;  %v2250_v1 = vshll.u32 %v11705_v55, 16  ;;  %v924_v13 = vadd.f32 1.0, %v10366_v56 }
 0x1fd   : > { %17493 = vst [vmem:[#allocation39_spill] sm:$0xff] %v11701_v18  ;;  %v2240_v28 = vshll.u32 %v11701_v18, 16  ;;  %v2244_v38 = vshrl.u32 %v11701_v18, 16  ;;  %v2651_v60 = vrot.slane %v2649_v43, 5  ;;  %v2655_v35 = vrot.slane %v2653_v3, 4  ;;  %v10370_v3 = vpop.eup %10369 }
 0x1fe   : > { %v2925_v36 = vsel %vm11463_vm10, %v2923_v39, %v2924_v14  ;;  %v3280_v61 = vmax.bf16 %v3149_v62, %v3053_v10  ;;  %10375 = vrcp.f32 %v939_v9  ;;  %v940_v43 = vadd.f32 1.0, %v10368_v22  ;;  %v11732_v9 = vld [vmem:[#allocation2 + $0x78] sm:$0xf]  ;;  %v11734_v22 = vld [vmem:[#allocation2 + $0x84] sm:$0xf] }
 0x1ff   : > { %v11718_v34 = vrot.slane %v2240_v28, 5  ;;  %v2246_v46 = vrot.slane %v2244_v38, 4  ;;  %v3054_v2 = vmax.bf16 %v2925_v36, %v2411_v15  ;;  %v2656_v59 = vor.u32 %v2655_v35, %v2651_v60  ;;  %v1612_v38 = vld [vmem:[#allocation2 + $0x54] sm:$0xf]  ;;  %17495 = vst [vmem:[#allocation41_spill] sm:$0xff] %v11732_v9  ;;  %v9815_v36 = vpop.f32.mrf.mxu1 }
 0x200   : > { %3312 = vst [vmem:[#allocation3 + $0x44] sm:$0xf] %v3280_v61  ;;  %v3382_v50 = vrot.slane %v3280_v61, 7  ;;  %v1756_v39 = vmax.bf16 %v1708_v53, %v1660_v49  ;;  %v11726_v56 = vadd.f32 %v11502_v44, %v11666_v8  ;;  %v11730_v15 = vadd.f32 %v11502_v44, %v11677_v19  ;;  %v11736_v35 = vld [vmem:[#allocation2 + $0x84] sm:$0xf] }
 0x201   : > { %17494 = vst [vmem:[#allocation40_spill] sm:$0xff] %v11718_v34  ;;  %v2247_v5 = vor.u32 %v2246_v46, %v11718_v34  ;;  %v3281_v62 = vmax.bf16 %v3152_v42, %v3054_v2  ;;  %v2657_v14 = vrot.slane %v2656_v59, 4  ;;  %17496 = vst [vmem:[#allocation42_spill] sm:$0xff] %v11736_v35  ;;  %v2252_v53 = vrot.slane %v2250_v1, 5  ;;  %v11738_v61 = vld [vmem:[#allocation2 + $0x3c] sm:$0xf] }
 0x202   : > { %v3383_v10 = vrot.slane %v3382_v50, 4  ;;  %3506 = vst [vmem:[#allocation2 + $0x30] sm:$0xe] %v3382_v50  ;;  %v1804_v42 = vmax.bf16 %v1756_v39, %v1612_v38  ;;  %10377 = vrcp.f32 %v924_v13  ;;  %17497 = vst [vmem:[#allocation43_spill] sm:$0xff] %v11738_v61  ;;  %v11740_v8 = vld [vmem:[#allocation2 + $0x3c] sm:$0xf] }
 0x203   : > { %v2248_v28 = vrot.slane %v2247_v5, 4  ;;  %3313 = vst [vmem:[#allocation3 + $0x54] sm:$0xf] %v3281_v62  ;;  %v3384_v49 = vrot.slane %v3281_v62, 7  ;;  %10379 = vrcp.f32 %v940_v43  ;;  %v925_v2 = vadd.f32 1.0, %v10370_v3  ;;  %v9816_v43 = vpop.f32.mrf.mxu1 }
 0x204   : > { %v3692_v59 = vld [vmem:[#allocation2 + $0x24] sm:$0xf]  ;;  %v3693_v50 = vld [vmem:[#allocation2 + $0x28] sm:$0xf]  ;;  %v2838_v39 = vmax.bf16 %v2657_v14, %v11705_v55  ;;  %1852 = vst [vmem:[#allocation2 + $0x3c] sm:$0xf] %v1804_v42 }
 0x205   : > { %v2652_v19 = vsel %vm11433_vm9, %v2248_v28, %v2651_v60  ;;  %v3385_v5 = vsel %vm11308_vm2, %v3383_v10, %v3384_v49  ;;  %v3386_v1 = vrot.slane %v3384_v49, 4  ;;  %v3644_v38 = vld [vmem:[#allocation2 + $0x18] sm:$0xf]  ;;  %10381 = vrcp.f32 %v925_v2  ;;  %v9770_v10 = vpop.f32.mrf.mxu0 }
 0x206   : > { %v11748_v13 = vmax.bf16 %v2652_v19, %v11701_v18  ;;  %v10372_v62 = vpop.eup %10371  ;;  %3507 = vst [vmem:[#allocation2 + $0x34] sm:$0xf] %v3385_v5  ;;  %v3645_v19 = vld [vmem:[#allocation2 + $0x1c] sm:$0xf]  ;;  %v2253_v55 = vsel %vm11433_vm9, %v2248_v28, %v2252_v53  ;;  %v845_v60 = vsub.f32 0.0, %v11726_v56  ;;  %v3836_v46 = vmax.bf16 %v3692_v59, %v3644_v38 }
 0x207   : > { %v10374_v49 = vpop.eup %10373  ;;  %3508 = vst [vmem:[#allocation2 + $0x38] sm:$0x1] %v3386_v1  ;;  %v1002_v42 = vmul.f32 %v10372_v62, %v11505_v41  ;;  %v3837_v3 = vmax.bf16 %v3693_v50, %v3645_v19  ;;  %v830_v2 = vsub.f32 0.0, %v11730_v15  ;;  %v2980_v34 = vrot.slane %v2838_v39, 5  ;;  %v1587_v62 = vld [vmem:[#allocation2 + $0xa8] sm:$0xf] }
 0x208   : > { %17498 = vst [vmem:[#allocation44_spill] sm:$0xff] %v11748_v13  ;;  %v17187_v14 = vrot.slane %v11748_v13, 5  ;;  %v987_v5 = vmul.f32 %v10374_v49, %v11515_v16  ;;  %v17499_v28 = vrot.slane %v11701_v18, 6  ;;  %v3838_v41 = vmax.bf16 %v3694_v4, %v3646_v30  ;;  %v9771_v16 = vpop.f32.mrf.mxu0 }
 0x209   : > { %v11768_v9 = vpack.c.bf16 %v1002_v42, %v1002_v42  ;;  %v2427_v35 = vmax.bf16 %v2253_v55, %v11701_v18  ;;  %v9817_v50 = vadd.f32 %v9816_v43, %v9815_v36  ;;  %v3740_v38 = vld [vmem:[#allocation2 + $0x30] sm:$0xf]  ;;  %v3207_v19 = vrot.slane %v11697_v51, 6  ;;  %v11874_v51 = vld [vmem:[#allocation2 + $0x9c] sm:$0xf] }
 0x20a   : > { %v2979_v1 = vrot.slane %v17187_v14, 4  ;;  %v3206_v53 = vrot.slane %v17499_v28, 4  ;;  %v11771_v59 = vpack.c.bf16 %v987_v5, %v987_v5  ;;  %v906_v42 = vmul.f32 1.442695, %v845_v60  ;;  %v1538_v28 = vld [vmem:[#allocation2 + $0x9c] sm:$0xf] }
 0x20b   : > { %1162 = vst [vmem:[#allocation3 + $0x1a0] sm:$0xf] %v11768_v9  ;;  %v1296_v39 = vrot.slane %v11768_v9, 7  ;;  %v17500_v30 = vmax.bf16 %v11622_v48, %v11624_v52  ;;  %v17501_v36 = vmax.bf16 %v11626_v23, %v11632_v12  ;;  %v10376_v5 = vpop.eup %10375  ;;  %v9772_v48 = vadd.f32 %v9771_v16, %v9770_v10  ;;  %v11791_v52 = vld [vmem:[#allocation2 + $0x88] sm:$0xf]  ;;  %17513 = vst [vmem:[#allocation53_spill] sm:$0xff] %v11874_v51 }
 0x20c   : > { %v2981_v49 = vsel %vm11463_vm10, %v2979_v1, %v2980_v34  ;;  %1147 = vst [vmem:[#allocation3 + $0xb0] sm:$0xf] %v11771_v59  ;;  %v876_v34 = vmul.f32 1.442695, %v830_v2  ;;  %v1732_v1 = vmax.bf16 %v1587_v62, %v1538_v28  ;;  %v3208_v60 = vsel %vm11478_vm11, %v3206_v53, %v3207_v19  ;;  %v11793_v23 = vld [vmem:[#allocation2 + $0x8c] sm:$0x3] }
 0x20d   : > { %v3884_v4 = vmax.bf16 %v3836_v46, %v17500_v30  ;;  %v3885_v43 = vmax.bf16 %v3837_v3, %v17501_v36  ;;  %v3070_v55 = vmax.bf16 %v2981_v49, %v2427_v35  ;;  %v3741_v14 = vld [vmem:[#allocation2 + $0x34] sm:$0xf]  ;;  %1399 = vst [vmem:[#allocation2 + $0xb4] sm:$0xe] %v1296_v39  ;;  %v11795_v12 = vld [vmem:[#allocation2 + $0x9c] sm:$0xf]  ;;  %v17502_v35 = vmax.bf16 %v11712_v58, %v11714_v57 }
 0x20e   : > { %v11802_v49 = vld [vmem:[#allocation2 + $0x18] sm:$0xf]  ;;  %v11804_v53 = vld [vmem:[#allocation2 + $0x20] sm:$0x3]  ;;  %v1003_v28 = vmul.f32 %v10376_v5, %v11525_v20  ;;  %10383 = vpow2.f32 %v906_v42  ;;  %v11812_v58 = vadd.f32 %v11502_v44, %v9817_v50  ;;  %v11820_v36 = vld [vmem:[#allocation2 + $0x3c] sm:$0xf] }
 0x20f   : > { %v3886_v46 = vmax.bf16 %v3838_v41, %v17502_v35  ;;  %v3932_v3 = vmax.bf16 %v3884_v4, %v3740_v38  ;;  %v3933_v2 = vmax.bf16 %v3885_v43, %v3741_v14  ;;  %v11800_v62 = vmax.bf16 %v3208_v60, %v3070_v55  ;;  %17504 = vst [vmem:[#allocation46_spill] sm:$0xff] %v11802_v49  ;;  %v11806_v19 = vld [vmem:[#allocation2 + $0x18] sm:$0xf]  ;;  %v10378_v57 = vpop.eup %10377  ;;  %v11814_v14 = vld [vmem:[#allocation2 + $0x40] sm:$0xf] }
 0x210   : > { %17505 = vst [vmem:[#allocation47_spill] sm:$0xff] %v11804_v53  ;;  %v3742_v16 = vld [vmem:[#allocation2 + $0x38] sm:$0x3]  ;;  %17506 = vst [vmem:[#allocation48_spill] sm:$0xff] %v11812_v58  ;;  %v11816_v41 = vld [vmem:[#allocation2 + $0x4c] sm:$0xf]  ;;  %10385 = vpow2.f32 %v876_v34  ;;  %v10380_v43 = vpop.eup %10379  ;;  %v17509_v55 = vmax.bf16 %v11645_v54, %v11734_v22  ;;  %v11845_v22 = vadd.f32 %v11502_v44, %v9772_v48 }
 0x211   : > { %17503 = vst [vmem:[#allocation45_spill] sm:$0xff] %v11800_v62  ;;  %v3934_v38 = vmax.bf16 %v3886_v46, %v3742_v16  ;;  %v9664_v30 = vcombine.low %v3932_v3, %v3933_v2  ;;  %3329 = vst [vmem:[#allocation3 + $0x154] sm:$0xf] %v11800_v62  ;;  %v17188_v4 = vrot.slane %v11800_v62, 7  ;;  %v11822_v20 = vld [vmem:[#allocation2 + $0x20] sm:$0x3]  ;;  %v1004_v48 = vmul.f32 %v10380_v43, %v11589_v45 }
 0x212   : > { %17507 = vst [vmem:[#allocation49_spill] sm:$0xff] %v11822_v20  ;;  %v11826_v42 = vld [vmem:[#allocation2 + $0x1c] sm:$0xf]  ;;  %v1780_v5 = vmax.bf16 %v1732_v1, %v17509_v55  ;;  %v17510_v3 = vrot.slane %v11609_v47, 7  ;;  %v1258_v54 = vrot.slane %v11771_v59, 7  ;;  %17511 = vst [vmem:[#allocation51_spill] sm:$0xff] %v11845_v22  ;;  %v10382_v1 = vpop.eup %10381  ;;  %v988_v47 = vmul.f32 %v10378_v57, %v11566_v7 }
 0x213   : > { %17508 = vst [vmem:[#allocation50_spill] sm:$0xff] %v11826_v42  ;;  %v11831_v60 = vld [vmem:[#allocation2 + $0x1c] sm:$0xf]  ;;  %3982 = vst [vmem:[#allocation2 + $0x20] sm:$0x3] %v3934_v38  ;;  %v3426_v46 = vrot.slane %v17188_v4, 4  ;;  %v1709_v38 = vmax.bf16 %v11816_v41, %v11814_v14  ;;  %v9412_v4 = vpack.c.bf16 %v1003_v28, %v1003_v28 }
 0x214   : > { %v1257_v2 = vrot.slane %v17510_v3, 4  ;;  %v11841_v16 = vld [vmem:[#allocation2 + $0x3c] sm:$0xe]  ;;  %9493 = vst [vmem:[#allocation2 + $0x18] sm:$0xff] %v9664_v30   ;;  %v11847_v55 = vld [vmem:[#allocation2 + $0x40] sm:$0xf]  ;;  %v989_v30 = vmul.f32 %v10382_v1, %v11594_v11  ;;  %v11864_v41 = vpack.c.bf16 %v988_v47, %v988_v47 }
 0x215   : > { %v2063_v34 = vshrl.u32 %v11820_v36, 16  ;;  %v11853_v3 = vld [vmem:[#allocation2 + $0x44] sm:$0x3]  ;;  %v1565_v35 = vld [vmem:[#allocation2 + $0x50] sm:$0x3]  ;;  %v2066_v59 = vshll.u32 %v11820_v36, 16 }
 0x216   : > { %3532 = vst [vmem:[#allocation2 + $0x98] sm:$0x1] %v3426_v46  ;;  %v1259_v44 = vsel %vm11308_vm2, %v1257_v2, %v1258_v54  ;;  %v11860_v50 = vld [vmem:[#allocation2 + $0xc] sm:$0xf]  ;;  %v2499_v14 = vshrl.u32 %v11841_v16, 16  ;;  %v2502_v28 = vshll.u32 %v11841_v16, 16  ;;  %v11870_v2 = vpack.c.bf16 %v1004_v48, %v1004_v48 }
 0x217   : > { %v1636_v7 = vld [vmem:[#allocation2 + $0xb4] sm:$0xf]  ;;  %v1260_v57 = vrot.slane %v1258_v54, 4  ;;  %1376 = vst [vmem:[#allocation2 + $0x58] sm:$0xf] %v1259_v44  ;;  %v1297_v45 = vrot.slane %v1296_v39, 4  ;;  %v11878_v47 = vpack.c.bf16 %v989_v30, %v989_v30  ;;  %v3791_v30 = vmax.bf16 %v11806_v19, %v11860_v50 }
 0x218   : > { %1163 = vst [vmem:[#allocation3 + $0x1b0] sm:$0xf] %v9412_v4  ;;  %v1516_v46 = vld [vmem:[#allocation2 + $0x44] sm:$0x3]  ;;  %v11866_v10 = vld [vmem:[#allocation2 + $0xa0] sm:$0xf]  ;;  %v1828_v43 = vmax.bf16 %v1780_v5, %v1636_v7 }
 0x219   : > { %v1298_v11 = vrot.slane %v9412_v4, 7  ;;  %v11872_v1 = vld [vmem:[#allocation2 + $0x9c] sm:$0xf]  ;;  %v1710_v49 = vmax.bf16 %v1565_v35, %v1516_v46  ;;  %1377 = vst [vmem:[#allocation2 + $0x5c] sm:$0x1] %v1260_v57  ;;  %v846_v44 = vsub.f32 0.0, %v11812_v58  ;;  %v17518_v58 = vmax.bf16 %v11562_v27, %v11471_v31 }
 0x21a   : > { %17512 = vst [vmem:[#allocation52_spill] sm:$0xff] %v11872_v1  ;;  %1148 = vst [vmem:[#allocation3 + $0xc0] sm:$0xf] %v11864_v41  ;;  %v1588_v39 = vld [vmem:[#allocation2 + $0xac] sm:$0xf]  ;;  %v2501_v42 = vrot.slane %v2499_v14, 4 }
 0x21b   : > { %v1589_v4 = vld [vmem:[#allocation2 + $0xb0] sm:$0x3]  ;;  %1876 = vst [vmem:[#allocation2 + $0x9c] sm:$0xf] %v1828_v43  ;;  %v1299_v5 = vsel %vm11308_vm2, %v1297_v45, %v1298_v11  ;;  %v1300_v48 = vrot.slane %v1298_v11, 4  ;;  %v2504_v62 = vrot.slane %v2502_v28, 5  ;;  %v1758_v19 = vmax.bf16 %v1710_v49, %v17518_v58 }
 0x21c   : > { %1164 = vst [vmem:[#allocation3 + $0x1c0] sm:$0xf] %v11870_v2  ;;  %v1539_v7 = vld [vmem:[#allocation2 + $0xa0] sm:$0xf]  ;;  %v1540_v57 = vld [vmem:[#allocation2 + $0xa4] sm:$0x3] }
 0x21d   : > { %v1566_v9 = vld [vmem:[#allocation2 + $0x54] sm:$0xf]  ;;  %v11891_v43 = vld [vmem:[#allocation2 + $0x18] sm:$0xf]  ;;  %1400 = vst [vmem:[#allocation2 + $0xb8] sm:$0xf] %v1299_v5  ;;  %v1733_v53 = vmax.bf16 %v1588_v39, %v1539_v7  ;;  %v2505_v61 = vor.u32 %v2504_v62, %v2501_v42 }
 0x21e   : > { %v17515_v45 = vrot.slane %v11864_v41, 7  ;;  %1149 = vst [vmem:[#allocation3 + $0xd0] sm:$0xf] %v11878_v47  ;;  %v11896_v11 = vld [vmem:[#allocation2 + $0x10] sm:$0xf]  ;;  %v2065_v35 = vrot.slane %v2063_v34, 4 }
 0x21f   : > { %v2068_v13 = vrot.slane %v2066_v59, 5  ;;  %v11900_v18 = vld [vmem:[#allocation2 + $0x1c] sm:$0xf]  ;;  %1401 = vst [vmem:[#allocation2 + $0xbc] sm:$0x1] %v1300_v48  ;;  %v17516_v14 = vrot.slane %v11870_v2, 7  ;;  %v10384_v59 = vpop.eup %10383 }
 0x220   : > { %1378 = vst [vmem:[#allocation2 + $0x60] sm:$0xe] %v17515_v45  ;;  %v831_v28 = vsub.f32 0.0, %v11845_v22  ;;  %v1517_v5 = vld [vmem:[#allocation2 + $0x48] sm:$0xf]  ;;  %v17517_v45 = vmax.bf16 %v11572_v29, %v11450_v25  ;;  %v4125_v50 = vshrl.u32 %v11891_v43, 16  ;;  %v10386_v1 = vpop.eup %10385 }
 0x221   : > { %1402 = vst [vmem:[#allocation2 + $0xc0] sm:$0xe] %v17516_v14  ;;  %v3695_v54 = vld [vmem:[#allocation2 + $0x30] sm:$0xf]  ;;  %v4128_v34 = vshll.u32 %v11891_v43, 16  ;;  %v1734_v14 = vmax.bf16 %v1589_v4, %v1540_v57  ;;  %v1711_v22 = vmax.bf16 %v1566_v9, %v1517_v5  ;;  %v4134_v31 = vshll.u32 %v11900_v18, 16 }
 0x222   : > { %v1757_v51 = vmax.bf16 %v1709_v38, %v17517_v45  ;;  %v3647_v48 = vld [vmem:[#allocation2 + $0x24] sm:$0xf]  ;;  %v11913_v20 = vld [vmem:[#allocation2 + $0x3c] sm:$0xc]  ;;  %v908_v24 = vmul.f32 1.442695, %v846_v44  ;;  %v2069_v58 = vor.u32 %v2068_v13, %v2065_v35  ;;  %v17520_v13 = vmax.bf16 %v11653_v33, %v11791_v52 }
 0x223   : > { %v1613_v25 = vld [vmem:[#allocation2 + $0x58] sm:$0xf]  ;;  %v4127_v29 = vrot.slane %v4125_v50, 4  ;;  %v4130_v38 = vrot.slane %v4128_v34, 5  ;;  %v3839_v27 = vmax.bf16 %v3695_v54, %v3647_v48  ;;  %v878_v45 = vmul.f32 1.442695, %v831_v28 }
 0x224   : > { %v1805_v49 = vmax.bf16 %v1757_v51, %v1613_v25  ;;  %v11916_v46 = vld [vmem:[#allocation2 + $0x40] sm:$0xf]  ;;  %v4138_v9 = vshrl.u32 %v11900_v18, 16  ;;  %v941_v44 = vadd.f32 1.0, %v10384_v59  ;;  %v11924_v7 = vld [vmem:[#allocation2 + $0x18] sm:$0xe]  ;;  %v11929_v51 = vmax.bf16 %v1733_v53, %v17520_v13 }
 0x225   : > { %17519 = vst [vmem:[#allocation54_spill] sm:$0xff] %v11916_v46  ;;  %v4131_v4 = vor.u32 %v4130_v38, %v4127_v29  ;;  %v11922_v42 = vld [vmem:[#allocation2 + $0x20] sm:$0x1]  ;;  %v17521_v54 = vmax.bf16 %v11637_v21, %v11793_v23  ;;  %v926_v57 = vadd.f32 1.0, %v10386_v1  ;;  %v11936_v28 = vrot.slane %v2505_v61, 4 }
 0x226   : > { %1853 = vst [vmem:[#allocation2 + $0x40] sm:$0xf] %v1805_v49  ;;  %v11938_v5 = vld [vmem:[#allocation2 + $0x9c] sm:$0xf]  ;;  %v11940_v34 = vrot.slane %v4134_v31, 5  ;;  %v17522_v59 = vmax.bf16 %v11740_v8, %v11558_v6  ;;  %10387 = vpow2.f32 %v908_v24  ;;  %v11947_v33 = vmax.bf16 %v3839_v27, %v3791_v30 }
 0x227   : > { %v11934_v35 = vmax.bf16 %v1734_v14, %v17521_v54  ;;  %v1614_v50 = vld [vmem:[#allocation2 + $0x5c] sm:$0x3]  ;;  %v11951_v21 = vrot.slane %v2069_v58, 4  ;;  %v11953_v23 = vld [vmem:[#allocation2 + $0x20] sm:$0x3]  ;;  %v4132_v61 = vrot.slane %v4131_v4, 4  ;;  %10389 = vpow2.f32 %v878_v45 }
 0x228   : > { %v11945_v48 = vmax.bf16 %v1711_v22, %v17522_v59  ;;  %v11949_v52 = vld [vmem:[#allocation2 + $0x9c] sm:$0xe]  ;;  %v1806_v53 = vmax.bf16 %v1758_v19, %v1614_v50  ;;  %v4140_v1 = vrot.slane %v4138_v9, 4  ;;  %v4144_v14 = vshll.u32 %v11922_v42, 16  ;;  %v11956_v25 = vld [vmem:[#allocation2 + $0x44] sm:$0x3] }
 0x229   : > { %10391 = vrcp.f32 %v941_v44  ;;  %17523 = vst [vmem:[#allocation55_spill] sm:$0xff] %v11956_v25  ;;  %v4573_v24 = vshrl.u32 %v11924_v7, 16  ;;  %v4576_v8 = vshll.u32 %v11924_v7, 16  ;;  %v2659_v22 = vshrl.u32 %v11949_v52, 16  ;;  %v4108_v30 = vld [vmem:[#allocation2 + $0x18] sm:$0xc] }
 0x22a   : > { %10393 = vrcp.f32 %v926_v57  ;;  %1854 = vst [vmem:[#allocation2 + $0x44] sm:$0x3] %v1806_v53  ;;  %v4141_v29 = vor.u32 %v4140_v1, %v11940_v34  ;;  %v4583_v19 = vshll.u32 %v11953_v23, 16  ;;  %v4587_v38 = vshrl.u32 %v11953_v23, 16 }
 0x22b   : > { %v2662_v31 = vshll.u32 %v11949_v52, 16  ;;  %v4137_v27 = vsel %vm11433_vm9, %v4132_v61, %v11940_v34  ;;  %v4575_v49 = vrot.slane %v4573_v24, 4  ;;  %v4578_v58 = vrot.slane %v4576_v8, 5 }
 0x22c   : > { %v4142_v4 = vrot.slane %v4141_v29, 4  ;;  %v4146_v9 = vrot.slane %v4144_v14, 5  ;;  %v4585_v44 = vrot.slane %v4583_v19, 5  ;;  %v4589_v13 = vrot.slane %v4587_v38, 4 }
 0x22d   : > { %v11969_v45 = vld [vmem:[#allocation2 + $0x40] sm:$0xf]  ;;  %v4579_v50 = vor.u32 %v4578_v58, %v4575_v49  ;;  %v9202_v59 = vrot.slane %v4108_v30, 10  ;;  %v5262_v24 = vrot.slane %v11900_v18, 6  ;;  %v11978_v29 = vrot.slane %v2659_v22, 4 }
 0x22e   : > { %v2072_v54 = vshll.u32 %v11969_v45, 16  ;;  %v2076_v57 = vshrl.u32 %v11969_v45, 16  ;;  %v17197_v53 = vrot.slane %v11969_v45, 6  ;;  %v4586_v1 = vsel %vm11433_vm9, %v4142_v4, %v4585_v44 }
 0x22f   : > { %v4590_v61 = vor.u32 %v4589_v13, %v4585_v44  ;;  %v11980_v38 = vrot.slane %v2662_v31, 5  ;;  %v4147_v49 = vsel %vm11433_vm9, %v4142_v4, %v4146_v9  ;;  %v4540_v30 = vmax.bf16 %v4137_v27, %v11891_v43 }
 0x230   : > { %v2074_v14 = vrot.slane %v2072_v54, 5  ;;  %v2078_v19 = vrot.slane %v2076_v57, 4  ;;  %v4580_v58 = vrot.slane %v4579_v50, 4  ;;  %v4941_v54 = vmax.bf16 %v4586_v1, %v11900_v18 }
 0x231   : > { %v1926_v39 = vld [vmem:[#allocation2 + $0x44] sm:$0x1]  ;;  %v4591_v22 = vrot.slane %v4590_v61, 4  ;;  %v11995_v4 = vrot.slane %v17197_v53, 4  ;;  %v5263_v43 = vsel %vm11478_vm11, %v9202_v59, %v5262_v24  ;;  %v4541_v46 = vmax.bf16 %v4147_v49, %v11900_v18 }
 0x232   : > { %v11985_v6 = vld [vmem:[#allocation2 + $0x44] sm:$0x3]  ;;  %v2079_v44 = vor.u32 %v2078_v19, %v2074_v14  ;;  %v2507_v13 = vsel %vm11433_vm9, %v11936_v28, %v2074_v14  ;;  %v2075_v28 = vsel %vm11433_vm9, %v11951_v21, %v2074_v14  ;;  %v2082_v50 = vshll.u32 %v1926_v39, 16 }
 0x233   : > { %v2509_v31 = vshll.u32 %v11985_v6, 16  ;;  %v2513_v57 = vshrl.u32 %v11985_v6, 16  ;;  %v11999_v27 = vpop.eup %10387  ;;  %v4581_v1 = vsel %vm11433_vm9, %v4580_v58, %v11940_v34  ;;  %v2815_v62 = vmax.bf16 %v2507_v13, %v11841_v16 }
 0x234   : > { %v2080_v9 = vrot.slane %v2079_v44, 4  ;;  %v12007_v61 = vpop.eup %10389  ;;  %v4940_v59 = vmax.bf16 %v4581_v1, %v11924_v7  ;;  %v4942_v21 = vmax.bf16 %v4591_v22, %v11922_v42  ;;  %v5038_v14 = vrot.slane %v4941_v54, 5  ;;  %v1638_v22 = vld [vmem:[#allocation2 + $0xbc] sm:$0x3] }
 0x235   : > { %17524 = vst [vmem:[#allocation56_spill] sm:$0xff] %v12007_v61  ;;  %v2511_v19 = vrot.slane %v2509_v31, 5  ;;  %v2515_v8 = vrot.slane %v2513_v57, 4  ;;  %v5264_v44 = vrot.slane %v5262_v24, 4  ;;  %v2412_v34 = vmax.bf16 %v2075_v28, %v11820_v36  ;;  %v1637_v61 = vld [vmem:[#allocation2 + $0xb8] sm:$0xf] }
 0x236   : > { %v12011_v53 = vpop.eup %10391  ;;  %v9186_v57 = vrot.slane %v4940_v59, 9  ;;  %v2084_v16 = vrot.slane %v2082_v50, 5  ;;  %v5040_v13 = vrot.slane %v5038_v14, 4  ;;  %v5041_v1 = vrot.slane %v4942_v21, 5  ;;  %v12024_v36 = vld [vmem:[#allocation2 + $0xa0] sm:$0xf] }
 0x237   : > { %v12015_v25 = vpop.eup %10393  ;;  %v2512_v58 = vsel %vm11433_vm9, %v2080_v9, %v2511_v19  ;;  %v2516_v31 = vor.u32 %v2515_v8, %v2511_v19  ;;  %v9157_v49 = vrot.slane %v2815_v62, 9  ;;  %v5265_v24 = vrot.slane %v11953_v23, 6  ;;  %17525 = vst [vmem:[#allocation57_spill] sm:$0xff] %v12024_v36  ;;  %v12030_v19 = vld [vmem:[#allocation2 + $0xa4] sm:$0x3] }
 0x238   : > { %v2816_v7 = vmax.bf16 %v2512_v58, %v11969_v45  ;;  %v5039_v42 = vsel %vm11463_vm10, %v9186_v57, %v5038_v14  ;;  %v2085_v8 = vsel %vm11433_vm9, %v2080_v9, %v2084_v16  ;;  %v5042_v28 = vsel %vm11463_vm10, %v5040_v13, %v5041_v1  ;;  %17526 = vst [vmem:[#allocation58_spill] sm:$0xff] %v12030_v19  ;;  %v12032_v59 = vld [vmem:[#allocation2 + $0xa4] sm:$0x3]  ;;  %v3696_v21 = vld [vmem:[#allocation2 + $0x34] sm:$0xf] }
 0x239   : > { %v2517_v18 = vrot.slane %v2516_v31, 4  ;;  %v5180_v50 = vmax.bf16 %v5039_v42, %v4540_v30  ;;  %v5181_v14 = vmax.bf16 %v5042_v28, %v4541_v46  ;;  %v5266_v23 = vsel %vm11478_vm11, %v5264_v44, %v5265_v24  ;;  %v12037_v31 = vld [vmem:[#allocation2 + $0xa0] sm:$0xf]  ;;  %v1590_v9 = vld [vmem:[#allocation2 + $0xb4] sm:$0xf] }
 0x23a   : > { %v2928_v54 = vrot.slane %v2816_v7, 5  ;;  %v1829_v58 = vmax.bf16 %v11929_v51, %v1637_v61  ;;  %v1830_v7 = vmax.bf16 %v11934_v35, %v1638_v22  ;;  %v3648_v13 = vld [vmem:[#allocation2 + $0x28] sm:$0xf]  ;;  %v12042_v1 = vld [vmem:[#allocation2 + $0xa4] sm:$0x3]  ;;  %v2413_v61 = vmax.bf16 %v2085_v8, %v11969_v45 }
 0x23b   : > { %v2817_v62 = vmax.bf16 %v2517_v18, %v1926_v39  ;;  %v5404_v30 = vmax.bf16 %v5263_v43, %v5180_v50  ;;  %17527 = vst [vmem:[#allocation59_spill] sm:$0xff] %v12042_v1  ;;  %v3158_v18 = vrot.slane %v11985_v6, 6  ;;  %v5405_v44 = vmax.bf16 %v5266_v23, %v5181_v14  ;;  %v1541_v51 = vld [vmem:[#allocation2 + $0xa8] sm:$0xf]  ;;  %v12064_v14 = vld [vmem:[#allocation2 + $0x58] sm:$0xf] }
 0x23c   : > { %v2929_v57 = vsel %vm11463_vm10, %v9157_v49, %v2928_v54  ;;  %v2930_v16 = vrot.slane %v2928_v54, 4  ;;  %1877 = vst [vmem:[#allocation2 + $0xa0] sm:$0xf] %v1829_v58  ;;  %v17528_v42 = vrot.slane %v11969_v45, 6  ;;  %v17529_v49 = vrot.slane %v11913_v20, 10 }
 0x23d   : > { %v2931_v39 = vrot.slane %v2817_v62, 5  ;;  %v3055_v46 = vmax.bf16 %v2929_v57, %v2412_v34  ;;  %v3840_v35 = vmax.bf16 %v3696_v21, %v3648_v13  ;;  %5436 = vst [vmem:[#allocation3 + $0x8] sm:$0xf] %v5404_v30  ;;  %v5500_v24 = vrot.slane %v5404_v30, 7  ;;  %1878 = vst [vmem:[#allocation2 + $0xa4] sm:$0x3] %v1830_v7 }
 0x23e   : > { %v3156_v43 = vsel %vm11478_vm11, %v17529_v49, %v17528_v42  ;;  %5437 = vst [vmem:[#allocation3 + $0x18] sm:$0xf] %v5405_v44  ;;  %v5502_v22 = vrot.slane %v5405_v44, 7  ;;  %v1735_v54 = vmax.bf16 %v1590_v9, %v1541_v51  ;;  %v17530_v8 = vshrl.u32 %v11938_v5, 16  ;;  %v1568_v44 = vld [vmem:[#allocation2 + $0x5c] sm:$0x3] }
 0x23f   : > { %v2932_v34 = vsel %vm11463_vm10, %v2930_v16, %v2931_v39  ;;  %v3282_v6 = vmax.bf16 %v3156_v43, %v3055_v46  ;;  %v17531_v20 = vshll.u32 %v11938_v5, 16  ;;  %v5501_v62 = vrot.slane %v5500_v24, 4  ;;  %5628 = vst [vmem:[#allocation2 + $0x18] sm:$0xe] %v5500_v24  ;;  %v12074_v39 = vld [vmem:[#allocation2 + $0x4c] sm:$0xf] }
 0x240   : > { %v12056_v28 = vrot.slane %v17530_v8, 4  ;;  %v3056_v50 = vmax.bf16 %v2932_v34, %v2413_v61  ;;  %v2665_v21 = vor.u32 %v11980_v38, %v11978_v29  ;;  %v3159_v23 = vsel %vm11478_vm11, %v11995_v4, %v3158_v18  ;;  %v12076_v29 = vld [vmem:[#allocation2 + $0x9c] sm:$0xc]  ;;  %v12102_v34 = vld [vmem:[#allocation2 + $0xb8] sm:$0xf] }
 0x241   : > { %v12060_v45 = vrot.slane %v17531_v20, 5  ;;  %3314 = vst [vmem:[#allocation3 + $0x64] sm:$0xf] %v3282_v6  ;;  %v3387_v58 = vrot.slane %v3282_v6, 7  ;;  %v5504_v9 = vrot.slane %v5502_v22, 4  ;;  %v5503_v16 = vsel %vm11308_vm2, %v5501_v62, %v5502_v22 }
 0x242   : > { %v3283_v57 = vmax.bf16 %v3159_v23, %v3056_v50  ;;  %v17532_v30 = vrot.slane %v11864_v41, 7  ;;  %v1263_v13 = vrot.slane %v11878_v47, 7  ;;  %v17533_v4 = vmax.bf16 %v11831_v60, %v11896_v11  ;;  %5629 = vst [vmem:[#allocation2 + $0x1c] sm:$0xf] %v5503_v16  ;;  %v1593_v36 = vld [vmem:[#allocation2 + $0xc0] sm:$0xf] }
 0x243   : > { %v3388_v38 = vrot.slane %v3387_v58, 4  ;;  %3509 = vst [vmem:[#allocation2 + $0x3c] sm:$0xe] %v3387_v58  ;;  %5630 = vst [vmem:[#allocation2 + $0x20] sm:$0x1] %v5504_v9  ;;  %v17534_v18 = vmax.bf16 %v11795_v12, %v11643_v40  ;;  %v1005_v47 = vmul.f32 %v12011_v53, %v11726_v56  ;;  %v1712_v51 = vmax.bf16 %v12064_v14, %v12074_v39 }
 0x244   : > { %v1262_v7 = vrot.slane %v17532_v30, 4  ;;  %v12081_v46 = vmax.bf16 %v3840_v35, %v17533_v4  ;;  %3315 = vst [vmem:[#allocation3 + $0x74] sm:$0xf] %v3283_v57  ;;  %v3389_v61 = vrot.slane %v3283_v57, 7  ;;  %v12092_v42 = vld [vmem:[#allocation2 + $0xa0] sm:$0xf]  ;;  %v2261_v6 = vor.u32 %v12060_v45, %v12056_v28 }
 0x245   : > { %v12086_v41 = vmax.bf16 %v1735_v54, %v17534_v18  ;;  %v1265_v11 = vrot.slane %v1263_v13, 4  ;;  %v2666_v49 = vrot.slane %v2665_v21, 4  ;;  %v12096_v43 = vld [vmem:[#allocation2 + $0xa4] sm:$0x3]  ;;  %v2264_v40 = vshll.u32 %v12092_v42, 16 }
 0x246   : > { %v1264_v60 = vsel %vm11308_vm2, %v1262_v7, %v1263_v13  ;;  %v2268_v12 = vshrl.u32 %v12092_v42, 16  ;;  %v9414_v56 = vpack.c.bf16 %v1005_v47, %v1005_v47  ;;  %v1519_v53 = vld [vmem:[#allocation2 + $0x50] sm:$0x3]  ;;  %v3390_v35 = vsel %vm11308_vm2, %v3388_v38, %v3389_v61  ;;  %v1934_v8 = vld [vmem:[#allocation2 + $0xa4] sm:$0x1] }
 0x247   : > { %1379 = vst [vmem:[#allocation2 + $0x64] sm:$0xf] %v1264_v60  ;;  %v3391_v24 = vrot.slane %v3389_v61, 4  ;;  %v2669_v22 = vshll.u32 %v12096_v43, 16  ;;  %1380 = vst [vmem:[#allocation2 + $0x68] sm:$0x1] %v1265_v11  ;;  %v1713_v14 = vmax.bf16 %v1568_v44, %v1519_v53  ;;  %v990_v28 = vmul.f32 %v12015_v25, %v11730_v15 }
 0x248   : > { %v9181_v54 = vrot.slane %v12076_v29, 10  ;;  %3510 = vst [vmem:[#allocation2 + $0x40] sm:$0xf] %v3390_v35  ;;  %v2266_v20 = vrot.slane %v2264_v40, 5  ;;  %v2270_v50 = vrot.slane %v2268_v12, 4  ;;  %v2673_v62 = vshrl.u32 %v12096_v43, 16 }
 0x249   : > { %1165 = vst [vmem:[#allocation3 + $0x1d0] sm:$0xf] %v9414_v56  ;;  %v1542_v21 = vld [vmem:[#allocation2 + $0xac] sm:$0xf]  ;;  %3511 = vst [vmem:[#allocation2 + $0x44] sm:$0x1] %v3391_v24  ;;  %v12130_v40 = vpack.c.bf16 %v990_v28, %v990_v28  ;;  %v17537_v35 = vmax.bf16 %v11853_v3, %v11560_v32 }
 0x24a   : > { %v2671_v23 = vrot.slane %v2669_v22, 5  ;;  %v1303_v58 = vrot.slane %v9414_v56, 7  ;;  %v12111_v45 = vld [vmem:[#allocation2 + $0xbc] sm:$0x3]  ;;  %v2271_v9 = vor.u32 %v2270_v50, %v2266_v20  ;;  %v2667_v57 = vsel %vm11433_vm9, %v2666_v49, %v2266_v20  ;;  %v12115_v30 = vld [vmem:[#allocation2 + $0x60] sm:$0xf] }
 0x24b   : > { %v2675_v16 = vrot.slane %v2673_v62, 4  ;;  %v17535_v7 = vrot.slane %v11870_v2, 7  ;;  %v1736_v39 = vmax.bf16 %v12102_v34, %v1542_v21  ;;  %v2262_v38 = vrot.slane %v2261_v6, 4  ;;  %v12121_v47 = vld [vmem:[#allocation2 + $0xb0] sm:$0x3] }
 0x24c   : > { %v2274_v4 = vshll.u32 %v1934_v8, 16  ;;  %v3211_v18 = vrot.slane %v12092_v42, 6  ;;  %v2272_v15 = vrot.slane %v2271_v9, 4  ;;  %v2839_v44 = vmax.bf16 %v2667_v57, %v11949_v52  ;;  %v3743_v60 = vld [vmem:[#allocation2 + $0x3c] sm:$0xf] }
 0x24d   : > { %v1302_v13 = vrot.slane %v17535_v7, 4  ;;  %v2676_v25 = vor.u32 %v2675_v16, %v2671_v23  ;;  %v1737_v2 = vmax.bf16 %v12111_v45, %v12121_v47  ;;  %v1807_v11 = vmax.bf16 %v11945_v48, %v12115_v30  ;;  %1150 = vst [vmem:[#allocation3 + $0xe0] sm:$0xf] %v12130_v40  ;;  %v12145_v50 = vld [vmem:[#allocation2 + $0x28] sm:$0xf]  ;;  %v17541_v16 = vld [vmem:[#allocation35_spill] sm:$0xff] }
 0x24e   : > { %v1305_v49 = vrot.slane %v1303_v58, 4  ;;  %v2672_v12 = vsel %vm11433_vm9, %v2272_v15, %v2671_v23  ;;  %v17536_v52 = vmax.bf16 %v11847_v55, %v11570_v17  ;;  %v1761_v24 = vmax.bf16 %v1713_v14, %v17537_v35  ;;  %17538 = vst [vmem:[#allocation60_spill] sm:$0xff] %v12145_v50  ;;  %v12150_v3 = vld [vmem:[#allocation2 + $0x28] sm:$0xf]  ;;  %v1639_v23 = vld [vmem:[#allocation2 + $0xc0] sm:$0xf] }
 0x24f   : > { %v1304_v61 = vsel %vm11308_vm2, %v1302_v13, %v1303_v58  ;;  %v2677_v56 = vrot.slane %v2676_v25, 4  ;;  %v2267_v34 = vsel %vm11433_vm9, %v2262_v38, %v2266_v20  ;;  %v2276_v48 = vrot.slane %v2274_v4, 5  ;;  %v3744_v62 = vld [vmem:[#allocation2 + $0x40] sm:$0xf]  ;;  %17539 = vst [vmem:[#allocation61_spill] sm:$0xff] %v12150_v3  ;;  %v17551_v45 = vld [vmem:[#allocation56_spill] sm:$0xff] }
 0x250   : > { %1403 = vst [vmem:[#allocation2 + $0xc4] sm:$0xf] %v1304_v61  ;;  %v1760_v53 = vmax.bf16 %v1712_v51, %v17536_v52  ;;  %v2840_v6 = vmax.bf16 %v2672_v12, %v12092_v42  ;;  %v3214_v22 = vrot.slane %v12096_v43, 6  ;;  %1404 = vst [vmem:[#allocation2 + $0xc8] sm:$0x1] %v1305_v49  ;;  %v3935_v17 = vmax.bf16 %v11947_v33, %v3743_v60 }
 0x251   : > { %v2841_v55 = vmax.bf16 %v2677_v56, %v1934_v8  ;;  %v9165_v51 = vrot.slane %v2839_v44, 9  ;;  %v3213_v32 = vrot.slane %v3211_v18, 4  ;;  %v3936_v20 = vmax.bf16 %v12081_v46, %v3744_v62  ;;  %v12156_v28 = vld [vmem:[#allocation2 + $0x8c] sm:$0x3]  ;;  %v1616_v9 = vld [vmem:[#allocation2 + $0x64] sm:$0xf] }
 0x252   : > { %v2277_v21 = vsel %vm11433_vm9, %v2272_v15, %v2276_v48  ;;  %v2984_v14 = vrot.slane %v2840_v6, 5  ;;  %v17200_v58 = vrot.slane %v12130_v40, 7  ;;  %17540 = vst [vmem:[#allocation62_spill] sm:$0xff] %v12156_v28  ;;  %v2428_v33 = vmax.bf16 %v2267_v34, %v11938_v5  ;;  %v1617_v57 = vld [vmem:[#allocation2 + $0x68] sm:$0x3] }
 0x253   : > { %v2987_v8 = vrot.slane %v2841_v55, 5  ;;  %v17542_v30 = vmax.bf16 %v11866_v10, %v17541_v16  ;;  %v942_v46 = vadd.f32 1.0, %v11999_v27  ;;  %3984 = vst [vmem:[#allocation2 + $0x28] sm:$0xf] %v3936_v20  ;;  %v1808_v4 = vmax.bf16 %v1760_v53, %v1616_v9  ;;  %v12167_v5 = vld [vmem:[#allocation2 + $0x24] sm:$0xf] }
 0x254   : > { %v2985_v13 = vsel %vm11463_vm10, %v9165_v51, %v2984_v14  ;;  %v2986_v38 = vrot.slane %v2984_v14, 4  ;;  %v1809_v15 = vmax.bf16 %v1761_v24, %v1617_v57  ;;  %1381 = vst [vmem:[#allocation2 + $0x6c] sm:$0xe] %v17200_v58  ;;  %17543 = vst [vmem:[#allocation35_spill] sm:$0xff] %v12167_v5  ;;  %v12169_v25 = vld [vmem:[#allocation2 + $0x24] sm:$0xf]  ;;  %v2429_v49 = vmax.bf16 %v2277_v21, %v12092_v42 }
 0x255   : > { %v1784_v7 = vmax.bf16 %v1736_v39, %v17542_v30  ;;  %17544 = vst [vmem:[#allocation63_spill] sm:$0xff] %v12169_v25  ;;  %v12171_v44 = vld [vmem:[#allocation2 + $0x80] sm:$0x3]  ;;  %v17546_v10 = vld [vmem:[#allocation31_spill] sm:$0xff]  ;;  %v12175_v27 = vld [vmem:[#allocation2 + $0x48] sm:$0xf]  ;;  %v3071_v12 = vmax.bf16 %v2985_v13, %v2428_v33  ;;  %v1831_v56 = vmax.bf16 %v12086_v41, %v1639_v23  ;;  %v3212_v24 = vsel %vm11478_vm11, %v9181_v54, %v3211_v18 }
 0x256   : > { %17545 = vst [vmem:[#allocation64_spill] sm:$0xff] %v12171_v44  ;;  %v1689_v39 = vmax.bf16 %v12032_v59, %v17546_v10  ;;  %v12177_v61 = vld [vmem:[#allocation2 + $0x50] sm:$0x3]  ;;  %3983 = vst [vmem:[#allocation2 + $0x24] sm:$0xf] %v3935_v17  ;;  %v2988_v59 = vsel %vm11463_vm10, %v2986_v38, %v2987_v8  ;;  %v9652_v34 = vcombine.low %v1807_v11, %v1808_v4  ;;  %10395 = vrcp.f32 %v942_v46  ;;  %v17552_v13 = vld [vmem:[#allocation33_spill] sm:$0xff] }
 0x257   : > { %17547 = vst [vmem:[#allocation31_spill] sm:$0xff] %v12177_v61  ;;  %v12179_v60 = vld [vmem:[#allocation2 + $0x50] sm:$0x3]  ;;  %v1640_v52 = vld [vmem:[#allocation2 + $0xc4] sm:$0xf]  ;;  %v3072_v29 = vmax.bf16 %v2988_v59, %v2429_v49  ;;  %v3298_v20 = vmax.bf16 %v3212_v24, %v3071_v12  ;;  %v3215_v23 = vsel %vm11478_vm11, %v3213_v32, %v3214_v22  ;;  %v927_v47 = vadd.f32 1.0, %v17551_v45 }
 0x258   : > { %v12183_v53 = vld [vmem:[#allocation2 + $0x88] sm:$0xf]  ;;  %1857 = vst [vmem:[#allocation2 + $0x50] sm:$0x3] %v1809_v15  ;;  %v1832_v48 = vmax.bf16 %v1784_v7, %v1640_v52  ;;  %v12197_v6 = vld [vmem:[#allocation2 + $0x90] sm:$0xf]  ;;  %v1785_v54 = vmax.bf16 %v1737_v2, %v1689_v39 }
 0x259   : > { %v12185_v35 = vld [vmem:[#allocation2 + $0x48] sm:$0xf]  ;;  %v12199_v62 = vld [vmem:[#allocation2 + $0x84] sm:$0xf]  ;;  %v12201_v17 = vld [vmem:[#allocation2 + $0x8c] sm:$0x3]  ;;  %v3299_v16 = vmax.bf16 %v3215_v23, %v3072_v29  ;;  %10397 = vrcp.f32 %v927_v47 }
 0x25a   : > { %v12195_v41 = vld [vmem:[#allocation2 + $0xa8] sm:$0xf]  ;;  %v12203_v55 = vld [vmem:[#allocation2 + $0x4c] sm:$0xf]  ;;  %v12214_v11 = vld [vmem:[#allocation2 + $0x7c] sm:$0xf]  ;;  %v9660_v8 = vcombine.low %v1831_v56, %v1832_v48 }
 0x25b   : > { %v12205_v51 = vld [vmem:[#allocation2 + $0x4c] sm:$0xf]  ;;  %v12212_v18 = vld [vmem:[#allocation2 + $0xa8] sm:$0xf]  ;;  %v3553_v9 = vld [vmem:[#allocation2 + $0x14] sm:$0x3] }
 0x25c   : > { %v12207_v42 = vld [vmem:[#allocation2 + $0xac] sm:$0xf]  ;;  %17549 = vst [vmem:[#allocation66_spill] sm:$0xff] %v12212_v18  ;;  %9653 = vst [vmem:[#allocation2 + $0x48] sm:$0xff] %v9652_v34   ;;  %v1641_v33 = vld [vmem:[#allocation2 + $0xc8] sm:$0x3] }
 0x25d   : > { %17548 = vst [vmem:[#allocation65_spill] sm:$0xff] %v12207_v42  ;;  %v12218_v14 = vld [vmem:[#allocation2 + $0xac] sm:$0xf]  ;;  %v12225_v2 = vld [vmem:[#allocation2 + $0x88] sm:$0xf]  ;;  %v3427_v30 = vrot.slane %v3298_v20, 7  ;;  %v1833_v7 = vmax.bf16 %v1785_v54, %v1641_v33 }
 0x25e   : > { %17550 = vst [vmem:[#allocation67_spill] sm:$0xff] %v12218_v14  ;;  %v3697_v57 = vld [vmem:[#allocation2 + $0x38] sm:$0x3]  ;;  %3330 = vst [vmem:[#allocation3 + $0x164] sm:$0xf] %v3298_v20  ;;  %v2231_v43 = vshrl.u32 %v12197_v6, 16 }
 0x25f   : > { %v12227_v46 = vld [vmem:[#allocation2 + $0x90] sm:$0xe]  ;;  %v17553_v32 = vld [vmem:[#allocation32_spill] sm:$0xff]  ;;  %v12234_v4 = vld [vmem:[#allocation2 + $0x2c] sm:$0x3]  ;;  %9661 = vst [vmem:[#allocation2 + $0xa8] sm:$0xff] %v9660_v8  }
 0x260   : > { %17554 = vst [vmem:[#allocation56_spill] sm:$0xff] %v12234_v4  ;;  %v17555_v15 = vld [vmem:[#allocation43_spill] sm:$0xff]  ;;  %v3649_v12 = vld [vmem:[#allocation2 + $0x2c] sm:$0x3]  ;;  %3331 = vst [vmem:[#allocation3 + $0x174] sm:$0xf] %v3299_v16 }
 0x261   : > { %v1666_v10 = vmax.bf16 %v12185_v35, %v17555_v15  ;;  %v12238_v39 = vld [vmem:[#allocation2 + $0xb0] sm:$0x3]  ;;  %v3428_v56 = vrot.slane %v3427_v30, 4  ;;  %v3429_v52 = vrot.slane %v3299_v16, 7  ;;  %3533 = vst [vmem:[#allocation2 + $0x9c] sm:$0xe] %v3427_v30  ;;  %v3841_v29 = vmax.bf16 %v3697_v57, %v3649_v12 }
 0x262   : > { %17556 = vst [vmem:[#allocation33_spill] sm:$0xff] %v12238_v39  ;;  %v12240_v49 = vld [vmem:[#allocation2 + $0xb0] sm:$0x3]  ;;  %v1569_v59 = vld [vmem:[#allocation2 + $0x60] sm:$0xf]  ;;  %v17558_v24 = vld [vmem:[#allocation52_spill] sm:$0xff] }
 0x263   : > { %17557 = vst [vmem:[#allocation32_spill] sm:$0xff] %v12240_v49  ;;  %1881 = vst [vmem:[#allocation2 + $0xb0] sm:$0x3] %v1833_v7  ;;  %v1575_v35 = vld [vmem:[#allocation2 + $0x78] sm:$0xf]  ;;  %v17559_v23 = vld [vmem:[#allocation37_spill] sm:$0xff]  ;;  %v3430_v7 = vsel %vm11308_vm2, %v3428_v56, %v3429_v52 }
 0x264   : > { %v12246_v20 = vld [vmem:[#allocation2 + $0x54] sm:$0xf]  ;;  %v12254_v30 = vld [vmem:[#allocation2 + $0x58] sm:$0xf]  ;;  %v3431_v15 = vrot.slane %v3429_v52, 4  ;;  %v12260_v12 = vrot.slane %v2231_v43, 4 }
 0x265   : > { %v1520_v54 = vld [vmem:[#allocation2 + $0x54] sm:$0xf]  ;;  %v12258_v57 = vld [vmem:[#allocation2 + $0x50] sm:$0x3]  ;;  %v17561_v21 = vld [vmem:[#allocation49_spill] sm:$0xff] }
 0x266   : > { %v17560_v47 = vld [vmem:[#allocation55_spill] sm:$0xff]  ;;  %v3793_v38 = vmax.bf16 %v17561_v21, %v3553_v9  ;;  %v12265_v45 = vld [vmem:[#allocation2 + $0x5c] sm:$0x3]  ;;  %3534 = vst [vmem:[#allocation2 + $0xa0] sm:$0xf] %v3430_v7  ;;  %v1714_v34 = vmax.bf16 %v1569_v59, %v1520_v54  ;;  %v17564_v22 = vld [vmem:[#allocation54_spill] sm:$0xff] }
 0x267   : > { %v1429_v58 = vld [vmem:[#allocation2 + $0x54] sm:$0xf]  ;;  %17563 = vst [vmem:[#allocation43_spill] sm:$0xff] %v12265_v45  ;;  %v1478_v16 = vld [vmem:[#allocation2 + $0x60] sm:$0xf]  ;;  %v2529_v21 = vshll.u32 %v12258_v57, 16 }
 0x268   : > { %v1526_v8 = vld [vmem:[#allocation2 + $0x6c] sm:$0xf]  ;;  %v1484_v52 = vld [vmem:[#allocation2 + $0x78] sm:$0xf]  ;;  %3535 = vst [vmem:[#allocation2 + $0xa4] sm:$0x1] %v3431_v15  ;;  %v12275_v7 = vmax.bf16 %v3841_v29, %v3793_v38  ;;  %v1672_v38 = vmax.bf16 %v1478_v16, %v1429_v58  ;;  %v1762_v50 = vmax.bf16 %v1714_v34, %v1666_v10  ;;  %v10396_v34 = vpop.eup %10395 }
 0x269   : > { %v12271_v39 = vld [vmem:[#allocation2 + $0x4c] sm:$0xf]  ;;  %v2533_v9 = vshrl.u32 %v12258_v57, 16  ;;  %v1720_v42 = vmax.bf16 %v1575_v35, %v1526_v8  ;;  %v12277_v59 = vld [vmem:[#allocation2 + $0xb4] sm:$0xf]  ;;  %v2531_v8 = vrot.slane %v2529_v21, 5 }
 0x26a   : > { %17565 = vst [vmem:[#allocation52_spill] sm:$0xff] %v12271_v39  ;;  %v1435_v48 = vld [vmem:[#allocation2 + $0x6c] sm:$0xf]  ;;  %17566 = vst [vmem:[#allocation37_spill] sm:$0xff] %v12275_v7  ;;  %v12279_v54 = vld [vmem:[#allocation2 + $0x5c] sm:$0x3] }
 0x26b   : > { %17567 = vst [vmem:[#allocation55_spill] sm:$0xff] %v12279_v54  ;;  %v12281_v56 = vld [vmem:[#allocation2 + $0x68] sm:$0x3]  ;;  %v2096_v49 = vshll.u32 %v12271_v39, 16  ;;  %v2100_v15 = vshrl.u32 %v12271_v39, 16  ;;  %v2535_v14 = vrot.slane %v2533_v9, 4  ;;  %v1678_v4 = vmax.bf16 %v1484_v52, %v1435_v48 }
 0x26c   : > { %17568 = vst [vmem:[#allocation49_spill] sm:$0xff] %v12281_v56  ;;  %v12285_v43 = vld [vmem:[#allocation2 + $0xc0] sm:$0xf]  ;;  %v12291_v29 = vld [vmem:[#allocation2 + $0x50] sm:$0x1]  ;;  %v1768_v21 = vmax.bf16 %v1720_v42, %v1672_v38  ;;  %v10398_v56 = vpop.eup %10397 }
 0x26d   : > { %v1544_v18 = vld [vmem:[#allocation2 + $0xb4] sm:$0xf]  ;;  %v12293_v5 = vld [vmem:[#allocation2 + $0x64] sm:$0xf]  ;;  %v1571_v25 = vld [vmem:[#allocation2 + $0x68] sm:$0x3]  ;;  %v2536_v16 = vor.u32 %v2535_v14, %v2531_v8 }
 0x26e   : > { %v12295_v3 = vrot.slane %v2096_v49, 5  ;;  %v2102_v33 = vrot.slane %v2100_v15, 4  ;;  %v12297_v7 = vld [vmem:[#allocation2 + $0x58] sm:$0xf]  ;;  %v1522_v19 = vld [vmem:[#allocation2 + $0x5c] sm:$0x3]  ;;  %v1738_v58 = vmax.bf16 %v1593_v36, %v1544_v18 }
 0x26f   : > { %v12301_v35 = vld [vmem:[#allocation2 + $0xb0] sm:$0x3]  ;;  %v2106_v49 = vshll.u32 %v12291_v29, 16  ;;  %v1618_v15 = vld [vmem:[#allocation2 + $0x6c] sm:$0xf]  ;;  %v1716_v1 = vmax.bf16 %v1571_v25, %v1522_v19  ;;  %v2537_v44 = vrot.slane %v2536_v16, 4 }
 0x270   : > { %17569 = vst [vmem:[#allocation54_spill] sm:$0xff] %v12295_v3  ;;  %17570 = vst [vmem:[#allocation68_spill] sm:$0xff] %v12301_v35  ;;  %v2103_v9 = vor.u32 %v2102_v33, %v12295_v3  ;;  %v2689_v48 = vshll.u32 %v12301_v35, 16  ;;  %v2693_v52 = vshrl.u32 %v12301_v35, 16  ;;  %v1624_v42 = vld [vmem:[#allocation2 + $0x84] sm:$0xf]  ;;  %v17572_v33 = vmax.bf16 %v17552_v13, %v12199_v62 }
 0x271   : > { %v12316_v61 = vld [vmem:[#allocation2 + $0x64] sm:$0xf]  ;;  %v1810_v45 = vmax.bf16 %v1762_v50, %v1618_v15  ;;  %v1816_v3 = vmax.bf16 %v1768_v21, %v1624_v42  ;;  %v17573_v19 = vld [vmem:[#allocation48_spill] sm:$0xff]  ;;  %v17574_v36 = vshll.u32 %v12197_v6, 16  ;;  %v2108_v16 = vrot.slane %v2106_v49, 5 }
 0x272   : > { %v2104_v38 = vrot.slane %v2103_v9, 4  ;;  %v12311_v28 = vrot.slane %v2689_v48, 5  ;;  %v2695_v10 = vrot.slane %v2693_v52, 4  ;;  %v1774_v54 = vmax.bf16 %v17572_v33, %v1678_v4  ;;  %v1481_v52 = vld [vmem:[#allocation2 + $0x6c] sm:$0xf]  ;;  %v17575_v62 = vld [vmem:[#allocation53_spill] sm:$0xff] }
 0x273   : > { %v1006_v25 = vmul.f32 %v10396_v34, %v17573_v19  ;;  %v2236_v18 = vrot.slane %v17574_v36, 5  ;;  %v1572_v14 = vld [vmem:[#allocation2 + $0x6c] sm:$0xf]  ;;  %v1521_v4 = vld [vmem:[#allocation2 + $0x58] sm:$0xf]  ;;  %v2820_v50 = vmax.bf16 %v2537_v44, %v12291_v29  ;;  %v17213_v21 = vrot.slane %v12271_v39, 6 }
 0x274   : > { %17571 = vst [vmem:[#allocation69_spill] sm:$0xff] %v12311_v28  ;;  %v2532_v9 = vsel %vm11433_vm9, %v2104_v38, %v2531_v8  ;;  %v2696_v48 = vor.u32 %v2695_v10, %v12311_v28  ;;  %v1822_v13 = vmax.bf16 %v1774_v54, %v17575_v62  ;;  %1858 = vst [vmem:[#allocation2 + $0x54] sm:$0xf] %v1810_v45  ;;  %v1523_v49 = vld [vmem:[#allocation2 + $0x60] sm:$0xf]  ;;  %v17579_v54 = vld [vmem:[#allocation51_spill] sm:$0xff] }
 0x275   : > { %v12326_v33 = vmax.bf16 %v2532_v9, %v12271_v39  ;;  %1864 = vst [vmem:[#allocation2 + $0x6c] sm:$0xf] %v1816_v3  ;;  %v12330_v34 = vpack.c.bf16 %v1006_v25, %v1006_v25  ;;  %v17578_v8 = vmax.bf16 %v12195_v41, %v17558_v24  ;;  %v991_v15 = vmul.f32 %v10398_v56, %v17579_v54  ;;  %v1432_v45 = vld [vmem:[#allocation2 + $0x60] sm:$0xf]  ;;  %v12349_v24 = vld [vmem:[#allocation2 + $0x48] sm:$0xf] }
 0x276   : > { %1870 = vst [vmem:[#allocation2 + $0x84] sm:$0xf] %v1822_v13  ;;  %v1715_v42 = vmax.bf16 %v12316_v61, %v1521_v4  ;;  %v17580_v44 = vmax.bf16 %v12179_v60, %v17560_v47  ;;  %v2109_v3 = vsel %vm11433_vm9, %v2104_v38, %v2108_v16  ;;  %v1717_v25 = vmax.bf16 %v1572_v14, %v1523_v49  ;;  %v1935_v56 = vld [vmem:[#allocation2 + $0xb0] sm:$0x1]  ;;  %v17583_v54 = vld [vmem:[#allocation42_spill] sm:$0xff] }
 0x277   : > { %17576 = vst [vmem:[#allocation48_spill] sm:$0xff] %v12326_v33  ;;  %17577 = vst [vmem:[#allocation53_spill] sm:$0xff] %v12330_v34  ;;  %v12335_v10 = vmax.bf16 %v1738_v58, %v17578_v8  ;;  %v17214_v19 = vrot.slane %v12326_v33, 5  ;;  %v17212_v41 = vrot.slane %v12330_v34, 7  ;;  %v2697_v61 = vrot.slane %v2696_v48, 4 }
 0x278   : > { %v12342_v29 = vmax.bf16 %v1716_v1, %v17580_v44  ;;  %1166 = vst [vmem:[#allocation3 + $0x1e0] sm:$0xf] %v12330_v34  ;;  %v17581_v58 = vrot.slane %v12130_v40, 7  ;;  %v1675_v1 = vmax.bf16 %v1481_v52, %v1432_v45  ;;  %v12353_v47 = vpack.c.bf16 %v991_v15, %v991_v15  ;;  %v12365_v48 = vld [vmem:[#allocation2 + $0xa8] sm:$0xf]  ;;  %v17584_v15 = vld [vmem:[#allocation41_spill] sm:$0xff] }
 0x279   : > { %v2937_v38 = vrot.slane %v17214_v19, 4  ;;  %v2938_v36 = vrot.slane %v2820_v50, 5  ;;  %v3164_v14 = vrot.slane %v17213_v21, 4  ;;  %1405 = vst [vmem:[#allocation2 + $0xcc] sm:$0xe] %v17212_v41  ;;  %v2237_v16 = vor.u32 %v2236_v18, %v12260_v12 }
 0x27a   : > { %v1267_v60 = vrot.slane %v17581_v58, 4  ;;  %v2415_v9 = vmax.bf16 %v2109_v3, %v12271_v39  ;;  %1151 = vst [vmem:[#allocation3 + $0xf0] sm:$0xf] %v12353_v47  ;;  %v1268_v40 = vrot.slane %v12353_v47, 7  ;;  %v2087_v52 = vshrl.u32 %v12349_v24, 16 }
 0x27b   : > { %v2090_v62 = vshll.u32 %v12349_v24, 16  ;;  %v2939_v13 = vsel %vm11463_vm10, %v2937_v38, %v2938_v36  ;;  %v3165_v4 = vrot.slane %v12258_v57, 6  ;;  %v2298_v50 = vshll.u32 %v1935_v56, 16  ;;  %v12384_v58 = vld [vmem:[#allocation2 + $0x90] sm:$0xc] }
 0x27c   : > { %v17582_v12 = vmax.bf16 %v12246_v20, %v12175_v27  ;;  %v3058_v49 = vmax.bf16 %v2939_v13, %v2415_v9  ;;  %v2844_v8 = vmax.bf16 %v2697_v61, %v1935_v56  ;;  %v17585_v44 = vmax.bf16 %v17583_v54, %v17584_v15  ;;  %v12386_v47 = vld [vmem:[#allocation2 + $0x78] sm:$0xf]  ;;  %v1648_v34 = vld [vmem:[#allocation2 + $0xe4] sm:$0xf]  ;;  %v12456_v26 = vld [vmem:[#allocation2 + $0x54] sm:$0xf] }
 0x27d   : > { %v1269_v3 = vsel %vm11308_vm2, %v1267_v60, %v1268_v40  ;;  %v3166_v57 = vsel %vm11478_vm11, %v3164_v14, %v3165_v4  ;;  %v2238_v27 = vrot.slane %v2237_v16, 4  ;;  %v2279_v20 = vshrl.u32 %v12365_v48, 16  ;;  %v12399_v60 = vld [vmem:[#allocation2 + $0xac] sm:$0xf]  ;;  %v1599_v4 = vld [vmem:[#allocation2 + $0xd8] sm:$0xf] }
 0x27e   : > { %v12375_v18 = vmax.bf16 %v1717_v25, %v17582_v12  ;;  %v12380_v45 = vmax.bf16 %v17585_v44, %v1675_v1  ;;  %1382 = vst [vmem:[#allocation2 + $0x70] sm:$0xf] %v1269_v3  ;;  %v17586_v25 = vshrl.u32 %v12227_v46, 16  ;;  %v12395_v61 = vmax.bf16 %v3166_v57, %v3058_v49  ;;  %v12397_v1 = vld [vmem:[#allocation2 + $0x6c] sm:$0xf]  ;;  %v17593_v12 = vld [vmem:[#allocation40_spill] sm:$0xff] }
 0x27f   : > { %v17589_v38 = vmax.bf16 %v12205_v51, %v17564_v22  ;;  %v12406_v14 = vrot.slane %v2087_v52, 4  ;;  %v12408_v16 = vrot.slane %v2090_v62, 5  ;;  %v12410_v9 = vrot.slane %v2298_v50, 5  ;;  %v12419_v22 = vld [vmem:[#allocation2 + $0x54] sm:$0xe]  ;;  %v17592_v62 = vld [vmem:[#allocation34_spill] sm:$0xff] }
 0x280   : > { %v12393_v56 = vrot.slane %v17586_v25, 4  ;;  %17588 = vst [vmem:[#allocation42_spill] sm:$0xff] %v12395_v61  ;;  %3317 = vst [vmem:[#allocation3 + $0x94] sm:$0xf] %v12395_v61  ;;  %v17215_v54 = vrot.slane %v12395_v61, 7  ;;  %v12417_v51 = vrot.slane %v2844_v8, 5 }
 0x281   : > { %v12404_v36 = vmax.bf16 %v1715_v42, %v17589_v38  ;;  %17591 = vst [vmem:[#allocation70_spill] sm:$0xff] %v12419_v22  ;;  %v12421_v42 = vld [vmem:[#allocation2 + $0x6c] sm:$0xe]  ;;  %v2159_v15 = vshrl.u32 %v12397_v1, 16  ;;  %v12428_v3 = vrot.slane %v2279_v20, 4  ;;  %v2162_v13 = vshll.u32 %v12397_v1, 16 }
 0x282   : > { %17587 = vst [vmem:[#allocation51_spill] sm:$0xff] %v12393_v56  ;;  %17590 = vst [vmem:[#allocation41_spill] sm:$0xff] %v12417_v51  ;;  %v1550_v44 = vld [vmem:[#allocation2 + $0xcc] sm:$0xf]  ;;  %v1433_v25 = vld [vmem:[#allocation2 + $0x64] sm:$0xf]  ;;  %v2093_v19 = vor.u32 %v12408_v16, %v12406_v14  ;;  %v2243_v20 = vsel %vm11433_vm9, %v2238_v27, %v17593_v12 }
 0x283   : > { %v3396_v38 = vrot.slane %v17215_v54, 4  ;;  %v12434_v41 = vld [vmem:[#allocation2 + $0x84] sm:$0xe]  ;;  %v1642_v21 = vld [vmem:[#allocation2 + $0xcc] sm:$0xf]  ;;  %v2539_v52 = vshrl.u32 %v12419_v22, 16  ;;  %v1744_v16 = vmax.bf16 %v1599_v4, %v1550_v44  ;;  %v12454_v28 = vmax.bf16 %v2243_v20, %v12197_v6 }
 0x284   : > { %v1485_v49 = vld [vmem:[#allocation2 + $0x7c] sm:$0xf]  ;;  %v12442_v57 = vld [vmem:[#allocation2 + $0xb4] sm:$0xf]  ;;  %v1524_v8 = vld [vmem:[#allocation2 + $0x64] sm:$0xf]  ;;  %v1834_v27 = vmax.bf16 %v12335_v10, %v1642_v21  ;;  %v17596_v21 = vmax.bf16 %v12285_v43, %v12277_v59  ;;  %v17597_v6 = vmax.bf16 %v12183_v53, %v12214_v11  ;;  %v17598_v43 = vmax.bf16 %v12254_v30, %v12203_v55 }
 0x285   : > { %17594 = vst [vmem:[#allocation34_spill] sm:$0xff] %v12442_v57  ;;  %v2542_v54 = vshll.u32 %v12419_v22, 16  ;;  %v2579_v50 = vshrl.u32 %v12421_v42, 16  ;;  %v1576_v61 = vld [vmem:[#allocation2 + $0x7c] sm:$0xf]  ;;  %v2582_v14 = vshll.u32 %v12421_v42, 16  ;;  %v17601_v53 = vmax.bf16 %v12293_v5, %v12297_v7 }
 0x286   : > { %3514 = vst [vmem:[#allocation2 + $0x50] sm:$0x1] %v3396_v38  ;;  %v1270_v35 = vrot.slane %v1268_v40, 4  ;;  %v1436_v39 = vld [vmem:[#allocation2 + $0x70] sm:$0xf]  ;;  %v12450_v51 = vrot.slane %v2159_v15, 4  ;;  %v1792_v10 = vmax.bf16 %v1744_v16, %v17596_v21 }
 0x287   : > { %v1482_v57 = vld [vmem:[#allocation2 + $0x70] sm:$0xf]  ;;  %v2619_v37 = vshrl.u32 %v12434_v41, 16  ;;  %17595 = vst [vmem:[#allocation71_spill] sm:$0xff] %v12454_v28  ;;  %v12458_v38 = vrot.slane %v2162_v13, 5  ;;  %v1679_v4 = vmax.bf16 %v1485_v49, %v1436_v39  ;;  %v12463_v44 = vrot.slane %v2539_v52, 4 }
 0x288   : > { %v1527_v33 = vld [vmem:[#allocation2 + $0x70] sm:$0xf]  ;;  %v1676_v22 = vmax.bf16 %v1482_v57, %v1433_v25  ;;  %1882 = vst [vmem:[#allocation2 + $0xb4] sm:$0xf] %v1834_v27  ;;  %1383 = vst [vmem:[#allocation2 + $0x74] sm:$0x1] %v1270_v35  ;;  %v1840_v28 = vmax.bf16 %v1792_v10, %v1648_v34  ;;  %v17599_v39 = vmax.bf16 %v17559_v23, %v12225_v2 }
 0x289   : > { %v1573_v12 = vld [vmem:[#allocation2 + $0x70] sm:$0xf]  ;;  %v1721_v56 = vmax.bf16 %v1576_v61, %v1527_v33  ;;  %v1622_v13 = vld [vmem:[#allocation2 + $0x7c] sm:$0xf]  ;;  %v12469_v20 = vrot.slane %v2542_v54, 5  ;;  %v17602_v61 = vld [vmem:[#allocation38_spill] sm:$0xff] }
 0x28a   : > { %v1619_v40 = vld [vmem:[#allocation2 + $0x70] sm:$0xf]  ;;  %v1718_v15 = vmax.bf16 %v1573_v12, %v1524_v8  ;;  %v1772_v57 = vmax.bf16 %v17597_v6, %v1676_v22  ;;  %v1775_v35 = vmax.bf16 %v17599_v39, %v1679_v4  ;;  %v1625_v12 = vld [vmem:[#allocation2 + $0x88] sm:$0xf]  ;;  %v12477_v33 = vld [vmem:[#allocation2 + $0xcc] sm:$0xf] }
 0x28b   : > { %v1811_v25 = vmax.bf16 %v12404_v36, %v1619_v40  ;;  %17600 = vst [vmem:[#allocation72_spill] sm:$0xff] %v12477_v33  ;;  %v1769_v11 = vmax.bf16 %v1721_v56, %v17601_v53  ;;  %v2111_v34 = vshrl.u32 %v12456_v26, 16  ;;  %v2114_v49 = vshll.u32 %v12456_v26, 16  ;;  %v12485_v55 = vld [vmem:[#allocation2 + $0x84] sm:$0xf] }
 0x28c   : > { %v1766_v59 = vmax.bf16 %v1718_v15, %v17598_v43  ;;  %v1820_v36 = vmax.bf16 %v1772_v57, %v17602_v61  ;;  %v12487_v30 = vld [vmem:[#allocation2 + $0x6c] sm:$0xc]  ;;  %v2581_v2 = vrot.slane %v2579_v50, 4  ;;  %v2584_v23 = vrot.slane %v2582_v14, 5  ;;  %1888 = vst [vmem:[#allocation2 + $0xcc] sm:$0xf] %v1840_v28 }
 0x28d   : > { %1859 = vst [vmem:[#allocation2 + $0x58] sm:$0xf] %v1811_v25  ;;  %17603 = vst [vmem:[#allocation38_spill] sm:$0xff] %v12487_v30  ;;  %v1823_v22 = vmax.bf16 %v1775_v35, %v12037_v31  ;;  %v1486_v52 = vld [vmem:[#allocation2 + $0x80] sm:$0x3]  ;;  %v2622_v5 = vshll.u32 %v12434_v41, 16  ;;  %v1817_v7 = vmax.bf16 %v1769_v11, %v1625_v12  ;;  %v17604_v56 = vmax.bf16 %v12380_v45, %v17592_v62 }
 0x28e   : > { %v1814_v54 = vmax.bf16 %v1766_v59, %v1622_v13  ;;  %v12494_v16 = vrot.slane %v2093_v19, 4  ;;  %v1577_v27 = vld [vmem:[#allocation2 + $0x80] sm:$0x3]  ;;  %v1434_v21 = vld [vmem:[#allocation2 + $0x68] sm:$0x3]  ;;  %v17605_v50 = vmax.bf16 %v12375_v18, %v12386_v47  ;;  %v2113_v14 = vrot.slane %v2111_v34, 4 }
 0x28f   : > { %v9656_v8 = vcombine.low %v17604_v56, %v1820_v36  ;;  %v1525_v10 = vld [vmem:[#allocation2 + $0x68] sm:$0x3]  ;;  %1871 = vst [vmem:[#allocation2 + $0x88] sm:$0xf] %v1823_v22  ;;  %v2116_v31 = vrot.slane %v2114_v49, 5  ;;  %v17606_v40 = vshll.u32 %v12365_v48, 16  ;;  %v2165_v18 = vor.u32 %v12458_v38, %v12450_v51 }
 0x290   : > { %v9654_v28 = vcombine.low %v17605_v50, %v1814_v54  ;;  %v12501_v15 = vrot.slane %v2619_v37, 4  ;;  %v1437_v62 = vld [vmem:[#allocation2 + $0x74] sm:$0x3]  ;;  %1865 = vst [vmem:[#allocation2 + $0x70] sm:$0xf] %v1817_v7  ;;  %v2207_v19 = vshrl.u32 %v12485_v55, 16  ;;  %v2585_v47 = vor.u32 %v2584_v23, %v2581_v2 }
 0x291   : > { %v2284_v4 = vrot.slane %v17606_v40, 5  ;;  %9657 = vst [vmem:[#allocation2 + $0x78] sm:$0xff] %v9656_v8   ;;  %v2210_v6 = vshll.u32 %v12485_v55, 16  ;;  %v1483_v57 = vld [vmem:[#allocation2 + $0x74] sm:$0x3]  ;;  %v1680_v43 = vmax.bf16 %v1486_v52, %v1437_v62  ;;  %v12509_v59 = vrot.slane %v2622_v5, 5 }
 0x292   : > { %v1528_v25 = vld [vmem:[#allocation2 + $0x74] sm:$0x3]  ;;  %9655 = vst [vmem:[#allocation2 + $0x60] sm:$0xff] %v9654_v28   ;;  %v1677_v35 = vmax.bf16 %v1483_v57, %v1434_v21  ;;  %v17607_v11 = vmax.bf16 %v17553_v32, %v12201_v17  ;;  %v17608_v36 = vld [vmem:[#allocation54_spill] sm:$0xff]  ;;  %v1623_v49 = vld [vmem:[#allocation2 + $0x80] sm:$0x3] }
 0x293   : > { %v1574_v13 = vld [vmem:[#allocation2 + $0x74] sm:$0x3]  ;;  %v2285_v37 = vor.u32 %v2284_v4, %v12428_v3  ;;  %v1722_v53 = vmax.bf16 %v1577_v27, %v1528_v25  ;;  %v2099_v34 = vsel %vm11433_vm9, %v12494_v16, %v17608_v36  ;;  %v2117_v3 = vor.u32 %v2116_v31, %v2113_v14  ;;  %v17612_v52 = vld [vmem:[#allocation49_spill] sm:$0xff]  ;;  %v17615_v32 = vld [vmem:[#allocation62_spill] sm:$0xff] }
 0x294   : > { %v1620_v39 = vld [vmem:[#allocation2 + $0x74] sm:$0x3]  ;;  %v1719_v12 = vmax.bf16 %v1574_v13, %v1525_v10  ;;  %v1776_v61 = vmax.bf16 %v17607_v11, %v1680_v43  ;;  %v12515_v38 = vld [vmem:[#allocation2 + $0x58] sm:$0xf]  ;;  %v12530_v27 = vrot.slane %v2207_v19, 4  ;;  %v12534_v28 = vrot.slane %v2210_v6, 5 }
 0x295   : > { %v1812_v51 = vmax.bf16 %v12342_v29, %v1620_v39  ;;  %v17609_v2 = vld [vmem:[#allocation43_spill] sm:$0xff]  ;;  %v17616_v56 = vld [vmem:[#allocation64_spill] sm:$0xff]  ;;  %v1626_v21 = vld [vmem:[#allocation2 + $0x8c] sm:$0x3]  ;;  %v2120_v16 = vshll.u32 %v12515_v38, 16  ;;  %v2286_v14 = vrot.slane %v2285_v37, 4 }
 0x296   : > { %v17610_v23 = vld [vmem:[#allocation31_spill] sm:$0xff]  ;;  %v17617_v29 = vmax.bf16 %v17615_v32, %v17616_v56  ;;  %v17619_v4 = vld [vmem:[#allocation36_spill] sm:$0xff]  ;;  %v2124_v57 = vshrl.u32 %v12515_v38, 16  ;;  %v3700_v25 = vld [vmem:[#allocation2 + $0x44] sm:$0x3]  ;;  %v2166_v19 = vrot.slane %v2165_v18, 4  ;;  %v2545_v18 = vor.u32 %v12469_v20, %v12463_v44 }
 0x297   : > { %v17611_v54 = vmax.bf16 %v17609_v2, %v17610_v23  ;;  %v17613_v5 = vld [vmem:[#allocation55_spill] sm:$0xff]  ;;  %1860 = vst [vmem:[#allocation2 + $0x5c] sm:$0x3] %v1812_v51  ;;  %v3745_v13 = vld [vmem:[#allocation2 + $0x44] sm:$0x3]  ;;  %v2586_v39 = vrot.slane %v2585_v47, 4  ;;  %v2213_v23 = vor.u32 %v12534_v28, %v12530_v27 }
 0x298   : > { %v17614_v7 = vmax.bf16 %v17612_v52, %v17613_v5  ;;  %v1773_v8 = vmax.bf16 %v17617_v29, %v1677_v35  ;;  %v17618_v10 = vld [vmem:[#allocation59_spill] sm:$0xff]  ;;  %v3652_v43 = vld [vmem:[#allocation2 + $0x38] sm:$0x3]  ;;  %v2118_v35 = vrot.slane %v2117_v3, 4  ;;  %v12569_v52 = vld [vmem:[#allocation2 + $0x2c] sm:$0x3] }
 0x299   : > { %v1767_v22 = vmax.bf16 %v1719_v12, %v17611_v54  ;;  %v1824_v50 = vmax.bf16 %v1776_v61, %v17618_v10  ;;  %v17620_v12 = vshll.u32 %v12399_v60, 16  ;;  %v12542_v6 = vld [vmem:[#allocation2 + $0x60] sm:$0xf]  ;;  %v12544_v37 = vld [vmem:[#allocation2 + $0x64] sm:$0xf]  ;;  %v12549_v61 = vmax.bf16 %v2099_v34, %v12349_v24  ;;  %v17621_v51 = vld [vmem:[#allocation39_spill] sm:$0xff] }
 0x29a   : > { %v1770_v17 = vmax.bf16 %v1722_v53, %v17614_v7  ;;  %v1821_v62 = vmax.bf16 %v1773_v8, %v17619_v4  ;;  %v12546_v11 = vld [vmem:[#allocation2 + $0x70] sm:$0xf]  ;;  %v17622_v3 = vrot.slane %v17621_v51, 6  ;;  %v3844_v34 = vmax.bf16 %v3700_v25, %v3652_v43  ;;  %v17625_v54 = vld [vmem:[#allocation37_spill] sm:$0xff]  ;;  %17626 = vst [vmem:[#allocation43_spill] sm:$0xff] %v12569_v52 }
 0x29b   : > { %v1815_v31 = vmax.bf16 %v1767_v22, %v1623_v49  ;;  %1872 = vst [vmem:[#allocation2 + $0x8c] sm:$0x3] %v1824_v50  ;;  %v12540_v53 = vrot.slane %v17620_v12, 5  ;;  %v17623_v49 = vrot.slane %v12384_v58, 10  ;;  %v3937_v22 = vmax.bf16 %v17625_v54, %v3745_v13  ;;  %v1907_v13 = vld [vmem:[#allocation2 + $0x78] sm:$0xf] }
 0x29c   : > { %v1818_v40 = vmax.bf16 %v1770_v17, %v1626_v21  ;;  %1869 = vst [vmem:[#allocation2 + $0x80] sm:$0x3] %v1821_v62  ;;  %v12571_v5 = vrot.slane %v2120_v16, 5  ;;  %v2126_v7 = vrot.slane %v2124_v57, 4  ;;  %v2135_v58 = vshrl.u32 %v12542_v6, 16 }
 0x29d   : > { %1863 = vst [vmem:[#allocation2 + $0x68] sm:$0x3] %v1815_v31  ;;  %v12561_v2 = vsel %vm11478_vm11, %v17623_v49, %v17622_v3  ;;  %v2291_v24 = vsel %vm11433_vm9, %v2286_v14, %v12540_v53  ;;  %v2138_v17 = vshll.u32 %v12542_v6, 16  ;;  %v2144_v32 = vshll.u32 %v12544_v37, 16  ;;  %3985 = vst [vmem:[#allocation2 + $0x2c] sm:$0x3] %v3937_v22 }
 0x29e   : > { %1866 = vst [vmem:[#allocation2 + $0x74] sm:$0x3] %v1818_v40  ;;  %17624 = vst [vmem:[#allocation54_spill] sm:$0xff] %v12561_v2  ;;  %v2148_v56 = vshrl.u32 %v12544_v37, 16  ;;  %v2168_v29 = vshll.u32 %v12546_v11, 16  ;;  %v2172_v8 = vshrl.u32 %v12546_v11, 16  ;;  %v2123_v21 = vsel %vm11433_vm9, %v2118_v35, %v12571_v5 }
 0x29f   : > { %v12579_v27 = vld [vmem:[#allocation2 + $0x5c] sm:$0x1]  ;;  %v2127_v10 = vor.u32 %v2126_v7, %v12571_v5  ;;  %v2137_v50 = vrot.slane %v2135_v58, 4  ;;  %v2140_v16 = vrot.slane %v2138_v17, 5  ;;  %v12586_v14 = vrot.slane %v2144_v32, 5  ;;  %v17629_v58 = vld [vmem:[#allocation47_spill] sm:$0xff] }
 0x2a0   : > { %v2130_v28 = vshll.u32 %v12579_v27, 16  ;;  %v2150_v31 = vrot.slane %v2148_v56, 4  ;;  %v2170_v40 = vrot.slane %v2168_v29, 5  ;;  %v2174_v57 = vrot.slane %v2172_v8, 4  ;;  %v12605_v54 = vld [vmem:[#allocation2 + $0x7c] sm:$0xf] }
 0x2a1   : > { %v12588_v4 = vrot.slane %v2127_v10, 4  ;;  %v2141_v62 = vor.u32 %v2140_v16, %v2137_v50  ;;  %v12591_v25 = vmax.bf16 %v2291_v24, %v12365_v48  ;;  %v12601_v3 = vmax.bf16 %v2123_v21, %v12456_v26  ;;  %v17628_v7 = vld [vmem:[#allocation56_spill] sm:$0xff]  ;;  %v12626_v10 = vld [vmem:[#allocation2 + $0x88] sm:$0xf] }
 0x2a2   : > { %v2151_v12 = vor.u32 %v2150_v31, %v12586_v14  ;;  %v2171_v51 = vsel %vm11433_vm9, %v2166_v19, %v2170_v40  ;;  %v2587_v49 = vsel %vm11433_vm9, %v2586_v39, %v2170_v40  ;;  %v2175_v48 = vor.u32 %v2174_v57, %v2170_v40  ;;  %v12635_v31 = vld [vmem:[#allocation2 + $0x8c] sm:$0x1]  ;;  %v12732_v52 = vld [vmem:[#allocation2 + $0x78] sm:$0xe] }
 0x2a3   : > { %17627 = vst [vmem:[#allocation31_spill] sm:$0xff] %v12591_v25  ;;  %v12608_v24 = vmax.bf16 %v2171_v51, %v12397_v1  ;;  %v12611_v22 = vmax.bf16 %v2587_v49, %v12421_v42  ;;  %v17630_v17 = vmax.bf16 %v17628_v7, %v17629_v58  ;;  %v2132_v19 = vrot.slane %v2130_v28, 5  ;;  %v12621_v29 = vld [vmem:[#allocation2 + $0x80] sm:$0x1] }
 0x2a4   : > { %v12593_v43 = vld [vmem:[#allocation2 + $0x68] sm:$0x1]  ;;  %v2142_v26 = vrot.slane %v2141_v62, 4  ;;  %v12618_v56 = vrot.slane %v2151_v12, 4  ;;  %v12623_v8 = vrot.slane %v2175_v48, 4  ;;  %v2183_v21 = vshrl.u32 %v1907_v13, 16 }
 0x2a5   : > { %v12595_v35 = vld [vmem:[#allocation2 + $0x74] sm:$0x1]  ;;  %v12616_v32 = vmax.bf16 %v3844_v34, %v17630_v17  ;;  %v2154_v39 = vshll.u32 %v12593_v43, 16  ;;  %v2186_v42 = vshll.u32 %v1907_v13, 16  ;;  %v2133_v34 = vsel %vm11433_vm9, %v12588_v4, %v2132_v19 }
 0x2a6   : > { %v2178_v1 = vshll.u32 %v12595_v35, 16  ;;  %v2147_v50 = vsel %vm11433_vm9, %v2142_v26, %v12586_v14  ;;  %v2192_v28 = vshll.u32 %v12605_v54, 16  ;;  %v2185_v62 = vrot.slane %v2183_v21, 4  ;;  %v12715_v33 = vld [vmem:[#allocation2 + $0x74] sm:$0x3] }
 0x2a7   : > { %17631 = vst [vmem:[#allocation49_spill] sm:$0xff] %v12616_v32  ;;  %v2156_v16 = vrot.slane %v2154_v39, 5  ;;  %v2188_v57 = vrot.slane %v2186_v42, 5  ;;  %v2196_v12 = vshrl.u32 %v12605_v54, 16  ;;  %v2202_v48 = vshll.u32 %v12621_v29, 16  ;;  %17637 = vst [vmem:[#allocation36_spill] sm:$0xff] %v12715_v33 }
 0x2a8   : > { %v2180_v40 = vrot.slane %v2178_v1, 5  ;;  %v12641_v49 = vrot.slane %v2192_v28, 5  ;;  %v2214_v7 = vrot.slane %v2213_v23, 4  ;;  %v2216_v26 = vshll.u32 %v12626_v10, 16 }
 0x2a9   : > { %v2157_v51 = vsel %vm11433_vm9, %v12618_v56, %v2156_v16  ;;  %v2189_v17 = vor.u32 %v2188_v57, %v2185_v62  ;;  %v2198_v19 = vrot.slane %v2196_v12, 4  ;;  %v2204_v39 = vrot.slane %v2202_v48, 5 }
 0x2aa   : > { %v2181_v58 = vsel %vm11433_vm9, %v12623_v8, %v2180_v40  ;;  %v2220_v1 = vshrl.u32 %v12626_v10, 16  ;;  %v2226_v21 = vshll.u32 %v12635_v31, 16  ;;  %v17632_v42 = vshrl.u32 %v12399_v60, 16  ;;  %v12658_v40 = vld [vmem:[#allocation2 + $0x48] sm:$0xe] }
 0x2ab   : > { %v2190_v28 = vrot.slane %v2189_v17, 4  ;;  %v2199_v45 = vor.u32 %v2198_v19, %v12641_v49  ;;  %v12653_v23 = vrot.slane %v2216_v26, 5  ;;  %v12656_v47 = vmax.bf16 %v2133_v34, %v12515_v38  ;;  %v12675_v26 = vld [vmem:[#allocation2 + $0x5c] sm:$0x3] }
 0x2ac   : > { %v2294_v16 = vrot.slane %v17632_v42, 4  ;;  %v2222_v62 = vrot.slane %v2220_v1, 4  ;;  %v2228_v57 = vrot.slane %v2226_v21, 5  ;;  %v12662_v48 = vmax.bf16 %v2147_v50, %v12542_v6  ;;  %17633 = vst [vmem:[#allocation55_spill] sm:$0xff] %v12675_v26 }
 0x2ad   : > { %v2195_v17 = vsel %vm11433_vm9, %v2190_v28, %v12641_v49  ;;  %v12667_v42 = vrot.slane %v2199_v45, 4  ;;  %v2219_v34 = vsel %vm11433_vm9, %v2214_v7, %v12653_v23  ;;  %v12673_v19 = vmax.bf16 %v2157_v51, %v12544_v37  ;;  %v12685_v45 = vld [vmem:[#allocation2 + $0x60] sm:$0xe] }
 0x2ae   : > { %v2295_v12 = vor.u32 %v2294_v16, %v12540_v53  ;;  %v2223_v1 = vor.u32 %v2222_v62, %v12653_v23  ;;  %v12681_v6 = vmax.bf16 %v2181_v58, %v12546_v11  ;;  %v12683_v50 = vmax.bf16 %v2195_v17, %v1907_v13 }
 0x2af   : > { %v2205_v7 = vsel %vm11433_vm9, %v12667_v42, %v2204_v39  ;;  %v12691_v51 = vmax.bf16 %v2219_v34, %v12485_v55  ;;  %v2519_v16 = vshrl.u32 %v12658_v40, 16  ;;  %v2522_v28 = vshll.u32 %v12658_v40, 16  ;;  %v12709_v55 = vld [vmem:[#allocation2 + $0x68] sm:$0x3] }
 0x2b0   : > { %v12678_v21 = vrot.slane %v2295_v12, 4  ;;  %v12695_v62 = vrot.slane %v2223_v1, 4  ;;  %v12702_v58 = vmax.bf16 %v2205_v7, %v12605_v54  ;;  %v12707_v39 = vrot.slane %v2545_v18, 4  ;;  %17635 = vst [vmem:[#allocation64_spill] sm:$0xff] %v12709_v55 }
 0x2b1   : > { %17634 = vst [vmem:[#allocation62_spill] sm:$0xff] %v12691_v51  ;;  %v2521_v17 = vrot.slane %v2519_v16, 4  ;;  %v2524_v34 = vrot.slane %v2522_v28, 5  ;;  %v2549_v1 = vshll.u32 %v12675_v26, 16  ;;  %v2553_v20 = vshrl.u32 %v12675_v26, 16 }
 0x2b2   : > { %v2301_v13 = vsel %vm11433_vm9, %v12678_v21, %v12410_v9  ;;  %v2229_v9 = vsel %vm11433_vm9, %v12695_v62, %v2228_v57  ;;  %v2559_v18 = vshrl.u32 %v12685_v45, 16  ;;  %v2569_v2 = vshll.u32 %v12709_v55, 16 }
 0x2b3   : > { %v12712_v12 = vmax.bf16 %v2301_v13, %v12399_v60  ;;  %v12727_v7 = vmax.bf16 %v2229_v9, %v12626_v10  ;;  %v2525_v16 = vor.u32 %v2524_v34, %v2521_v17  ;;  %v12729_v28 = vrot.slane %v2549_v1, 5 }
 0x2b4   : > { %v2562_v13 = vshll.u32 %v12685_v45, 16  ;;  %v2555_v57 = vrot.slane %v2553_v20, 4  ;;  %v2561_v32 = vrot.slane %v2559_v18, 4  ;;  %v2573_v44 = vshrl.u32 %v12709_v55, 16  ;;  %v12743_v18 = vld [vmem:[#allocation2 + $0x80] sm:$0x3] }
 0x2b5   : > { %17636 = vst [vmem:[#allocation59_spill] sm:$0xff] %v12712_v12  ;;  %17638 = vst [vmem:[#allocation39_spill] sm:$0xff] %v12727_v7  ;;  %v2526_v30 = vrot.slane %v2525_v16, 4  ;;  %v2552_v9 = vsel %vm11433_vm9, %v12588_v4, %v12729_v28  ;;  %v2589_v17 = vshll.u32 %v12715_v33, 16  ;;  %v2571_v1 = vrot.slane %v2569_v2, 5 }
 0x2b6   : > { %v2564_v0 = vrot.slane %v2562_v13, 5  ;;  %v2556_v34 = vor.u32 %v2555_v57, %v12729_v28  ;;  %v2575_v26 = vrot.slane %v2573_v44, 4  ;;  %v2593_v20 = vshrl.u32 %v12715_v33, 16  ;;  %17639 = vst [vmem:[#allocation37_spill] sm:$0xff] %v12743_v18  ;;  %v12749_v4 = vld [vmem:[#allocation2 + $0x8c] sm:$0x3] }
 0x2b7   : > { %v2527_v16 = vsel %vm11433_vm9, %v2526_v30, %v17608_v36  ;;  %v2591_v12 = vrot.slane %v2589_v17, 5  ;;  %v2599_v25 = vshrl.u32 %v12732_v52, 16  ;;  %17640 = vst [vmem:[#allocation56_spill] sm:$0xff] %v12749_v4  ;;  %v2572_v2 = vsel %vm11433_vm9, %v12618_v56, %v2571_v1  ;;  %v1951_v7 = vld [vmem:[#allocation2 + $0xa8] sm:$0xe] }
 0x2b8   : > { %v2565_v55 = vor.u32 %v2564_v0, %v2561_v32  ;;  %v12751_v13 = vrot.slane %v2556_v34, 4  ;;  %v2576_v44 = vor.u32 %v2575_v26, %v2571_v1  ;;  %v2595_v28 = vrot.slane %v2593_v20, 4 }
 0x2b9   : > { %v2592_v33 = vsel %vm11433_vm9, %v12623_v8, %v2591_v12  ;;  %v2601_v30 = vrot.slane %v2599_v25, 4  ;;  %v2602_v0 = vshll.u32 %v12732_v52, 16  ;;  %v2609_v17 = vshll.u32 %v12743_v18, 16 }
 0x2ba   : > { %v2566_v57 = vrot.slane %v2565_v55, 4  ;;  %v12760_v36 = vrot.slane %v2576_v44, 4  ;;  %v2596_v32 = vor.u32 %v2595_v28, %v2591_v12  ;;  %v2613_v34 = vshrl.u32 %v12743_v18, 16 }
 0x2bb   : > { %v2604_v26 = vrot.slane %v2602_v0, 5  ;;  %v17641_v55 = vor.u32 %v12509_v59, %v12501_v15  ;;  %v2629_v25 = vshll.u32 %v12749_v4, 16  ;;  %v2611_v20 = vrot.slane %v2609_v17, 5 }
 0x2bc   : > { %v2567_v56 = vsel %vm11433_vm9, %v2566_v57, %v12586_v14  ;;  %v2597_v1 = vrot.slane %v2596_v32, 4  ;;  %v2615_v44 = vrot.slane %v2613_v34, 4  ;;  %v2633_v12 = vshrl.u32 %v12749_v4, 16  ;;  %v17643_v34 = vld [vmem:[#allocation51_spill] sm:$0xff]  ;;  %v17644_v4 = vld [vmem:[#allocation69_spill] sm:$0xff] }
 0x2bd   : > { %v2626_v8 = vrot.slane %v17641_v55, 4  ;;  %v2605_v28 = vor.u32 %v2604_v26, %v2601_v30  ;;  %v2631_v51 = vrot.slane %v2629_v25, 5  ;;  %v17642_v14 = vshll.u32 %v12227_v46, 16 }
 0x2be   : > { %v2612_v15 = vsel %vm11433_vm9, %v12667_v42, %v2611_v20  ;;  %v2616_v59 = vor.u32 %v2615_v44, %v2611_v20  ;;  %v2635_v0 = vrot.slane %v2633_v12, 4  ;;  %v2679_v32 = vshrl.u32 %v1951_v7, 16 }
 0x2bf   : > { %v2627_v18 = vsel %vm11433_vm9, %v2626_v8, %v12653_v23  ;;  %v2644_v57 = vrot.slane %v17642_v14, 5  ;;  %v2606_v17 = vrot.slane %v2605_v28, 4  ;;  %v2632_v30 = vsel %vm11433_vm9, %v12695_v62, %v2631_v51  ;;  %v17645_v28 = vld [vmem:[#allocation70_spill] sm:$0xff] }
 0x2c0   : > { %v2682_v55 = vshll.u32 %v1951_v7, 16  ;;  %v2617_v23 = vrot.slane %v2616_v59, 4  ;;  %v2636_v8 = vor.u32 %v2635_v0, %v2631_v51  ;;  %v2681_v25 = vrot.slane %v2679_v32, 4 }
 0x2c1   : > { %v2645_v26 = vor.u32 %v2644_v57, %v17643_v34  ;;  %v2692_v14 = vsel %vm11433_vm9, %v12678_v21, %v17644_v4  ;;  %v2607_v42 = vsel %vm11433_vm9, %v2606_v17, %v12641_v49  ;;  %v2818_v12 = vmax.bf16 %v2527_v16, %v12658_v40  ;;  %v17647_v4 = vld [vmem:[#allocation40_spill] sm:$0xff] }
 0x2c2   : > { %v2684_v44 = vrot.slane %v2682_v55, 5  ;;  %v2637_v62 = vrot.slane %v2636_v8, 4  ;;  %v17646_v51 = vsel %vm11433_vm9, %v12707_v39, %v12571_v5  ;;  %v2822_v59 = vmax.bf16 %v2552_v9, %v12515_v38 }
 0x2c3   : > { %v2646_v20 = vrot.slane %v2645_v26, 4  ;;  %v2821_v57 = vmax.bf16 %v17646_v51, %v17645_v28  ;;  %v2823_v21 = vmax.bf16 %v12751_v13, %v12579_v27  ;;  %v2824_v40 = vmax.bf16 %v2567_v56, %v12685_v45 }
 0x2c4   : > { %v2685_v0 = vor.u32 %v2684_v44, %v2681_v25  ;;  %v2825_v16 = vmax.bf16 %v2572_v2, %v12544_v37  ;;  %v2826_v32 = vmax.bf16 %v12760_v36, %v12593_v43  ;;  %v2828_v5 = vmax.bf16 %v2592_v33, %v12546_v11 }
 0x2c5   : > { %v2647_v49 = vsel %vm11433_vm9, %v2646_v20, %v17647_v4  ;;  %v2829_v39 = vmax.bf16 %v2597_v1, %v12595_v35  ;;  %v2830_v9 = vmax.bf16 %v2607_v42, %v12732_v52  ;;  %v2831_v27 = vmax.bf16 %v2612_v15, %v12605_v54 }
 0x2c6   : > { %v2686_v17 = vrot.slane %v2685_v0, 4  ;;  %v2832_v13 = vmax.bf16 %v2617_v23, %v12621_v29  ;;  %v2833_v34 = vmax.bf16 %v2627_v18, %v12434_v41  ;;  %v2834_v45 = vmax.bf16 %v2632_v30, %v12626_v10  ;;  %v17648_v41 = vld [vmem:[#allocation48_spill] sm:$0xff] }
 0x2c7   : > { %v2835_v2 = vmax.bf16 %v2637_v62, %v12635_v31  ;;  %v2836_v56 = vmax.bf16 %v2647_v49, %v12227_v46  ;;  %v2843_v43 = vmax.bf16 %v2692_v14, %v12399_v60  ;;  %v9158_v52 = vrot.slane %v2818_v12, 9 }
 0x2c8   : > { %v2687_v33 = vsel %vm11433_vm9, %v2686_v17, %v12540_v53  ;;  %v9159_v35 = vrot.slane %v2821_v57, 9  ;;  %v2942_v36 = vrot.slane %v2822_v59, 5  ;;  %v2945_v15 = vrot.slane %v2823_v21, 5 }
 0x2c9   : > { %v2842_v1 = vmax.bf16 %v2687_v33, %v1951_v7  ;;  %v9160_v29 = vrot.slane %v2824_v40, 9  ;;  %v2949_v26 = vrot.slane %v2825_v16, 5  ;;  %v17649_v18 = vrot.slane %v17648_v41, 5  ;;  %v17654_v41 = vld [vmem:[#allocation62_spill] sm:$0xff] }
 0x2ca   : > { %v12829_v46 = vsel %vm11463_vm10, %v9159_v35, %v2942_v36  ;;  %v2944_v55 = vrot.slane %v2942_v36, 4  ;;  %v2952_v23 = vrot.slane %v2826_v32, 5  ;;  %v9161_v8 = vrot.slane %v12611_v22, 9  ;;  %v1976_v35 = vld [vmem:[#allocation2 + $0x54] sm:$0xc] }
 0x2cb   : > { %v12825_v31 = vsel %vm11463_vm10, %v9158_v52, %v17649_v18  ;;  %v12833_v53 = vsel %vm11463_vm10, %v9160_v29, %v2949_v26  ;;  %v2951_v7 = vrot.slane %v2949_v26, 4  ;;  %v2956_v25 = vrot.slane %v2828_v5, 5  ;;  %v1977_v36 = vld [vmem:[#allocation2 + $0x60] sm:$0xc]  ;;  %v17655_v18 = vld [vmem:[#allocation39_spill] sm:$0xff] }
 0x2cc   : > { %v2946_v14 = vsel %vm11463_vm10, %v2944_v55, %v2945_v15  ;;  %v2959_v42 = vrot.slane %v2829_v39, 5  ;;  %v9162_v20 = vrot.slane %v2830_v9, 9  ;;  %v2963_v44 = vrot.slane %v2831_v27, 5  ;;  %v17651_v9 = vld [vmem:[#allocation44_spill] sm:$0xff]  ;;  %v17653_v15 = vld [vmem:[#allocation41_spill] sm:$0xff]  ;;  %v17657_v55 = vld [vmem:[#allocation31_spill] sm:$0xff] }
 0x2cd   : > { %v2953_v12 = vsel %vm11463_vm10, %v2951_v7, %v2952_v23  ;;  %v12842_v62 = vsel %vm11463_vm10, %v9161_v8, %v2956_v25  ;;  %v2958_v28 = vrot.slane %v2956_v25, 4  ;;  %v2966_v51 = vrot.slane %v2832_v13, 5  ;;  %v17658_v23 = vld [vmem:[#allocation59_spill] sm:$0xff] }
 0x2ce   : > { %v12846_v57 = vsel %vm11463_vm10, %v9162_v20, %v2963_v44  ;;  %v2965_v22 = vrot.slane %v2963_v44, 4  ;;  %v9163_v59 = vrot.slane %v2833_v34, 9  ;;  %v2970_v21 = vrot.slane %v2834_v45, 5  ;;  %v17659_v25 = vld [vmem:[#allocation55_spill] sm:$0xff]  ;;  %v17660_v20 = vld [vmem:[#allocation52_spill] sm:$0xff] }
 0x2cf   : > { %v2960_v4 = vsel %vm11463_vm10, %v2958_v28, %v2959_v42  ;;  %v2973_v49 = vrot.slane %v2835_v2, 5  ;;  %v9164_v0 = vrot.slane %v2836_v56, 9  ;;  %v9166_v40 = vrot.slane %v2842_v1, 9  ;;  %v1975_v2 = vld [vmem:[#allocation2 + $0x48] sm:$0xc] }
 0x2d0   : > { %v2967_v16 = vsel %vm11463_vm10, %v2965_v22, %v2966_v51  ;;  %v12854_v32 = vsel %vm11463_vm10, %v9163_v59, %v2970_v21  ;;  %v2972_v5 = vrot.slane %v2970_v21, 4  ;;  %v2991_v39 = vrot.slane %v2843_v43, 5  ;;  %v1980_v42 = vld [vmem:[#allocation2 + $0x84] sm:$0xc]  ;;  %v17663_v51 = vld [vmem:[#allocation64_spill] sm:$0xff] }
 0x2d1   : > { %v17652_v17 = vrot.slane %v17651_v9, 5  ;;  %v3057_v13 = vmax.bf16 %v12825_v31, %v12549_v61  ;;  %v3059_v34 = vmax.bf16 %v12829_v46, %v12601_v3  ;;  %v3060_v45 = vmax.bf16 %v2946_v14, %v12656_v47  ;;  %v17656_v46 = vld [vmem:[#allocation71_spill] sm:$0xff] }
 0x2d2   : > { %v2974_v56 = vsel %vm11463_vm10, %v2972_v5, %v2973_v49  ;;  %v12871_v43 = vsel %vm11463_vm10, %v9166_v40, %v2991_v39  ;;  %v2993_v33 = vrot.slane %v2991_v39, 4  ;;  %v3061_v52 = vmax.bf16 %v12833_v53, %v12662_v48 }
 0x2d3   : > { %v12860_v27 = vsel %vm11463_vm10, %v9164_v0, %v17652_v17  ;;  %v3062_v61 = vmax.bf16 %v2953_v12, %v12673_v19  ;;  %v3063_v3 = vmax.bf16 %v12842_v62, %v12608_v24  ;;  %v3064_v47 = vmax.bf16 %v2960_v4, %v12681_v6  ;;  %v1979_v19 = vld [vmem:[#allocation2 + $0x78] sm:$0xc]  ;;  %v1983_v0 = vld [vmem:[#allocation2 + $0xa8] sm:$0xc]  ;;  %v17667_v17 = vld [vmem:[#allocation37_spill] sm:$0xff] }
 0x2d4   : > { %v3065_v1 = vmax.bf16 %v12846_v57, %v12683_v50  ;;  %v2995_v29 = vsel %vm11463_vm10, %v2993_v33, %v17653_v15  ;;  %v3066_v26 = vmax.bf16 %v2967_v16, %v12702_v58  ;;  %v3067_v48 = vmax.bf16 %v12854_v32, %v17654_v41  ;;  %v17665_v32 = vld [vmem:[#allocation38_spill] sm:$0xff]  ;;  %v13127_v12 = vld [vmem:[#allocation2 + $0x50] sm:$0x3] }
 0x2d5   : > { %v3068_v31 = vmax.bf16 %v2974_v56, %v17655_v18  ;;  %v3069_v24 = vmax.bf16 %v12860_v27, %v17656_v46  ;;  %v3073_v6 = vmax.bf16 %v12871_v43, %v17657_v55  ;;  %v3074_v50 = vmax.bf16 %v2995_v29, %v17658_v23 }
 0x2d6   : > { %v9174_v53 = vrot.slane %v1975_v2, 10  ;;  %v9175_v7 = vrot.slane %v1976_v35, 10  ;;  %v3169_v8 = vrot.slane %v12515_v38, 6  ;;  %v3172_v58 = vrot.slane %v17659_v25, 6  ;;  %v17664_v38 = vld [vmem:[#allocation36_spill] sm:$0xff] }
 0x2d7   : > { %v9176_v14 = vrot.slane %v1977_v36, 10  ;;  %v17661_v44 = vrot.slane %v17660_v20, 6  ;;  %v3176_v28 = vrot.slane %v12544_v37, 6  ;;  %v3179_v57 = vrot.slane %v17663_v51, 6  ;;  %v17668_v35 = vld [vmem:[#allocation56_spill] sm:$0xff] }
 0x2d8   : > { %v3183_v22 = vrot.slane %v12546_v11, 6  ;;  %v3170_v59 = vsel %vm11478_vm11, %v9175_v7, %v3169_v8  ;;  %v3171_v21 = vrot.slane %v3169_v8, 4  ;;  %v3186_v4 = vrot.slane %v17664_v38, 6 }
 0x2d9   : > { %v3163_v62 = vsel %vm11478_vm11, %v9174_v53, %v17661_v44  ;;  %v9178_v49 = vrot.slane %v1979_v19, 10  ;;  %v3177_v40 = vsel %vm11478_vm11, %v9176_v14, %v3176_v28  ;;  %v3178_v16 = vrot.slane %v3176_v28, 4  ;;  %v17669_v14 = vld [vmem:[#allocation68_spill] sm:$0xff] }
 0x2da   : > { %v17666_v5 = vrot.slane %v17665_v32, 10  ;;  %v3185_v39 = vrot.slane %v3183_v22, 4  ;;  %v3173_v11 = vsel %vm11478_vm11, %v3171_v21, %v3172_v58  ;;  %v3190_v9 = vrot.slane %v12605_v54, 6 }
 0x2db   : > { %v3193_v27 = vrot.slane %v17667_v17, 6  ;;  %v9179_v2 = vrot.slane %v1980_v42, 10  ;;  %v3180_v56 = vsel %vm11478_vm11, %v3178_v16, %v3179_v57  ;;  %v3197_v33 = vrot.slane %v12626_v10, 6 }
 0x2dc   : > { %v3184_v37 = vsel %vm11478_vm11, %v17666_v5, %v3183_v22  ;;  %v3187_v43 = vsel %vm11478_vm11, %v3185_v39, %v3186_v4  ;;  %v3200_v36 = vrot.slane %v17668_v35, 6  ;;  %v3191_v15 = vsel %vm11478_vm11, %v9178_v49, %v3190_v9  ;;  %v17672_v49 = vld [vmem:[#allocation42_spill] sm:$0xff]  ;;  %v3748_v39 = vld [vmem:[#allocation2 + $0x50] sm:$0x3] }
 0x2dd   : > { %v3192_v29 = vrot.slane %v3190_v9, 4  ;;  %v9182_v41 = vrot.slane %v1983_v0, 10  ;;  %v3218_v54 = vrot.slane %v12399_v60, 6  ;;  %v3198_v18 = vsel %vm11478_vm11, %v9179_v2, %v3197_v33 }
 0x2de   : > { %v3199_v19 = vrot.slane %v3197_v33, 4  ;;  %v3284_v46 = vmax.bf16 %v3163_v62, %v3057_v13  ;;  %v3286_v55 = vmax.bf16 %v3170_v59, %v3059_v34  ;;  %v3287_v7 = vmax.bf16 %v3173_v11, %v3060_v45  ;;  %v17671_v45 = vld [vmem:[#allocation54_spill] sm:$0xff] }
 0x2df   : > { %v3194_v23 = vsel %vm11478_vm11, %v3192_v29, %v3193_v27  ;;  %v3219_v10 = vsel %vm11478_vm11, %v9182_v41, %v3218_v54  ;;  %v3220_v53 = vrot.slane %v3218_v54, 4  ;;  %v3288_v25 = vmax.bf16 %v3177_v40, %v3061_v52  ;;  %v17675_v29 = vld [vmem:[#allocation49_spill] sm:$0xff]  ;;  %v12966_v54 = vld [vmem:[#allocation2 + $0x38] sm:$0x3] }
 0x2e0   : > { %v3201_v8 = vsel %vm11478_vm11, %v3199_v19, %v3200_v36  ;;  %v3289_v58 = vmax.bf16 %v3180_v56, %v3062_v61  ;;  %v3290_v60 = vmax.bf16 %v3184_v37, %v3063_v3  ;;  %3316 = vst [vmem:[#allocation3 + $0x84] sm:$0xf] %v3284_v46  ;;  %3318 = vst [vmem:[#allocation3 + $0xa4] sm:$0xf] %v3286_v55  ;;  %v17670_v42 = vrot.slane %v17669_v14, 6 }
 0x2e1   : > { %v3291_v34 = vmax.bf16 %v3187_v43, %v3064_v47  ;;  %v3292_v20 = vmax.bf16 %v3191_v15, %v3065_v1  ;;  %v3293_v44 = vmax.bf16 %v3194_v23, %v3066_v26  ;;  %3319 = vst [vmem:[#allocation3 + $0xb4] sm:$0xf] %v3287_v7  ;;  %v3294_v62 = vmax.bf16 %v3198_v18, %v3067_v48  ;;  %v12968_v18 = vld [vmem:[#allocation2 + $0x38] sm:$0x3]  ;;  %v3698_v14 = vld [vmem:[#allocation2 + $0x3c] sm:$0xf] }
 0x2e2   : > { %v3222_v13 = vsel %vm11478_vm11, %v3220_v53, %v17670_v42  ;;  %v12936_v28 = vmax.bf16 %v3201_v8, %v3068_v31  ;;  %v12939_v51 = vmax.bf16 %v17671_v45, %v3069_v24  ;;  %v12941_v52 = vmax.bf16 %v3219_v10, %v3073_v6  ;;  %3320 = vst [vmem:[#allocation3 + $0xc4] sm:$0xf] %v3288_v25  ;;  %v17676_v10 = vld [vmem:[#allocation45_spill] sm:$0xff]  ;;  %v12988_v45 = vld [vmem:[#allocation2 + $0x3c] sm:$0xf] }
 0x2e3   : > { %3321 = vst [vmem:[#allocation3 + $0xd4] sm:$0xf] %v3289_v58  ;;  %3322 = vst [vmem:[#allocation3 + $0xe4] sm:$0xf] %v3290_v60  ;;  %v12943_v61 = vmax.bf16 %v3222_v13, %v3074_v50  ;;  %v3392_v3 = vrot.slane %v3284_v46, 7  ;;  %v3397_v47 = vrot.slane %v3286_v55, 7  ;;  %v3940_v41 = vmax.bf16 %v17675_v29, %v3748_v39 }
 0x2e4   : > { %3323 = vst [vmem:[#allocation3 + $0xf4] sm:$0xf] %v3291_v34  ;;  %3324 = vst [vmem:[#allocation3 + $0x104] sm:$0xf] %v3292_v20  ;;  %v3399_v1 = vrot.slane %v3287_v7, 7  ;;  %v3402_v26 = vrot.slane %v3288_v25, 7 }
 0x2e5   : > { %3325 = vst [vmem:[#allocation3 + $0x114] sm:$0xf] %v3293_v44  ;;  %3326 = vst [vmem:[#allocation3 + $0x124] sm:$0xf] %v3294_v62  ;;  %v3404_v48 = vrot.slane %v3289_v58, 7  ;;  %v3407_v31 = vrot.slane %v3290_v60, 7 }
 0x2e6   : > { %3327 = vst [vmem:[#allocation3 + $0x134] sm:$0xf] %v12936_v28  ;;  %3328 = vst [vmem:[#allocation3 + $0x144] sm:$0xf] %v12939_v51  ;;  %v3409_v24 = vrot.slane %v3291_v34, 7  ;;  %v3393_v6 = vrot.slane %v3392_v3, 4 }
 0x2e7   : > { %3332 = vst [vmem:[#allocation3 + $0x184] sm:$0xf] %v12941_v52  ;;  %v3398_v50 = vrot.slane %v3397_v47, 4  ;;  %v3401_v57 = vrot.slane %v3399_v1, 4  ;;  %v3412_v22 = vrot.slane %v3292_v20, 7  ;;  %v3403_v59 = vrot.slane %v3402_v26, 4 }
 0x2e8   : > { %3512 = vst [vmem:[#allocation2 + $0x48] sm:$0xe] %v3392_v3  ;;  %3515 = vst [vmem:[#allocation2 + $0x54] sm:$0xe] %v3397_v47  ;;  %v3406_v21 = vrot.slane %v3404_v48, 4  ;;  %v3408_v38 = vrot.slane %v3407_v31, 4 }
 0x2e9   : > { %3333 = vst [vmem:[#allocation3 + $0x194] sm:$0xf] %v12943_v61  ;;  %v3411_v4 = vrot.slane %v3409_v24, 4  ;;  %3518 = vst [vmem:[#allocation2 + $0x60] sm:$0xe] %v3402_v26  ;;  %v17673_v0 = vrot.slane %v17672_v49, 7  ;;  %v3400_v32 = vsel %vm11308_vm2, %v3398_v50, %v3399_v1  ;;  %v3405_v11 = vsel %vm11308_vm2, %v3403_v59, %v3404_v48 }
 0x2ea   : > { %3521 = vst [vmem:[#allocation2 + $0x6c] sm:$0xe] %v3407_v31  ;;  %v3413_v5 = vrot.slane %v3412_v22, 4  ;;  %v3414_v37 = vrot.slane %v3293_v44, 7  ;;  %3517 = vst [vmem:[#allocation2 + $0x5c] sm:$0x1] %v3401_v57  ;;  %v3410_v9 = vsel %vm11308_vm2, %v3408_v38, %v3409_v24 }
 0x2eb   : > { %v3395_v16 = vsel %vm11308_vm2, %v3393_v6, %v17673_v0  ;;  %3524 = vst [vmem:[#allocation2 + $0x78] sm:$0xe] %v3412_v22  ;;  %v3417_v17 = vrot.slane %v3294_v62, 7  ;;  %v3419_v27 = vrot.slane %v12936_v28, 7  ;;  %3516 = vst [vmem:[#allocation2 + $0x58] sm:$0xf] %v3400_v32 }
 0x2ec   : > { %3513 = vst [vmem:[#allocation2 + $0x4c] sm:$0xf] %v3395_v16  ;;  %3520 = vst [vmem:[#allocation2 + $0x68] sm:$0x1] %v3406_v21  ;;  %v3415_v2 = vsel %vm11308_vm2, %v3413_v5, %v3414_v37  ;;  %v3416_v56 = vrot.slane %v3414_v37, 4  ;;  %v3422_v43 = vrot.slane %v12939_v51, 7 }
 0x2ed   : > { %3523 = vst [vmem:[#allocation2 + $0x74] sm:$0x1] %v3411_v4  ;;  %v3432_v33 = vrot.slane %v12941_v52, 7  ;;  %3519 = vst [vmem:[#allocation2 + $0x64] sm:$0xf] %v3405_v11  ;;  %v3418_v35 = vrot.slane %v3417_v17, 4 }
 0x2ee   : > { %3522 = vst [vmem:[#allocation2 + $0x70] sm:$0xf] %v3410_v9  ;;  %v3421_v36 = vrot.slane %v3419_v27, 4  ;;  %v3434_v15 = vrot.slane %v12943_v61, 7  ;;  %3525 = vst [vmem:[#allocation2 + $0x7c] sm:$0xf] %v3415_v2 }
 0x2ef   : > { %3527 = vst [vmem:[#allocation2 + $0x84] sm:$0xe] %v3417_v17  ;;  %v3423_v19 = vrot.slane %v3422_v43, 4  ;;  %v3433_v46 = vrot.slane %v3432_v33, 4  ;;  %3526 = vst [vmem:[#allocation2 + $0x80] sm:$0x1] %v3416_v56  ;;  %v3420_v55 = vsel %vm11308_vm2, %v3418_v35, %v3419_v27 }
 0x2f0   : > { %3530 = vst [vmem:[#allocation2 + $0x90] sm:$0xe] %v3422_v43  ;;  %3536 = vst [vmem:[#allocation2 + $0xa8] sm:$0xe] %v3432_v33  ;;  %v3436_v23 = vrot.slane %v3434_v15, 4  ;;  %v17677_v53 = vrot.slane %v17676_v10, 7 }
 0x2f1   : > { %3529 = vst [vmem:[#allocation2 + $0x8c] sm:$0x1] %v3421_v36  ;;  %3988 = vst [vmem:[#allocation2 + $0x38] sm:$0x3] %v3940_v41  ;;  %v3435_v8 = vsel %vm11308_vm2, %v3433_v46, %v3434_v15  ;;  %v3699_v25 = vld [vmem:[#allocation2 + $0x40] sm:$0xf] }
 0x2f2   : > { %v3425_v7 = vsel %vm11308_vm2, %v3423_v19, %v17677_v53  ;;  %3528 = vst [vmem:[#allocation2 + $0x88] sm:$0xf] %v3420_v55  ;;  %3537 = vst [vmem:[#allocation2 + $0xac] sm:$0xf] %v3435_v8  ;;  %v12978_v58 = vld [vmem:[#allocation2 + $0x28] sm:$0xf] }
 0x2f3   : > { %3531 = vst [vmem:[#allocation2 + $0x94] sm:$0xf] %v3425_v7  ;;  %3538 = vst [vmem:[#allocation2 + $0xb0] sm:$0x1] %v3436_v23  ;;  %v3651_v60 = vld [vmem:[#allocation2 + $0x34] sm:$0xf] }
 0x2f4   : > { %17678 = vst [vmem:[#allocation47_spill] sm:$0xff] %v12978_v58  ;;  %v12980_v42 = vld [vmem:[#allocation2 + $0x40] sm:$0xf]  ;;  %v3843_v13 = vmax.bf16 %v3699_v25, %v3651_v60  ;;  %v12984_v44 = vld [vmem:[#allocation2 + $0x30] sm:$0xf]  ;;  %v17679_v52 = vld [vmem:[#allocation50_spill] sm:$0xff] }
 0x2f5   : > { %v3703_v62 = vld [vmem:[#allocation2 + $0x50] sm:$0x3]  ;;  %v12986_v28 = vld [vmem:[#allocation2 + $0x34] sm:$0xf]  ;;  %v17680_v61 = vld [vmem:[#allocation61_spill] sm:$0xff] }
 0x2f6   : > { %v3650_v51 = vld [vmem:[#allocation2 + $0x30] sm:$0xf]  ;;  %v3795_v3 = vmax.bf16 %v17680_v61, %v17679_v52  ;;  %v12994_v1 = vld [vmem:[#allocation2 + $0x34] sm:$0xf]  ;;  %v12996_v26 = vld [vmem:[#allocation2 + $0x44] sm:$0x3] }
 0x2f7   : > { %v12992_v47 = vld [vmem:[#allocation2 + $0x30] sm:$0xf]  ;;  %v3655_v48 = vld [vmem:[#allocation2 + $0x44] sm:$0x3]  ;;  %v3842_v24 = vmax.bf16 %v3698_v14, %v3650_v51  ;;  %v13002_v50 = vld [vmem:[#allocation2 + $0x48] sm:$0xf] }
 0x2f8   : > { %v12998_v31 = vld [vmem:[#allocation2 + $0xa4] sm:$0x3]  ;;  %v13004_v57 = vld [vmem:[#allocation2 + $0x50] sm:$0x3]  ;;  %v13006_v22 = vld [vmem:[#allocation2 + $0x54] sm:$0xf]  ;;  %v3847_v21 = vmax.bf16 %v3703_v62, %v3655_v48  ;;  %v13012_v49 = vmax.bf16 %v3843_v13, %v3795_v3 }
 0x2f9   : > { %v13000_v6 = vld [vmem:[#allocation2 + $0x44] sm:$0x3]  ;;  %v13008_v59 = vld [vmem:[#allocation2 + $0x98] sm:$0x3]  ;;  %v17681_v38 = vld [vmem:[#allocation43_spill] sm:$0xff] }
 0x2fa   : > { %v3799_v4 = vmax.bf16 %v12968_v18, %v17681_v38  ;;  %17682 = vst [vmem:[#allocation51_spill] sm:$0xff] %v13012_v49  ;;  %v13014_v0 = vld [vmem:[#allocation2 + $0x3c] sm:$0xf]  ;;  %v13016_v16 = vld [vmem:[#allocation2 + $0x48] sm:$0xf]  ;;  %v17685_v9 = vld [vmem:[#allocation63_spill] sm:$0xff]  ;;  %v3868_v62 = vmax.bf16 %v12998_v31, %v13008_v59 }
 0x2fb   : > { %v13018_v32 = vld [vmem:[#allocation2 + $0x60] sm:$0xf]  ;;  %v13022_v37 = vld [vmem:[#allocation2 + $0x4c] sm:$0xf]  ;;  %v13024_v39 = vld [vmem:[#allocation2 + $0x58] sm:$0xf] }
 0x2fc   : > { %17683 = vst [vmem:[#allocation69_spill] sm:$0xff] %v13018_v32  ;;  %v13020_v5 = vld [vmem:[#allocation2 + $0x80] sm:$0x3]  ;;  %v17684_v11 = vld [vmem:[#allocation46_spill] sm:$0xff]  ;;  %v13032_v56 = vld [vmem:[#allocation2 + $0x50] sm:$0x3]  ;;  %v13091_v59 = vmax.bf16 %v3847_v21, %v3799_v4 }
 0x2fd   : > { %v3794_v17 = vmax.bf16 %v17685_v9, %v17684_v11  ;;  %v13028_v27 = vld [vmem:[#allocation2 + $0x40] sm:$0xf]  ;;  %v13030_v2 = vld [vmem:[#allocation2 + $0x4c] sm:$0xf]  ;;  %v13034_v43 = vld [vmem:[#allocation2 + $0x54] sm:$0xf] }
 0x2fe   : > { %v13036_v33 = vld [vmem:[#allocation2 + $0x64] sm:$0xf]  ;;  %v13038_v35 = vld [vmem:[#allocation2 + $0x68] sm:$0x3]  ;;  %v13040_v36 = vld [vmem:[#allocation2 + $0x5c] sm:$0x3] }
 0x2ff   : > { %17686 = vst [vmem:[#allocation70_spill] sm:$0xff] %v13036_v33  ;;  %17687 = vst [vmem:[#allocation40_spill] sm:$0xff] %v13038_v35  ;;  %v13042_v15 = vld [vmem:[#allocation2 + $0x60] sm:$0xf]  ;;  %v13044_v29 = vld [vmem:[#allocation2 + $0x64] sm:$0xf]  ;;  %v13070_v51 = vmax.bf16 %v3842_v24, %v3794_v17 }
 0x300   : > { %v17688_v41 = vld [vmem:[#allocation35_spill] sm:$0xff]  ;;  %v17689_v19 = vld [vmem:[#allocation60_spill] sm:$0xff]  ;;  %v13060_v8 = vld [vmem:[#allocation2 + $0x68] sm:$0x3]  ;;  %17701 = vst [vmem:[#allocation36_spill] sm:$0xff] %v13091_v59 }
 0x301   : > { %v13054_v10 = vld [vmem:[#allocation2 + $0x58] sm:$0xf]  ;;  %v13056_v53 = vld [vmem:[#allocation2 + $0x5c] sm:$0x3]  ;;  %17693 = vst [vmem:[#allocation62_spill] sm:$0xff] %v13060_v8  ;;  %17694 = vst [vmem:[#allocation39_spill] sm:$0xff] %v13070_v51 }
 0x302   : > { %17690 = vst [vmem:[#allocation48_spill] sm:$0xff] %v13054_v10  ;;  %17691 = vst [vmem:[#allocation44_spill] sm:$0xff] %v13056_v53  ;;  %v13058_v7 = vld [vmem:[#allocation2 + $0x78] sm:$0xf]  ;;  %v13062_v25 = vld [vmem:[#allocation2 + $0x80] sm:$0x3] }
 0x303   : > { %17692 = vst [vmem:[#allocation41_spill] sm:$0xff] %v13058_v7  ;;  %v3628_v60 = vld [vmem:[#allocation2 + $0x8c] sm:$0x3]  ;;  %v13072_v52 = vld [vmem:[#allocation2 + $0xa0] sm:$0xf] }
 0x304   : > { %17695 = vst [vmem:[#allocation71_spill] sm:$0xff] %v13072_v52  ;;  %v13074_v61 = vld [vmem:[#allocation2 + $0x6c] sm:$0xf]  ;;  %v13076_v3 = vld [vmem:[#allocation2 + $0x70] sm:$0xf]  ;;  %v3820_v24 = vmax.bf16 %v3628_v60, %v13020_v5 }
 0x305   : > { %17696 = vst [vmem:[#allocation31_spill] sm:$0xff] %v13074_v61  ;;  %17697 = vst [vmem:[#allocation59_spill] sm:$0xff] %v13076_v3  ;;  %v13078_v48 = vld [vmem:[#allocation2 + $0x74] sm:$0x3]  ;;  %v13080_v38 = vld [vmem:[#allocation2 + $0x78] sm:$0xf] }
 0x306   : > { %17698 = vst [vmem:[#allocation55_spill] sm:$0xff] %v13080_v38  ;;  %v13082_v11 = vld [vmem:[#allocation2 + $0x7c] sm:$0xf]  ;;  %v13095_v34 = vld [vmem:[#allocation2 + $0x6c] sm:$0xf]  ;;  %v3817_v21 = vmax.bf16 %v13062_v25, %v13078_v48  ;;  %v13157_v61 = vmax.bf16 %v3868_v62, %v3820_v24 }
 0x307   : > { %17699 = vst [vmem:[#allocation52_spill] sm:$0xff] %v13082_v11  ;;  %v13084_v9 = vld [vmem:[#allocation2 + $0x9c] sm:$0xf]  ;;  %17703 = vst [vmem:[#allocation37_spill] sm:$0xff] %v13095_v34  ;;  %v13097_v13 = vld [vmem:[#allocation2 + $0x70] sm:$0xf] }
 0x308   : > { %17700 = vst [vmem:[#allocation64_spill] sm:$0xff] %v13084_v9  ;;  %v13093_v17 = vld [vmem:[#allocation2 + $0x7c] sm:$0xf]  ;;  %17704 = vst [vmem:[#allocation56_spill] sm:$0xff] %v13097_v13  ;;  %v3721_v14 = vld [vmem:[#allocation2 + $0x98] sm:$0x3]  ;;  %v17711_v9 = vmax.bf16 %v12984_v44, %v17688_v41 }
 0x309   : > { %17702 = vst [vmem:[#allocation38_spill] sm:$0xff] %v13093_v17  ;;  %v13107_v4 = vld [vmem:[#allocation2 + $0x40] sm:$0xf]  ;;  %v13109_v5 = vld [vmem:[#allocation2 + $0x74] sm:$0x3]  ;;  %17710 = vst [vmem:[#allocation50_spill] sm:$0xff] %v13157_v61 }
 0x30a   : > { %17705 = vst [vmem:[#allocation68_spill] sm:$0xff] %v13109_v5  ;;  %v13111_v60 = vld [vmem:[#allocation2 + $0x84] sm:$0xf]  ;;  %v13113_v55 = vld [vmem:[#allocation2 + $0x88] sm:$0xf] }
 0x30b   : > { %17706 = vst [vmem:[#allocation54_spill] sm:$0xff] %v13111_v60  ;;  %17707 = vst [vmem:[#allocation42_spill] sm:$0xff] %v13113_v55  ;;  %v3653_v46 = vld [vmem:[#allocation2 + $0x3c] sm:$0xf]  ;;  %v13123_v18 = vld [vmem:[#allocation2 + $0x48] sm:$0xf] }
 0x30c   : > { %v13125_v40 = vld [vmem:[#allocation2 + $0x4c] sm:$0xf]  ;;  %v13129_v30 = vld [vmem:[#allocation2 + $0x60] sm:$0xf]  ;;  %v13131_v63 = vld [vmem:[#allocation2 + $0x64] sm:$0xf] }
 0x30d   : > { %v13133_v23 = vld [vmem:[#allocation2 + $0x68] sm:$0x3]  ;;  %v3673_v58 = vld [vmem:[#allocation2 + $0x8c] sm:$0x3]  ;;  %v13135_v20 = vld [vmem:[#allocation2 + $0x90] sm:$0xf] }
 0x30e   : > { %17708 = vst [vmem:[#allocation49_spill] sm:$0xff] %v13135_v20  ;;  %v13145_v49 = vld [vmem:[#allocation2 + $0x54] sm:$0xf]  ;;  %v13147_v51 = vld [vmem:[#allocation2 + $0x58] sm:$0xf]  ;;  %v3865_v48 = vmax.bf16 %v3721_v14, %v3673_v58 }
 0x30f   : > { %v13149_v32 = vld [vmem:[#allocation2 + $0x5c] sm:$0x3]  ;;  %v13151_v34 = vld [vmem:[#allocation2 + $0x94] sm:$0xf]  ;;  %v3701_v53 = vld [vmem:[#allocation2 + $0x48] sm:$0xf] }
 0x310   : > { %17709 = vst [vmem:[#allocation45_spill] sm:$0xff] %v13151_v34  ;;  %v3702_v8 = vld [vmem:[#allocation2 + $0x4c] sm:$0xf]  ;;  %v13159_v59 = vld [vmem:[#allocation2 + $0x78] sm:$0xf]  ;;  %v3845_v33 = vmax.bf16 %v3701_v53, %v3653_v46 }
 0x311   : > { %v13161_v3 = vld [vmem:[#allocation2 + $0x7c] sm:$0xf]  ;;  %v13163_v11 = vld [vmem:[#allocation2 + $0x80] sm:$0x3]  ;;  %v3704_v38 = vld [vmem:[#allocation2 + $0x54] sm:$0xf]  ;;  %v3846_v13 = vmax.bf16 %v3702_v8, %v13107_v4  ;;  %v13173_v8 = vmax.bf16 %v3865_v48, %v3817_v21 }
 0x312   : > { %v3705_v35 = vld [vmem:[#allocation2 + $0x58] sm:$0xf]  ;;  %v3706_v5 = vld [vmem:[#allocation2 + $0x5c] sm:$0x3]  ;;  %v3665_v14 = vld [vmem:[#allocation2 + $0x6c] sm:$0xf]  ;;  %v3848_v60 = vmax.bf16 %v3704_v38, %v13123_v18  ;;  %v13181_v10 = vmax.bf16 %v3845_v33, %v17711_v9  ;;  %v17713_v9 = vmax.bf16 %v12988_v45, %v12992_v47  ;;  %v17715_v45 = vmax.bf16 %v12996_v26, %v12966_v54 }
 0x313   : > { %v3666_v62 = vld [vmem:[#allocation2 + $0x70] sm:$0xf]  ;;  %v3667_v24 = vld [vmem:[#allocation2 + $0x74] sm:$0x3]  ;;  %v3671_v25 = vld [vmem:[#allocation2 + $0x84] sm:$0xf]  ;;  %v3849_v46 = vmax.bf16 %v3705_v35, %v13125_v40  ;;  %v3850_v53 = vmax.bf16 %v3706_v5, %v13127_v12  ;;  %v17719_v54 = vmax.bf16 %v13006_v22, %v13016_v16 }
 0x314   : > { %v3672_v61 = vld [vmem:[#allocation2 + $0x88] sm:$0xf]  ;;  %v3707_v17 = vld [vmem:[#allocation2 + $0x60] sm:$0xf]  ;;  %v3708_v55 = vld [vmem:[#allocation2 + $0x64] sm:$0xf] }
 0x315   : > { %v3709_v7 = vld [vmem:[#allocation2 + $0x68] sm:$0x3]  ;;  %v3710_v4 = vld [vmem:[#allocation2 + $0x6c] sm:$0xf]  ;;  %v3711_v31 = vld [vmem:[#allocation2 + $0x70] sm:$0xf]  ;;  %v3851_v58 = vmax.bf16 %v3707_v17, %v13145_v49  ;;  %v3852_v34 = vmax.bf16 %v3708_v55, %v13147_v51  ;;  %v17712_v49 = vmax.bf16 %v12986_v28, %v17689_v19  ;;  %v13194_v17 = vmax.bf16 %v3848_v60, %v17713_v9 }
 0x316   : > { %v3712_v20 = vld [vmem:[#allocation2 + $0x74] sm:$0x3]  ;;  %v3853_v52 = vmax.bf16 %v3709_v7, %v13149_v32  ;;  %v3713_v18 = vld [vmem:[#allocation2 + $0x78] sm:$0xf]  ;;  %v3714_v40 = vld [vmem:[#allocation2 + $0x7c] sm:$0xf]  ;;  %v3854_v12 = vmax.bf16 %v3710_v4, %v13129_v30  ;;  %v3855_v38 = vmax.bf16 %v3711_v31, %v13131_v63  ;;  %v17714_v19 = vmax.bf16 %v12980_v42, %v12994_v1 }
 0x317   : > { %v3715_v35 = vld [vmem:[#allocation2 + $0x80] sm:$0x3]  ;;  %v3856_v21 = vmax.bf16 %v3712_v20, %v13133_v23  ;;  %v13189_v55 = vmax.bf16 %v3846_v13, %v17712_v49  ;;  %v3716_v32 = vld [vmem:[#allocation2 + $0x84] sm:$0xf]  ;;  %v3717_v7 = vld [vmem:[#allocation2 + $0x88] sm:$0xf]  ;;  %v3857_v44 = vmax.bf16 %v3713_v18, %v3665_v14  ;;  %v3858_v33 = vmax.bf16 %v3714_v40, %v3666_v62 }
 0x318   : > { %v3718_v51 = vld [vmem:[#allocation2 + $0x8c] sm:$0x3]  ;;  %v3859_v41 = vmax.bf16 %v3715_v35, %v3667_v24  ;;  %v3719_v30 = vld [vmem:[#allocation2 + $0x90] sm:$0xf]  ;;  %v3720_v63 = vld [vmem:[#allocation2 + $0x94] sm:$0xf]  ;;  %v3860_v20 = vmax.bf16 %v3716_v32, %v13159_v59  ;;  %v3861_v23 = vmax.bf16 %v3717_v7, %v13161_v3  ;;  %v13202_v13 = vmax.bf16 %v3849_v46, %v17714_v19 }
 0x319   : > { %v3862_v28 = vmax.bf16 %v3718_v51, %v13163_v11  ;;  %v3863_v31 = vmax.bf16 %v3719_v30, %v3671_v25  ;;  %v3864_v5 = vmax.bf16 %v3720_v63, %v3672_v61  ;;  %v3898_v47 = vmax.bf16 %v3850_v53, %v17715_v45  ;;  %v13210_v59 = vld [vmem:[#allocation2 + $0x48] sm:$0xf]  ;;  %v13212_v3 = vld [vmem:[#allocation2 + $0x4c] sm:$0xf]  ;;  %v3749_v25 = vld [vmem:[#allocation2 + $0x54] sm:$0xf] }
 0x31a   : > { %v17716_v60 = vmax.bf16 %v13002_v50, %v13014_v0  ;;  %v17717_v11 = vmax.bf16 %v13022_v37, %v13028_v27  ;;  %v17718_v1 = vmax.bf16 %v13004_v57, %v13000_v6  ;;  %v13227_v26 = vmax.bf16 %v3854_v12, %v17719_v54  ;;  %v3751_v37 = vld [vmem:[#allocation2 + $0x5c] sm:$0x3]  ;;  %v13254_v24 = vld [vmem:[#allocation2 + $0x60] sm:$0xf]  ;;  %v17732_v18 = vld [vmem:[#allocation70_spill] sm:$0xff] }
 0x31b   : > { %v17720_v50 = vmax.bf16 %v13024_v39, %v13030_v2  ;;  %v17722_v6 = vmax.bf16 %v13042_v15, %v13034_v43  ;;  %v17723_v22 = vld [vmem:[#allocation48_spill] sm:$0xff]  ;;  %v17725_v39 = vld [vmem:[#allocation62_spill] sm:$0xff]  ;;  %v17728_v46 = vld [vmem:[#allocation37_spill] sm:$0xff] }
 0x31c   : > { %v3899_v48 = vmax.bf16 %v3851_v58, %v17716_v60  ;;  %v13217_v42 = vmax.bf16 %v3852_v34, %v17717_v11  ;;  %v13222_v61 = vmax.bf16 %v3853_v52, %v17718_v1  ;;  %v3750_v58 = vld [vmem:[#allocation2 + $0x58] sm:$0xf]  ;;  %v17721_v34 = vmax.bf16 %v13040_v36, %v13032_v56  ;;  %v13256_v56 = vld [vmem:[#allocation2 + $0x64] sm:$0xf]  ;;  %v3754_v36 = vld [vmem:[#allocation2 + $0x68] sm:$0x3] }
 0x31d   : > { %v13232_v0 = vmax.bf16 %v3855_v38, %v17720_v50  ;;  %v13242_v57 = vmax.bf16 %v3857_v44, %v17722_v6  ;;  %v17724_v16 = vmax.bf16 %v13044_v29, %v17723_v22  ;;  %v17726_v2 = vld [vmem:[#allocation44_spill] sm:$0xff]  ;;  %v17729_v53 = vld [vmem:[#allocation69_spill] sm:$0xff]  ;;  %v17737_v49 = vld [vmem:[#allocation55_spill] sm:$0xff] }
 0x31e   : > { %v13237_v27 = vmax.bf16 %v3856_v21, %v17721_v34  ;;  %v17727_v14 = vmax.bf16 %v17725_v39, %v17726_v2  ;;  %v17730_v43 = vmax.bf16 %v17728_v46, %v17729_v53  ;;  %v17731_v4 = vld [vmem:[#allocation56_spill] sm:$0xff]  ;;  %v17738_v32 = vld [vmem:[#allocation31_spill] sm:$0xff]  ;;  %v17743_v30 = vld [vmem:[#allocation54_spill] sm:$0xff]  ;;  %v3941_v46 = vmax.bf16 %v13181_v10, %v3749_v25 }
 0x31f   : > { %v13247_v52 = vmax.bf16 %v3858_v33, %v17724_v16  ;;  %v17733_v29 = vmax.bf16 %v17731_v4, %v17732_v18  ;;  %v17734_v35 = vld [vmem:[#allocation68_spill] sm:$0xff]  ;;  %v17739_v7 = vmax.bf16 %v17737_v49, %v17738_v32  ;;  %v17741_v33 = vld [vmem:[#allocation59_spill] sm:$0xff]  ;;  %v17744_v63 = vld [vmem:[#allocation41_spill] sm:$0xff]  ;;  %v3942_v53 = vmax.bf16 %v13189_v55, %v3750_v58 }
 0x320   : > { %v13252_v62 = vmax.bf16 %v3859_v41, %v17727_v14  ;;  %v13261_v15 = vmax.bf16 %v3860_v20, %v17730_v43  ;;  %v17735_v12 = vld [vmem:[#allocation40_spill] sm:$0xff]  ;;  %v17745_v20 = vmax.bf16 %v17743_v30, %v17744_v63  ;;  %v17747_v19 = vld [vmem:[#allocation49_spill] sm:$0xff]  ;;  %v17750_v11 = vld [vmem:[#allocation38_spill] sm:$0xff]  ;;  %v3945_v49 = vmax.bf16 %v13202_v13, %v13256_v56  ;;  %3989 = vst [vmem:[#allocation2 + $0x3c] sm:$0xf] %v3941_v46 }
 0x321   : > { %v13266_v40 = vmax.bf16 %v3861_v23, %v17733_v29  ;;  %v17736_v38 = vmax.bf16 %v17734_v35, %v17735_v12  ;;  %v13276_v51 = vmax.bf16 %v3863_v31, %v17739_v7  ;;  %v17740_v44 = vld [vmem:[#allocation52_spill] sm:$0xff]  ;;  %v17752_v54 = vld [vmem:[#allocation71_spill] sm:$0xff]  ;;  %v17753_v50 = vld [vmem:[#allocation45_spill] sm:$0xff]  ;;  %v3946_v32 = vmax.bf16 %v3898_v47, %v3754_v36  ;;  %3990 = vst [vmem:[#allocation2 + $0x40] sm:$0xf] %v3942_v53 }
 0x322   : > { %v17742_v41 = vmax.bf16 %v17740_v44, %v17741_v33  ;;  %v17746_v23 = vld [vmem:[#allocation64_spill] sm:$0xff]  ;;  %v17754_v31 = vmax.bf16 %v17752_v54, %v17753_v50  ;;  %v17755_v6 = vld [vmem:[#allocation39_spill] sm:$0xff]  ;;  %v3755_v22 = vld [vmem:[#allocation2 + $0x6c] sm:$0xf] }
 0x323   : > { %v13271_v21 = vmax.bf16 %v3862_v28, %v17736_v38  ;;  %v17748_v45 = vmax.bf16 %v17746_v23, %v17747_v19  ;;  %v17749_v28 = vld [vmem:[#allocation42_spill] sm:$0xff]  ;;  %v3756_v16 = vld [vmem:[#allocation2 + $0x70] sm:$0xf]  ;;  %v3757_v39 = vld [vmem:[#allocation2 + $0x74] sm:$0x3]  ;;  %v3947_v7 = vmax.bf16 %v3899_v48, %v3755_v22 }
 0x324   : > { %v13281_v9 = vmax.bf16 %v3864_v5, %v17742_v41  ;;  %v17751_v1 = vmax.bf16 %v17749_v28, %v17750_v11  ;;  %v3938_v5 = vmax.bf16 %v17755_v6, %v13210_v59  ;;  %v17756_v2 = vld [vmem:[#allocation51_spill] sm:$0xff]  ;;  %v17757_v43 = vld [vmem:[#allocation36_spill] sm:$0xff]  ;;  %v3760_v35 = vld [vmem:[#allocation2 + $0x80] sm:$0x3]  ;;  %v3944_v59 = vmax.bf16 %v13194_v17, %v13254_v24  ;;  %3994 = vst [vmem:[#allocation2 + $0x50] sm:$0x3] %v3946_v32 }
 0x325   : > { %v13289_v60 = vmax.bf16 %v17748_v45, %v17745_v20  ;;  %v3939_v14 = vmax.bf16 %v17756_v2, %v13212_v3  ;;  %v3943_v4 = vmax.bf16 %v17757_v43, %v3751_v37  ;;  %v3758_v18 = vld [vmem:[#allocation2 + $0x78] sm:$0xf]  ;;  %v3759_v29 = vld [vmem:[#allocation2 + $0x7c] sm:$0xf]  ;;  %v3761_v3 = vld [vmem:[#allocation2 + $0x84] sm:$0xf]  ;;  %v3948_v55 = vmax.bf16 %v13217_v42, %v3756_v16 }
 0x326   : > { %v13297_v34 = vmax.bf16 %v17754_v31, %v17751_v1  ;;  %v3766_v12 = vld [vmem:[#allocation2 + $0x98] sm:$0x3]  ;;  %v3767_v38 = vld [vmem:[#allocation2 + $0x9c] sm:$0xf]  ;;  %v3762_v44 = vld [vmem:[#allocation2 + $0x88] sm:$0xf]  ;;  %v3949_v25 = vmax.bf16 %v13222_v61, %v3757_v39  ;;  %v3950_v58 = vmax.bf16 %v13227_v26, %v3758_v18  ;;  %v3951_v37 = vmax.bf16 %v13232_v0, %v3759_v29 }
 0x327   : > { %v3763_v10 = vld [vmem:[#allocation2 + $0x8c] sm:$0x3]  ;;  %3991 = vst [vmem:[#allocation2 + $0x44] sm:$0x3] %v3943_v4  ;;  %v3764_v17 = vld [vmem:[#allocation2 + $0x90] sm:$0xf]  ;;  %v3952_v13 = vmax.bf16 %v13237_v27, %v3760_v35  ;;  %v3953_v47 = vmax.bf16 %v13242_v57, %v3761_v3  ;;  %v3954_v48 = vmax.bf16 %v13247_v52, %v3762_v44  ;;  %v3958_v41 = vmax.bf16 %v13271_v21, %v3766_v12 }
 0x328   : > { %v3765_v24 = vld [vmem:[#allocation2 + $0x94] sm:$0xf]  ;;  %v3768_v33 = vld [vmem:[#allocation2 + $0xa0] sm:$0xf]  ;;  %v3955_v42 = vmax.bf16 %v13252_v62, %v3763_v10  ;;  %3995 = vst [vmem:[#allocation2 + $0x54] sm:$0xf] %v3947_v7  ;;  %v3956_v0 = vmax.bf16 %v13261_v15, %v3764_v17  ;;  %v3959_v30 = vmax.bf16 %v13276_v51, %v3767_v38  ;;  %v9665_v23 = vcombine.low %v3938_v5, %v3939_v14 }
 0x329   : > { %v3769_v61 = vld [vmem:[#allocation2 + $0xa4] sm:$0x3]  ;;  %v3770_v26 = vld [vmem:[#allocation2 + $0xa8] sm:$0xf]  ;;  %v3771_v56 = vld [vmem:[#allocation2 + $0xac] sm:$0xf]  ;;  %v3957_v36 = vmax.bf16 %v13266_v40, %v3765_v24  ;;  %v3960_v52 = vmax.bf16 %v13281_v9, %v3768_v33  ;;  %v9667_v19 = vcombine.low %v3944_v59, %v3945_v49  ;;  %v9669_v45 = vcombine.low %v3950_v58, %v3951_v37 }
 0x32a   : > { %3996 = vst [vmem:[#allocation2 + $0x58] sm:$0xf] %v3948_v55  ;;  %3997 = vst [vmem:[#allocation2 + $0x5c] sm:$0x3] %v3949_v25  ;;  %v13322_v27 = vld [vmem:[#allocation2 + $0x84] sm:$0xf]  ;;  %v3961_v62 = vmax.bf16 %v13173_v8, %v3769_v61  ;;  %v3962_v63 = vmax.bf16 %v13289_v60, %v3770_v26  ;;  %v3963_v20 = vmax.bf16 %v13297_v34, %v3771_v56 }
 0x32b   : > { %17758 = vst [vmem:[#allocation61_spill] sm:$0xff] %v13322_v27  ;;  %v3772_v57 = vld [vmem:[#allocation2 + $0xb0] sm:$0x3]  ;;  %4000 = vst [vmem:[#allocation2 + $0x68] sm:$0x3] %v3952_v13  ;;  %v17761_v21 = vld [vmem:[#allocation50_spill] sm:$0xff]  ;;  %v9671_v28 = vcombine.low %v3956_v0, %v3957_v36 }
 0x32c   : > { %4001 = vst [vmem:[#allocation2 + $0x6c] sm:$0xf] %v3953_v47  ;;  %4002 = vst [vmem:[#allocation2 + $0x70] sm:$0xf] %v3954_v48  ;;  %v13328_v15 = vld [vmem:[#allocation2 + $0x88] sm:$0xf]  ;;  %v3964_v51 = vmax.bf16 %v17761_v21, %v3772_v57  ;;  %v9673_v11 = vcombine.low %v3962_v63, %v3963_v20 }
 0x32d   : > { %4003 = vst [vmem:[#allocation2 + $0x74] sm:$0x3] %v3955_v42  ;;  %17759 = vst [vmem:[#allocation43_spill] sm:$0xff] %v13328_v15  ;;  %v13330_v40 = vld [vmem:[#allocation2 + $0x8c] sm:$0x3]  ;;  %v17768_v31 = vld [vmem:[#allocation47_spill] sm:$0xff] }
 0x32e   : > { %17760 = vst [vmem:[#allocation46_spill] sm:$0xff] %v13330_v40  ;;  %4006 = vst [vmem:[#allocation2 + $0x80] sm:$0x3] %v3958_v41  ;;  %v13333_v8 = vld [vmem:[#allocation2 + $0x90] sm:$0xf]  ;;  %v17769_v34 = vshll.u32 %v17768_v31, 16 }
 0x32f   : > { %4007 = vst [vmem:[#allocation2 + $0x84] sm:$0xf] %v3959_v30  ;;  %17762 = vst [vmem:[#allocation63_spill] sm:$0xff] %v13333_v8  ;;  %v13335_v9 = vld [vmem:[#allocation2 + $0x98] sm:$0x3]  ;;  %v17770_v5 = vshrl.u32 %v17768_v31, 16 }
 0x330   : > { %17763 = vst [vmem:[#allocation35_spill] sm:$0xff] %v13335_v9  ;;  %v13337_v60 = vld [vmem:[#allocation2 + $0x98] sm:$0x3]  ;;  %4008 = vst [vmem:[#allocation2 + $0x88] sm:$0xf] %v3960_v52  ;;  %v13347_v6 = vrot.slane %v17769_v34, 5 }
 0x331   : > { %17764 = vst [vmem:[#allocation60_spill] sm:$0xff] %v13337_v60  ;;  %4009 = vst [vmem:[#allocation2 + $0x8c] sm:$0x3] %v3961_v62  ;;  %v13339_v1 = vld [vmem:[#allocation2 + $0x94] sm:$0xf]  ;;  %v4164_v22 = vrot.slane %v17770_v5, 4 }
 0x332   : > { %17765 = vst [vmem:[#allocation48_spill] sm:$0xff] %v13339_v1  ;;  %v13341_v54 = vld [vmem:[#allocation2 + $0x90] sm:$0xf]  ;;  %v13343_v50 = vld [vmem:[#allocation2 + $0x94] sm:$0xf]  ;;  %9666 = vst [vmem:[#allocation2 + $0x30] sm:$0xff] %v9665_v23  }
 0x333   : > { %17766 = vst [vmem:[#allocation62_spill] sm:$0xff] %v13341_v54  ;;  %17767 = vst [vmem:[#allocation44_spill] sm:$0xff] %v13343_v50  ;;  %v13351_v16 = vld [vmem:[#allocation2 + $0x24] sm:$0xf]  ;;  %v13353_v39 = vld [vmem:[#allocation2 + $0x2c] sm:$0x1]  ;;  %v4165_v2 = vor.u32 %v4164_v22, %v13347_v6 }
 0x334   : > { %9668 = vst [vmem:[#allocation2 + $0x48] sm:$0xff] %v9667_v19   ;;  %9670 = vst [vmem:[#allocation2 + $0x60] sm:$0xff] %v9669_v45   ;;  %v4149_v14 = vshrl.u32 %v13351_v16, 16  ;;  %v4152_v46 = vshll.u32 %v13351_v16, 16  ;;  %v4168_v53 = vshll.u32 %v13353_v39, 16  ;;  %v17263_v12 = vrot.slane %v17768_v31, 6 }
 0x335   : > { %4012 = vst [vmem:[#allocation2 + $0x98] sm:$0x3] %v3964_v51  ;;  %9672 = vst [vmem:[#allocation2 + $0x78] sm:$0xff] %v9671_v28   ;;  %v13359_v43 = vrot.slane %v4165_v2, 4  ;;  %v13361_v29 = vld [vmem:[#allocation2 + $0x38] sm:$0x1] }
 0x336   : > { %9674 = vst [vmem:[#allocation2 + $0x90] sm:$0xff] %v9673_v11   ;;  %17771 = vst [vmem:[#allocation37_spill] sm:$0xff] %v13353_v39  ;;  %v4151_v4 = vrot.slane %v4149_v14, 4  ;;  %v4154_v18 = vrot.slane %v4152_v46, 5  ;;  %v4170_v35 = vrot.slane %v4168_v53, 5  ;;  %v4192_v44 = vshll.u32 %v13361_v29, 16 }
 0x337   : > { %17772 = vst [vmem:[#allocation69_spill] sm:$0xff] %v13359_v43  ;;  %17773 = vst [vmem:[#allocation56_spill] sm:$0xff] %v13361_v29  ;;  %v13364_v38 = vld [vmem:[#allocation2 + $0x24] sm:$0xe]  ;;  %v13374_v10 = vld [vmem:[#allocation2 + $0x3c] sm:$0xf] }
 0x338   : > { %17774 = vst [vmem:[#allocation70_spill] sm:$0xff] %v13364_v38  ;;  %v4155_v59 = vor.u32 %v4154_v18, %v4151_v4  ;;  %v4171_v32 = vsel %vm11433_vm9, %v13359_v43, %v4170_v35  ;;  %v13378_v55 = vrot.slane %v17263_v12, 4  ;;  %v13380_v25 = vld [vmem:[#allocation2 + $0x40] sm:$0xf]  ;;  %v13387_v24 = vld [vmem:[#allocation2 + $0x44] sm:$0x1] }
 0x339   : > { %v13369_v7 = vld [vmem:[#allocation2 + $0x30] sm:$0xf]  ;;  %v13371_v3 = vld [vmem:[#allocation2 + $0x34] sm:$0xf]  ;;  %v13383_v58 = vmax.bf16 %v4171_v32, %v17768_v31  ;;  %17778 = vst [vmem:[#allocation55_spill] sm:$0xff] %v13387_v24  ;;  %v13397_v26 = vrot.slane %v4192_v44, 5 }
 0x33a   : > { %17776 = vst [vmem:[#allocation68_spill] sm:$0xff] %v13378_v55  ;;  %v13389_v33 = vrot.slane %v4155_v59, 4  ;;  %v4173_v13 = vshrl.u32 %v13369_v7, 16  ;;  %v4176_v47 = vshll.u32 %v13369_v7, 16  ;;  %v4182_v48 = vshll.u32 %v13371_v3, 16 }
 0x33b   : > { %17777 = vst [vmem:[#allocation40_spill] sm:$0xff] %v13383_v58  ;;  %v13394_v42 = vld [vmem:[#allocation2 + $0x48] sm:$0xf]  ;;  %v4186_v61 = vshrl.u32 %v13371_v3, 16  ;;  %v4197_v56 = vshrl.u32 %v13374_v10, 16  ;;  %v4200_v0 = vshll.u32 %v13374_v10, 16 }
 0x33c   : > { %v4175_v41 = vrot.slane %v4173_v13, 4  ;;  %v4178_v30 = vrot.slane %v4176_v47, 5  ;;  %v13405_v57 = vrot.slane %v4182_v48, 5  ;;  %v4206_v20 = vshll.u32 %v13380_v25, 16  ;;  %v13408_v21 = vld [vmem:[#allocation2 + $0x4c] sm:$0xf] }
 0x33d   : > { %v4188_v52 = vrot.slane %v4186_v61, 4  ;;  %v4199_v62 = vrot.slane %v4197_v56, 4  ;;  %v4202_v63 = vrot.slane %v4200_v0, 5  ;;  %v4210_v23 = vshrl.u32 %v13380_v25, 16  ;;  %v13413_v28 = vld [vmem:[#allocation2 + $0x50] sm:$0x1] }
 0x33e   : > { %v4179_v51 = vor.u32 %v4178_v30, %v4175_v41  ;;  %v4216_v19 = vshll.u32 %v13387_v24, 16  ;;  %v4221_v45 = vshrl.u32 %v13394_v42, 16  ;;  %17779 = vst [vmem:[#allocation31_spill] sm:$0xff] %v13413_v28  ;;  %v13416_v5 = vrot.slane %v4206_v20, 5  ;;  %v13423_v4 = vld [vmem:[#allocation2 + $0x54] sm:$0xf] }
 0x33f   : > { %v4189_v11 = vor.u32 %v4188_v52, %v13405_v57  ;;  %v4203_v34 = vor.u32 %v4202_v63, %v4199_v62  ;;  %v4224_v22 = vshll.u32 %v13394_v42, 16  ;;  %v4212_v14 = vrot.slane %v4210_v23, 4  ;;  %v13430_v44 = vld [vmem:[#allocation2 + $0x58] sm:$0xf]  ;;  %v13439_v56 = vld [vmem:[#allocation2 + $0x5c] sm:$0x1] }
 0x340   : > { %v13419_v2 = vrot.slane %v4179_v51, 4  ;;  %v13421_v46 = vrot.slane %v4216_v19, 5  ;;  %v4223_v53 = vrot.slane %v4221_v45, 4  ;;  %v4230_v32 = vshll.u32 %v13408_v21, 16  ;;  %17780 = vst [vmem:[#allocation52_spill] sm:$0xff] %v13439_v56 }
 0x341   : > { %v13425_v18 = vrot.slane %v4189_v11, 4  ;;  %v13427_v35 = vrot.slane %v4203_v34, 4  ;;  %v4226_v59 = vrot.slane %v4224_v22, 5  ;;  %v4213_v47 = vor.u32 %v4212_v14, %v13416_v5  ;;  %v13456_v23 = vld [vmem:[#allocation2 + $0x60] sm:$0xf] }
 0x342   : > { %v4234_v48 = vshrl.u32 %v13408_v21, 16  ;;  %v4240_v61 = vshll.u32 %v13413_v28, 16  ;;  %v13449_v52 = vrot.slane %v4230_v32, 5  ;;  %v4245_v51 = vshrl.u32 %v13423_v4, 16  ;;  %v13463_v22 = vld [vmem:[#allocation2 + $0x64] sm:$0xf] }
 0x343   : > { %v4227_v30 = vor.u32 %v4226_v59, %v4223_v53  ;;  %v13451_v62 = vrot.slane %v4213_v47, 4  ;;  %v4248_v45 = vshll.u32 %v13423_v4, 16  ;;  %v4254_v11 = vshll.u32 %v13430_v44, 16  ;;  %17781 = vst [vmem:[#allocation59_spill] sm:$0xff] %v13463_v22  ;;  %v13471_v47 = vld [vmem:[#allocation2 + $0x68] sm:$0x1] }
 0x344   : > { %v4236_v63 = vrot.slane %v4234_v48, 4  ;;  %v13453_v20 = vrot.slane %v4240_v61, 5  ;;  %v4258_v34 = vshrl.u32 %v13430_v44, 16  ;;  %v4247_v59 = vrot.slane %v4245_v51, 4  ;;  %17782 = vst [vmem:[#allocation54_spill] sm:$0xff] %v13471_v47 }
 0x345   : > { %v13458_v19 = vrot.slane %v4227_v30, 4  ;;  %v4264_v32 = vshll.u32 %v13439_v56, 16  ;;  %v4250_v61 = vrot.slane %v4248_v45, 5  ;;  %v13477_v30 = vrot.slane %v4254_v11, 5  ;;  %v13485_v14 = vld [vmem:[#allocation2 + $0x6c] sm:$0xf] }
 0x346   : > { %v4237_v53 = vor.u32 %v4236_v63, %v13449_v52  ;;  %v4260_v12 = vrot.slane %v4258_v34, 4  ;;  %v4269_v63 = vshrl.u32 %v13456_v23, 16  ;;  %v4272_v51 = vshll.u32 %v13456_v23, 16  ;;  %v13490_v11 = vld [vmem:[#allocation2 + $0x70] sm:$0xf] }
 0x347   : > { %v13481_v37 = vrot.slane %v4264_v32, 5  ;;  %v4251_v41 = vor.u32 %v4250_v61, %v4247_v59  ;;  %v4278_v13 = vshll.u32 %v13463_v22, 16  ;;  %v4282_v45 = vshrl.u32 %v13463_v22, 16  ;;  %17783 = vst [vmem:[#allocation41_spill] sm:$0xff] %v13490_v11  ;;  %v13497_v36 = vld [vmem:[#allocation2 + $0x74] sm:$0x1] }
 0x348   : > { %v13479_v17 = vrot.slane %v4237_v53, 4  ;;  %v4261_v0 = vor.u32 %v4260_v12, %v13477_v30  ;;  %v4271_v53 = vrot.slane %v4269_v63, 4  ;;  %v4274_v32 = vrot.slane %v4272_v51, 5  ;;  %17784 = vst [vmem:[#allocation64_spill] sm:$0xff] %v13497_v36  ;;  %v13505_v1 = vld [vmem:[#allocation2 + $0x78] sm:$0xf] }
 0x349   : > { %v4288_v48 = vshll.u32 %v13471_v47, 16  ;;  %v13499_v59 = vrot.slane %v4251_v41, 4  ;;  %v13503_v61 = vrot.slane %v4278_v13, 5  ;;  %v4284_v9 = vrot.slane %v4282_v45, 4  ;;  %v13532_v54 = vld [vmem:[#allocation2 + $0x84] sm:$0xf] }
 0x34a   : > { %v13501_v12 = vrot.slane %v4261_v0, 4  ;;  %v4275_v8 = vor.u32 %v4274_v32, %v4271_v53  ;;  %v4293_v34 = vshrl.u32 %v13485_v14, 16  ;;  %v4296_v63 = vshll.u32 %v13485_v14, 16  ;;  %17789 = vst [vmem:[#allocation45_spill] sm:$0xff] %v13532_v54  ;;  %v13548_v58 = vld [vmem:[#allocation2 + $0x88] sm:$0xf] }
 0x34b   : > { %17785 = vst [vmem:[#allocation49_spill] sm:$0xff] %v13503_v61  ;;  %v13507_v60 = vrot.slane %v4288_v48, 5  ;;  %v4285_v0 = vor.u32 %v4284_v9, %v13503_v61  ;;  %v4302_v51 = vshll.u32 %v13490_v11, 16  ;;  %v13521_v48 = vld [vmem:[#allocation2 + $0x7c] sm:$0xf]  ;;  %v4306_v40 = vshrl.u32 %v13490_v11, 16 }
 0x34c   : > { %17786 = vst [vmem:[#allocation42_spill] sm:$0xff] %v13521_v48  ;;  %v13523_v45 = vrot.slane %v4275_v8, 4  ;;  %v4295_v53 = vrot.slane %v4293_v34, 4  ;;  %v4298_v32 = vrot.slane %v4296_v63, 5  ;;  %v4312_v15 = vshll.u32 %v13497_v36, 16  ;;  %17791 = vst [vmem:[#allocation51_spill] sm:$0xff] %v13548_v58 }
 0x34d   : > { %v13526_v50 = vrot.slane %v4285_v0, 4  ;;  %v13528_v41 = vrot.slane %v4302_v51, 5  ;;  %v4317_v13 = vshrl.u32 %v13505_v1, 16  ;;  %v13534_v9 = vld [vmem:[#allocation2 + $0x80] sm:$0x1]  ;;  %v4308_v63 = vrot.slane %v4306_v40, 4 }
 0x34e   : > { %17790 = vst [vmem:[#allocation39_spill] sm:$0xff] %v13534_v9  ;;  %v4299_v34 = vor.u32 %v4298_v32, %v4295_v53  ;;  %v4320_v0 = vshll.u32 %v13505_v1, 16  ;;  %v13545_v27 = vrot.slane %v4312_v15, 5  ;;  %v4326_v31 = vshll.u32 %v13521_v48, 16  ;;  %v13561_v56 = vld [vmem:[#allocation2 + $0x8c] sm:$0x1] }
 0x34f   : > { %17787 = vst [vmem:[#allocation38_spill] sm:$0xff] %v13526_v50  ;;  %17788 = vst [vmem:[#allocation71_spill] sm:$0xff] %v13528_v41  ;;  %v4319_v55 = vrot.slane %v4317_v13, 4  ;;  %v4309_v8 = vor.u32 %v4308_v63, %v13528_v41  ;;  %v4330_v40 = vshrl.u32 %v13521_v48, 16  ;;  %v4336_v47 = vshll.u32 %v13534_v9, 16 }
 0x350   : > { %v13550_v36 = vrot.slane %v4299_v34, 4  ;;  %v4322_v53 = vrot.slane %v4320_v0, 5  ;;  %v13554_v32 = vrot.slane %v4326_v31, 5  ;;  %v4341_v51 = vshrl.u32 %v13532_v54, 16  ;;  %v13559_v13 = vld [vmem:[#allocation2 + $0x90] sm:$0xf] }
 0x351   : > { %v4344_v15 = vshll.u32 %v13532_v54, 16  ;;  %17792 = vst [vmem:[#allocation36_spill] sm:$0xff] %v13561_v56  ;;  %v13567_v63 = vrot.slane %v4309_v8, 4  ;;  %v4332_v31 = vrot.slane %v4330_v40, 4  ;;  %v4338_v28 = vrot.slane %v4336_v47, 5 }
 0x352   : > { %v4305_v34 = vsel %vm11433_vm9, %v13550_v36, %v13528_v41  ;;  %v4323_v0 = vor.u32 %v4322_v53, %v4319_v55  ;;  %v4343_v24 = vrot.slane %v4341_v51, 4  ;;  %v4350_v29 = vshll.u32 %v13548_v58, 16  ;;  %v13570_v39 = vld [vmem:[#allocation2 + $0x94] sm:$0xf]  ;;  %v13582_v53 = vld [vmem:[#allocation2 + $0x98] sm:$0x1] }
 0x353   : > { %17793 = vst [vmem:[#allocation50_spill] sm:$0xff] %v13567_v63  ;;  %v4346_v9 = vrot.slane %v4344_v15, 5  ;;  %17794 = vst [vmem:[#allocation73_spill] sm:$0xff] %v13570_v39  ;;  %v4315_v43 = vsel %vm11433_vm9, %v13567_v63, %v13545_v27  ;;  %v4333_v54 = vor.u32 %v4332_v31, %v13554_v32  ;;  %v4354_v36 = vshrl.u32 %v13548_v58, 16 }
 0x354   : > { %v4324_v38 = vrot.slane %v4323_v0, 4  ;;  %v13578_v55 = vrot.slane %v4350_v29, 5  ;;  %v4360_v47 = vshll.u32 %v13561_v56, 16  ;;  %v4365_v51 = vshrl.u32 %v13559_v13, 16  ;;  %17795 = vst [vmem:[#allocation74_spill] sm:$0xff] %v13582_v53 }
 0x355   : > { %v4347_v8 = vor.u32 %v4346_v9, %v4343_v24  ;;  %v13587_v15 = vrot.slane %v4333_v54, 4  ;;  %v4356_v27 = vrot.slane %v4354_v36, 4  ;;  %v4368_v0 = vshll.u32 %v13559_v13, 16 }
 0x356   : > { %v4329_v40 = vsel %vm11433_vm9, %v4324_v38, %v13554_v32  ;;  %v4362_v41 = vrot.slane %v4360_v47, 5  ;;  %v4367_v24 = vrot.slane %v4365_v51, 4  ;;  %v4374_v29 = vshll.u32 %v13570_v39, 16 }
 0x357   : > { %v4348_v31 = vrot.slane %v4347_v8, 4  ;;  %v4339_v9 = vsel %vm11433_vm9, %v13587_v15, %v4338_v28  ;;  %v4357_v56 = vor.u32 %v4356_v27, %v13578_v55  ;;  %v4370_v63 = vrot.slane %v4368_v0, 5 }
 0x358   : > { %v4378_v58 = vshrl.u32 %v13570_v39, 16  ;;  %v13599_v38 = vrot.slane %v4374_v29, 5  ;;  %v4384_v36 = vshll.u32 %v13582_v53, 16  ;;  %v17796_v8 = vsel %vm11433_vm9, %v13389_v33, %v13347_v6  ;;  %v13850_v53 = vld [vmem:[#allocation2 + $0x78] sm:$0xe] }
 0x359   : > { %v4353_v54 = vsel %vm11433_vm9, %v4348_v31, %v13578_v55  ;;  %v13608_v28 = vmax.bf16 %v17796_v8, %v13351_v16  ;;  %v13610_v47 = vrot.slane %v4357_v56, 4  ;;  %v4371_v51 = vor.u32 %v4370_v63, %v4367_v24  ;;  %17843 = vst [vmem:[#allocation102_spill] sm:$0xff] %v13850_v53 }
 0x35a   : > { %v4380_v27 = vrot.slane %v4378_v58, 4  ;;  %v17798_v0 = vsel %vm11433_vm9, %v13419_v2, %v13405_v57  ;;  %v4386_v29 = vrot.slane %v4384_v36, 5  ;;  %v17800_v16 = vsel %vm11433_vm9, %v13425_v18, %v13397_v26 }
 0x35b   : > { %17797 = vst [vmem:[#allocation75_spill] sm:$0xff] %v13608_v28  ;;  %v13618_v31 = vmax.bf16 %v17798_v0, %v13369_v7  ;;  %v13626_v33 = vmax.bf16 %v17800_v16, %v13371_v3  ;;  %v17802_v58 = vsel %vm11433_vm9, %v13427_v35, %v13416_v5  ;;  %v17804_v7 = vsel %vm11433_vm9, %v13451_v62, %v13421_v46  ;;  %v13708_v16 = vld [vmem:[#allocation2 + $0x38] sm:$0x3] }
 0x35c   : > { %v13634_v56 = vmax.bf16 %v17802_v58, %v13374_v10  ;;  %v13642_v2 = vmax.bf16 %v17804_v7, %v13380_v25  ;;  %v4363_v26 = vsel %vm11433_vm9, %v13610_v47, %v4362_v41  ;;  %v4372_v63 = vrot.slane %v4371_v51, 4  ;;  %17820 = vst [vmem:[#allocation88_spill] sm:$0xff] %v13708_v16 }
 0x35d   : > { %17799 = vst [vmem:[#allocation76_spill] sm:$0xff] %v13618_v31  ;;  %17801 = vst [vmem:[#allocation77_spill] sm:$0xff] %v13626_v33  ;;  %v4381_v24 = vor.u32 %v4380_v27, %v13599_v38  ;;  %v17806_v10 = vsel %vm11433_vm9, %v13458_v19, %v13449_v52  ;;  %v17808_v46 = vsel %vm11433_vm9, %v13479_v17, %v13453_v20  ;;  %v13688_v27 = vld [vmem:[#allocation2 + $0x2c] sm:$0x3]  ;;  %v13831_v33 = vld [vmem:[#allocation2 + $0x74] sm:$0x3] }
 0x35e   : > { %17803 = vst [vmem:[#allocation78_spill] sm:$0xff] %v13634_v56  ;;  %17805 = vst [vmem:[#allocation79_spill] sm:$0xff] %v13642_v2  ;;  %v13654_v35 = vmax.bf16 %v17806_v10, %v13394_v42  ;;  %v13662_v36 = vmax.bf16 %v17808_v46, %v13408_v21  ;;  %v17810_v41 = vsel %vm11433_vm9, %v13499_v59, %v13477_v30  ;;  %v13722_v10 = vld [vmem:[#allocation2 + $0x3c] sm:$0xe]  ;;  %v13823_v56 = vld [vmem:[#allocation2 + $0x6c] sm:$0xe] }
 0x35f   : > { %v13670_v8 = vmax.bf16 %v17810_v41, %v13423_v4  ;;  %v17812_v42 = vsel %vm11433_vm9, %v13501_v12, %v13481_v37  ;;  %v17814_v20 = vsel %vm11433_vm9, %v13523_v45, %v13503_v61  ;;  %17816 = vst [vmem:[#allocation85_spill] sm:$0xff] %v13688_v27  ;;  %v4377_v4 = vsel %vm11433_vm9, %v4372_v63, %v13599_v38 }
 0x360   : > { %17807 = vst [vmem:[#allocation80_spill] sm:$0xff] %v13654_v35  ;;  %17809 = vst [vmem:[#allocation81_spill] sm:$0xff] %v13662_v36  ;;  %v13678_v19 = vmax.bf16 %v17812_v42, %v13430_v44  ;;  %v13686_v51 = vmax.bf16 %v17814_v20, %v13456_v23  ;;  %v13693_v59 = vrot.slane %v4381_v24, 4  ;;  %v17817_v37 = vsel %vm11433_vm9, %v13526_v50, %v13507_v60  ;;  %v13706_v23 = vld [vmem:[#allocation2 + $0x30] sm:$0xe]  ;;  %v17824_v24 = vld [vmem:[#allocation45_spill] sm:$0xff] }
 0x361   : > { %17811 = vst [vmem:[#allocation82_spill] sm:$0xff] %v13670_v8  ;;  %v13701_v0 = vmax.bf16 %v17817_v37, %v13463_v22  ;;  %v13704_v45 = vmax.bf16 %v4305_v34, %v13485_v14  ;;  %v13711_v58 = vmax.bf16 %v4315_v43, %v13490_v11  ;;  %v13714_v7 = vmax.bf16 %v4329_v40, %v13505_v1  ;;  %v17826_v34 = vld [vmem:[#allocation51_spill] sm:$0xff]  ;;  %v17829_v1 = vld [vmem:[#allocation70_spill] sm:$0xff]  ;;  %v13803_v36 = vld [vmem:[#allocation2 + $0x60] sm:$0xe] }
 0x362   : > { %17813 = vst [vmem:[#allocation83_spill] sm:$0xff] %v13678_v19  ;;  %17815 = vst [vmem:[#allocation84_spill] sm:$0xff] %v13686_v51  ;;  %v13717_v63 = vmax.bf16 %v4339_v9, %v13521_v48  ;;  %v13720_v60 = vmax.bf16 %v4353_v54, %v17824_v24  ;;  %v4387_v14 = vsel %vm11433_vm9, %v13693_v59, %v4386_v29  ;;  %v17830_v40 = vshrl.u32 %v17829_v1, 16  ;;  %v13789_v51 = vld [vmem:[#allocation2 + $0x5c] sm:$0x3] }
 0x363   : > { %17818 = vst [vmem:[#allocation86_spill] sm:$0xff] %v13701_v0  ;;  %17819 = vst [vmem:[#allocation87_spill] sm:$0xff] %v13704_v45  ;;  %v13728_v46 = vmax.bf16 %v4363_v26, %v17826_v34  ;;  %v13731_v43 = vmax.bf16 %v4377_v4, %v13559_v13  ;;  %v13736_v9 = vmax.bf16 %v4387_v14, %v13570_v39  ;;  %v17832_v54 = vshll.u32 %v17829_v1, 16 }
 0x364   : > { %17821 = vst [vmem:[#allocation89_spill] sm:$0xff] %v13711_v58  ;;  %17822 = vst [vmem:[#allocation90_spill] sm:$0xff] %v13714_v7  ;;  %v4595_v41 = vrot.slane %v17830_v40, 4  ;;  %v4603_v20 = vshll.u32 %v13688_v27, 16  ;;  %v4607_v37 = vshrl.u32 %v13688_v27, 16  ;;  %v4613_v29 = vshrl.u32 %v13706_v23, 16 }
 0x365   : > { %17823 = vst [vmem:[#allocation91_spill] sm:$0xff] %v13717_v63  ;;  %17825 = vst [vmem:[#allocation45_spill] sm:$0xff] %v13720_v60  ;;  %v4598_v42 = vrot.slane %v17832_v54, 5  ;;  %v4616_v26 = vshll.u32 %v13706_v23, 16  ;;  %v4623_v13 = vshll.u32 %v13708_v16, 16  ;;  %v4627_v4 = vshrl.u32 %v13708_v16, 16 }
 0x366   : > { %17827 = vst [vmem:[#allocation92_spill] sm:$0xff] %v13728_v46  ;;  %17828 = vst [vmem:[#allocation93_spill] sm:$0xff] %v13731_v43  ;;  %v13746_v40 = vrot.slane %v4603_v20, 5  ;;  %v4609_v14 = vrot.slane %v4607_v37, 4  ;;  %v13749_v43 = vld [vmem:[#allocation2 + $0x44] sm:$0x3] }
 0x367   : > { %17831 = vst [vmem:[#allocation70_spill] sm:$0xff] %v13736_v9  ;;  %v4599_v24 = vor.u32 %v4598_v42, %v4595_v41  ;;  %v4633_v9 = vshrl.u32 %v13722_v10, 16  ;;  %17833 = vst [vmem:[#allocation94_spill] sm:$0xff] %v13749_v43  ;;  %v4615_v54 = vrot.slane %v4613_v29, 4  ;;  %v4618_v46 = vrot.slane %v4616_v26, 5  ;;  %v17834_v58 = vld [vmem:[#allocation69_spill] sm:$0xff] }
 0x368   : > { %v13751_v60 = vrot.slane %v4623_v13, 5  ;;  %v4629_v27 = vrot.slane %v4627_v4, 4  ;;  %v13753_v63 = vld [vmem:[#allocation2 + $0x48] sm:$0xe]  ;;  %v4610_v42 = vor.u32 %v4609_v14, %v13746_v40  ;;  %v13762_v37 = vld [vmem:[#allocation2 + $0x50] sm:$0x3] }
 0x369   : > { %v13755_v7 = vrot.slane %v4599_v24, 4  ;;  %v4635_v20 = vrot.slane %v4633_v9, 4  ;;  %17835 = vst [vmem:[#allocation69_spill] sm:$0xff] %v13762_v37  ;;  %v4619_v16 = vor.u32 %v4618_v46, %v4615_v54  ;;  %v4636_v13 = vshll.u32 %v13722_v10, 16  ;;  %v13783_v41 = vld [vmem:[#allocation2 + $0x54] sm:$0xe] }
 0x36a   : > { %v4630_v26 = vor.u32 %v4629_v27, %v13751_v60  ;;  %v13774_v24 = vrot.slane %v4610_v42, 4  ;;  %v4643_v9 = vshll.u32 %v13749_v43, 16  ;;  %v4647_v46 = vshrl.u32 %v13749_v43, 16  ;;  %17836 = vst [vmem:[#allocation95_spill] sm:$0xff] %v13789_v51  ;;  %17837 = vst [vmem:[#allocation96_spill] sm:$0xff] %v13803_v36 }
 0x36b   : > { %v13778_v14 = vrot.slane %v4619_v16, 4  ;;  %v4638_v29 = vrot.slane %v4636_v13, 5  ;;  %v4653_v27 = vshrl.u32 %v13753_v63, 16  ;;  %v4656_v4 = vshll.u32 %v13753_v63, 16  ;;  %17839 = vst [vmem:[#allocation98_spill] sm:$0xff] %v13823_v56  ;;  %17841 = vst [vmem:[#allocation100_spill] sm:$0xff] %v13831_v33 }
 0x36c   : > { %v13780_v54 = vrot.slane %v4630_v26, 4  ;;  %v13785_v45 = vrot.slane %v4643_v9, 5  ;;  %v4649_v0 = vrot.slane %v4647_v46, 4  ;;  %v4663_v42 = vshll.u32 %v13762_v37, 16 }
 0x36d   : > { %v4639_v26 = vor.u32 %v4638_v29, %v4635_v20  ;;  %v4655_v13 = vrot.slane %v4653_v27, 4  ;;  %v4667_v43 = vshrl.u32 %v13762_v37, 16  ;;  %v4658_v19 = vrot.slane %v4656_v4, 5  ;;  %v13809_v27 = vld [vmem:[#allocation2 + $0x68] sm:$0x3] }
 0x36e   : > { %v4650_v46 = vor.u32 %v4649_v0, %v13785_v45  ;;  %v13801_v8 = vrot.slane %v4663_v42, 5  ;;  %v4673_v20 = vshrl.u32 %v13783_v41, 16  ;;  %v4676_v29 = vshll.u32 %v13783_v41, 16  ;;  %17838 = vst [vmem:[#allocation97_spill] sm:$0xff] %v13809_v27 }
 0x36f   : > { %v13805_v35 = vrot.slane %v4639_v26, 4  ;;  %v4669_v2 = vrot.slane %v4667_v43, 4  ;;  %v4659_v37 = vor.u32 %v4658_v19, %v4655_v13  ;;  %v4683_v4 = vshll.u32 %v13789_v51, 16 }
 0x370   : > { %v13811_v16 = vrot.slane %v4650_v46, 4  ;;  %v4675_v26 = vrot.slane %v4673_v20, 4  ;;  %v4678_v9 = vrot.slane %v4676_v29, 5  ;;  %v4687_v13 = vshrl.u32 %v13789_v51, 16  ;;  %v13856_v20 = vld [vmem:[#allocation2 + $0x80] sm:$0x3] }
 0x371   : > { %v4670_v42 = vor.u32 %v4669_v2, %v13801_v8  ;;  %v13825_v46 = vrot.slane %v4659_v37, 4  ;;  %v13827_v19 = vrot.slane %v4683_v4, 5  ;;  %v4693_v0 = vshrl.u32 %v13803_v36, 16  ;;  %17844 = vst [vmem:[#allocation103_spill] sm:$0xff] %v13856_v20 }
 0x372   : > { %v4679_v28 = vor.u32 %v4678_v9, %v4675_v26  ;;  %v4696_v43 = vshll.u32 %v13803_v36, 16  ;;  %v4703_v2 = vshll.u32 %v13809_v27, 16  ;;  %v4689_v29 = vrot.slane %v4687_v13, 4 }
 0x373   : > { %17840 = vst [vmem:[#allocation99_spill] sm:$0xff] %v13827_v19  ;;  %v13833_v31 = vrot.slane %v4670_v42, 4  ;;  %v4695_v4 = vrot.slane %v4693_v0, 4  ;;  %v4707_v26 = vshrl.u32 %v13809_v27, 16  ;;  %v4713_v37 = vshrl.u32 %v13823_v56, 16 }
 0x374   : > { %v13845_v51 = vrot.slane %v4679_v28, 4  ;;  %v4698_v42 = vrot.slane %v4696_v43, 5  ;;  %v13847_v9 = vrot.slane %v4703_v2, 5  ;;  %v4690_v39 = vor.u32 %v4689_v29, %v13827_v19  ;;  %v13877_v28 = vld [vmem:[#allocation2 + $0x8c] sm:$0x3] }
 0x375   : > { %v4716_v34 = vshll.u32 %v13823_v56, 16  ;;  %v4723_v48 = vshll.u32 %v13831_v33, 16  ;;  %v4709_v13 = vrot.slane %v4707_v26, 4  ;;  %v4715_v29 = vrot.slane %v4713_v37, 4  ;;  %v13902_v26 = vld [vmem:[#allocation2 + $0x98] sm:$0x3] }
 0x376   : > { %17842 = vst [vmem:[#allocation101_spill] sm:$0xff] %v13847_v9  ;;  %v4699_v0 = vor.u32 %v4698_v42, %v4695_v4  ;;  %v13866_v2 = vrot.slane %v4690_v39, 4  ;;  %v4727_v36 = vshrl.u32 %v13831_v33, 16  ;;  %v4733_v4 = vshrl.u32 %v13850_v53, 16  ;;  %v13875_v42 = vld [vmem:[#allocation2 + $0x84] sm:$0xe] }
 0x377   : > { %v4718_v27 = vrot.slane %v4716_v34, 5  ;;  %v13868_v11 = vrot.slane %v4723_v48, 5  ;;  %v4710_v22 = vor.u32 %v4709_v13, %v13847_v9  ;;  %17848 = vst [vmem:[#allocation107_spill] sm:$0xff] %v13875_v42  ;;  %v4736_v48 = vshll.u32 %v13850_v53, 16  ;;  %v13896_v39 = vld [vmem:[#allocation2 + $0x90] sm:$0xe] }
 0x378   : > { %17845 = vst [vmem:[#allocation104_spill] sm:$0xff] %v13866_v2  ;;  %v13870_v56 = vrot.slane %v4699_v0, 4  ;;  %v4743_v37 = vshll.u32 %v13856_v20, 16  ;;  %v4729_v13 = vrot.slane %v4727_v36, 4  ;;  %v4735_v33 = vrot.slane %v4733_v4, 4  ;;  %v17851_v36 = vld [vmem:[#allocation71_spill] sm:$0xff] }
 0x379   : > { %17846 = vst [vmem:[#allocation105_spill] sm:$0xff] %v13868_v11  ;;  %v4719_v43 = vor.u32 %v4718_v27, %v4715_v29  ;;  %v13889_v0 = vrot.slane %v4710_v22, 4  ;;  %v4738_v27 = vrot.slane %v4736_v48, 5  ;;  %v4747_v34 = vshrl.u32 %v13856_v20, 16 }
 0x37a   : > { %17847 = vst [vmem:[#allocation106_spill] sm:$0xff] %v13870_v56  ;;  %v13893_v29 = vrot.slane %v4743_v37, 5  ;;  %v4730_v53 = vor.u32 %v4729_v13, %v13868_v11  ;;  %v4753_v50 = vshrl.u32 %v13875_v42, 16  ;;  %v4756_v2 = vshll.u32 %v13875_v42, 16 }
 0x37b   : > { %17850 = vst [vmem:[#allocation108_spill] sm:$0xff] %v13889_v0  ;;  %v13891_v9 = vrot.slane %v4719_v43, 4  ;;  %v4763_v22 = vshll.u32 %v13877_v28, 16  ;;  %v4739_v4 = vor.u32 %v4738_v27, %v4735_v33  ;;  %v4749_v37 = vrot.slane %v4747_v34, 4 }
 0x37c   : > { %v4746_v48 = vsel %vm11433_vm9, %v13587_v15, %v13893_v29  ;;  %v13912_v13 = vrot.slane %v4730_v53, 4  ;;  %v4755_v20 = vrot.slane %v4753_v50, 4  ;;  %v4758_v42 = vrot.slane %v4756_v2, 5 }
 0x37d   : > { %v4721_v43 = vsel %vm11433_vm9, %v13891_v9, %v17851_v36  ;;  %v4765_v11 = vrot.slane %v4763_v22, 5  ;;  %v4740_v0 = vrot.slane %v4739_v4, 4  ;;  %v4750_v61 = vor.u32 %v4749_v37, %v13893_v29  ;;  %v10404_v37 = vld [vmem:[#allocation2 + $0x28] sm:$0xf] }
 0x37e   : > { %v4767_v56 = vshrl.u32 %v13877_v28, 16  ;;  %v4773_v19 = vshrl.u32 %v13896_v39, 16  ;;  %v4759_v9 = vor.u32 %v4758_v42, %v4755_v20  ;;  %v4776_v15 = vshll.u32 %v13896_v39, 16 }
 0x37f   : > { %v4766_v33 = vsel %vm11433_vm9, %v13610_v47, %v4765_v11  ;;  %v4783_v53 = vshll.u32 %v13902_v26, 16  ;;  %v4741_v50 = vsel %vm11433_vm9, %v4740_v0, %v13554_v32  ;;  %v13925_v2 = vrot.slane %v4750_v61, 4 }
 0x380   : > { %v4769_v34 = vrot.slane %v4767_v56, 4  ;;  %v4775_v27 = vrot.slane %v4773_v19, 4  ;;  %v4760_v29 = vrot.slane %v4759_v9, 4  ;;  %v4778_v22 = vrot.slane %v4776_v15, 5  ;;  %v17854_v56 = vld [vmem:[#allocation37_spill] sm:$0xff]  ;;  %v17857_v9 = vld [vmem:[#allocation56_spill] sm:$0xff] }
 0x381   : > { %v4785_v36 = vrot.slane %v4783_v53, 5  ;;  %v4787_v20 = vshrl.u32 %v13902_v26, 16  ;;  %v17852_v47 = vsel %vm11433_vm9, %v13755_v7, %v13347_v6  ;;  %v17853_v61 = vsel %vm11433_vm9, %v17834_v58, %v13746_v40 }
 0x382   : > { %v4770_v42 = vor.u32 %v4769_v34, %v4765_v11  ;;  %v4943_v4 = vmax.bf16 %v17852_v47, %v17829_v1  ;;  %v4944_v32 = vmax.bf16 %v10404_v37, %v17853_v61  ;;  %v4945_v19 = vmax.bf16 %v13774_v24, %v17854_v56  ;;  %v17873_v37 = vld [vmem:[#allocation59_spill] sm:$0xff]  ;;  %v17877_v56 = vld [vmem:[#allocation54_spill] sm:$0xff] }
 0x383   : > { %v4761_v11 = vsel %vm11433_vm9, %v4760_v29, %v13578_v55  ;;  %v4779_v0 = vor.u32 %v4778_v22, %v4775_v27  ;;  %v4786_v6 = vsel %vm11433_vm9, %v13693_v59, %v4785_v36  ;;  %v4789_v7 = vrot.slane %v4787_v20, 4  ;;  %v17868_v29 = vld [vmem:[#allocation104_spill] sm:$0xff]  ;;  %v17871_v20 = vld [vmem:[#allocation49_spill] sm:$0xff] }
 0x384   : > { %v13947_v1 = vrot.slane %v4770_v42, 4  ;;  %v17855_v58 = vsel %vm11433_vm9, %v13778_v14, %v13405_v57  ;;  %v17856_v55 = vsel %vm11433_vm9, %v13425_v18, %v13751_v60  ;;  %v4948_v59 = vmax.bf16 %v13780_v54, %v17857_v9  ;;  %v17860_v60 = vld [vmem:[#allocation55_spill] sm:$0xff]  ;;  %v17881_v9 = vld [vmem:[#allocation50_spill] sm:$0xff] }
 0x385   : > { %v4946_v40 = vmax.bf16 %v17855_v58, %v13706_v23  ;;  %v4947_v24 = vmax.bf16 %v17856_v55, %v13371_v3  ;;  %v4780_v15 = vrot.slane %v4779_v0, 4  ;;  %v4790_v53 = vor.u32 %v4789_v7, %v4785_v36  ;;  %v17870_v36 = vld [vmem:[#allocation106_spill] sm:$0xff]  ;;  %v17880_v55 = vld [vmem:[#allocation41_spill] sm:$0xff] }
 0x386   : > { %v17858_v34 = vsel %vm11433_vm9, %v13805_v35, %v13416_v5  ;;  %v17859_v23 = vsel %vm11433_vm9, %v13451_v62, %v13785_v45  ;;  %v4951_v14 = vmax.bf16 %v13811_v16, %v17860_v60  ;;  %v17861_v54 = vsel %vm11433_vm9, %v13825_v46, %v13449_v52  ;;  %v17867_v46 = vld [vmem:[#allocation52_spill] sm:$0xff]  ;;  %v17879_v7 = vld [vmem:[#allocation98_spill] sm:$0xff] }
 0x387   : > { %v4949_v57 = vmax.bf16 %v17858_v34, %v13722_v10  ;;  %v4950_v18 = vmax.bf16 %v17859_v23, %v13380_v25  ;;  %v4952_v27 = vmax.bf16 %v17861_v54, %v13753_v63  ;;  %v17862_v5 = vsel %vm11433_vm9, %v13479_v17, %v13801_v8  ;;  %v17863_v10 = vld [vmem:[#allocation31_spill] sm:$0xff]  ;;  %v17884_v23 = vld [vmem:[#allocation64_spill] sm:$0xff]  ;;  %v17885_v54 = vld [vmem:[#allocation102_spill] sm:$0xff] }
 0x388   : > { %v4953_v35 = vmax.bf16 %v17862_v5, %v13408_v21  ;;  %v4954_v62 = vmax.bf16 %v13833_v31, %v17863_v10  ;;  %v4781_v45 = vsel %vm11433_vm9, %v4780_v15, %v13599_v38  ;;  %v13994_v16 = vrot.slane %v4790_v53, 4  ;;  %v17865_v17 = vld [vmem:[#allocation99_spill] sm:$0xff]  ;;  %v17869_v38 = vld [vmem:[#allocation96_spill] sm:$0xff]  ;;  %v17882_v15 = vld [vmem:[#allocation105_spill] sm:$0xff] }
 0x389   : > { %v17864_v52 = vsel %vm11433_vm9, %v13845_v51, %v13477_v30  ;;  %v17866_v8 = vsel %vm11433_vm9, %v13501_v12, %v17865_v17  ;;  %v4957_v22 = vmax.bf16 %v17868_v29, %v17867_v46  ;;  %v17872_v42 = vsel %vm11433_vm9, %v17870_v36, %v17871_v20  ;;  %v17874_v30 = vld [vmem:[#allocation38_spill] sm:$0xff]  ;;  %v17875_v51 = vld [vmem:[#allocation101_spill] sm:$0xff]  ;;  %v17878_v12 = vld [vmem:[#allocation108_spill] sm:$0xff] }
 0x38a   : > { %v4955_v63 = vmax.bf16 %v17864_v52, %v13783_v41  ;;  %v4956_v31 = vmax.bf16 %v17866_v8, %v13430_v44  ;;  %v4958_v47 = vmax.bf16 %v17872_v42, %v17869_v38  ;;  %v17876_v41 = vsel %vm11433_vm9, %v17874_v30, %v17875_v51  ;;  %v17886_v10 = vld [vmem:[#allocation42_spill] sm:$0xff]  ;;  %v17887_v17 = vld [vmem:[#allocation39_spill] sm:$0xff]  ;;  %v17890_v36 = vld [vmem:[#allocation36_spill] sm:$0xff] }
 0x38b   : > { %v4959_v61 = vmax.bf16 %v17876_v41, %v17873_v37  ;;  %v4960_v0 = vmax.bf16 %v17878_v12, %v17877_v56  ;;  %v4961_v58 = vmax.bf16 %v4721_v43, %v17879_v7  ;;  %v17883_v53 = vsel %vm11433_vm9, %v17881_v9, %v17882_v15  ;;  %v17888_v46 = vld [vmem:[#allocation107_spill] sm:$0xff]  ;;  %v17891_v30 = vld [vmem:[#allocation73_spill] sm:$0xff]  ;;  %v17892_v41 = vld [vmem:[#allocation74_spill] sm:$0xff] }
 0x38c   : > { %v4962_v34 = vmax.bf16 %v17883_v53, %v17880_v55  ;;  %v4963_v60 = vmax.bf16 %v13912_v13, %v17884_v23  ;;  %v4964_v5 = vmax.bf16 %v4741_v50, %v17885_v54  ;;  %v4965_v52 = vmax.bf16 %v4746_v48, %v17886_v10  ;;  %v17889_v43 = vld [vmem:[#allocation51_spill] sm:$0xff] }
 0x38d   : > { %v4966_v8 = vmax.bf16 %v13925_v2, %v17887_v17  ;;  %v4967_v29 = vmax.bf16 %v4761_v11, %v17888_v46  ;;  %v4968_v38 = vmax.bf16 %v4766_v33, %v17889_v43  ;;  %v4969_v20 = vmax.bf16 %v13947_v1, %v17890_v36 }
 0x38e   : > { %v4970_v42 = vmax.bf16 %v4781_v45, %v13896_v39  ;;  %v4971_v51 = vmax.bf16 %v4786_v6, %v17891_v30  ;;  %v4972_v13 = vmax.bf16 %v13994_v16, %v17892_v41  ;;  %v9187_v50 = vrot.slane %v4943_v4, 9 }
 0x38f   : > { %v5045_v56 = vrot.slane %v4944_v32, 5  ;;  %v5048_v48 = vrot.slane %v4945_v19, 5  ;;  %v9188_v12 = vrot.slane %v4946_v40, 9  ;;  %v5052_v7 = vrot.slane %v4947_v24, 5 }
 0x390   : > { %v5055_v2 = vrot.slane %v4948_v59, 5  ;;  %v9189_v9 = vrot.slane %v4949_v57, 9  ;;  %v5059_v11 = vrot.slane %v4950_v18, 5  ;;  %v5062_v53 = vrot.slane %v4951_v14, 5 }
 0x391   : > { %v14047_v33 = vsel %vm11463_vm10, %v9187_v50, %v5045_v56  ;;  %v5047_v1 = vrot.slane %v5045_v56, 4  ;;  %v9190_v39 = vrot.slane %v4952_v27, 9  ;;  %v14051_v6 = vsel %vm11463_vm10, %v9188_v12, %v5052_v7 }
 0x392   : > { %v5054_v45 = vrot.slane %v5052_v7, 4  ;;  %v14055_v4 = vsel %vm11463_vm10, %v9189_v9, %v5059_v11  ;;  %v5061_v32 = vrot.slane %v5059_v11, 4  ;;  %v5066_v40 = vrot.slane %v4953_v35, 5 }
 0x393   : > { %v5049_v19 = vsel %vm11463_vm10, %v5047_v1, %v5048_v48  ;;  %v5069_v24 = vrot.slane %v4954_v62, 5  ;;  %v9191_v59 = vrot.slane %v4955_v63, 9  ;;  %v5073_v14 = vrot.slane %v4956_v31, 5 }
 0x394   : > { %v5056_v57 = vsel %vm11463_vm10, %v5054_v45, %v5055_v2  ;;  %v5063_v18 = vsel %vm11463_vm10, %v5061_v32, %v5062_v53  ;;  %v5076_v27 = vrot.slane %v4957_v22, 5  ;;  %v14065_v16 = vsel %vm11463_vm10, %v9190_v39, %v5066_v40 }
 0x395   : > { %v5068_v23 = vrot.slane %v5066_v40, 4  ;;  %v9192_v54 = vrot.slane %v4958_v47, 9  ;;  %v5080_v17 = vrot.slane %v4959_v61, 5  ;;  %v14069_v35 = vsel %vm11463_vm10, %v9191_v59, %v5073_v14  ;;  %v17897_v40 = vld [vmem:[#allocation76_spill] sm:$0xff]  ;;  %v17898_v59 = vld [vmem:[#allocation77_spill] sm:$0xff] }
 0x396   : > { %v5075_v62 = vrot.slane %v5073_v14, 4  ;;  %v5083_v63 = vrot.slane %v4960_v0, 5  ;;  %v9193_v46 = vrot.slane %v4961_v58, 9  ;;  %v5087_v41 = vrot.slane %v4962_v34, 5 }
 0x397   : > { %v5070_v36 = vsel %vm11463_vm10, %v5068_v23, %v5069_v24  ;;  %v14075_v31 = vsel %vm11463_vm10, %v9192_v54, %v5080_v17  ;;  %v5082_v22 = vrot.slane %v5080_v17, 4  ;;  %v5090_v61 = vrot.slane %v4963_v60, 5  ;;  %v17900_v54 = vld [vmem:[#allocation79_spill] sm:$0xff] }
 0x398   : > { %v5077_v47 = vsel %vm11463_vm10, %v5075_v62, %v5076_v27  ;;  %v9194_v50 = vrot.slane %v4964_v5, 9  ;;  %v5094_v56 = vrot.slane %v4965_v52, 5  ;;  %v14083_v0 = vsel %vm11463_vm10, %v9193_v46, %v5087_v41  ;;  %v17919_v24 = vld [vmem:[#allocation47_spill] sm:$0xff] }
 0x399   : > { %v5084_v48 = vsel %vm11463_vm10, %v5082_v22, %v5083_v63  ;;  %v5089_v58 = vrot.slane %v5087_v41, 4  ;;  %v5097_v12 = vrot.slane %v4966_v8, 5  ;;  %v9195_v2 = vrot.slane %v4967_v29, 9  ;;  %v17902_v63 = vld [vmem:[#allocation81_spill] sm:$0xff]  ;;  %v4110_v41 = vld [vmem:[#allocation2 + $0x30] sm:$0xc] }
 0x39a   : > { %v14087_v7 = vsel %vm11463_vm10, %v9194_v50, %v5094_v56  ;;  %v5096_v34 = vrot.slane %v5094_v56, 4  ;;  %v5101_v9 = vrot.slane %v4968_v38, 5  ;;  %v5104_v5 = vrot.slane %v4969_v20, 5  ;;  %v17895_v38 = vld [vmem:[#allocation75_spill] sm:$0xff]  ;;  %v17896_v20 = vld [vmem:[#allocation40_spill] sm:$0xff] }
 0x39b   : > { %v5091_v60 = vsel %vm11463_vm10, %v5089_v58, %v5090_v61  ;;  %v9196_v52 = vrot.slane %v4970_v42, 9  ;;  %v5108_v11 = vrot.slane %v4971_v51, 5  ;;  %v5111_v39 = vrot.slane %v4972_v13, 5  ;;  %v17899_v13 = vld [vmem:[#allocation78_spill] sm:$0xff]  ;;  %v4109_v22 = vld [vmem:[#allocation2 + $0x24] sm:$0xc] }
 0x39c   : > { %v5098_v1 = vsel %vm11463_vm10, %v5096_v34, %v5097_v12  ;;  %v14095_v53 = vsel %vm11463_vm10, %v9195_v2, %v5101_v9  ;;  %v5103_v8 = vrot.slane %v5101_v9, 4  ;;  %v14104_v42 = vmax.bf16 %v5049_v19, %v17896_v20  ;;  %v17901_v19 = vld [vmem:[#allocation80_spill] sm:$0xff]  ;;  %v17903_v61 = vld [vmem:[#allocation82_spill] sm:$0xff]  ;;  %v17904_v50 = vld [vmem:[#allocation83_spill] sm:$0xff] }
 0x39d   : > { %v14099_v45 = vsel %vm11463_vm10, %v9196_v52, %v5108_v11  ;;  %v5110_v29 = vrot.slane %v5108_v11, 4  ;;  %v14111_v14 = vmax.bf16 %v5056_v57, %v17898_v59  ;;  %v14118_v17 = vmax.bf16 %v5063_v18, %v17900_v54  ;;  %v17905_v58 = vld [vmem:[#allocation84_spill] sm:$0xff]  ;;  %v17906_v34 = vld [vmem:[#allocation86_spill] sm:$0xff]  ;;  %v17907_v9 = vld [vmem:[#allocation87_spill] sm:$0xff] }
 0x39e   : > { %17894 = vst [vmem:[#allocation71_spill] sm:$0xff] %v14099_v45  ;;  %v5105_v51 = vsel %vm11463_vm10, %v5103_v8, %v5104_v5  ;;  %v14123_v46 = vmax.bf16 %v5070_v36, %v17902_v63  ;;  %v14128_v56 = vmax.bf16 %v5077_v47, %v17904_v50  ;;  %v14133_v18 = vmax.bf16 %v5084_v48, %v17906_v34  ;;  %v4111_v2 = vld [vmem:[#allocation2 + $0x3c] sm:$0xc]  ;;  %v17908_v36 = vld [vmem:[#allocation89_spill] sm:$0xff]  ;;  %v17909_v11 = vld [vmem:[#allocation90_spill] sm:$0xff] }
 0x39f   : > { %v5112_v23 = vsel %vm11463_vm10, %v5110_v29, %v5111_v39  ;;  %v14138_v52 = vmax.bf16 %v5091_v60, %v17908_v36  ;;  %v17910_v39 = vld [vmem:[#allocation91_spill] sm:$0xff]  ;;  %v17911_v47 = vld [vmem:[#allocation45_spill] sm:$0xff]  ;;  %v17912_v59 = vld [vmem:[#allocation92_spill] sm:$0xff]  ;;  %v9203_v36 = vrot.slane %v4109_v22, 10  ;;  %v9204_v8 = vrot.slane %v4110_v41, 10 }
 0x3a0   : > { %v14143_v29 = vmax.bf16 %v5098_v1, %v17910_v39  ;;  %v14148_v54 = vmax.bf16 %v5105_v51, %v17912_v59  ;;  %v17914_v50 = vld [vmem:[#allocation70_spill] sm:$0xff]  ;;  %v17916_v5 = vld [vmem:[#allocation85_spill] sm:$0xff]  ;;  %v5276_v1 = vrot.slane %v13371_v3, 6  ;;  %v4113_v39 = vld [vmem:[#allocation2 + $0x54] sm:$0xc]  ;;  %v9205_v20 = vrot.slane %v4111_v2, 10 }
 0x3a1   : > { %v14153_v34 = vmax.bf16 %v5112_v23, %v17914_v50  ;;  %v4112_v60 = vld [vmem:[#allocation2 + $0x48] sm:$0xc]  ;;  %v5272_v12 = vrot.slane %v17916_v5, 6  ;;  %v17917_v57 = vld [vmem:[#allocation88_spill] sm:$0xff]  ;;  %v5283_v51 = vrot.slane %v13380_v25, 6  ;;  %v17920_v63 = vrot.slane %v17919_v24, 6 }
 0x3a2   : > { %v5279_v62 = vrot.slane %v17917_v57, 6  ;;  %v17918_v59 = vld [vmem:[#allocation94_spill] sm:$0xff]  ;;  %v17922_v50 = vld [vmem:[#allocation68_spill] sm:$0xff]  ;;  %v5277_v3 = vsel %vm11478_vm11, %v9204_v8, %v5276_v1  ;;  %v5278_v41 = vrot.slane %v5276_v1, 4  ;;  %v4114_v5 = vld [vmem:[#allocation2 + $0x60] sm:$0xc] }
 0x3a3   : > { %17915 = vst [vmem:[#allocation37_spill] sm:$0xff] %v14153_v34  ;;  %v5286_v27 = vrot.slane %v17918_v59, 6  ;;  %v5270_v23 = vsel %vm11478_vm11, %v9203_v36, %v17920_v63  ;;  %v5273_v22 = vsel %vm11478_vm11, %v17922_v50, %v5272_v12  ;;  %v5284_v57 = vsel %vm11478_vm11, %v9205_v20, %v5283_v51  ;;  %v4115_v24 = vld [vmem:[#allocation2 + $0x6c] sm:$0xc]  ;;  %v17923_v36 = vld [vmem:[#allocation69_spill] sm:$0xff] }
 0x3a4   : > { %v5285_v25 = vrot.slane %v5283_v51, 4  ;;  %v9206_v2 = vrot.slane %v4112_v60, 10  ;;  %v5290_v59 = vrot.slane %v13408_v21, 6  ;;  %v5280_v63 = vsel %vm11478_vm11, %v5278_v41, %v5279_v62  ;;  %v17924_v51 = vld [vmem:[#allocation95_spill] sm:$0xff]  ;;  %v4116_v50 = vld [vmem:[#allocation2 + $0x78] sm:$0xc] }
 0x3a5   : > { %v5293_v15 = vrot.slane %v17923_v36, 6  ;;  %v9207_v49 = vrot.slane %v4113_v39, 10  ;;  %v5297_v12 = vrot.slane %v13430_v44, 6  ;;  %v5300_v60 = vrot.slane %v17924_v51, 6  ;;  %v4117_v39 = vld [vmem:[#allocation2 + $0x84] sm:$0xc] }
 0x3a6   : > { %v5287_v8 = vsel %vm11478_vm11, %v5285_v25, %v5286_v27  ;;  %v5291_v1 = vsel %vm11478_vm11, %v9206_v2, %v5290_v59  ;;  %v5292_v20 = vrot.slane %v5290_v59, 4  ;;  %v9208_v62 = vrot.slane %v4114_v5, 10  ;;  %v17925_v36 = vld [vmem:[#allocation97_spill] sm:$0xff]  ;;  %v4118_v48 = vld [vmem:[#allocation2 + $0x90] sm:$0xc] }
 0x3a7   : > { %v5298_v21 = vsel %vm11478_vm11, %v9207_v49, %v5297_v12  ;;  %v5299_v34 = vrot.slane %v5297_v12, 4  ;;  %v5304_v41 = vrot.slane %v17873_v37, 6  ;;  %v5307_v27 = vrot.slane %v17925_v36, 6  ;;  %v17926_v12 = vld [vmem:[#allocation100_spill] sm:$0xff] }
 0x3a8   : > { %v5294_v44 = vsel %vm11478_vm11, %v5292_v20, %v5293_v15  ;;  %v9209_v25 = vrot.slane %v4115_v24, 10  ;;  %v5311_v2 = vrot.slane %v17880_v55, 6  ;;  %v5314_v5 = vrot.slane %v17926_v12, 6  ;;  %v17927_v24 = vld [vmem:[#allocation103_spill] sm:$0xff] }
 0x3a9   : > { %v5301_v59 = vsel %vm11478_vm11, %v5299_v34, %v5300_v60  ;;  %v5305_v51 = vsel %vm11478_vm11, %v9208_v62, %v5304_v41  ;;  %v5306_v49 = vrot.slane %v5304_v41, 4  ;;  %v9210_v15 = vrot.slane %v4116_v50, 10 }
 0x3aa   : > { %v5312_v37 = vsel %vm11478_vm11, %v9209_v25, %v5311_v2  ;;  %v5313_v45 = vrot.slane %v5311_v2, 4  ;;  %v5318_v20 = vrot.slane %v17886_v10, 6  ;;  %v5321_v36 = vrot.slane %v17927_v24, 6 }
 0x3ab   : > { %v5308_v55 = vsel %vm11478_vm11, %v5306_v49, %v5307_v27  ;;  %v9211_v34 = vrot.slane %v4117_v39, 10  ;;  %v5325_v60 = vrot.slane %v17889_v43, 6  ;;  %v5328_v25 = vrot.slane %v13877_v28, 6 }
 0x3ac   : > { %v5315_v62 = vsel %vm11478_vm11, %v5313_v45, %v5314_v5  ;;  %v5319_v41 = vsel %vm11478_vm11, %v9210_v15, %v5318_v20  ;;  %v5320_v12 = vrot.slane %v5318_v20, 4  ;;  %v9212_v2 = vrot.slane %v4118_v48, 10 }
 0x3ad   : > { %v5326_v10 = vsel %vm11478_vm11, %v9211_v34, %v5325_v60  ;;  %v5327_v50 = vrot.slane %v5325_v60, 4  ;;  %v5332_v27 = vrot.slane %v17891_v30, 6  ;;  %v5335_v43 = vrot.slane %v13902_v26, 6 }
 0x3ae   : > { %v5322_v39 = vsel %vm11478_vm11, %v5320_v12, %v5321_v36  ;;  %v17928_v45 = vmax.bf16 %v14047_v33, %v17895_v38  ;;  %v5407_v5 = vmax.bf16 %v5273_v22, %v14104_v42  ;;  %v17929_v30 = vmax.bf16 %v14051_v6, %v17897_v40 }
 0x3af   : > { %v5329_v28 = vsel %vm11478_vm11, %v5327_v50, %v5328_v25  ;;  %v5333_v15 = vsel %vm11478_vm11, %v9212_v2, %v5332_v27  ;;  %v5334_v48 = vrot.slane %v5332_v27, 4  ;;  %v14223_v24 = vmax.bf16 %v5280_v63, %v14111_v14 }
 0x3b0   : > { %v5406_v49 = vmax.bf16 %v5270_v23, %v17928_v45  ;;  %v5408_v20 = vmax.bf16 %v5277_v3, %v17929_v30  ;;  %v17930_v26 = vmax.bf16 %v14055_v4, %v17899_v13  ;;  %v5411_v38 = vmax.bf16 %v5287_v8, %v14118_v17  ;;  %5439 = vst [vmem:[#allocation3 + $0x38] sm:$0xf] %v5407_v5 }
 0x3b1   : > { %v17931_v42 = vmax.bf16 %v14065_v16, %v17901_v19  ;;  %v5336_v22 = vsel %vm11478_vm11, %v5334_v48, %v5335_v43  ;;  %v14235_v6 = vmax.bf16 %v5294_v44, %v14123_v46  ;;  %v17932_v40 = vmax.bf16 %v14069_v35, %v17903_v61  ;;  %5441 = vst [vmem:[#allocation3 + $0x58] sm:$0xf] %v14223_v24 }
 0x3b2   : > { %v5410_v33 = vmax.bf16 %v5284_v57, %v17930_v26  ;;  %5438 = vst [vmem:[#allocation3 + $0x28] sm:$0xf] %v5406_v49  ;;  %v14243_v4 = vmax.bf16 %v5301_v59, %v14128_v56  ;;  %5440 = vst [vmem:[#allocation3 + $0x48] sm:$0xf] %v5408_v20  ;;  %v17933_v16 = vmax.bf16 %v14075_v31, %v17905_v58  ;;  %v5512_v57 = vrot.slane %v14223_v24, 7 }
 0x3b3   : > { %v5412_v23 = vmax.bf16 %v5291_v1, %v17931_v42  ;;  %v14240_v14 = vmax.bf16 %v5298_v21, %v17932_v40  ;;  %v14251_v17 = vmax.bf16 %v5308_v55, %v14133_v18  ;;  %v17934_v19 = vmax.bf16 %v14083_v0, %v17907_v9  ;;  %5443 = vst [vmem:[#allocation3 + $0x78] sm:$0xf] %v5411_v38  ;;  %v17938_v9 = vld [vmem:[#allocation93_spill] sm:$0xff] }
 0x3b4   : > { %v14248_v13 = vmax.bf16 %v5305_v51, %v17933_v16  ;;  %v14259_v35 = vmax.bf16 %v5315_v62, %v14138_v52  ;;  %5442 = vst [vmem:[#allocation3 + $0x68] sm:$0xf] %v5410_v33  ;;  %v17935_v31 = vmax.bf16 %v14087_v7, %v17909_v11  ;;  %v14268_v56 = vmax.bf16 %v5322_v39, %v14143_v29  ;;  %v17937_v7 = vld [vmem:[#allocation71_spill] sm:$0xff]  ;;  %v17940_v29 = vld [vmem:[#allocation37_spill] sm:$0xff] }
 0x3b5   : > { %v14256_v46 = vmax.bf16 %v5312_v37, %v17934_v19  ;;  %5444 = vst [vmem:[#allocation3 + $0x88] sm:$0xf] %v5412_v23  ;;  %v17936_v0 = vmax.bf16 %v14095_v53, %v17911_v47  ;;  %v14276_v18 = vmax.bf16 %v5329_v28, %v14148_v54  ;;  %5445 = vst [vmem:[#allocation3 + $0x98] sm:$0xf] %v14235_v6  ;;  %v5505_v53 = vrot.slane %v5406_v49, 7 }
 0x3b6   : > { %v14265_v61 = vmax.bf16 %v5319_v41, %v17935_v31  ;;  %5446 = vst [vmem:[#allocation3 + $0xa8] sm:$0xf] %v14240_v14  ;;  %5447 = vst [vmem:[#allocation3 + $0xb8] sm:$0xf] %v14243_v4  ;;  %v17939_v52 = vmax.bf16 %v17937_v7, %v17938_v9  ;;  %v14287_v3 = vmax.bf16 %v5336_v22, %v17940_v29  ;;  %v5507_v47 = vrot.slane %v5407_v5, 7 }
 0x3b7   : > { %v14273_v58 = vmax.bf16 %v5326_v10, %v17936_v0  ;;  %5448 = vst [vmem:[#allocation3 + $0xc8] sm:$0xf] %v14248_v13  ;;  %5449 = vst [vmem:[#allocation3 + $0xd8] sm:$0xf] %v14251_v17  ;;  %v5510_v54 = vrot.slane %v5408_v20, 7  ;;  %v5515_v63 = vrot.slane %v5410_v33, 7 }
 0x3b8   : > { %v14284_v11 = vmax.bf16 %v5333_v15, %v17939_v52  ;;  %5450 = vst [vmem:[#allocation3 + $0xe8] sm:$0xf] %v14256_v46  ;;  %5451 = vst [vmem:[#allocation3 + $0xf8] sm:$0xf] %v14259_v35  ;;  %v5517_v8 = vrot.slane %v5411_v38, 7  ;;  %v5506_v1 = vrot.slane %v5505_v53, 4 }
 0x3b9   : > { %5452 = vst [vmem:[#allocation3 + $0x108] sm:$0xf] %v14265_v61  ;;  %5453 = vst [vmem:[#allocation3 + $0x118] sm:$0xf] %v14268_v56  ;;  %v5509_v21 = vrot.slane %v5507_v47, 4  ;;  %v5520_v44 = vrot.slane %v5412_v23, 7 }
 0x3ba   : > { %5454 = vst [vmem:[#allocation3 + $0x128] sm:$0xf] %v14273_v58  ;;  %5455 = vst [vmem:[#allocation3 + $0x138] sm:$0xf] %v14276_v18  ;;  %v5522_v59 = vrot.slane %v14235_v6, 7  ;;  %v5511_v51 = vrot.slane %v5510_v54, 4  ;;  %v5508_v60 = vsel %vm11308_vm2, %v5506_v1, %v5507_v47 }
 0x3bb   : > { %5631 = vst [vmem:[#allocation2 + $0x24] sm:$0xe] %v5505_v53  ;;  %5456 = vst [vmem:[#allocation3 + $0x148] sm:$0xf] %v14284_v11  ;;  %v5514_v37 = vrot.slane %v5512_v57, 4  ;;  %v5516_v55 = vrot.slane %v5515_v63, 4 }
 0x3bc   : > { %5457 = vst [vmem:[#allocation3 + $0x158] sm:$0xf] %v14287_v3  ;;  %v5519_v36 = vrot.slane %v5517_v8, 4  ;;  %5634 = vst [vmem:[#allocation2 + $0x30] sm:$0xe] %v5510_v54  ;;  %v5521_v62 = vrot.slane %v5520_v44, 4  ;;  %v5513_v25 = vsel %vm11308_vm2, %v5511_v51, %v5512_v57 }
 0x3bd   : > { %5637 = vst [vmem:[#allocation2 + $0x3c] sm:$0xe] %v5515_v63  ;;  %v5524_v41 = vrot.slane %v5522_v59, 4  ;;  %v5525_v12 = vrot.slane %v14240_v14, 7  ;;  %5633 = vst [vmem:[#allocation2 + $0x2c] sm:$0x1] %v5509_v21  ;;  %v5518_v10 = vsel %vm11308_vm2, %v5516_v55, %v5517_v8 }
 0x3be   : > { %5640 = vst [vmem:[#allocation2 + $0x48] sm:$0xe] %v5520_v44  ;;  %v5527_v50 = vrot.slane %v14243_v4, 7  ;;  %v5530_v2 = vrot.slane %v14248_v13, 7  ;;  %5632 = vst [vmem:[#allocation2 + $0x28] sm:$0xf] %v5508_v60  ;;  %v5523_v27 = vsel %vm11308_vm2, %v5521_v62, %v5522_v59 }
 0x3bf   : > { %5636 = vst [vmem:[#allocation2 + $0x38] sm:$0x1] %v5514_v37  ;;  %5639 = vst [vmem:[#allocation2 + $0x44] sm:$0x1] %v5519_v36  ;;  %v5526_v39 = vrot.slane %v5525_v12, 4  ;;  %v5532_v43 = vrot.slane %v14251_v17, 7 }
 0x3c0   : > { %v5535_v45 = vrot.slane %v14256_v46, 7  ;;  %5635 = vst [vmem:[#allocation2 + $0x34] sm:$0xf] %v5513_v25  ;;  %5638 = vst [vmem:[#allocation2 + $0x40] sm:$0xf] %v5518_v10  ;;  %v5529_v49 = vrot.slane %v5527_v50, 4 }
 0x3c1   : > { %5642 = vst [vmem:[#allocation2 + $0x50] sm:$0x1] %v5524_v41  ;;  %5643 = vst [vmem:[#allocation2 + $0x54] sm:$0xe] %v5525_v12  ;;  %v5531_v5 = vrot.slane %v5530_v2, 4  ;;  %v5537_v28 = vrot.slane %v14259_v35, 7  ;;  %v5528_v48 = vsel %vm11308_vm2, %v5526_v39, %v5527_v50 }
 0x3c2   : > { %v5540_v15 = vrot.slane %v14265_v61, 7  ;;  %5641 = vst [vmem:[#allocation2 + $0x4c] sm:$0xf] %v5523_v27  ;;  %5646 = vst [vmem:[#allocation2 + $0x60] sm:$0xe] %v5530_v2  ;;  %v5534_v30 = vrot.slane %v5532_v43, 4 }
 0x3c3   : > { %v5536_v20 = vrot.slane %v5535_v45, 4  ;;  %v5542_v24 = vrot.slane %v14268_v56, 7  ;;  %5649 = vst [vmem:[#allocation2 + $0x6c] sm:$0xe] %v5535_v45  ;;  %v5533_v26 = vsel %vm11308_vm2, %v5531_v5, %v5532_v43  ;;  %v5539_v33 = vrot.slane %v5537_v28, 4 }
 0x3c4   : > { %v5541_v38 = vrot.slane %v5540_v15, 4  ;;  %v5545_v42 = vrot.slane %v14273_v58, 7  ;;  %5644 = vst [vmem:[#allocation2 + $0x58] sm:$0xf] %v5528_v48  ;;  %5645 = vst [vmem:[#allocation2 + $0x5c] sm:$0x1] %v5529_v49 }
 0x3c5   : > { %5652 = vst [vmem:[#allocation2 + $0x78] sm:$0xe] %v5540_v15  ;;  %v5538_v23 = vsel %vm11308_vm2, %v5536_v20, %v5537_v28  ;;  %v5544_v22 = vrot.slane %v5542_v24, 4  ;;  %v5547_v6 = vrot.slane %v14276_v18, 7  ;;  %v5550_v40 = vrot.slane %v14284_v11, 7 }
 0x3c6   : > { %5647 = vst [vmem:[#allocation2 + $0x64] sm:$0xf] %v5533_v26  ;;  %5648 = vst [vmem:[#allocation2 + $0x68] sm:$0x1] %v5534_v30  ;;  %v5543_v14 = vsel %vm11308_vm2, %v5541_v38, %v5542_v24  ;;  %v5546_v4 = vrot.slane %v5545_v42, 4  ;;  %v5552_v16 = vrot.slane %v14287_v3, 7 }
 0x3c7   : > { %5650 = vst [vmem:[#allocation2 + $0x70] sm:$0xf] %v5538_v23  ;;  %5651 = vst [vmem:[#allocation2 + $0x74] sm:$0x1] %v5539_v33  ;;  %v5549_v13 = vrot.slane %v5547_v6, 4  ;;  %v5551_v17 = vrot.slane %v5550_v40, 4 }
 0x3c8   : > { %5655 = vst [vmem:[#allocation2 + $0x84] sm:$0xe] %v5545_v42  ;;  %5653 = vst [vmem:[#allocation2 + $0x7c] sm:$0xf] %v5543_v14  ;;  %v5548_v19 = vsel %vm11308_vm2, %v5546_v4, %v5547_v6  ;;  %v5554_v46 = vrot.slane %v5552_v16, 4 }
 0x3c9   : > { %5654 = vst [vmem:[#allocation2 + $0x80] sm:$0x1] %v5544_v22  ;;  %5658 = vst [vmem:[#allocation2 + $0x90] sm:$0xe] %v5550_v40  ;;  %v5553_v35 = vsel %vm11308_vm2, %v5551_v17, %v5552_v16  ;;  %v14333_v31 = vld [vmem:[#allocation2 + $0xc] sm:$0xf] }
 0x3ca   : > { %5656 = vst [vmem:[#allocation2 + $0x88] sm:$0xf] %v5548_v19  ;;  %5657 = vst [vmem:[#allocation2 + $0x8c] sm:$0x1] %v5549_v13  ;;  %v14335_v61 = vld [vmem:[#allocation2 + $0x10] sm:$0xf] }
 0x3cb   : > { %5659 = vst [vmem:[#allocation2 + $0x94] sm:$0xf] %v5553_v35  ;;  %5660 = vst [vmem:[#allocation2 + $0x98] sm:$0x1] %v5554_v46  ;;  %v14337_v56 = vld [vmem:[#allocation2 + $0x14] sm:$0x3] }
 0x3cc   : > { %v14339_v0 = vld [vmem:[#allocation2] sm:$0xf]  ;;  %v14341_v58 = vld [vmem:[#allocation2 + $0x4] sm:$0xf]  ;;  %v14343_v18 = vld [vmem:[#allocation2 + $0x8] sm:$0x3] }
 0x3cd   : > { %v14345_v7 = vld [vmem:[#allocation2 + $0x5c] sm:$0x3]  ;;  %v14347_v9 = vld [vmem:[#allocation2 + $0x6c] sm:$0xf]  ;;  %v14349_v52 = vld [vmem:[#allocation2 + $0x68] sm:$0x3] }
 0x3ce   : > { %17942 = vst [vmem:[#allocation56_spill] sm:$0xff] %v14345_v7  ;;  %17943 = vst [vmem:[#allocation55_spill] sm:$0xff] %v14347_v9  ;;  %v14351_v11 = vld [vmem:[#allocation2 + $0xc] sm:$0xf]  ;;  %v14353_v29 = vld [vmem:[#allocation2 + $0x10] sm:$0xf] }
 0x3cf   : > { %17944 = vst [vmem:[#allocation31_spill] sm:$0xff] %v14349_v52  ;;  %v14355_v3 = vld [vmem:[#allocation2 + $0x14] sm:$0x3]  ;;  %v14357_v53 = vld [vmem:[#allocation2 + $0x70] sm:$0xf] }
 0x3d0   : > { %17945 = vst [vmem:[#allocation99_spill] sm:$0xff] %v14357_v53  ;;  %v14359_v47 = vld [vmem:[#allocation2 + $0x18] sm:$0xf]  ;;  %v14361_v54 = vld [vmem:[#allocation2 + $0x1c] sm:$0xf] }
 0x3d1   : > { %v14363_v57 = vld [vmem:[#allocation2 + $0x78] sm:$0xf]  ;;  %v14365_v63 = vld [vmem:[#allocation2 + $0x7c] sm:$0xf]  ;;  %v14369_v1 = vld [vmem:[#allocation2 + $0x20] sm:$0x3] }
 0x3d2   : > { %17946 = vst [vmem:[#allocation52_spill] sm:$0xff] %v14363_v57  ;;  %17947 = vst [vmem:[#allocation104_spill] sm:$0xff] %v14365_v63  ;;  %v14371_v21 = vld [vmem:[#allocation2 + $0x24] sm:$0xf]  ;;  %v14373_v44 = vld [vmem:[#allocation2 + $0x28] sm:$0xf] }
 0x3d3   : > { %v14379_v37 = vld [vmem:[#allocation2 + $0x18] sm:$0xf]  ;;  %v14381_v55 = vld [vmem:[#allocation2 + $0x2c] sm:$0x3]  ;;  %v14383_v36 = vld [vmem:[#allocation2 + $0x30] sm:$0xf] }
 0x3d4   : > { %v14385_v60 = vld [vmem:[#allocation2 + $0x34] sm:$0xf]  ;;  %v14387_v62 = vld [vmem:[#allocation2 + $0x1c] sm:$0xf]  ;;  %v14389_v41 = vld [vmem:[#allocation2 + $0x20] sm:$0x3] }
 0x3d5   : > { %v14391_v12 = vld [vmem:[#allocation2 + $0x24] sm:$0xf]  ;;  %v14393_v25 = vld [vmem:[#allocation2 + $0x28] sm:$0xf]  ;;  %v14395_v10 = vld [vmem:[#allocation2 + $0x38] sm:$0x3] }
 0x3d6   : > { %v14397_v50 = vld [vmem:[#allocation2 + $0x3c] sm:$0xf]  ;;  %v14399_v2 = vld [vmem:[#allocation2 + $0x40] sm:$0xf]  ;;  %v14407_v45 = vld [vmem:[#allocation2 + $0x2c] sm:$0x3] }
 0x3d7   : > { %17948 = vst [vmem:[#allocation96_spill] sm:$0xff] %v14399_v2  ;;  %v14409_v49 = vld [vmem:[#allocation2 + $0x30] sm:$0xf]  ;;  %v14411_v5 = vld [vmem:[#allocation2 + $0x34] sm:$0xf] }
 0x3d8   : > { %17949 = vst [vmem:[#allocation106_spill] sm:$0xff] %v14411_v5  ;;  %v14413_v28 = vld [vmem:[#allocation2 + $0x38] sm:$0x3]  ;;  %v14415_v15 = vld [vmem:[#allocation2 + $0x44] sm:$0x3] }
 0x3d9   : > { %17950 = vst [vmem:[#allocation49_spill] sm:$0xff] %v14413_v28  ;;  %17951 = vst [vmem:[#allocation59_spill] sm:$0xff] %v14415_v15  ;;  %v14417_v48 = vld [vmem:[#allocation2 + $0x48] sm:$0xf]  ;;  %v14419_v30 = vld [vmem:[#allocation2 + $0x4c] sm:$0xf] }
 0x3da   : > { %17952 = vst [vmem:[#allocation38_spill] sm:$0xff] %v14417_v48  ;;  %17953 = vst [vmem:[#allocation101_spill] sm:$0xff] %v14419_v30  ;;  %v14421_v20 = vld [vmem:[#allocation2 + $0x3c] sm:$0xf]  ;;  %v14423_v24 = vld [vmem:[#allocation2 + $0x40] sm:$0xf] }
 0x3db   : > { %17954 = vst [vmem:[#allocation54_spill] sm:$0xff] %v14421_v20  ;;  %17955 = vst [vmem:[#allocation108_spill] sm:$0xff] %v14423_v24  ;;  %v14425_v26 = vld [vmem:[#allocation2 + $0x44] sm:$0x3]  ;;  %v14427_v33 = vld [vmem:[#allocation2 + $0x48] sm:$0xf] }
 0x3dc   : > { %17956 = vst [vmem:[#allocation98_spill] sm:$0xff] %v14425_v26  ;;  %17957 = vst [vmem:[#allocation41_spill] sm:$0xff] %v14427_v33  ;;  %v14429_v38 = vld [vmem:[#allocation2 + $0x60] sm:$0xf]  ;;  %v14431_v42 = vld [vmem:[#allocation2 + $0x64] sm:$0xf] }
 0x3dd   : > { %17958 = vst [vmem:[#allocation50_spill] sm:$0xff] %v14429_v38  ;;  %17959 = vst [vmem:[#allocation105_spill] sm:$0xff] %v14431_v42  ;;  %v14433_v23 = vld [vmem:[#allocation2 + $0x50] sm:$0x3]  ;;  %v14435_v22 = vld [vmem:[#allocation2 + $0x54] sm:$0xf] }
 0x3de   : > { %17960 = vst [vmem:[#allocation64_spill] sm:$0xff] %v14433_v23  ;;  %17961 = vst [vmem:[#allocation102_spill] sm:$0xff] %v14435_v22  ;;  %v14437_v6 = vld [vmem:[#allocation2 + $0x58] sm:$0xf]  ;;  %v14447_v13 = vld [vmem:[#allocation2 + $0x4c] sm:$0xf] }
 0x3df   : > { %17962 = vst [vmem:[#allocation42_spill] sm:$0xff] %v14437_v6  ;;  %17963 = vst [vmem:[#allocation39_spill] sm:$0xff] %v14447_v13  ;;  %v14449_v17 = vld [vmem:[#allocation2 + $0x50] sm:$0x3]  ;;  %v14451_v19 = vld [vmem:[#allocation2 + $0x54] sm:$0xf] }
 0x3e0   : > { %17964 = vst [vmem:[#allocation107_spill] sm:$0xff] %v14449_v17  ;;  %17965 = vst [vmem:[#allocation51_spill] sm:$0xff] %v14451_v19  ;;  %v14453_v46 = vld [vmem:[#allocation2 + $0x58] sm:$0xf]  ;;  %v14455_v35 = vld [vmem:[#allocation2 + $0x5c] sm:$0x3] }
 0x3e1   : > { %17966 = vst [vmem:[#allocation36_spill] sm:$0xff] %v14453_v46  ;;  %17967 = vst [vmem:[#allocation73_spill] sm:$0xff] %v14455_v35  ;;  %v14457_v51 = vld [vmem:[#allocation2 + $0x60] sm:$0xf]  ;;  %v14459_v59 = vld [vmem:[#allocation2 + $0x64] sm:$0xf] }
 0x3e2   : > { %17968 = vst [vmem:[#allocation74_spill] sm:$0xff] %v14457_v51  ;;  %17969 = vst [vmem:[#allocation75_spill] sm:$0xff] %v14459_v59  ;;  %v14469_v40 = vld [vmem:[#allocation2 + $0x1c] sm:$0xf]  ;;  %v14471_v43 = vld [vmem:[#allocation2 + $0x68] sm:$0x3] }
 0x3e3   : > { %17970 = vst [vmem:[#allocation40_spill] sm:$0xff] %v14471_v43  ;;  %v14473_v39 = vld [vmem:[#allocation2 + $0x6c] sm:$0xf]  ;;  %v14475_v27 = vld [vmem:[#allocation2 + $0x70] sm:$0xf] }
 0x3e4   : > { %17971 = vst [vmem:[#allocation76_spill] sm:$0xff] %v14473_v39  ;;  %17972 = vst [vmem:[#allocation77_spill] sm:$0xff] %v14475_v27  ;;  %v5772_v53 = vld [vmem:[#allocation2 + $0x18] sm:$0xf]  ;;  %v14485_v63 = vld [vmem:[#allocation2 + $0x74] sm:$0x3] }
 0x3e5   : > { %17973 = vst [vmem:[#allocation78_spill] sm:$0xff] %v14485_v63  ;;  %v14487_v9 = vld [vmem:[#allocation2 + $0x20] sm:$0x3]  ;;  %v14489_v57 = vld [vmem:[#allocation2 + $0x24] sm:$0xf] }
 0x3e6   : > { %v14491_v34 = vld [vmem:[#allocation2 + $0x28] sm:$0xf]  ;;  %v14501_v32 = vld [vmem:[#allocation2 + $0x2c] sm:$0x3]  ;;  %v14503_v7 = vld [vmem:[#allocation2 + $0x30] sm:$0xf] }
 0x3e7   : > { %v14505_v52 = vld [vmem:[#allocation2 + $0x34] sm:$0xf]  ;;  %v5820_v28 = vld [vmem:[#allocation2 + $0x24] sm:$0xf]  ;;  %v5821_v15 = vld [vmem:[#allocation2 + $0x28] sm:$0xf] }
 0x3e8   : > { %v14515_v33 = vld [vmem:[#allocation2 + $0x38] sm:$0x3]  ;;  %v14517_v22 = vld [vmem:[#allocation2 + $0x3c] sm:$0xf]  ;;  %v14519_v26 = vld [vmem:[#allocation2 + $0x40] sm:$0xf]  ;;  %v5964_v4 = vmax.bf16 %v5820_v28, %v5772_v53  ;;  %v5965_v19 = vmax.bf16 %v5821_v15, %v14469_v40 }
 0x3e9   : > { %v5822_v23 = vld [vmem:[#allocation2 + $0x2c] sm:$0x3]  ;;  %v5823_v24 = vld [vmem:[#allocation2 + $0x30] sm:$0xf]  ;;  %v14521_v30 = vld [vmem:[#allocation2 + $0x34] sm:$0xf] }
 0x3ea   : > { %v14528_v14 = vld [vmem:[#allocation2 + $0x44] sm:$0x3]  ;;  %v14530_v46 = vld [vmem:[#allocation2 + $0x48] sm:$0xf]  ;;  %v14532_v59 = vld [vmem:[#allocation2 + $0x4c] sm:$0xf]  ;;  %v5966_v28 = vmax.bf16 %v5822_v23, %v14487_v9  ;;  %v5967_v15 = vmax.bf16 %v5823_v24, %v14489_v57  ;;  %v5968_v40 = vmax.bf16 %v14521_v30, %v14491_v34  ;;  %v17974_v34 = vmax.bf16 %v14333_v31, %v14339_v0 }
 0x3eb   : > { %v14534_v51 = vld [vmem:[#allocation2 + $0x60] sm:$0xf]  ;;  %v14536_v17 = vld [vmem:[#allocation2 + $0x64] sm:$0xf]  ;;  %v5825_v35 = vld [vmem:[#allocation2 + $0x38] sm:$0x3]  ;;  %v17976_v31 = vmax.bf16 %v14335_v61, %v14341_v58 }
 0x3ec   : > { %v14538_v13 = vld [vmem:[#allocation2 + $0x3c] sm:$0xf]  ;;  %v14540_v8 = vld [vmem:[#allocation2 + $0x40] sm:$0xf]  ;;  %v14548_v16 = vld [vmem:[#allocation2 + $0x50] sm:$0x3]  ;;  %v5969_v53 = vmax.bf16 %v5825_v35, %v14501_v32  ;;  %v14564_v30 = vmax.bf16 %v5964_v4, %v17974_v34 }
 0x3ed   : > { %v14550_v42 = vld [vmem:[#allocation2 + $0x54] sm:$0xf]  ;;  %v14552_v27 = vld [vmem:[#allocation2 + $0x58] sm:$0xf]  ;;  %v14554_v38 = vld [vmem:[#allocation2 + $0x68] sm:$0x3]  ;;  %v5970_v9 = vmax.bf16 %v14538_v13, %v14503_v7  ;;  %v5971_v57 = vmax.bf16 %v14540_v8, %v14505_v52  ;;  %v14578_v0 = vmax.bf16 %v5965_v19, %v17976_v31 }
 0x3ee   : > { %v5828_v39 = vld [vmem:[#allocation2 + $0x44] sm:$0x3]  ;;  %v5829_v6 = vld [vmem:[#allocation2 + $0x48] sm:$0xf]  ;;  %v5830_v20 = vld [vmem:[#allocation2 + $0x4c] sm:$0xf] }
 0x3ef   : > { %17975 = vst [vmem:[#allocation79_spill] sm:$0xff] %v14564_v30  ;;  %v14566_v24 = vld [vmem:[#allocation2 + $0x5c] sm:$0x3]  ;;  %v14568_v23 = vld [vmem:[#allocation2 + $0x78] sm:$0xf]  ;;  %v5972_v35 = vmax.bf16 %v5828_v39, %v14515_v33  ;;  %v5973_v7 = vmax.bf16 %v5829_v6, %v14517_v22  ;;  %v5974_v52 = vmax.bf16 %v5830_v20, %v14519_v26  ;;  %17977 = vst [vmem:[#allocation80_spill] sm:$0xff] %v14578_v0 }
 0x3f0   : > { %v14570_v43 = vld [vmem:[#allocation2 + $0x7c] sm:$0xf]  ;;  %v5831_v63 = vld [vmem:[#allocation2 + $0x50] sm:$0x3]  ;;  %v5832_v48 = vld [vmem:[#allocation2 + $0x54] sm:$0xf]  ;;  %v17978_v20 = vmax.bf16 %v14337_v56, %v14343_v18 }
 0x3f1   : > { %v5833_v32 = vld [vmem:[#allocation2 + $0x58] sm:$0xf]  ;;  %v5793_v8 = vld [vmem:[#allocation2 + $0x6c] sm:$0xf]  ;;  %v5794_v4 = vld [vmem:[#allocation2 + $0x70] sm:$0xf]  ;;  %v5975_v2 = vmax.bf16 %v5831_v63, %v14528_v14  ;;  %v5976_v39 = vmax.bf16 %v5832_v48, %v14530_v46  ;;  %v17979_v63 = vmax.bf16 %v14359_v47, %v14351_v11 }
 0x3f2   : > { %v14580_v13 = vld [vmem:[#allocation2 + $0x80] sm:$0x3]  ;;  %v5834_v34 = vld [vmem:[#allocation2 + $0x5c] sm:$0x3]  ;;  %v5836_v5 = vld [vmem:[#allocation2 + $0x64] sm:$0xf]  ;;  %v5977_v33 = vmax.bf16 %v5833_v32, %v14532_v59  ;;  %v14588_v26 = vmax.bf16 %v5966_v28, %v17978_v20  ;;  %v17981_v32 = vmax.bf16 %v14369_v1, %v14355_v3  ;;  %v17984_v3 = vmax.bf16 %v14381_v55, %v14389_v41 }
 0x3f3   : > { %v5835_v30 = vld [vmem:[#allocation2 + $0x60] sm:$0xf]  ;;  %v5795_v61 = vld [vmem:[#allocation2 + $0x74] sm:$0x3]  ;;  %v5837_v58 = vld [vmem:[#allocation2 + $0x68] sm:$0x3]  ;;  %v5978_v19 = vmax.bf16 %v5834_v34, %v14548_v16  ;;  %v5980_v0 = vmax.bf16 %v5836_v5, %v14552_v27  ;;  %v14596_v48 = vmax.bf16 %v5967_v15, %v17979_v63  ;;  %v17980_v16 = vmax.bf16 %v14361_v54, %v14353_v29 }
 0x3f4   : > { %v5838_v22 = vld [vmem:[#allocation2 + $0x6c] sm:$0xf]  ;;  %v5839_v6 = vld [vmem:[#allocation2 + $0x70] sm:$0xf]  ;;  %v5979_v31 = vmax.bf16 %v5835_v30, %v14550_v42  ;;  %v5840_v59 = vld [vmem:[#allocation2 + $0x74] sm:$0x3]  ;;  %v5981_v18 = vmax.bf16 %v5837_v58, %v14566_v24  ;;  %v14610_v24 = vmax.bf16 %v5969_v53, %v17981_v32  ;;  %v17982_v54 = vmax.bf16 %v14371_v21, %v14379_v37 }
 0x3f5   : > { %v5841_v14 = vld [vmem:[#allocation2 + $0x78] sm:$0xf]  ;;  %v5842_v56 = vld [vmem:[#allocation2 + $0x7c] sm:$0xf]  ;;  %v5982_v46 = vmax.bf16 %v5838_v22, %v14534_v51  ;;  %v5983_v28 = vmax.bf16 %v5839_v6, %v14536_v17  ;;  %v14604_v42 = vmax.bf16 %v5968_v40, %v17980_v16  ;;  %v5843_v27 = vld [vmem:[#allocation2 + $0x80] sm:$0x3]  ;;  %v5984_v11 = vmax.bf16 %v5840_v59, %v14554_v38 }
 0x3f6   : > { %v5844_v5 = vld [vmem:[#allocation2 + $0x84] sm:$0xf]  ;;  %v5845_v30 = vld [vmem:[#allocation2 + $0x88] sm:$0xf]  ;;  %v5985_v47 = vmax.bf16 %v5841_v14, %v5793_v8  ;;  %v5986_v15 = vmax.bf16 %v5842_v56, %v5794_v4  ;;  %v5846_v51 = vld [vmem:[#allocation2 + $0x8c] sm:$0x3]  ;;  %v5987_v34 = vmax.bf16 %v5843_v27, %v5795_v61  ;;  %v14617_v40 = vmax.bf16 %v5970_v9, %v17982_v54 }
 0x3f7   : > { %v5988_v17 = vmax.bf16 %v5844_v5, %v14568_v23  ;;  %v5989_v29 = vmax.bf16 %v5845_v30, %v14570_v43  ;;  %v5990_v38 = vmax.bf16 %v5846_v51, %v14580_v13  ;;  %v17983_v8 = vmax.bf16 %v14373_v44, %v14387_v62  ;;  %v14635_v21 = vld [vmem:[#allocation2 + $0x30] sm:$0xf]  ;;  %v18002_v22 = vld [vmem:[#allocation98_spill] sm:$0xff]  ;;  %v5872_v59 = vld [vmem:[#allocation2 + $0x40] sm:$0xf] }
 0x3f8   : > { %v14628_v1 = vmax.bf16 %v5972_v35, %v17984_v3  ;;  %v17985_v43 = vmax.bf16 %v14383_v36, %v14391_v12  ;;  %v17986_v37 = vmax.bf16 %v14385_v60, %v14393_v25  ;;  %v17987_v44 = vmax.bf16 %v14395_v10, %v14407_v45  ;;  %v17989_v36 = vld [vmem:[#allocation96_spill] sm:$0xff]  ;;  %v17990_v12 = vld [vmem:[#allocation106_spill] sm:$0xff]  ;;  %v14657_v35 = vld [vmem:[#allocation2 + $0x34] sm:$0xf] }
 0x3f9   : > { %v14623_v4 = vmax.bf16 %v5971_v57, %v17983_v8  ;;  %v17988_v55 = vmax.bf16 %v14397_v50, %v14409_v49  ;;  %v17991_v57 = vmax.bf16 %v17989_v36, %v17990_v12  ;;  %v5870_v60 = vld [vmem:[#allocation2 + $0x38] sm:$0x3]  ;;  %v5871_v25 = vld [vmem:[#allocation2 + $0x3c] sm:$0xf]  ;;  %v17996_v45 = vld [vmem:[#allocation54_spill] sm:$0xff] }
 0x3fa   : > { %v14633_v53 = vmax.bf16 %v5973_v7, %v17985_v43  ;;  %v14640_v9 = vmax.bf16 %v5974_v52, %v17986_v37  ;;  %v14645_v62 = vmax.bf16 %v5975_v2, %v17987_v44  ;;  %v17992_v7 = vld [vmem:[#allocation59_spill] sm:$0xff]  ;;  %v17993_v52 = vld [vmem:[#allocation49_spill] sm:$0xff]  ;;  %v17995_v2 = vld [vmem:[#allocation38_spill] sm:$0xff] }
 0x3fb   : > { %v14650_v41 = vmax.bf16 %v5976_v39, %v17988_v55  ;;  %v14655_v23 = vmax.bf16 %v5977_v33, %v17991_v57  ;;  %v17994_v13 = vmax.bf16 %v17992_v7, %v17993_v52  ;;  %v17997_v20 = vmax.bf16 %v17995_v2, %v17996_v45  ;;  %v17998_v49 = vld [vmem:[#allocation101_spill] sm:$0xff]  ;;  %v17999_v39 = vld [vmem:[#allocation108_spill] sm:$0xff]  ;;  %v14679_v56 = vld [vmem:[#allocation2 + $0x48] sm:$0xf] }
 0x3fc   : > { %v18000_v61 = vmax.bf16 %v17998_v49, %v17999_v39  ;;  %v18001_v33 = vld [vmem:[#allocation64_spill] sm:$0xff]  ;;  %v5873_v14 = vld [vmem:[#allocation2 + $0x44] sm:$0x3]  ;;  %v18008_v30 = vld [vmem:[#allocation39_spill] sm:$0xff] }
 0x3fd   : > { %v14662_v10 = vmax.bf16 %v5978_v19, %v17994_v13  ;;  %v14667_v50 = vmax.bf16 %v5979_v31, %v17997_v20  ;;  %v18003_v6 = vmax.bf16 %v18001_v33, %v18002_v22  ;;  %v18004_v19 = vld [vmem:[#allocation102_spill] sm:$0xff]  ;;  %v18005_v16 = vld [vmem:[#allocation41_spill] sm:$0xff]  ;;  %v18011_v54 = vld [vmem:[#allocation107_spill] sm:$0xff] }
 0x3fe   : > { %v14672_v58 = vmax.bf16 %v5980_v0, %v18000_v61  ;;  %v18006_v27 = vmax.bf16 %v18004_v19, %v18005_v16  ;;  %v18007_v31 = vld [vmem:[#allocation42_spill] sm:$0xff]  ;;  %v18010_v0 = vld [vmem:[#allocation73_spill] sm:$0xff]  ;;  %v18014_v43 = vld [vmem:[#allocation51_spill] sm:$0xff] }
 0x3ff   : > { %v14677_v63 = vmax.bf16 %v5981_v18, %v18003_v6  ;;  %v18009_v32 = vmax.bf16 %v18007_v31, %v18008_v30  ;;  %v18012_v8 = vmax.bf16 %v18010_v0, %v18011_v54  ;;  %v18013_v18 = vld [vmem:[#allocation74_spill] sm:$0xff]  ;;  %v5876_v36 = vld [vmem:[#allocation2 + $0x50] sm:$0x3]  ;;  %v18017_v12 = vld [vmem:[#allocation36_spill] sm:$0xff] }
 0x400   : > { %v14684_v5 = vmax.bf16 %v5982_v46, %v18006_v27  ;;  %v18015_v37 = vmax.bf16 %v18013_v18, %v18014_v43  ;;  %v14701_v55 = vld [vmem:[#allocation2 + $0x4c] sm:$0xf]  ;;  %v18016_v46 = vld [vmem:[#allocation75_spill] sm:$0xff]  ;;  %v18020_v52 = vld [vmem:[#allocation56_spill] sm:$0xff]  ;;  %v6064_v18 = vmax.bf16 %v14604_v42, %v5872_v59  ;;  %v6065_v43 = vmax.bf16 %v14610_v24, %v5873_v14 }
 0x401   : > { %v14689_v51 = vmax.bf16 %v5983_v28, %v18009_v32  ;;  %v14694_v3 = vmax.bf16 %v5984_v11, %v18012_v8  ;;  %v18018_v57 = vmax.bf16 %v18016_v46, %v18017_v12  ;;  %v18019_v28 = vld [vmem:[#allocation31_spill] sm:$0xff]  ;;  %v18023_v11 = vld [vmem:[#allocation76_spill] sm:$0xff]  ;;  %v18024_v45 = vld [vmem:[#allocation50_spill] sm:$0xff] }
 0x402   : > { %v14699_v44 = vmax.bf16 %v5985_v47, %v18015_v37  ;;  %v18021_v13 = vmax.bf16 %v18019_v28, %v18020_v52  ;;  %v18025_v20 = vmax.bf16 %v18023_v11, %v18024_v45  ;;  %v18026_v47 = vld [vmem:[#allocation77_spill] sm:$0xff]  ;;  %v5877_v22 = vld [vmem:[#allocation2 + $0x54] sm:$0xf]  ;;  %v5878_v6 = vld [vmem:[#allocation2 + $0x58] sm:$0xf] }
 0x403   : > { %v14706_v7 = vmax.bf16 %v5986_v15, %v18018_v57  ;;  %v18027_v39 = vld [vmem:[#allocation105_spill] sm:$0xff]  ;;  %v18029_v19 = vld [vmem:[#allocation78_spill] sm:$0xff]  ;;  %v18030_v15 = vld [vmem:[#allocation40_spill] sm:$0xff]  ;;  %v6070_v12 = vmax.bf16 %v14640_v9, %v5878_v6  ;;  %6112 = vst [vmem:[#allocation2 + $0x28] sm:$0xf] %v6064_v18 }
 0x404   : > { %v14711_v2 = vmax.bf16 %v5987_v34, %v18021_v13  ;;  %v14716_v49 = vmax.bf16 %v5988_v17, %v18025_v20  ;;  %v18028_v61 = vmax.bf16 %v18026_v47, %v18027_v39  ;;  %v18031_v16 = vmax.bf16 %v18029_v19, %v18030_v15  ;;  %v18032_v34 = vld [vmem:[#allocation79_spill] sm:$0xff]  ;;  %v18033_v30 = vld [vmem:[#allocation80_spill] sm:$0xff]  ;;  %v5880_v54 = vld [vmem:[#allocation2 + $0x60] sm:$0xf]  ;;  %6113 = vst [vmem:[#allocation2 + $0x2c] sm:$0x3] %v6065_v43 }
 0x405   : > { %v6060_v31 = vmax.bf16 %v18032_v34, %v14635_v21  ;;  %v6061_v32 = vmax.bf16 %v18033_v30, %v14657_v35  ;;  %v6062_v17 = vmax.bf16 %v14588_v26, %v5870_v60  ;;  %v5879_v0 = vld [vmem:[#allocation2 + $0x5c] sm:$0x3]  ;;  %v5881_v8 = vld [vmem:[#allocation2 + $0x64] sm:$0xf]  ;;  %v5882_v37 = vld [vmem:[#allocation2 + $0x68] sm:$0x3]  ;;  %v6067_v35 = vmax.bf16 %v14623_v4, %v14701_v55 }
 0x406   : > { %18022 = vst [vmem:[#allocation81_spill] sm:$0xff] %v14711_v2  ;;  %v14721_v33 = vmax.bf16 %v5989_v29, %v18028_v61  ;;  %v14726_v27 = vmax.bf16 %v5990_v38, %v18031_v16  ;;  %v6063_v29 = vmax.bf16 %v14596_v48, %v5871_v25  ;;  %v6066_v38 = vmax.bf16 %v14617_v40, %v14679_v56  ;;  %v5883_v46 = vld [vmem:[#allocation2 + $0x6c] sm:$0xf]  ;;  %v5884_v21 = vld [vmem:[#allocation2 + $0x70] sm:$0xf] }
 0x407   : > { %v6068_v26 = vmax.bf16 %v14628_v1, %v5876_v36  ;;  %v6069_v60 = vmax.bf16 %v14633_v53, %v5877_v22  ;;  %6110 = vst [vmem:[#allocation2 + $0x20] sm:$0x3] %v6062_v17  ;;  %v5885_v48 = vld [vmem:[#allocation2 + $0x74] sm:$0x3]  ;;  %v5886_v42 = vld [vmem:[#allocation2 + $0x78] sm:$0xf]  ;;  %v6071_v24 = vmax.bf16 %v14645_v62, %v5879_v0  ;;  %v6072_v40 = vmax.bf16 %v14650_v41, %v5880_v54 }
 0x408   : > { %v5887_v25 = vld [vmem:[#allocation2 + $0x7c] sm:$0xf]  ;;  %v6073_v59 = vmax.bf16 %v14655_v23, %v5881_v8  ;;  %v6074_v14 = vmax.bf16 %v14662_v10, %v5882_v37  ;;  %6111 = vst [vmem:[#allocation2 + $0x24] sm:$0xf] %v6063_v29  ;;  %v5888_v4 = vld [vmem:[#allocation2 + $0x80] sm:$0x3]  ;;  %v6075_v9 = vmax.bf16 %v14667_v50, %v5883_v46  ;;  %v6076_v56 = vmax.bf16 %v14672_v58, %v5884_v21 }
 0x409   : > { %v5889_v1 = vld [vmem:[#allocation2 + $0x84] sm:$0xf]  ;;  %v5890_v53 = vld [vmem:[#allocation2 + $0x88] sm:$0xf]  ;;  %v6077_v55 = vmax.bf16 %v14677_v63, %v5885_v48  ;;  %v6078_v62 = vmax.bf16 %v14684_v5, %v5886_v42  ;;  %6116 = vst [vmem:[#allocation2 + $0x38] sm:$0x3] %v6068_v26  ;;  %v6079_v36 = vmax.bf16 %v14689_v51, %v5887_v25  ;;  %v6080_v57 = vmax.bf16 %v14694_v3, %v5888_v4 }
 0x40a   : > { %6117 = vst [vmem:[#allocation2 + $0x3c] sm:$0xf] %v6069_v60  ;;  %6118 = vst [vmem:[#allocation2 + $0x40] sm:$0xf] %v6070_v12  ;;  %v5892_v41 = vld [vmem:[#allocation2 + $0x90] sm:$0xf]  ;;  %v6081_v28 = vmax.bf16 %v14699_v44, %v5889_v1  ;;  %v6082_v50 = vmax.bf16 %v14706_v7, %v5890_v53  ;;  %v9679_v52 = vcombine.low %v6060_v31, %v6061_v32 }
 0x40b   : > { %v5893_v23 = vld [vmem:[#allocation2 + $0x94] sm:$0xf]  ;;  %v5894_v10 = vld [vmem:[#allocation2 + $0x98] sm:$0x3]  ;;  %6119 = vst [vmem:[#allocation2 + $0x44] sm:$0x3] %v6071_v24  ;;  %v6084_v58 = vmax.bf16 %v14716_v49, %v5892_v41  ;;  %v9680_v3 = vcombine.low %v6066_v38, %v6067_v35  ;;  %v9682_v44 = vcombine.low %v6072_v40, %v6073_v59  ;;  %v9684_v11 = vcombine.low %v6078_v62, %v6079_v36  ;;  %v9818_v49 = vpop.f32.mrf.mxu1 }
 0x40c   : > { %6122 = vst [vmem:[#allocation2 + $0x50] sm:$0x3] %v6074_v14  ;;  %v6085_v63 = vmax.bf16 %v14721_v33, %v5893_v23  ;;  %v6086_v5 = vmax.bf16 %v14726_v27, %v5894_v10  ;;  %6123 = vst [vmem:[#allocation2 + $0x54] sm:$0xf] %v6075_v9  ;;  %v14758_v13 = vld [vmem:[#allocation2 + $0x80] sm:$0x3] }
 0x40d   : > { %6124 = vst [vmem:[#allocation2 + $0x58] sm:$0xf] %v6076_v56  ;;  %6125 = vst [vmem:[#allocation2 + $0x5c] sm:$0x3] %v6077_v55  ;;  %v14760_v51 = vld [vmem:[#allocation2 + $0x80] sm:$0x3]  ;;  %v9819_v47 = vpop.f32.mrf.mxu1 }
 0x40e   : > { %18034 = vst [vmem:[#allocation82_spill] sm:$0xff] %v14758_v13  ;;  %18035 = vst [vmem:[#allocation83_spill] sm:$0xff] %v14760_v51  ;;  %v9686_v7 = vcombine.low %v6084_v58, %v6085_v63  ;;  %v14762_v45 = vld [vmem:[#allocation2 + $0x78] sm:$0xf]  ;;  %v14764_v20 = vld [vmem:[#allocation2 + $0x7c] sm:$0xf]  ;;  %v9820_v33 = vadd.f32 %v9819_v47, %v9818_v49 }
 0x40f   : > { %6128 = vst [vmem:[#allocation2 + $0x68] sm:$0x3] %v6080_v57  ;;  %6129 = vst [vmem:[#allocation2 + $0x6c] sm:$0xf] %v6081_v28  ;;  %v14772_v19 = vld [vmem:[#allocation2 + $0x24] sm:$0xf] }
 0x410   : > { %6130 = vst [vmem:[#allocation2 + $0x70] sm:$0xf] %v6082_v50  ;;  %9533 = vst [vmem:[#allocation2 + $0x18] sm:$0xff] %v9679_v52   ;;  %v14776_v27 = vld [vmem:[#allocation2 + $0x28] sm:$0xf]  ;;  %v6277_v8 = vshrl.u32 %v14772_v19, 16 }
 0x411   : > { %6134 = vst [vmem:[#allocation2 + $0x80] sm:$0x3] %v6086_v5  ;;  %18036 = vst [vmem:[#allocation84_spill] sm:$0xff] %v14762_v45  ;;  %v10405_v32 = vld [vmem:[%s17472_s16] ss:$0 sm:$0xff]  ;;  %v6280_v29 = vshll.u32 %v14772_v19, 16 }
 0x412   : > { %18037 = vst [vmem:[#allocation86_spill] sm:$0xff] %v14764_v20  ;;  %9681 = vst [vmem:[#allocation2 + $0x30] sm:$0xff] %v9680_v3   ;;  %v14783_v17 = vadd.f32 %v10405_v32, %v9820_v33  ;;  %v14789_v18 = vld [vmem:[#allocation2 + $0x20] sm:$0x1]  ;;  %v6286_v43 = vshll.u32 %v14776_v27, 16  ;;  %v6290_v38 = vshrl.u32 %v14776_v27, 16 }
 0x413   : > { %9683 = vst [vmem:[#allocation2 + $0x48] sm:$0xff] %v9682_v44   ;;  %9685 = vst [vmem:[#allocation2 + $0x60] sm:$0xff] %v9684_v11   ;;  %v14796_v26 = vld [vmem:[#allocation2 + $0x2c] sm:$0x1]  ;;  %v6279_v12 = vrot.slane %v6277_v8, 4  ;;  %v6282_v48 = vrot.slane %v6280_v29, 5 }
 0x414   : > { %9687 = vst [vmem:[#allocation2 + $0x78] sm:$0xff] %v9686_v7   ;;  %18038 = vst [vmem:[#allocation87_spill] sm:$0xff] %v14783_v17  ;;  %v847_v35 = vsub.f32 0.0, %v14783_v17  ;;  %v6272_v25 = vshll.u32 %v14789_v18, 16  ;;  %v14802_v24 = vrot.slane %v6286_v43, 5  ;;  %v6292_v40 = vrot.slane %v6290_v38, 4 }
 0x415   : > { %18039 = vst [vmem:[#allocation89_spill] sm:$0xff] %v14796_v26  ;;  %v6296_v1 = vshll.u32 %v14796_v26, 16  ;;  %v14807_v9 = vld [vmem:[#allocation2 + $0x3c] sm:$0xf]  ;;  %v6283_v55 = vor.u32 %v6282_v48, %v6279_v12  ;;  %v14813_v23 = vld [vmem:[#allocation2 + $0x40] sm:$0xf] }
 0x416   : > { %v910_v53 = vmul.f32 1.442695, %v847_v35  ;;  %v14815_v10 = vld [vmem:[#allocation2 + $0x38] sm:$0x1]  ;;  %v14817_v36 = vrot.slane %v6272_v25, 5  ;;  %v6293_v57 = vor.u32 %v6292_v40, %v14802_v24  ;;  %v6325_v3 = vshrl.u32 %v14807_v9, 16 }
 0x417   : > { %v14766_v39 = vld [vmem:[#allocation2 + $0x18] sm:$0xf]  ;;  %v14768_v61 = vld [vmem:[#allocation2 + $0x1c] sm:$0xf]  ;;  %18040 = vst [vmem:[#allocation90_spill] sm:$0xff] %v14815_v10  ;;  %v14828_v52 = vrot.slane %v6296_v1, 5 }
 0x418   : > { %v6253_v22 = vshrl.u32 %v14766_v39, 16  ;;  %v6256_v6 = vshll.u32 %v14766_v39, 16  ;;  %v6262_v15 = vshll.u32 %v14768_v61, 16  ;;  %v6266_v16 = vshrl.u32 %v14768_v61, 16  ;;  %v14822_v58 = vld [vmem:[#allocation2 + $0x54] sm:$0xf] }
 0x419   : > { %v14778_v34 = vld [vmem:[#allocation2 + $0x30] sm:$0xf]  ;;  %v14799_v42 = vld [vmem:[#allocation2 + $0x34] sm:$0xf]  ;;  %10399 = vpow2.f32 %v910_v53  ;;  %v14837_v7 = vrot.slane %v6283_v55, 4  ;;  %v6328_v47 = vshll.u32 %v14807_v9, 16 }
 0x41a   : > { %v6255_v31 = vrot.slane %v6253_v22, 4  ;;  %v6258_v30 = vrot.slane %v6256_v6, 5  ;;  %v14785_v0 = vrot.slane %v6262_v15, 5  ;;  %v6268_v54 = vrot.slane %v6266_v16, 4  ;;  %v14820_v50 = vld [vmem:[#allocation2 + $0x48] sm:$0xf] }
 0x41b   : > { %v6301_v37 = vshrl.u32 %v14778_v34, 16  ;;  %v6304_v46 = vshll.u32 %v14778_v34, 16  ;;  %v6310_v62 = vshll.u32 %v14799_v42, 16  ;;  %v6314_v41 = vshrl.u32 %v14799_v42, 16  ;;  %v14831_v44 = vld [vmem:[#allocation2 + $0x4c] sm:$0xf] }
 0x41c   : > { %v6259_v21 = vor.u32 %v6258_v30, %v6255_v31  ;;  %v6269_v60 = vor.u32 %v6268_v54, %v14785_v0  ;;  %v14842_v33 = vld [vmem:[#allocation2 + $0x58] sm:$0xf]  ;;  %v6320_v6 = vshll.u32 %v14815_v10, 16  ;;  %v6334_v15 = vshll.u32 %v14813_v23, 16  ;;  %v14847_v31 = vld [vmem:[#allocation2 + $0x44] sm:$0x1] }
 0x41d   : > { %v6303_v59 = vrot.slane %v6301_v37, 4  ;;  %v6306_v14 = vrot.slane %v6304_v46, 5  ;;  %v14839_v49 = vrot.slane %v6310_v62, 5  ;;  %18042 = vst [vmem:[#allocation91_spill] sm:$0xff] %v14842_v33  ;;  %v6316_v22 = vrot.slane %v6314_v41, 4  ;;  %18043 = vst [vmem:[#allocation45_spill] sm:$0xff] %v14847_v31 }
 0x41e   : > { %v14804_v4 = vrot.slane %v6259_v21, 4  ;;  %v14809_v56 = vrot.slane %v6269_v60, 4  ;;  %v6338_v16 = vshrl.u32 %v14813_v23, 16  ;;  %v14849_v30 = vrot.slane %v6293_v57, 4  ;;  %v14855_v29 = vld [vmem:[#allocation2 + $0x60] sm:$0xf] }
 0x41f   : > { %v6307_v28 = vor.u32 %v6306_v14, %v6303_v59  ;;  %v6349_v54 = vshrl.u32 %v14820_v50, 16  ;;  %v6352_v8 = vshll.u32 %v14820_v50, 16  ;;  %v6327_v43 = vrot.slane %v6325_v3, 4  ;;  %v14860_v21 = vld [vmem:[#allocation2 + $0x64] sm:$0xf] }
 0x420   : > { %v6358_v38 = vshll.u32 %v14831_v44, 16  ;;  %v6362_v37 = vshrl.u32 %v14831_v44, 16  ;;  %v6373_v46 = vshrl.u32 %v14822_v58, 16  ;;  %18044 = vst [vmem:[#allocation92_spill] sm:$0xff] %v14860_v21  ;;  %v6330_v35 = vrot.slane %v6328_v47, 5 }
 0x421   : > { %v14851_v32 = vrot.slane %v6307_v28, 4  ;;  %v6376_v60 = vshll.u32 %v14822_v58, 16  ;;  %v6382_v12 = vshll.u32 %v14842_v33, 16  ;;  %v6386_v48 = vshrl.u32 %v14842_v33, 16  ;;  %v14893_v13 = vld [vmem:[#allocation2 + $0x5c] sm:$0x1] }
 0x422   : > { %v6317_v25 = vor.u32 %v6316_v22, %v14839_v49  ;;  %v14866_v40 = vrot.slane %v6334_v15, 5  ;;  %v6340_v59 = vrot.slane %v6338_v16, 4  ;;  %v6344_v14 = vshll.u32 %v14847_v31, 16  ;;  %18046 = vst [vmem:[#allocation85_spill] sm:$0xff] %v14893_v13  ;;  %v14895_v16 = vld [vmem:[#allocation2 + $0x68] sm:$0x1] }
 0x423   : > { %v6351_v1 = vrot.slane %v6349_v54, 4  ;;  %v6354_v53 = vrot.slane %v6352_v8, 5  ;;  %v6397_v55 = vshrl.u32 %v14855_v29, 16  ;;  %v6400_v62 = vshll.u32 %v14855_v29, 16  ;;  %18047 = vst [vmem:[#allocation88_spill] sm:$0xff] %v14895_v16 }
 0x424   : > { %v14871_v41 = vrot.slane %v6358_v38, 5  ;;  %v6364_v57 = vrot.slane %v6362_v37, 4  ;;  %v6375_v28 = vrot.slane %v6373_v46, 4  ;;  %v6406_v3 = vshll.u32 %v14860_v21, 16  ;;  %v14883_v38 = vld [vmem:[#allocation2 + $0x78] sm:$0xf] }
 0x425   : > { %v6378_v47 = vrot.slane %v6376_v60, 5  ;;  %v14874_v11 = vrot.slane %v6382_v12, 5  ;;  %v6388_v22 = vrot.slane %v6386_v48, 4  ;;  %v6410_v15 = vshrl.u32 %v14860_v21, 16  ;;  %v14885_v37 = vld [vmem:[#allocation2 + $0x50] sm:$0x1] }
 0x426   : > { %v6399_v54 = vrot.slane %v6397_v55, 4  ;;  %v6402_v8 = vrot.slane %v6400_v62, 5  ;;  %v14881_v5 = vrot.slane %v6406_v3, 5  ;;  %18045 = vst [vmem:[#allocation70_spill] sm:$0xff] %v14885_v37  ;;  %v6299_v46 = vsel %vm11433_vm9, %v14849_v30, %v14828_v52  ;;  %v14904_v45 = vpop.eup %10399  ;;  %v14906_v52 = vld [vmem:[#allocation2 + $0x7c] sm:$0xf] }
 0x427   : > { %v14891_v60 = vrot.slane %v6320_v6, 5  ;;  %v6331_v12 = vor.u32 %v6330_v35, %v6327_v43  ;;  %v6412_v48 = vrot.slane %v6410_v15, 4  ;;  %v6313_v55 = vsel %vm11433_vm9, %v14851_v32, %v14839_v49  ;;  %18048 = vst [vmem:[#allocation94_spill] sm:$0xff] %v14904_v45  ;;  %18049 = vst [vmem:[#allocation47_spill] sm:$0xff] %v14906_v52  ;;  %v14938_v26 = vld [vmem:[#allocation2 + $0x18] sm:$0xe] }
 0x428   : > { %v14901_v62 = vrot.slane %v6317_v25, 4  ;;  %v6341_v3 = vor.u32 %v6340_v59, %v14866_v40  ;;  %v6346_v20 = vrot.slane %v6344_v14, 5  ;;  %v6355_v6 = vor.u32 %v6354_v53, %v6351_v1  ;;  %v14916_v1 = vld [vmem:[#allocation2 + $0x80] sm:$0x1] }
 0x429   : > { %v6365_v43 = vor.u32 %v6364_v57, %v14871_v41  ;;  %v6379_v35 = vor.u32 %v6378_v47, %v6375_v28  ;;  %v6389_v15 = vor.u32 %v6388_v22, %v14874_v11  ;;  %v6403_v51 = vor.u32 %v6402_v8, %v6399_v54  ;;  %18050 = vst [vmem:[#allocation68_spill] sm:$0xff] %v14916_v1 }
 0x42a   : > { %v6413_v2 = vor.u32 %v6412_v48, %v14881_v5  ;;  %v6445_v32 = vshrl.u32 %v14883_v38, 16  ;;  %v6448_v25 = vshll.u32 %v14883_v38, 16  ;;  %v6332_v17 = vrot.slane %v6331_v12, 4 }
 0x42b   : > { %v6368_v59 = vshll.u32 %v14885_v37, 16  ;;  %v6392_v14 = vshll.u32 %v14893_v13, 16  ;;  %v6416_v45 = vshll.u32 %v14895_v16, 16  ;;  %v6454_v28 = vshll.u32 %v14906_v52, 16 }
 0x42c   : > { %v6447_v53 = vrot.slane %v6445_v32, 4  ;;  %v6450_v57 = vrot.slane %v6448_v25, 5  ;;  %v6458_v47 = vshrl.u32 %v14906_v52, 16  ;;  %v14920_v22 = vrot.slane %v6341_v3, 4 }
 0x42d   : > { %v6356_v54 = vrot.slane %v6355_v6, 4  ;;  %v14922_v8 = vrot.slane %v6365_v43, 4  ;;  %v6380_v12 = vrot.slane %v6379_v35, 4  ;;  %v6323_v48 = vsel %vm11433_vm9, %v14901_v62, %v14891_v60  ;;  %v14952_v60 = vld [vmem:[#allocation2 + $0x20] sm:$0x3] }
 0x42e   : > { %v14928_v16 = vrot.slane %v6389_v15, 4  ;;  %v6404_v13 = vrot.slane %v6403_v51, 4  ;;  %v14930_v32 = vrot.slane %v6413_v2, 4  ;;  %v6337_v25 = vsel %vm11433_vm9, %v6332_v17, %v14866_v40  ;;  %18051 = vst [vmem:[#allocation69_spill] sm:$0xff] %v14952_v60 }
 0x42f   : > { %v6370_v3 = vrot.slane %v6368_v59, 5  ;;  %v6451_v37 = vor.u32 %v6450_v57, %v6447_v53  ;;  %v6464_v6 = vshll.u32 %v14916_v1, 16  ;;  %v6394_v43 = vrot.slane %v6392_v14, 5  ;;  %v14971_v57 = vld [vmem:[#allocation2 + $0x24] sm:$0xe] }
 0x430   : > { %v6418_v35 = vrot.slane %v6416_v45, 5  ;;  %v14936_v31 = vrot.slane %v6454_v28, 5  ;;  %v6460_v10 = vrot.slane %v6458_v47, 4  ;;  %v6347_v2 = vsel %vm11433_vm9, %v14920_v22, %v6346_v20 }
 0x431   : > { %v6361_v51 = vsel %vm11433_vm9, %v6356_v54, %v14871_v41  ;;  %v6371_v17 = vsel %vm11433_vm9, %v14922_v8, %v6370_v3  ;;  %v6385_v45 = vsel %vm11433_vm9, %v6380_v12, %v14874_v11  ;;  %v6395_v15 = vsel %vm11433_vm9, %v14928_v16, %v6394_v43  ;;  %v14989_v12 = vld [vmem:[#allocation2 + $0x2c] sm:$0x3]  ;;  %v14999_v43 = vld [vmem:[#allocation2 + $0x30] sm:$0xe] }
 0x432   : > { %v6409_v20 = vsel %vm11433_vm9, %v6404_v13, %v14881_v5  ;;  %v6419_v59 = vsel %vm11433_vm9, %v14930_v32, %v6418_v35  ;;  %v18052_v14 = vsel %vm11433_vm9, %v14804_v4, %v14785_v0  ;;  %v6452_v28 = vrot.slane %v6451_v37, 4  ;;  %18058 = vst [vmem:[#allocation103_spill] sm:$0xff] %v14989_v12 }
 0x433   : > { %v14969_v53 = vmax.bf16 %v18052_v14, %v14766_v39  ;;  %v6466_v47 = vrot.slane %v6464_v6, 5  ;;  %v18054_v13 = vsel %vm11433_vm9, %v14809_v56, %v14817_v36  ;;  %v18056_v4 = vsel %vm11433_vm9, %v14837_v7, %v14802_v24 }
 0x434   : > { %v14979_v54 = vmax.bf16 %v18054_v13, %v14768_v61  ;;  %v14987_v39 = vmax.bf16 %v18056_v4, %v14772_v19  ;;  %v6461_v37 = vor.u32 %v6460_v10, %v14936_v31  ;;  %v14993_v3 = vmax.bf16 %v6299_v46, %v14776_v27 }
 0x435   : > { %18053 = vst [vmem:[#allocation95_spill] sm:$0xff] %v14969_v53  ;;  %v14996_v6 = vmax.bf16 %v6313_v55, %v14778_v34  ;;  %v6701_v36 = vshrl.u32 %v14938_v26, 16  ;;  %v15002_v35 = vmax.bf16 %v6323_v48, %v14799_v42  ;;  %v15005_v19 = vmax.bf16 %v6337_v25, %v14807_v9 }
 0x436   : > { %18055 = vst [vmem:[#allocation97_spill] sm:$0xff] %v14979_v54  ;;  %18057 = vst [vmem:[#allocation100_spill] sm:$0xff] %v14987_v39  ;;  %v6704_v7 = vshll.u32 %v14938_v26, 16  ;;  %v6711_v10 = vshll.u32 %v14952_v60, 16  ;;  %v15010_v46 = vmax.bf16 %v6347_v2, %v14813_v23  ;;  %v6715_v34 = vshrl.u32 %v14952_v60, 16 }
 0x437   : > { %18059 = vst [vmem:[#allocation71_spill] sm:$0xff] %v14993_v3  ;;  %18060 = vst [vmem:[#allocation93_spill] sm:$0xff] %v14996_v6  ;;  %v6721_v55 = vshrl.u32 %v14971_v57, 16  ;;  %v6724_v14 = vshll.u32 %v14971_v57, 16  ;;  %v6703_v13 = vrot.slane %v6701_v36, 4  ;;  %v6731_v48 = vshll.u32 %v14989_v12, 16 }
 0x438   : > { %18061 = vst [vmem:[#allocation37_spill] sm:$0xff] %v15002_v35  ;;  %18062 = vst [vmem:[#allocation96_spill] sm:$0xff] %v15005_v19  ;;  %v6706_v4 = vrot.slane %v6704_v7, 5  ;;  %v6735_v9 = vshrl.u32 %v14989_v12, 16  ;;  %v6457_v25 = vsel %vm11433_vm9, %v6452_v28, %v14936_v31  ;;  %v15020_v19 = vrot.slane %v6461_v37, 4 }
 0x439   : > { %18063 = vst [vmem:[#allocation106_spill] sm:$0xff] %v15010_v46  ;;  %v15023_v2 = vmax.bf16 %v6361_v51, %v14820_v50  ;;  %v6741_v60 = vshrl.u32 %v14999_v43, 16  ;;  %v15026_v46 = vld [vmem:[#allocation2 + $0x3c] sm:$0xe]  ;;  %v15029_v36 = vmax.bf16 %v6371_v17, %v14831_v44  ;;  %v15032_v7 = vmax.bf16 %v6385_v45, %v14822_v58  ;;  %v15039_v28 = vld [vmem:[#allocation2 + $0x38] sm:$0x3] }
 0x43a   : > { %v15035_v12 = vmax.bf16 %v6395_v15, %v14842_v33  ;;  %v15037_v35 = vrot.slane %v6711_v10, 5  ;;  %18068 = vst [vmem:[#allocation101_spill] sm:$0xff] %v15039_v28  ;;  %v6717_v37 = vrot.slane %v6715_v34, 4  ;;  %v6723_v50 = vrot.slane %v6721_v55, 4  ;;  %v15054_v55 = vld [vmem:[#allocation2 + $0x48] sm:$0xe] }
 0x43b   : > { %18064 = vst [vmem:[#allocation59_spill] sm:$0xff] %v15023_v2  ;;  %18065 = vst [vmem:[#allocation49_spill] sm:$0xff] %v15029_v36  ;;  %v6726_v51 = vrot.slane %v6724_v14, 5  ;;  %v6744_v2 = vshll.u32 %v14999_v43, 16  ;;  %v15043_v6 = vmax.bf16 %v6409_v20, %v14855_v29  ;;  %v6707_v17 = vor.u32 %v6706_v4, %v6703_v13  ;;  %v15059_v4 = vld [vmem:[#allocation2 + $0x44] sm:$0x3] }
 0x43c   : > { %18066 = vst [vmem:[#allocation38_spill] sm:$0xff] %v15032_v7  ;;  %18067 = vst [vmem:[#allocation54_spill] sm:$0xff] %v15035_v12  ;;  %v15045_v36 = vrot.slane %v6731_v48, 5  ;;  %v6737_v58 = vrot.slane %v6735_v9, 4  ;;  %v6467_v45 = vsel %vm11433_vm9, %v15020_v19, %v6466_v47  ;;  %v15051_v15 = vmax.bf16 %v6419_v59, %v14860_v21  ;;  %v15125_v33 = vld [vmem:[#allocation2 + $0x78] sm:$0xe] }
 0x43d   : > { %18069 = vst [vmem:[#allocation108_spill] sm:$0xff] %v15043_v6  ;;  %v6743_v10 = vrot.slane %v6741_v60, 4  ;;  %v6761_v34 = vshrl.u32 %v15026_v46, 16  ;;  %v6746_v14 = vrot.slane %v6744_v2, 5  ;;  %v6751_v29 = vshll.u32 %v15039_v28, 16  ;;  %18071 = vst [vmem:[#allocation98_spill] sm:$0xff] %v15059_v4 }
 0x43e   : > { %18070 = vst [vmem:[#allocation64_spill] sm:$0xff] %v15051_v15  ;;  %v6755_v20 = vshrl.u32 %v15039_v28, 16  ;;  %v6764_v13 = vshll.u32 %v15026_v46, 16  ;;  %v15062_v48 = vmax.bf16 %v6457_v25, %v14883_v38  ;;  %v6718_v59 = vor.u32 %v6717_v37, %v15037_v35  ;;  %v15071_v28 = vld [vmem:[#allocation2 + $0x50] sm:$0x3] }
 0x43f   : > { %v6727_v47 = vor.u32 %v6726_v51, %v6723_v50  ;;  %v6763_v60 = vrot.slane %v6761_v34, 4  ;;  %v15066_v9 = vmax.bf16 %v6467_v45, %v14906_v52  ;;  %v15068_v15 = vrot.slane %v6707_v17, 4  ;;  %18074 = vst [vmem:[#allocation42_spill] sm:$0xff] %v15071_v28  ;;  %v15083_v51 = vld [vmem:[#allocation2 + $0x54] sm:$0xe] }
 0x440   : > { %18072 = vst [vmem:[#allocation102_spill] sm:$0xff] %v15062_v48  ;;  %v6738_v2 = vor.u32 %v6737_v58, %v15045_v36  ;;  %v6766_v6 = vrot.slane %v6764_v13, 5  ;;  %v6781_v37 = vshrl.u32 %v15054_v55, 16  ;;  %v6784_v50 = vshll.u32 %v15054_v55, 16  ;;  %v15088_v13 = vld [vmem:[#allocation2 + $0x5c] sm:$0x3] }
 0x441   : > { %18073 = vst [vmem:[#allocation41_spill] sm:$0xff] %v15066_v9  ;;  %v6747_v17 = vor.u32 %v6746_v14, %v6743_v10  ;;  %v15085_v58 = vrot.slane %v6751_v29, 5  ;;  %v6757_v45 = vrot.slane %v6755_v20, 4  ;;  %v6771_v34 = vshll.u32 %v15059_v4, 16  ;;  %v15102_v20 = vld [vmem:[#allocation2 + $0x60] sm:$0xe] }
 0x442   : > { %v15090_v38 = vrot.slane %v6718_v59, 4  ;;  %v15092_v9 = vrot.slane %v6727_v47, 4  ;;  %v6767_v48 = vor.u32 %v6766_v6, %v6763_v60  ;;  %v6775_v25 = vshrl.u32 %v15059_v4, 16  ;;  %v15107_v60 = vld [vmem:[#allocation2 + $0x68] sm:$0x3] }
 0x443   : > { %v15099_v10 = vrot.slane %v6738_v2, 4  ;;  %v6783_v14 = vrot.slane %v6781_v37, 4  ;;  %v6791_v29 = vshll.u32 %v15071_v28, 16  ;;  %v6786_v7 = vrot.slane %v6784_v50, 5 }
 0x444   : > { %v6795_v59 = vshrl.u32 %v15071_v28, 16  ;;  %v6801_v47 = vshrl.u32 %v15083_v51, 16  ;;  %v6804_v6 = vshll.u32 %v15083_v51, 16  ;;  %v15109_v4 = vrot.slane %v6747_v17, 4 }
 0x445   : > { %v6758_v12 = vor.u32 %v6757_v45, %v15085_v58  ;;  %v15112_v2 = vrot.slane %v6771_v34, 5  ;;  %v6811_v37 = vshll.u32 %v15088_v13, 16  ;;  %v15115_v3 = vrot.slane %v6767_v48, 4 }
 0x446   : > { %v6777_v39 = vrot.slane %v6775_v25, 4  ;;  %v6803_v50 = vrot.slane %v6801_v47, 4  ;;  %v6806_v54 = vrot.slane %v6804_v6, 5  ;;  %v15117_v28 = vrot.slane %v6791_v29, 5 }
 0x447   : > { %v6815_v53 = vshrl.u32 %v15088_v13, 16  ;;  %v6821_v1 = vshrl.u32 %v15102_v20, 16  ;;  %v6824_v17 = vshll.u32 %v15102_v20, 16  ;;  %v6787_v52 = vor.u32 %v6786_v7, %v6783_v14 }
 0x448   : > { %v6797_v21 = vrot.slane %v6795_v59, 4  ;;  %v15122_v45 = vrot.slane %v6811_v37, 5  ;;  %v6831_v34 = vshll.u32 %v15107_v60, 16  ;;  %v6807_v48 = vor.u32 %v6806_v54, %v6803_v50 }
 0x449   : > { %v6817_v25 = vrot.slane %v6815_v53, 4  ;;  %v6823_v47 = vrot.slane %v6821_v1, 4  ;;  %v6826_v6 = vrot.slane %v6824_v17, 5  ;;  %v6729_v29 = vsel %vm11433_vm9, %v15092_v9, %v14802_v24  ;;  %v15140_v53 = vld [vmem:[#allocation2 + $0x80] sm:$0x3] }
 0x44a   : > { %v6749_v7 = vsel %vm11433_vm9, %v15109_v4, %v14839_v49  ;;  %v6754_v14 = vsel %vm11433_vm9, %v14901_v62, %v15085_v58  ;;  %v6835_v54 = vshrl.u32 %v15107_v60, 16  ;;  %v15142_v1 = vrot.slane %v6758_v12, 4 }
 0x44b   : > { %v6778_v59 = vor.u32 %v6777_v39, %v15112_v2  ;;  %v6827_v37 = vor.u32 %v6826_v6, %v6823_v47  ;;  %v6833_v24 = vrot.slane %v6831_v34, 5  ;;  %v6774_v49 = vsel %vm11433_vm9, %v14920_v22, %v15112_v2 }
 0x44c   : > { %v6788_v4 = vrot.slane %v6787_v52, 4  ;;  %v6837_v9 = vrot.slane %v6835_v54, 4  ;;  %v6861_v50 = vshrl.u32 %v15125_v33, 16  ;;  %v6769_v62 = vsel %vm11433_vm9, %v15115_v3, %v14866_v40 }
 0x44d   : > { %v6798_v12 = vor.u32 %v6797_v21, %v15117_v28  ;;  %v6808_v58 = vrot.slane %v6807_v48, 4  ;;  %v6818_v39 = vor.u32 %v6817_v25, %v15122_v45  ;;  %v6828_v17 = vrot.slane %v6827_v37, 4 }
 0x44e   : > { %v6863_v34 = vrot.slane %v6861_v50, 4  ;;  %v6864_v47 = vshll.u32 %v15125_v33, 16  ;;  %v6871_v22 = vshll.u32 %v15140_v53, 16  ;;  %v15158_v52 = vrot.slane %v6778_v59, 4 }
 0x44f   : > { %v6794_v2 = vsel %vm11433_vm9, %v14922_v8, %v15117_v28  ;;  %v6838_v6 = vor.u32 %v6837_v9, %v6833_v24  ;;  %v6875_v40 = vshrl.u32 %v15140_v53, 16  ;;  %v6789_v21 = vsel %vm11433_vm9, %v6788_v4, %v14871_v41 }
 0x450   : > { %v6814_v3 = vsel %vm11433_vm9, %v14928_v16, %v15122_v45  ;;  %v6866_v48 = vrot.slane %v6864_v47, 5  ;;  %v6873_v25 = vrot.slane %v6871_v22, 5  ;;  %v15172_v54 = vrot.slane %v6798_v12, 4  ;;  %v18084_v22 = vld [vmem:[#allocation92_spill] sm:$0xff] }
 0x451   : > { %v6809_v8 = vsel %vm11433_vm9, %v6808_v58, %v14874_v11  ;;  %v6834_v28 = vsel %vm11433_vm9, %v14930_v32, %v6833_v24  ;;  %v6877_v59 = vrot.slane %v6875_v40, 4  ;;  %v15180_v37 = vrot.slane %v6818_v39, 4  ;;  %v18078_v58 = vld [vmem:[#allocation89_spill] sm:$0xff] }
 0x452   : > { %v6829_v41 = vsel %vm11433_vm9, %v6828_v17, %v14881_v5  ;;  %v6867_v16 = vor.u32 %v6866_v48, %v6863_v34  ;;  %v18075_v45 = vsel %vm11433_vm9, %v15068_v15, %v14785_v0  ;;  %v15191_v11 = vrot.slane %v6838_v6, 4  ;;  %v18080_v17 = vld [vmem:[#allocation45_spill] sm:$0xff]  ;;  %v18085_v6 = vld [vmem:[#allocation88_spill] sm:$0xff] }
 0x453   : > { %v7068_v4 = vmax.bf16 %v18075_v45, %v14938_v26  ;;  %v6878_v9 = vor.u32 %v6877_v59, %v6873_v25  ;;  %v18076_v32 = vsel %vm11433_vm9, %v14809_v56, %v15037_v35  ;;  %v7070_v5 = vmax.bf16 %v15090_v38, %v14789_v18  ;;  %v18079_v38 = vld [vmem:[#allocation90_spill] sm:$0xff] }
 0x454   : > { %v7069_v24 = vmax.bf16 %v18076_v32, %v14768_v61  ;;  %v6868_v50 = vrot.slane %v6867_v16, 4  ;;  %v6874_v12 = vsel %vm11433_vm9, %v15020_v19, %v6873_v25  ;;  %v7071_v0 = vmax.bf16 %v6729_v29, %v14971_v57 }
 0x455   : > { %v18077_v26 = vsel %vm11433_vm9, %v14849_v30, %v15045_v36  ;;  %v7073_v56 = vmax.bf16 %v15099_v10, %v18078_v58  ;;  %v7074_v35 = vmax.bf16 %v6749_v7, %v14999_v43  ;;  %v7075_v18 = vmax.bf16 %v6754_v14, %v14799_v42  ;;  %v18081_v10 = vld [vmem:[#allocation70_spill] sm:$0xff] }
 0x456   : > { %v7072_v15 = vmax.bf16 %v18077_v26, %v14776_v27  ;;  %v7076_v39 = vmax.bf16 %v15142_v1, %v18079_v38  ;;  %v6879_v19 = vrot.slane %v6878_v9, 4  ;;  %v7077_v57 = vmax.bf16 %v6769_v62, %v15026_v46  ;;  %v18082_v1 = vld [vmem:[#allocation91_spill] sm:$0xff]  ;;  %v18083_v62 = vld [vmem:[#allocation85_spill] sm:$0xff] }
 0x457   : > { %v7078_v29 = vmax.bf16 %v6774_v49, %v14813_v23  ;;  %v7079_v34 = vmax.bf16 %v15158_v52, %v18080_v17  ;;  %v6869_v30 = vsel %vm11433_vm9, %v6868_v50, %v14936_v31  ;;  %v7080_v36 = vmax.bf16 %v6789_v21, %v15054_v55 }
 0x458   : > { %v7081_v43 = vmax.bf16 %v6794_v2, %v14831_v44  ;;  %v7082_v7 = vmax.bf16 %v15172_v54, %v18081_v10  ;;  %v7083_v14 = vmax.bf16 %v6809_v8, %v15083_v51  ;;  %v7084_v46 = vmax.bf16 %v6814_v3, %v18082_v1  ;;  %v18086_v51 = vld [vmem:[#allocation47_spill] sm:$0xff]  ;;  %v18087_v3 = vld [vmem:[#allocation68_spill] sm:$0xff] }
 0x459   : > { %v7085_v49 = vmax.bf16 %v15180_v37, %v18083_v62  ;;  %v7086_v47 = vmax.bf16 %v6829_v41, %v15102_v20  ;;  %v7087_v52 = vmax.bf16 %v6834_v28, %v18084_v22  ;;  %v7088_v31 = vmax.bf16 %v15191_v11, %v18085_v6  ;;  %v18089_v6 = vld [vmem:[#allocation95_spill] sm:$0xff] }
 0x45a   : > { %v9218_v55 = vrot.slane %v7068_v4, 9  ;;  %v7166_v40 = vrot.slane %v7069_v24, 5  ;;  %v7092_v2 = vmax.bf16 %v6869_v30, %v15125_v33  ;;  %v7173_v21 = vrot.slane %v7072_v15, 5 }
 0x45b   : > { %v9220_v48 = vrot.slane %v7074_v35, 9  ;;  %v7180_v25 = vrot.slane %v7075_v18, 5  ;;  %v7093_v54 = vmax.bf16 %v6874_v12, %v18086_v51  ;;  %v7094_v8 = vmax.bf16 %v6879_v19, %v18087_v3 }
 0x45c   : > { %v7168_v59 = vrot.slane %v7166_v40, 4  ;;  %v7169_v37 = vrot.slane %v7070_v5, 5  ;;  %v9219_v16 = vrot.slane %v7071_v0, 9  ;;  %v7175_v20 = vrot.slane %v7173_v21, 4 }
 0x45d   : > { %v7176_v41 = vrot.slane %v7073_v56, 5  ;;  %v7182_v28 = vrot.slane %v7180_v25, 4  ;;  %v15241_v11 = vsel %vm11463_vm10, %v9218_v55, %v7166_v40  ;;  %v7183_v4 = vrot.slane %v7076_v39, 5  ;;  %v18090_v40 = vld [vmem:[#allocation97_spill] sm:$0xff] }
 0x45e   : > { %v9221_v9 = vrot.slane %v7077_v57, 9  ;;  %v7187_v33 = vrot.slane %v7078_v29, 5  ;;  %v15245_v32 = vsel %vm11463_vm10, %v9219_v16, %v7173_v21  ;;  %v15249_v24 = vsel %vm11463_vm10, %v9220_v48, %v7180_v25  ;;  %v6236_v21 = vld [vmem:[#allocation2 + $0x18] sm:$0xc] }
 0x45f   : > { %v9222_v5 = vrot.slane %v7080_v36, 9  ;;  %v7194_v50 = vrot.slane %v7081_v43, 5  ;;  %v7170_v12 = vsel %vm11463_vm10, %v7168_v59, %v7169_v37  ;;  %v7190_v26 = vrot.slane %v7079_v34, 5  ;;  %v18093_v37 = vld [vmem:[#allocation93_spill] sm:$0xff] }
 0x460   : > { %v7189_v0 = vrot.slane %v7187_v33, 4  ;;  %v7201_v15 = vrot.slane %v7084_v46, 5  ;;  %v7177_v58 = vsel %vm11463_vm10, %v7175_v20, %v7176_v41  ;;  %v7184_v56 = vsel %vm11463_vm10, %v7182_v28, %v7183_v4  ;;  %v18094_v20 = vld [vmem:[#allocation37_spill] sm:$0xff]  ;;  %v18095_v28 = vld [vmem:[#allocation96_spill] sm:$0xff] }
 0x461   : > { %v7196_v35 = vrot.slane %v7194_v50, 4  ;;  %v9224_v18 = vrot.slane %v7086_v47, 9  ;;  %v7197_v38 = vrot.slane %v7082_v7, 5  ;;  %v9223_v39 = vrot.slane %v7083_v14, 9 }
 0x462   : > { %v7203_v19 = vrot.slane %v7201_v15, 4  ;;  %v7208_v57 = vrot.slane %v7087_v52, 5  ;;  %v15259_v29 = vsel %vm11463_vm10, %v9221_v9, %v7187_v33  ;;  %v15263_v17 = vsel %vm11463_vm10, %v9222_v5, %v7194_v50  ;;  %v18096_v9 = vld [vmem:[#allocation106_spill] sm:$0xff]  ;;  %v6238_v5 = vld [vmem:[#allocation2 + $0x30] sm:$0xc] }
 0x463   : > { %v7204_v34 = vrot.slane %v7085_v49, 5  ;;  %v9226_v30 = vrot.slane %v7092_v2, 9  ;;  %v7191_v36 = vsel %vm11463_vm10, %v7189_v0, %v7190_v26  ;;  %v15269_v43 = vsel %vm11463_vm10, %v9223_v39, %v7201_v15  ;;  %v18098_v26 = vld [vmem:[#allocation49_spill] sm:$0xff] }
 0x464   : > { %v7210_v10 = vrot.slane %v7208_v57, 4  ;;  %v7222_v7 = vrot.slane %v7093_v54, 5  ;;  %v7198_v14 = vsel %vm11463_vm10, %v7196_v35, %v7197_v38  ;;  %v15277_v62 = vsel %vm11463_vm10, %v9224_v18, %v7208_v57  ;;  %v18091_v54 = vld [vmem:[#allocation100_spill] sm:$0xff]  ;;  %v18100_v35 = vld [vmem:[#allocation54_spill] sm:$0xff] }
 0x465   : > { %v7205_v46 = vsel %vm11463_vm10, %v7203_v19, %v7204_v34  ;;  %v7211_v49 = vrot.slane %v7088_v31, 5  ;;  %v7225_v52 = vrot.slane %v7094_v8, 5  ;;  %v7308_v55 = vmax.bf16 %v15241_v11, %v18089_v6  ;;  %v18092_v31 = vld [vmem:[#allocation71_spill] sm:$0xff]  ;;  %v6237_v8 = vld [vmem:[#allocation2 + $0x24] sm:$0xc]  ;;  %v18101_v38 = vld [vmem:[#allocation108_spill] sm:$0xff] }
 0x466   : > { %v7224_v47 = vrot.slane %v7222_v7, 4  ;;  %v15282_v2 = vmax.bf16 %v7170_v12, %v18090_v40  ;;  %v15288_v25 = vsel %vm11463_vm10, %v9226_v30, %v7222_v7  ;;  %v7310_v3 = vmax.bf16 %v15245_v32, %v18091_v54  ;;  %v18097_v12 = vld [vmem:[#allocation59_spill] sm:$0xff]  ;;  %v6239_v34 = vld [vmem:[#allocation2 + $0x3c] sm:$0xc] }
 0x467   : > { %v7212_v48 = vsel %vm11463_vm10, %v7210_v10, %v7211_v49  ;;  %v15293_v59 = vmax.bf16 %v7177_v58, %v18092_v31  ;;  %v7312_v16 = vmax.bf16 %v15249_v24, %v18093_v37  ;;  %v15298_v41 = vmax.bf16 %v7184_v56, %v18094_v20  ;;  %v18099_v58 = vld [vmem:[#allocation38_spill] sm:$0xff]  ;;  %v18102_v30 = vld [vmem:[#allocation64_spill] sm:$0xff]  ;;  %v6241_v56 = vld [vmem:[#allocation2 + $0x54] sm:$0xc] }
 0x468   : > { %v15303_v33 = vmax.bf16 %v7191_v36, %v18096_v9  ;;  %v7226_v50 = vsel %vm11463_vm10, %v7224_v47, %v7225_v52  ;;  %v15310_v15 = vmax.bf16 %v7198_v14, %v18098_v26  ;;  %v15315_v18 = vmax.bf16 %v7205_v46, %v18100_v35  ;;  %v18103_v10 = vld [vmem:[#allocation102_spill] sm:$0xff]  ;;  %v18104_v46 = vld [vmem:[#allocation103_spill] sm:$0xff] }
 0x469   : > { %v9234_v19 = vrot.slane %v6236_v21, 10  ;;  %v7390_v57 = vrot.slane %v14768_v61, 6  ;;  %v15321_v36 = vmax.bf16 %v7212_v48, %v18102_v30  ;;  %v9235_v14 = vrot.slane %v6237_v8, 10  ;;  %v6240_v47 = vld [vmem:[#allocation2 + $0x48] sm:$0xc]  ;;  %v18105_v21 = vld [vmem:[#allocation41_spill] sm:$0xff] }
 0x46a   : > { %v7397_v49 = vrot.slane %v14776_v27, 6  ;;  %v7400_v40 = vrot.slane %v18104_v46, 6  ;;  %v9236_v31 = vrot.slane %v6238_v5, 10  ;;  %v7404_v20 = vrot.slane %v14799_v42, 6  ;;  %v18106_v61 = vld [vmem:[#allocation69_spill] sm:$0xff] }
 0x46b   : > { %v7392_v52 = vrot.slane %v7390_v57, 4  ;;  %v15329_v9 = vmax.bf16 %v7226_v50, %v18105_v21  ;;  %v7393_v26 = vrot.slane %v18106_v61, 6  ;;  %v7411_v35 = vrot.slane %v14813_v23, 6  ;;  %v6242_v30 = vld [vmem:[#allocation2 + $0x60] sm:$0xc]  ;;  %v18109_v50 = vld [vmem:[#allocation98_spill] sm:$0xff] }
 0x46c   : > { %v7399_v48 = vrot.slane %v7397_v49, 4  ;;  %v7391_v8 = vsel %vm11478_vm11, %v9234_v19, %v7390_v57  ;;  %v7398_v27 = vsel %vm11478_vm11, %v9235_v14, %v7397_v49  ;;  %v7406_v39 = vrot.slane %v7404_v20, 4  ;;  %v18108_v46 = vld [vmem:[#allocation101_spill] sm:$0xff]  ;;  %v6244_v14 = vld [vmem:[#allocation2 + $0x78] sm:$0xc] }
 0x46d   : > { %v7407_v5 = vrot.slane %v18108_v46, 6  ;;  %v9237_v42 = vrot.slane %v6239_v34, 10  ;;  %v7413_v0 = vrot.slane %v7411_v35, 4  ;;  %v7414_v21 = vrot.slane %v18109_v50, 6 }
 0x46e   : > { %v9238_v4 = vrot.slane %v6240_v47, 10  ;;  %v7394_v61 = vsel %vm11478_vm11, %v7392_v52, %v7393_v26  ;;  %v7401_v23 = vsel %vm11478_vm11, %v7399_v48, %v7400_v40  ;;  %v7405_v19 = vsel %vm11478_vm11, %v9236_v31, %v7404_v20  ;;  %v18110_v20 = vld [vmem:[#allocation42_spill] sm:$0xff] }
 0x46f   : > { %v7418_v57 = vrot.slane %v14831_v44, 6  ;;  %v7412_v49 = vsel %vm11478_vm11, %v9237_v42, %v7411_v35  ;;  %v7425_v34 = vrot.slane %v18082_v1, 6  ;;  %v7428_v46 = vrot.slane %v15088_v13, 6 }
 0x470   : > { %v9240_v47 = vrot.slane %v6242_v30, 10  ;;  %v7408_v52 = vsel %vm11478_vm11, %v7406_v39, %v7407_v5  ;;  %v9239_v50 = vrot.slane %v6241_v56, 10  ;;  %v7432_v40 = vrot.slane %v18084_v22, 6 }
 0x471   : > { %v7420_v26 = vrot.slane %v7418_v57, 4  ;;  %v7415_v31 = vsel %vm11478_vm11, %v7413_v0, %v7414_v21  ;;  %v7419_v44 = vsel %vm11478_vm11, %v9238_v4, %v7418_v57  ;;  %v7421_v48 = vrot.slane %v18110_v20, 6 }
 0x472   : > { %v7427_v35 = vrot.slane %v7425_v34, 4  ;;  %v7426_v13 = vsel %vm11478_vm11, %v9239_v50, %v7425_v34  ;;  %v7434_v1 = vrot.slane %v7432_v40, 4  ;;  %v7435_v30 = vrot.slane %v15107_v60, 6  ;;  %v1545_v50 = vld [vmem:[#allocation2 + $0xb8] sm:$0xf] }
 0x473   : > { %v9242_v39 = vrot.slane %v6244_v14, 10  ;;  %v7422_v56 = vsel %vm11478_vm11, %v7420_v26, %v7421_v48  ;;  %v7433_v0 = vsel %vm11478_vm11, %v9240_v47, %v7432_v40  ;;  %v7446_v4 = vrot.slane %v18086_v51, 6  ;;  %v1595_v47 = vld [vmem:[#allocation2 + $0xc8] sm:$0x3]  ;;  %v1546_v40 = vld [vmem:[#allocation2 + $0xbc] sm:$0x3] }
 0x474   : > { %v7429_v22 = vsel %vm11478_vm11, %v7427_v35, %v7428_v46  ;;  %v7436_v5 = vsel %vm11478_vm11, %v7434_v1, %v7435_v30  ;;  %v7449_v42 = vrot.slane %v15140_v53, 6  ;;  %v7532_v60 = vmax.bf16 %v7391_v8, %v7308_v55  ;;  %v1547_v8 = vld [vmem:[#allocation2 + $0xc0] sm:$0xf]  ;;  %v15420_v48 = vld [vmem:[#allocation2 + $0xcc] sm:$0xf] }
 0x475   : > { %v7533_v21 = vmax.bf16 %v7394_v61, %v15282_v2  ;;  %v7447_v57 = vsel %vm11478_vm11, %v9242_v39, %v7446_v4  ;;  %v7448_v14 = vrot.slane %v7446_v4, 4  ;;  %v7534_v34 = vmax.bf16 %v7398_v27, %v7310_v3  ;;  %v15411_v27 = vld [vmem:[#allocation2 + $0xb4] sm:$0xf]  ;;  %v1500_v39 = vld [vmem:[#allocation2 + $0xb8] sm:$0xf] }
 0x476   : > { %v7535_v51 = vmax.bf16 %v7401_v23, %v15293_v59  ;;  %v7536_v53 = vmax.bf16 %v7405_v19, %v7312_v16  ;;  %v7537_v46 = vmax.bf16 %v7408_v52, %v15298_v41  ;;  %v18111_v11 = vmax.bf16 %v15259_v29, %v18095_v28  ;;  %7564 = vst [vmem:[#allocation3 + $0xc] sm:$0xf] %v7532_v60  ;;  %v15413_v61 = vld [vmem:[#allocation2 + $0xb4] sm:$0xe]  ;;  %v18121_v52 = vld [vmem:[#allocation72_spill] sm:$0xff]  ;;  %v18124_v60 = vld [vmem:[#allocation57_spill] sm:$0xff] }
 0x477   : > { %v7539_v55 = vmax.bf16 %v7415_v31, %v15303_v33  ;;  %7565 = vst [vmem:[#allocation3 + $0x1c] sm:$0xf] %v7533_v21  ;;  %v7450_v32 = vsel %vm11478_vm11, %v7448_v14, %v7449_v42  ;;  %v18112_v2 = vmax.bf16 %v15263_v17, %v18097_v12  ;;  %v7541_v24 = vmax.bf16 %v7422_v56, %v15310_v15  ;;  %v18116_v33 = vld [vmem:[#allocation94_spill] sm:$0xff]  ;;  %v1501_v56 = vld [vmem:[#allocation2 + $0xbc] sm:$0x3]  ;;  %v18125_v21 = vld [vmem:[#allocation67_spill] sm:$0xff] }
 0x478   : > { %v7538_v6 = vmax.bf16 %v7412_v49, %v18111_v11  ;;  %v18113_v3 = vmax.bf16 %v15269_v43, %v18099_v58  ;;  %7566 = vst [vmem:[#allocation3 + $0x2c] sm:$0xf] %v7534_v34  ;;  %7567 = vst [vmem:[#allocation3 + $0x3c] sm:$0xf] %v7535_v51  ;;  %v7543_v29 = vmax.bf16 %v7429_v22, %v15315_v18  ;;  %v943_v12 = vadd.f32 1.0, %v18116_v33  ;;  %v18118_v18 = vld [vmem:[#allocation53_spill] sm:$0xff] }
 0x479   : > { %v7540_v54 = vmax.bf16 %v7419_v44, %v18112_v2  ;;  %v18114_v37 = vmax.bf16 %v15277_v62, %v18101_v38  ;;  %v7545_v41 = vmax.bf16 %v7436_v5, %v15321_v36  ;;  %v18115_v17 = vmax.bf16 %v15288_v25, %v18103_v10  ;;  %7568 = vst [vmem:[#allocation3 + $0x4c] sm:$0xf] %v7536_v53  ;;  %v18117_v25 = vld [vmem:[#allocation87_spill] sm:$0xff]  ;;  %v18122_v31 = vld [vmem:[#allocation66_spill] sm:$0xff]  ;;  %v1454_v5 = vld [vmem:[#allocation2 + $0xb8] sm:$0xf] }
 0x47a   : > { %v7542_v59 = vmax.bf16 %v7426_v13, %v18113_v3  ;;  %7569 = vst [vmem:[#allocation3 + $0x5c] sm:$0xf] %v7537_v46  ;;  %7570 = vst [vmem:[#allocation3 + $0x6c] sm:$0xf] %v7538_v6  ;;  %v7549_v43 = vmax.bf16 %v7450_v32, %v15329_v9  ;;  %10401 = vrcp.f32 %v943_v12  ;;  %v18119_v38 = vrot.slane %v18118_v18, 7  ;;  %v18123_v44 = vld [vmem:[#allocation34_spill] sm:$0xff] }
 0x47b   : > { %v7544_v16 = vmax.bf16 %v7433_v0, %v18114_v37  ;;  %v7548_v28 = vmax.bf16 %v7447_v57, %v18115_v17  ;;  %7571 = vst [vmem:[#allocation3 + $0x7c] sm:$0xf] %v7539_v55  ;;  %7572 = vst [vmem:[#allocation3 + $0x8c] sm:$0xf] %v7540_v54  ;;  %v1594_v9 = vld [vmem:[#allocation2 + $0xc4] sm:$0xf]  ;;  %v1741_v26 = vmax.bf16 %v18121_v52, %v1547_v8 }
 0x47c   : > { %7573 = vst [vmem:[#allocation3 + $0x9c] sm:$0xf] %v7541_v24  ;;  %7574 = vst [vmem:[#allocation3 + $0xac] sm:$0xf] %v7542_v59  ;;  %v1307_v36 = vrot.slane %v18119_v38, 4  ;;  %v1693_v20 = vmax.bf16 %v18123_v44, %v18122_v31  ;;  %v1739_v35 = vmax.bf16 %v1594_v9, %v1545_v50  ;;  %v2303_v13 = vshrl.u32 %v15411_v27, 16 }
 0x47d   : > { %7575 = vst [vmem:[#allocation3 + $0xbc] sm:$0xf] %v7543_v29  ;;  %7576 = vst [vmem:[#allocation3 + $0xcc] sm:$0xf] %v7544_v16  ;;  %v2306_v1 = vshll.u32 %v15411_v27, 16  ;;  %v2699_v30 = vshrl.u32 %v15413_v61, 16  ;;  %v1740_v22 = vmax.bf16 %v1595_v47, %v1546_v40  ;;  %v1691_v57 = vmax.bf16 %v18125_v21, %v18124_v60 }
 0x47e   : > { %7577 = vst [vmem:[#allocation3 + $0xdc] sm:$0xf] %v7545_v41  ;;  %7580 = vst [vmem:[#allocation3 + $0x10c] sm:$0xf] %v7548_v28  ;;  %v1504_v0 = vld [vmem:[#allocation2 + $0xc8] sm:$0x3]  ;;  %v1789_v4 = vmax.bf16 %v1741_v26, %v1693_v20 }
 0x47f   : > { %7581 = vst [vmem:[#allocation3 + $0x11c] sm:$0xf] %v7549_v43  ;;  %v1503_v42 = vld [vmem:[#allocation2 + $0xc4] sm:$0xf]  ;;  %v1455_v14 = vld [vmem:[#allocation2 + $0xbc] sm:$0x3]  ;;  %v1787_v3 = vmax.bf16 %v1739_v35, %v1691_v57 }
 0x480   : > { %v1548_v34 = vld [vmem:[#allocation2 + $0xc4] sm:$0xf]  ;;  %v15427_v51 = vld [vmem:[#allocation2 + $0xcc] sm:$0xe]  ;;  %v1600_v53 = vld [vmem:[#allocation2 + $0xdc] sm:$0xf] }
 0x481   : > { %v18126_v46 = vld [vmem:[#allocation58_spill] sm:$0xff]  ;;  %v18127_v11 = vld [vmem:[#allocation32_spill] sm:$0xff]  ;;  %v2351_v55 = vshrl.u32 %v15420_v48, 16  ;;  %v2354_v32 = vshll.u32 %v15420_v48, 16  ;;  %v2702_v2 = vshll.u32 %v15413_v61, 16  ;;  %v2305_v59 = vrot.slane %v2303_v13, 4 }
 0x482   : > { %v1692_v6 = vmax.bf16 %v18127_v11, %v18126_v46  ;;  %v1549_v54 = vld [vmem:[#allocation2 + $0xc8] sm:$0x3]  ;;  %v1601_v24 = vld [vmem:[#allocation2 + $0xe0] sm:$0x3]  ;;  %v2308_v29 = vrot.slane %v2306_v1, 5  ;;  %v2701_v37 = vrot.slane %v2699_v30, 4 }
 0x483   : > { %v1645_v16 = vld [vmem:[#allocation2 + $0xd8] sm:$0xf]  ;;  %v18128_v43 = vld [vmem:[#allocation65_spill] sm:$0xff]  ;;  %v2704_v50 = vrot.slane %v2702_v2, 5  ;;  %v1650_v31 = vld [vmem:[#allocation2 + $0xec] sm:$0x3] }
 0x484   : > { %v1694_v33 = vmax.bf16 %v1500_v39, %v18128_v43  ;;  %v18129_v12 = vld [vmem:[#allocation33_spill] sm:$0xff]  ;;  %v2739_v35 = vshrl.u32 %v15427_v51, 16  ;;  %v2742_v13 = vshll.u32 %v15427_v51, 16  ;;  %v1837_v39 = vmax.bf16 %v1789_v4, %v1645_v16  ;;  %v15438_v46 = vld [vmem:[#allocation2 + $0xcc] sm:$0xc] }
 0x485   : > { %v1647_v40 = vld [vmem:[#allocation2 + $0xe0] sm:$0x3]  ;;  %v2309_v60 = vor.u32 %v2308_v29, %v2305_v59  ;;  %v2705_v21 = vor.u32 %v2704_v50, %v2701_v37  ;;  %v1984_v4 = vld [vmem:[#allocation2 + $0xb4] sm:$0xc] }
 0x487   : > { %v10402_v62 = vpop.eup %10401  ;;  %v2706_v2 = vrot.slane %v2705_v21, 4 }
 0x488   : > { %v1007_v15 = vmul.f32 %v10402_v62, %v18117_v25  ;;  %v1695_v62 = vmax.bf16 %v1501_v56, %v18129_v12  ;;  %v1697_v25 = vmax.bf16 %v1503_v42, %v1454_v5  ;;  %v9183_v12 = vrot.slane %v1984_v4, 10 }
 0x48a   : > { %v9416_v58 = vpack.c.bf16 %v1007_v15, %v1007_v15  ;;  %v1788_v15 = vmax.bf16 %v1740_v22, %v1692_v6  ;;  %v2310_v6 = vrot.slane %v2309_v60, 4 }
 0x48c   : > { %1167 = vst [vmem:[#allocation3 + $0x1f0] sm:$0xf] %v9416_v58  ;;  %v1308_v10 = vrot.slane %v9416_v58, 7 }
 0x48e   : > { %v1309_v19 = vsel %vm11308_vm2, %v1307_v36, %v1308_v10  ;;  %v1310_v49 = vrot.slane %v1308_v10, 4  ;;  %v1698_v36 = vmax.bf16 %v1504_v0, %v1455_v14  ;;  %v2353_v0 = vrot.slane %v2351_v55, 4 }
 0x48f   : > { %1406 = vst [vmem:[#allocation2 + $0xd0] sm:$0xf] %v1309_v19  ;;  %v1646_v19 = vld [vmem:[#allocation2 + $0xdc] sm:$0xf]  ;;  %v2356_v14 = vrot.slane %v2354_v32, 5 }
 0x490   : > { %1407 = vst [vmem:[#allocation2 + $0xd4] sm:$0x1] %v1310_v49  ;;  %v1649_v49 = vld [vmem:[#allocation2 + $0xe8] sm:$0xf] }
 0x496   : > { %v1551_v41 = vld [vmem:[#allocation2 + $0xd0] sm:$0xf] }
 0x497   : > { %v1597_v17 = vld [vmem:[#allocation2 + $0xd0] sm:$0xf]  ;;  %v1552_v58 = vld [vmem:[#allocation2 + $0xd4] sm:$0x3]  ;;  %v1745_v9 = vmax.bf16 %v1600_v53, %v1551_v41  ;;  %v2744_v53 = vrot.slane %v2742_v13, 5 }
 0x498   : > { %v1643_v28 = vld [vmem:[#allocation2 + $0xd0] sm:$0xf]  ;;  %v1598_v18 = vld [vmem:[#allocation2 + $0xd4] sm:$0x3]  ;;  %v1742_v10 = vmax.bf16 %v1597_v17, %v1548_v34  ;;  %v1746_v52 = vmax.bf16 %v1601_v24, %v1552_v58  ;;  %v2741_v34 = vrot.slane %v2739_v35, 4 }
 0x499   : > { %v1644_v38 = vld [vmem:[#allocation2 + $0xd4] sm:$0x3]  ;;  %v1835_v8 = vmax.bf16 %v1787_v3, %v1643_v28  ;;  %v1743_v47 = vmax.bf16 %v1598_v18, %v1549_v54  ;;  %v1793_v20 = vmax.bf16 %v1745_v9, %v1697_v25  ;;  %v2357_v3 = vor.u32 %v2356_v14, %v2353_v0 }
 0x49a   : > { %v1836_v26 = vmax.bf16 %v1788_v15, %v1644_v38  ;;  %v1790_v44 = vmax.bf16 %v1742_v10, %v1694_v33  ;;  %v1794_v30 = vmax.bf16 %v1746_v52, %v1698_v36  ;;  %v2745_v59 = vor.u32 %v2744_v53, %v2741_v34 }
 0x49b   : > { %1883 = vst [vmem:[#allocation2 + $0xb8] sm:$0xf] %v1835_v8  ;;  %v1791_v1 = vmax.bf16 %v1743_v47, %v1695_v62  ;;  %v1841_v22 = vmax.bf16 %v1793_v20, %v1649_v49  ;;  %v9185_v62 = vrot.slane %v15438_v46, 10  ;;  %v2358_v38 = vrot.slane %v2357_v3, 4 }
 0x49c   : > { %1884 = vst [vmem:[#allocation2 + $0xbc] sm:$0x3] %v1836_v26  ;;  %v1838_v56 = vmax.bf16 %v1790_v44, %v1646_v19  ;;  %v1842_v42 = vmax.bf16 %v1794_v30, %v1650_v31  ;;  %v15461_v36 = vrot.slane %v2745_v59, 4 }
 0x49d   : > { %v1839_v5 = vmax.bf16 %v1791_v1, %v1647_v40  ;;  %1889 = vst [vmem:[#allocation2 + $0xd0] sm:$0xf] %v1841_v22 }
 0x49e   : > { %v9662_v57 = vcombine.low %v1837_v39, %v1838_v56  ;;  %1890 = vst [vmem:[#allocation2 + $0xd4] sm:$0x3] %v1842_v42 }
 0x49f   : > { %1887 = vst [vmem:[#allocation2 + $0xc8] sm:$0x3] %v1839_v5 }
 0x4a0   : > { %9663 = vst [vmem:[#allocation2 + $0xc0] sm:$0xff] %v9662_v57  }
 0x4a2   : > { %v15440_v11 = vld [vmem:[#allocation2 + $0xb8] sm:$0xf] }
 0x4a3   : > { %v15442_v55 = vld [vmem:[#allocation2 + $0xbc] sm:$0x1]  ;;  %v2312_v24 = vshll.u32 %v15440_v11, 16  ;;  %v2316_v32 = vshrl.u32 %v15440_v11, 16  ;;  %v3225_v41 = vrot.slane %v15440_v11, 6 }
 0x4a4   : > { %v15444_v54 = vld [vmem:[#allocation2 + $0xbc] sm:$0x3]  ;;  %v2322_v29 = vshll.u32 %v15442_v55, 16  ;;  %v15455_v25 = vld [vmem:[#allocation2 + $0xd0] sm:$0xf] }
 0x4a5   : > { %v2709_v37 = vshll.u32 %v15444_v54, 16  ;;  %v2713_v16 = vshrl.u32 %v15444_v54, 16  ;;  %v2314_v17 = vrot.slane %v2312_v24, 5  ;;  %v2318_v28 = vrot.slane %v2316_v32, 4  ;;  %v15478_v31 = vld [vmem:[#allocation2 + $0xd4] sm:$0x1] }
 0x4a6   : > { %v15457_v15 = vld [vmem:[#allocation2 + $0xc8] sm:$0x1]  ;;  %v2324_v8 = vrot.slane %v2322_v29, 5  ;;  %v15471_v49 = vsel %vm11478_vm11, %v9183_v12, %v3225_v41  ;;  %v3228_v47 = vrot.slane %v15444_v54, 6  ;;  %v2360_v39 = vshll.u32 %v15455_v25, 16 }
 0x4a7   : > { %v15452_v43 = vrot.slane %v2709_v37, 5  ;;  %v2715_v33 = vrot.slane %v2713_v16, 4  ;;  %v2315_v58 = vsel %vm11433_vm9, %v2310_v6, %v2314_v17  ;;  %v2319_v18 = vor.u32 %v2318_v28, %v2314_v17  ;;  %v1919_v10 = vld [vmem:[#allocation2 + $0xc0] sm:$0xf]  ;;  %v15463_v9 = vld [vmem:[#allocation2 + $0xc4] sm:$0xf] }
 0x4a8   : > { %v2707_v19 = vsel %vm11433_vm9, %v2706_v2, %v2314_v17  ;;  %v2327_v26 = vshrl.u32 %v1919_v10, 16  ;;  %v15475_v50 = vmax.bf16 %v2315_v58, %v15411_v27  ;;  %v2330_v44 = vshll.u32 %v1919_v10, 16  ;;  %v1953_v56 = vld [vmem:[#allocation2 + $0xc0] sm:$0xe]  ;;  %v15489_v34 = vld [vmem:[#allocation2 + $0xc8] sm:$0x3] }
 0x4a9   : > { %v2320_v52 = vrot.slane %v2319_v18, 4  ;;  %v2716_v40 = vor.u32 %v2715_v33, %v15452_v43  ;;  %v2336_v20 = vshll.u32 %v15463_v9, 16  ;;  %v2340_v35 = vshrl.u32 %v15463_v9, 16  ;;  %v15499_v17 = vld [vmem:[#allocation2 + $0xd4] sm:$0x3] }
 0x4aa   : > { %v2346_v13 = vshll.u32 %v15457_v15, 16  ;;  %v2329_v30 = vrot.slane %v2327_v26, 4  ;;  %v2364_v27 = vshrl.u32 %v15455_v25, 16  ;;  %v2332_v22 = vrot.slane %v2330_v44, 5 }
 0x4ab   : > { %v2325_v1 = vsel %vm11433_vm9, %v2320_v52, %v2324_v8  ;;  %v2338_v0 = vrot.slane %v2336_v20, 5  ;;  %v2342_v5 = vrot.slane %v2340_v35, 4  ;;  %v2845_v42 = vmax.bf16 %v2707_v19, %v15413_v61 }
 0x4ac   : > { %v2348_v60 = vrot.slane %v2346_v13, 5  ;;  %v2362_v21 = vrot.slane %v2360_v39, 5  ;;  %v2366_v57 = vrot.slane %v2364_v27, 4  ;;  %v2370_v14 = vshll.u32 %v15478_v31, 16 }
 0x4ad   : > { %v2333_v53 = vor.u32 %v2332_v22, %v2329_v30  ;;  %v2343_v4 = vor.u32 %v2342_v5, %v2338_v0  ;;  %v15492_v6 = vmax.bf16 %v2325_v1, %v15440_v11  ;;  %v2712_v2 = vsel %vm11433_vm9, %v2320_v52, %v15452_v43 }
 0x4ae   : > { %v2363_v24 = vsel %vm11433_vm9, %v2358_v38, %v2362_v21  ;;  %v2367_v61 = vor.u32 %v2366_v57, %v2362_v21  ;;  %v2717_v32 = vrot.slane %v2716_v40, 4  ;;  %v2719_v3 = vshrl.u32 %v1953_v56, 16 }
 0x4af   : > { %v2334_v59 = vrot.slane %v2333_v53, 4  ;;  %v2344_v29 = vrot.slane %v2343_v4, 4  ;;  %v2372_v37 = vrot.slane %v2370_v14, 5  ;;  %v2722_v16 = vshll.u32 %v1953_v56, 16 }
 0x4b0   : > { %v2368_v28 = vrot.slane %v2367_v61, 4  ;;  %v2721_v33 = vrot.slane %v2719_v3, 4  ;;  %v2729_v12 = vshll.u32 %v15489_v34, 16  ;;  %v2733_v58 = vshrl.u32 %v15489_v34, 16 }
 0x4b1   : > { %v2339_v43 = vsel %vm11433_vm9, %v2334_v59, %v2338_v0  ;;  %v2349_v18 = vsel %vm11433_vm9, %v2344_v29, %v2348_v60  ;;  %v15508_v38 = vmax.bf16 %v2363_v24, %v15420_v48  ;;  %v2724_v8 = vrot.slane %v2722_v16, 5 }
 0x4b2   : > { %v2373_v19 = vsel %vm11433_vm9, %v2368_v28, %v2372_v37  ;;  %v15512_v52 = vmax.bf16 %v2339_v43, %v1919_v10  ;;  %v2731_v26 = vrot.slane %v2729_v12, 5  ;;  %v2747_v40 = vsel %vm11433_vm9, %v15461_v36, %v2362_v21 }
 0x4b3   : > { %v2435_v44 = vmax.bf16 %v2349_v18, %v15463_v9  ;;  %v2725_v20 = vor.u32 %v2724_v8, %v2721_v33  ;;  %v2735_v35 = vrot.slane %v2733_v58, 4  ;;  %v2749_v13 = vshll.u32 %v15499_v17, 16  ;;  %v1985_v33 = vld [vmem:[#allocation2 + $0xc0] sm:$0xc] }
 0x4b4   : > { %v2732_v48 = vsel %vm11433_vm9, %v2344_v29, %v2731_v26  ;;  %v2753_v1 = vshrl.u32 %v15499_v17, 16  ;;  %v2846_v30 = vmax.bf16 %v2712_v2, %v15440_v11  ;;  %v2847_v10 = vmax.bf16 %v2717_v32, %v15442_v55 }
 0x4b5   : > { %v2726_v39 = vrot.slane %v2725_v20, 4  ;;  %v2736_v27 = vor.u32 %v2735_v35, %v2731_v26  ;;  %v2751_v22 = vrot.slane %v2749_v13, 5  ;;  %v2849_v36 = vmax.bf16 %v2732_v48, %v15463_v9 }
 0x4b6   : > { %v2755_v5 = vrot.slane %v2753_v1, 4  ;;  %v2851_v60 = vmax.bf16 %v2747_v40, %v15427_v51  ;;  %v9167_v21 = vrot.slane %v2845_v42, 9  ;;  %v2998_v57 = vrot.slane %v2846_v30, 5 }
 0x4b7   : > { %v2727_v14 = vsel %vm11433_vm9, %v2726_v39, %v2338_v0  ;;  %v2737_v53 = vrot.slane %v2736_v27, 4  ;;  %v2752_v4 = vsel %vm11433_vm9, %v2368_v28, %v2751_v22  ;;  %v3001_v2 = vrot.slane %v2847_v10, 5 }
 0x4b8   : > { %v2756_v24 = vor.u32 %v2755_v5, %v2751_v22  ;;  %v2848_v55 = vmax.bf16 %v2727_v14, %v1953_v56  ;;  %v2852_v61 = vmax.bf16 %v2752_v4, %v15455_v25  ;;  %v2999_v32 = vsel %vm11463_vm10, %v9167_v21, %v2998_v57  ;;  %v18131_v14 = vld [vmem:[#allocation62_spill] sm:$0xff] }
 0x4b9   : > { %v2850_v3 = vmax.bf16 %v2737_v53, %v15457_v15  ;;  %v3000_v51 = vrot.slane %v2998_v57, 4  ;;  %v3005_v42 = vrot.slane %v2849_v36, 5  ;;  %v9169_v59 = vrot.slane %v2851_v60, 9  ;;  %v18130_v57 = vld [vmem:[#allocation61_spill] sm:$0xff] }
 0x4ba   : > { %v2757_v29 = vrot.slane %v2756_v24, 4  ;;  %v9168_v37 = vrot.slane %v2848_v55, 9  ;;  %v3012_v0 = vrot.slane %v2852_v61, 5  ;;  %v3075_v16 = vmax.bf16 %v2999_v32, %v15475_v50  ;;  %v3677_v55 = vld [vmem:[#allocation2 + $0x9c] sm:$0xf] }
 0x4bb   : > { %v3002_v28 = vsel %vm11463_vm10, %v3000_v51, %v3001_v2  ;;  %v3007_v56 = vrot.slane %v3005_v42, 4  ;;  %v3008_v12 = vrot.slane %v2850_v3, 5  ;;  %v3227_v58 = vrot.slane %v3225_v41, 4  ;;  %v15575_v51 = vld [vmem:[#allocation2 + $0x74] sm:$0x3] }
 0x4bc   : > { %v2853_v43 = vmax.bf16 %v2757_v29, %v15478_v31  ;;  %v3006_v15 = vsel %vm11463_vm10, %v9168_v37, %v3005_v42  ;;  %v3013_v18 = vsel %vm11463_vm10, %v9169_v59, %v3012_v0  ;;  %v3014_v8 = vrot.slane %v3012_v0, 4  ;;  %18132 = vst [vmem:[#allocation39_spill] sm:$0xff] %v15575_v51  ;;  %v5891_v29 = vld [vmem:[#allocation2 + $0x8c] sm:$0x3] }
 0x4bd   : > { %v2437_v50 = vmax.bf16 %v2373_v19, %v15455_v25  ;;  %v3009_v26 = vsel %vm11463_vm10, %v3007_v56, %v3008_v12  ;;  %v3076_v40 = vmax.bf16 %v3002_v28, %v15492_v6  ;;  %v3077_v20 = vmax.bf16 %v3006_v15, %v15512_v52  ;;  %v18133_v56 = vld [vmem:[#allocation81_spill] sm:$0xff]  ;;  %v15590_v15 = vld [vmem:[#allocation2 + $0xac] sm:$0xf] }
 0x4be   : > { %v3015_v11 = vrot.slane %v2853_v43, 5  ;;  %v3078_v41 = vmax.bf16 %v3009_v26, %v2435_v44  ;;  %v3079_v31 = vmax.bf16 %v3013_v18, %v15508_v38  ;;  %v9184_v35 = vrot.slane %v1985_v33, 10  ;;  %v15583_v33 = vld [vmem:[#allocation2 + $0xa0] sm:$0xf]  ;;  %v15588_v43 = vld [vmem:[#allocation2 + $0xa8] sm:$0xf] }
 0x4bf   : > { %v3229_v13 = vsel %vm11478_vm11, %v3227_v58, %v3228_v47  ;;  %v3232_v48 = vrot.slane %v15463_v9, 6  ;;  %v3235_v19 = vrot.slane %v15489_v34, 6  ;;  %v3239_v1 = vrot.slane %v15455_v25, 6  ;;  %v15586_v58 = vld [vmem:[#allocation2 + $0xa4] sm:$0x3] }
 0x4c0   : > { %v3016_v6 = vsel %vm11463_vm10, %v3014_v8, %v3015_v11  ;;  %v3242_v52 = vrot.slane %v15499_v17, 6  ;;  %v3302_v44 = vmax.bf16 %v15471_v49, %v3075_v16  ;;  %v3303_v38 = vmax.bf16 %v3229_v13, %v3076_v40  ;;  %v15581_v16 = vld [vmem:[#allocation2 + $0x9c] sm:$0xf]  ;;  %v15592_v18 = vld [vmem:[#allocation2 + $0xb0] sm:$0x3] }
 0x4c1   : > { %v3080_v30 = vmax.bf16 %v3016_v6, %v2437_v50  ;;  %v3233_v54 = vsel %vm11478_vm11, %v9184_v35, %v3232_v48  ;;  %v3234_v10 = vrot.slane %v3232_v48, 4  ;;  %v3240_v9 = vsel %vm11478_vm11, %v9185_v62, %v3239_v1  ;;  %v3725_v62 = vld [vmem:[#allocation2 + $0xa8] sm:$0xf]  ;;  %v3678_v8 = vld [vmem:[#allocation2 + $0xa0] sm:$0xf] }
 0x4c2   : > { %v3241_v47 = vrot.slane %v3239_v1, 4  ;;  %v3304_v25 = vmax.bf16 %v3233_v54, %v3077_v20  ;;  %v3306_v34 = vmax.bf16 %v3240_v9, %v3079_v31  ;;  %3334 = vst [vmem:[#allocation3 + $0x1a4] sm:$0xf] %v3302_v44  ;;  %3335 = vst [vmem:[#allocation3 + $0x1b4] sm:$0xf] %v3303_v38  ;;  %v3437_v39 = vrot.slane %v3302_v44, 7 }
 0x4c3   : > { %v3236_v49 = vsel %vm11478_vm11, %v3234_v10, %v3235_v19  ;;  %v3439_v17 = vrot.slane %v3303_v38, 7  ;;  %v3821_v53 = vmax.bf16 %v18131_v14, %v18130_v57  ;;  %v3869_v3 = vmax.bf16 %v3725_v62, %v3677_v55  ;;  %v3679_v50 = vld [vmem:[#allocation2 + $0xa4] sm:$0x3]  ;;  %v3680_v26 = vld [vmem:[#allocation2 + $0xa8] sm:$0xf]  ;;  %v18134_v19 = vld [vmem:[#allocation43_spill] sm:$0xff] }
 0x4c4   : > { %v3243_v27 = vsel %vm11478_vm11, %v3241_v47, %v3242_v52  ;;  %v3305_v22 = vmax.bf16 %v3236_v49, %v3078_v41  ;;  %3336 = vst [vmem:[#allocation3 + $0x1c4] sm:$0xf] %v3304_v25  ;;  %3338 = vst [vmem:[#allocation3 + $0x1e4] sm:$0xf] %v3306_v34  ;;  %v3438_v46 = vrot.slane %v3437_v39, 4  ;;  %v3442_v36 = vrot.slane %v3304_v25, 7 }
 0x4c5   : > { %3539 = vst [vmem:[#allocation2 + $0xb4] sm:$0xe] %v3437_v39  ;;  %v3307_v5 = vmax.bf16 %v3243_v27, %v3080_v30  ;;  %v3441_v60 = vrot.slane %v3439_v17, 4  ;;  %v3447_v21 = vrot.slane %v3306_v34, 7  ;;  %v3917_v28 = vmax.bf16 %v3869_v3, %v3821_v53  ;;  %v3726_v40 = vld [vmem:[#allocation2 + $0xac] sm:$0xf] }
 0x4c6   : > { %3337 = vst [vmem:[#allocation3 + $0x1d4] sm:$0xf] %v3305_v22  ;;  %v3440_v4 = vsel %vm11308_vm2, %v3438_v46, %v3439_v17  ;;  %v3443_v2 = vrot.slane %v3442_v36, 4  ;;  %v3444_v24 = vrot.slane %v3305_v22, 7  ;;  %3542 = vst [vmem:[#allocation2 + $0xc0] sm:$0xe] %v3442_v36  ;;  %v6083_v12 = vmax.bf16 %v18133_v56, %v5891_v29 }
 0x4c7   : > { %3339 = vst [vmem:[#allocation3 + $0x1f4] sm:$0xf] %v3307_v5  ;;  %v3448_v61 = vrot.slane %v3447_v21, 4  ;;  %v3449_v32 = vrot.slane %v3307_v5, 7  ;;  %3540 = vst [vmem:[#allocation2 + $0xb8] sm:$0xf] %v3440_v4 }
 0x4c8   : > { %3541 = vst [vmem:[#allocation2 + $0xbc] sm:$0x1] %v3441_v60  ;;  %3545 = vst [vmem:[#allocation2 + $0xcc] sm:$0xe] %v3447_v21  ;;  %v3445_v42 = vsel %vm11308_vm2, %v3443_v2, %v3444_v24  ;;  %v3446_v59 = vrot.slane %v3444_v24, 4  ;;  %v18135_v1 = vld [vmem:[#allocation44_spill] sm:$0xff]  ;;  %v3870_v60 = vmax.bf16 %v3726_v40, %v3678_v8 }
 0x4c9   : > { %v3450_v37 = vsel %vm11308_vm2, %v3448_v61, %v3449_v32  ;;  %v3451_v0 = vrot.slane %v3449_v32, 4  ;;  %3543 = vst [vmem:[#allocation2 + $0xc4] sm:$0xf] %v3445_v42  ;;  %v3727_v20 = vld [vmem:[#allocation2 + $0xb0] sm:$0x3]  ;;  %v3822_v6 = vmax.bf16 %v18135_v1, %v18134_v19  ;;  %v18136_v52 = vld [vmem:[#allocation46_spill] sm:$0xff] }
 0x4ca   : > { %3544 = vst [vmem:[#allocation2 + $0xc8] sm:$0x1] %v3446_v59  ;;  %3546 = vst [vmem:[#allocation2 + $0xd0] sm:$0xf] %v3450_v37  ;;  %v15594_v11 = vld [vmem:[#allocation2 + $0xd8] sm:$0xf]  ;;  %v3871_v21 = vmax.bf16 %v3727_v20, %v3679_v50 }
 0x4cb   : > { %3547 = vst [vmem:[#allocation2 + $0xd4] sm:$0x1] %v3451_v0  ;;  %6131 = vst [vmem:[#allocation2 + $0x74] sm:$0x3] %v6083_v12  ;;  %v3587_v41 = vld [vmem:[#allocation2 + $0x9c] sm:$0xf]  ;;  %v15633_v56 = vmax.bf16 %v3870_v60, %v3822_v6 }
 0x4cc   : > { %v15596_v31 = vld [vmem:[#allocation2 + $0xa0] sm:$0xf]  ;;  %v15598_v35 = vld [vmem:[#allocation2 + $0xb4] sm:$0xf]  ;;  %v18137_v44 = vld [vmem:[#allocation60_spill] sm:$0xff]  ;;  %v3827_v32 = vmax.bf16 %v15588_v43, %v3587_v41 }
 0x4cd   : > { %v3728_v13 = vld [vmem:[#allocation2 + $0xb4] sm:$0xf]  ;;  %v3823_v38 = vmax.bf16 %v18137_v44, %v18136_v52  ;;  %v15604_v30 = vld [vmem:[#allocation2 + $0xa4] sm:$0x3]  ;;  %v15606_v54 = vld [vmem:[#allocation2 + $0xa8] sm:$0xf]  ;;  %v3828_v3 = vmax.bf16 %v15590_v15, %v15596_v31 }
 0x4ce   : > { %v3773_v48 = vld [vmem:[#allocation2 + $0xb4] sm:$0xf]  ;;  %v3641_v10 = vld [vmem:[#allocation2 + $0xc0] sm:$0xf]  ;;  %v3738_v25 = vld [vmem:[#allocation2 + $0xdc] sm:$0xf]  ;;  %v3872_v49 = vmax.bf16 %v3728_v13, %v3680_v26 }
 0x4cf   : > { %v3683_v9 = vld [vmem:[#allocation2 + $0xb4] sm:$0xf]  ;;  %v3731_v47 = vld [vmem:[#allocation2 + $0xc0] sm:$0xf]  ;;  %v3965_v17 = vmax.bf16 %v3917_v28, %v3773_v48  ;;  %v15610_v27 = vld [vmem:[#allocation2 + $0xac] sm:$0xf]  ;;  %v3830_v28 = vmax.bf16 %v15598_v35, %v15606_v54  ;;  %v15635_v12 = vmax.bf16 %v3871_v21, %v3823_v38 }
 0x4d0   : > { %v18138_v34 = vld [vmem:[#allocation63_spill] sm:$0xff]  ;;  %v15612_v46 = vld [vmem:[#allocation2 + $0xb8] sm:$0xf]  ;;  %v15614_v36 = vld [vmem:[#allocation2 + $0xe0] sm:$0x3]  ;;  %v3875_v57 = vmax.bf16 %v3731_v47, %v3683_v9 }
 0x4d1   : > { %v3824_v39 = vmax.bf16 %v15581_v16, %v18138_v34  ;;  %v3593_v22 = vld [vmem:[#allocation2 + $0xb4] sm:$0xf]  ;;  %v18139_v62 = vld [vmem:[#allocation48_spill] sm:$0xff]  ;;  %v15618_v14 = vld [vmem:[#allocation2 + $0xb0] sm:$0x3]  ;;  %v3831_v26 = vmax.bf16 %v15612_v46, %v15610_v27 }
 0x4d2   : > { %v3825_v5 = vmax.bf16 %v15583_v33, %v18139_v62  ;;  %v3594_v53 = vld [vmem:[#allocation2 + $0xb8] sm:$0xf]  ;;  %v15620_v4 = vld [vmem:[#allocation2 + $0xbc] sm:$0x3]  ;;  %v3686_v24 = vld [vmem:[#allocation2 + $0xc0] sm:$0xf]  ;;  %v3833_v42 = vmax.bf16 %v3641_v10, %v3593_v22  ;;  %v3829_v33 = vmax.bf16 %v15592_v18, %v15604_v30  ;;  %v3923_v1 = vmax.bf16 %v3875_v57, %v3827_v32 }
 0x4d3   : > { %v15622_v2 = vld [vmem:[#allocation2 + $0xbc] sm:$0x3]  ;;  %v18140_v55 = vld [vmem:[#allocation35_spill] sm:$0xff]  ;;  %4013 = vst [vmem:[#allocation2 + $0x9c] sm:$0xf] %v3965_v17  ;;  %v15640_v41 = vmax.bf16 %v3872_v49, %v3824_v39 }
 0x4d4   : > { %v3826_v61 = vmax.bf16 %v15586_v58, %v18140_v55  ;;  %v3642_v59 = vld [vmem:[#allocation2 + $0xc4] sm:$0xf]  ;;  %v3681_v29 = vld [vmem:[#allocation2 + $0xac] sm:$0xf]  ;;  %v3682_v37 = vld [vmem:[#allocation2 + $0xb0] sm:$0x3]  ;;  %v3832_v13 = vmax.bf16 %v15622_v2, %v15618_v14 }
 0x4d5   : > { %v3687_v0 = vld [vmem:[#allocation2 + $0xc4] sm:$0xf]  ;;  %v3689_v16 = vld [vmem:[#allocation2 + $0xcc] sm:$0xf]  ;;  %v3643_v58 = vld [vmem:[#allocation2 + $0xc8] sm:$0x3]  ;;  %v3834_v40 = vmax.bf16 %v3642_v59, %v3594_v53 }
 0x4d6   : > { %v3684_v43 = vld [vmem:[#allocation2 + $0xb8] sm:$0xf]  ;;  %v3685_v15 = vld [vmem:[#allocation2 + $0xbc] sm:$0x3]  ;;  %v3688_v8 = vld [vmem:[#allocation2 + $0xc8] sm:$0x3]  ;;  %v3881_v20 = vmax.bf16 %v15594_v11, %v3689_v16  ;;  %v3835_v48 = vmax.bf16 %v3643_v58, %v15620_v4 }
 0x4d7   : > { %v3690_v50 = vld [vmem:[#allocation2 + $0xd0] sm:$0xf]  ;;  %v3691_v18 = vld [vmem:[#allocation2 + $0xd4] sm:$0x3]  ;;  %v3729_v31 = vld [vmem:[#allocation2 + $0xb8] sm:$0xf] }
 0x4d8   : > { %v3730_v35 = vld [vmem:[#allocation2 + $0xbc] sm:$0x3]  ;;  %v3882_v19 = vmax.bf16 %v3738_v25, %v3690_v50  ;;  %v3732_v6 = vld [vmem:[#allocation2 + $0xc4] sm:$0xf]  ;;  %v3733_v52 = vld [vmem:[#allocation2 + $0xc8] sm:$0x3]  ;;  %v3873_v38 = vmax.bf16 %v3729_v31, %v3681_v29  ;;  %v3883_v54 = vmax.bf16 %v15614_v36, %v3691_v18  ;;  %v3929_v11 = vmax.bf16 %v3881_v20, %v3833_v42 }
 0x4d9   : > { %v3734_v44 = vld [vmem:[#allocation2 + $0xcc] sm:$0xf]  ;;  %v3874_v30 = vmax.bf16 %v3730_v35, %v3682_v37  ;;  %v3735_v10 = vld [vmem:[#allocation2 + $0xd0] sm:$0xf]  ;;  %v3736_v9 = vld [vmem:[#allocation2 + $0xd4] sm:$0x3]  ;;  %v3876_v39 = vmax.bf16 %v3732_v6, %v3684_v43  ;;  %v3877_v49 = vmax.bf16 %v3733_v52, %v3685_v15 }
 0x4da   : > { %v3782_v47 = vld [vmem:[#allocation2 + $0xd8] sm:$0xf]  ;;  %v3783_v34 = vld [vmem:[#allocation2 + $0xdc] sm:$0xf]  ;;  %v3878_v17 = vmax.bf16 %v3734_v44, %v3686_v24  ;;  %v3930_v27 = vmax.bf16 %v3882_v19, %v3834_v40  ;;  %v3785_v22 = vld [vmem:[#allocation2 + $0xe4] sm:$0xf]  ;;  %v3879_v60 = vmax.bf16 %v3735_v10, %v3687_v0  ;;  %v3880_v21 = vmax.bf16 %v3736_v9, %v3688_v8 }
 0x4db   : > { %v3776_v46 = vld [vmem:[#allocation2 + $0xc0] sm:$0xf]  ;;  %v3777_v25 = vld [vmem:[#allocation2 + $0xc4] sm:$0xf]  ;;  %v3921_v57 = vmax.bf16 %v3873_v38, %v3825_v5  ;;  %v3922_v14 = vmax.bf16 %v3874_v30, %v3826_v61  ;;  %v3774_v53 = vld [vmem:[#allocation2 + $0xb8] sm:$0xf]  ;;  %v3924_v2 = vmax.bf16 %v3876_v39, %v3828_v3  ;;  %v3925_v55 = vmax.bf16 %v3877_v49, %v3829_v33 }
 0x4dc   : > { %v3784_v62 = vld [vmem:[#allocation2 + $0xe0] sm:$0x3]  ;;  %v3775_v4 = vld [vmem:[#allocation2 + $0xbc] sm:$0x3]  ;;  %v3778_v36 = vld [vmem:[#allocation2 + $0xc8] sm:$0x3]  ;;  %v3926_v32 = vmax.bf16 %v3878_v17, %v3830_v28  ;;  %v3931_v42 = vmax.bf16 %v3883_v54, %v3835_v48  ;;  %v3927_v24 = vmax.bf16 %v3879_v60, %v3831_v26  ;;  %v3928_v16 = vmax.bf16 %v3880_v21, %v3832_v13 }
 0x4dd   : > { %v3779_v59 = vld [vmem:[#allocation2 + $0xcc] sm:$0xf]  ;;  %v3786_v29 = vld [vmem:[#allocation2 + $0xe8] sm:$0xf]  ;;  %v3966_v58 = vmax.bf16 %v15633_v56, %v3774_v53  ;;  %v3967_v43 = vmax.bf16 %v15635_v12, %v3775_v4  ;;  %v3780_v0 = vld [vmem:[#allocation2 + $0xd0] sm:$0xf]  ;;  %v3968_v5 = vmax.bf16 %v15640_v41, %v3776_v46  ;;  %v3969_v61 = vmax.bf16 %v3921_v57, %v3777_v25 }
 0x4de   : > { %v3787_v37 = vld [vmem:[#allocation2 + $0xec] sm:$0x3]  ;;  %v3781_v15 = vld [vmem:[#allocation2 + $0xd4] sm:$0x3]  ;;  %v3970_v8 = vmax.bf16 %v3922_v14, %v3778_v36  ;;  %v3971_v50 = vmax.bf16 %v3923_v1, %v3779_v59  ;;  %v3972_v33 = vmax.bf16 %v3924_v2, %v3780_v0  ;;  %v3974_v40 = vmax.bf16 %v3926_v32, %v3782_v47  ;;  %v15651_v12 = vld [vmem:[#allocation2 + $0x9c] sm:$0xf] }
 0x4df   : > { %v15649_v3 = vld [vmem:[#allocation2 + $0x6c] sm:$0xe]  ;;  %v3973_v28 = vmax.bf16 %v3925_v55, %v3781_v15  ;;  %v3975_v20 = vmax.bf16 %v3927_v24, %v3783_v34  ;;  %4014 = vst [vmem:[#allocation2 + $0xa0] sm:$0xf] %v3966_v58  ;;  %4015 = vst [vmem:[#allocation2 + $0xa4] sm:$0x3] %v3967_v43  ;;  %v3976_v26 = vmax.bf16 %v3928_v16, %v3784_v62 }
 0x4e0   : > { %18141 = vst [vmem:[#allocation73_spill] sm:$0xff] %v15649_v3  ;;  %v3977_v18 = vmax.bf16 %v3929_v11, %v3785_v22  ;;  %v3978_v56 = vmax.bf16 %v3930_v27, %v3786_v29  ;;  %v3979_v31 = vmax.bf16 %v3931_v42, %v3787_v37  ;;  %4018 = vst [vmem:[#allocation2 + $0xb0] sm:$0x3] %v3970_v8  ;;  %v6841_v13 = vshrl.u32 %v15649_v3, 16  ;;  %v15655_v19 = vld [vmem:[#allocation2 + $0x9c] sm:$0xe] }
 0x4e1   : > { %4019 = vst [vmem:[#allocation2 + $0xb4] sm:$0xf] %v3971_v50  ;;  %v9675_v41 = vcombine.low %v3968_v5, %v3969_v61  ;;  %4020 = vst [vmem:[#allocation2 + $0xb8] sm:$0xf] %v3972_v33  ;;  %v9677_v35 = vcombine.low %v3974_v40, %v3975_v20  ;;  %v6844_v48 = vshll.u32 %v15649_v3, 16  ;;  %v4389_v1 = vshrl.u32 %v15651_v12, 16 }
 0x4e2   : > { %4021 = vst [vmem:[#allocation2 + $0xbc] sm:$0x3] %v3973_v28  ;;  %4024 = vst [vmem:[#allocation2 + $0xc8] sm:$0x3] %v3976_v26  ;;  %v4392_v6 = vshll.u32 %v15651_v12, 16  ;;  %v6843_v38 = vrot.slane %v6841_v13, 4 }
 0x4e3   : > { %4025 = vst [vmem:[#allocation2 + $0xcc] sm:$0xf] %v3977_v18  ;;  %4026 = vst [vmem:[#allocation2 + $0xd0] sm:$0xf] %v3978_v56  ;;  %v6170_v52 = vld [vmem:[#allocation2 + $0x6c] sm:$0xf] }
 0x4e4   : > { %4027 = vst [vmem:[#allocation2 + $0xd4] sm:$0x3] %v3979_v31  ;;  %9676 = vst [vmem:[#allocation2 + $0xa8] sm:$0xff] %v9675_v41   ;;  %v15659_v44 = vld [vmem:[#allocation2 + $0x70] sm:$0xf]  ;;  %v6846_v30 = vrot.slane %v6844_v48, 5 }
 0x4e5   : > { %9678 = vst [vmem:[#allocation2 + $0xc0] sm:$0xff] %v9677_v35   ;;  %18142 = vst [vmem:[#allocation107_spill] sm:$0xff] %v15659_v44  ;;  %v4793_v54 = vshrl.u32 %v15655_v19, 16  ;;  %v4796_v11 = vshll.u32 %v15655_v19, 16  ;;  %v4391_v10 = vrot.slane %v4389_v1, 4  ;;  %v4394_v9 = vrot.slane %v4392_v6, 5 }
 0x4e6   : > { %v6421_v47 = vshrl.u32 %v6170_v52, 16  ;;  %v6424_v34 = vshll.u32 %v6170_v52, 16  ;;  %v6430_v39 = vshll.u32 %v15659_v44, 16  ;;  %v6434_v49 = vshrl.u32 %v15659_v44, 16  ;;  %v15670_v25 = vld [vmem:[#allocation2 + $0x9c] sm:$0xc] }
 0x4e7   : > { %v6847_v17 = vor.u32 %v6846_v30, %v6843_v38  ;;  %v17388_v27 = vrot.slane %v15659_v44, 6  ;;  %v15666_v22 = vrot.slane %v4793_v54, 4  ;;  %v15668_v46 = vrot.slane %v4796_v11, 5  ;;  %18143 = vst [vmem:[#allocation74_spill] sm:$0xff] %v15670_v25  ;;  %v15676_v57 = vld [vmem:[#allocation2 + $0xa0] sm:$0xf] }
 0x4e8   : > { %v4395_v62 = vor.u32 %v4394_v9, %v4391_v10  ;;  %v15672_v60 = vrot.slane %v6421_v47, 4  ;;  %v15674_v21 = vrot.slane %v6424_v34, 5  ;;  %v15678_v14 = vld [vmem:[#allocation2 + $0xa4] sm:$0x1]  ;;  %v15680_v53 = vrot.slane %v6430_v39, 5 }
 0x4e9   : > { %v15682_v4 = vrot.slane %v6434_v49, 4  ;;  %v15688_v55 = vrot.slane %v6847_v17, 4  ;;  %v15692_v32 = vrot.slane %v17388_v27, 4  ;;  %v15694_v42 = vld [vmem:[#allocation2 + $0xb0] sm:$0x1]  ;;  %v4799_v59 = vor.u32 %v15668_v46, %v15666_v22 }
 0x4ea   : > { %18144 = vst [vmem:[#allocation51_spill] sm:$0xff] %v15672_v60  ;;  %18145 = vst [vmem:[#allocation75_spill] sm:$0xff] %v15674_v21  ;;  %v15699_v37 = vrot.slane %v4395_v62, 4  ;;  %v4398_v24 = vshll.u32 %v15676_v57, 16  ;;  %v4402_v16 = vshrl.u32 %v15676_v57, 16  ;;  %v4408_v58 = vshll.u32 %v15678_v14, 16 }
 0x4eb   : > { %18146 = vst [vmem:[#allocation36_spill] sm:$0xff] %v15680_v53  ;;  %18147 = vst [vmem:[#allocation31_spill] sm:$0xff] %v15682_v4  ;;  %v15684_v36 = vld [vmem:[#allocation2 + $0xa8] sm:$0xf]  ;;  %v15686_v2 = vld [vmem:[#allocation2 + $0xac] sm:$0xf] }
 0x4ec   : > { %18148 = vst [vmem:[#allocation56_spill] sm:$0xff] %v15688_v55  ;;  %18149 = vst [vmem:[#allocation76_spill] sm:$0xff] %v15692_v32  ;;  %v15704_v43 = vld [vmem:[#allocation2 + $0xb4] sm:$0xf]  ;;  %v4413_v0 = vshrl.u32 %v15684_v36, 16  ;;  %v4416_v15 = vshll.u32 %v15684_v36, 16 }
 0x4ed   : > { %v4422_v5 = vshll.u32 %v15686_v2, 16  ;;  %v4426_v61 = vshrl.u32 %v15686_v2, 16  ;;  %v15710_v8 = vld [vmem:[#allocation2 + $0xb8] sm:$0xf]  ;;  %v15712_v50 = vrot.slane %v4398_v24, 5  ;;  %v4404_v33 = vrot.slane %v4402_v16, 4 }
 0x4ee   : > { %v15714_v28 = vrot.slane %v4408_v58, 5  ;;  %v4432_v40 = vshll.u32 %v15694_v42, 16  ;;  %v15717_v20 = vld [vmem:[#allocation2 + $0xbc] sm:$0x1]  ;;  %v4415_v26 = vrot.slane %v4413_v0, 4  ;;  %v4418_v18 = vrot.slane %v4416_v15, 5 }
 0x4ef   : > { %v15719_v56 = vrot.slane %v4422_v5, 5  ;;  %v4428_v31 = vrot.slane %v4426_v61, 4  ;;  %v4401_v41 = vsel %vm11433_vm9, %v15699_v37, %v15712_v50  ;;  %v4405_v35 = vor.u32 %v4404_v33, %v15712_v50  ;;  %v15729_v1 = vld [vmem:[#allocation2 + $0xc0] sm:$0xf]  ;;  %v15734_v54 = vld [vmem:[#allocation2 + $0xcc] sm:$0xf] }
 0x4f0   : > { %v15726_v13 = vrot.slane %v4432_v40, 5  ;;  %v4437_v48 = vshrl.u32 %v15704_v43, 16  ;;  %v4419_v6 = vor.u32 %v4418_v18, %v4415_v26  ;;  %v4440_v38 = vshll.u32 %v15704_v43, 16  ;;  %v15740_v34 = vld [vmem:[#allocation2 + $0xc4] sm:$0xf] }
 0x4f1   : > { %v4429_v52 = vor.u32 %v4428_v31, %v15719_v56  ;;  %v4446_v30 = vshll.u32 %v15710_v8, 16  ;;  %v15736_v11 = vrot.slane %v4405_v35, 4  ;;  %v4450_v9 = vshrl.u32 %v15710_v8, 16  ;;  %v15746_v37 = vld [vmem:[#allocation2 + $0xc8] sm:$0x1] }
 0x4f2   : > { %v4439_v10 = vrot.slane %v4437_v48, 4  ;;  %v4456_v47 = vshll.u32 %v15717_v20, 16  ;;  %v4420_v39 = vrot.slane %v4419_v6, 4  ;;  %v4442_v17 = vrot.slane %v4440_v38, 5  ;;  %v15764_v31 = vld [vmem:[#allocation2 + $0xd0] sm:$0xf] }
 0x4f3   : > { %v15742_v49 = vrot.slane %v4429_v52, 4  ;;  %v15744_v62 = vrot.slane %v4446_v30, 5  ;;  %v4411_v24 = vsel %vm11433_vm9, %v15736_v11, %v15714_v28  ;;  %v4452_v16 = vrot.slane %v4450_v9, 4  ;;  %v15768_v38 = vld [vmem:[#allocation2 + $0xd4] sm:$0x1] }
 0x4f4   : > { %v4458_v58 = vrot.slane %v4456_v47, 5  ;;  %v4461_v0 = vshrl.u32 %v15729_v1, 16  ;;  %v4425_v15 = vsel %vm11433_vm9, %v4420_v39, %v15719_v56  ;;  %v4443_v61 = vor.u32 %v4442_v17, %v4439_v10  ;;  %v15873_v21 = vld [vmem:[#allocation2 + $0xd4] sm:$0x3] }
 0x4f5   : > { %v4435_v5 = vsel %vm11433_vm9, %v15742_v49, %v15726_v13  ;;  %v4464_v33 = vshll.u32 %v15729_v1, 16  ;;  %v4453_v40 = vor.u32 %v4452_v16, %v15744_v62  ;;  %v4470_v28 = vshll.u32 %v15740_v34, 16 }
 0x4f6   : > { %v4463_v26 = vrot.slane %v4461_v0, 4  ;;  %v4474_v18 = vshrl.u32 %v15740_v34, 16  ;;  %v4444_v35 = vrot.slane %v4443_v61, 4  ;;  %v4480_v6 = vshll.u32 %v15746_v37, 16 }
 0x4f7   : > { %v4466_v48 = vrot.slane %v4464_v33, 5  ;;  %v4485_v52 = vshrl.u32 %v15734_v54, 16  ;;  %v15770_v13 = vrot.slane %v4453_v40, 4  ;;  %v15772_v30 = vrot.slane %v4470_v28, 5 }
 0x4f8   : > { %v4476_v10 = vrot.slane %v4474_v18, 4  ;;  %v4488_v9 = vshll.u32 %v15734_v54, 16  ;;  %v4449_v47 = vsel %vm11433_vm9, %v4444_v35, %v15744_v62  ;;  %v4482_v17 = vrot.slane %v4480_v6, 5  ;;  %v15795_v6 = vld [vmem:[#allocation2 + $0xa4] sm:$0x3] }
 0x4f9   : > { %v4467_v39 = vor.u32 %v4466_v48, %v4463_v26  ;;  %v4487_v16 = vrot.slane %v4485_v52, 4  ;;  %v4459_v0 = vsel %vm11433_vm9, %v15770_v13, %v4458_v58  ;;  %v4494_v40 = vshll.u32 %v15764_v31, 16 }
 0x4fa   : > { %v4477_v61 = vor.u32 %v4476_v10, %v15772_v30  ;;  %v4490_v33 = vrot.slane %v4488_v9, 5  ;;  %v4498_v18 = vshrl.u32 %v15764_v31, 16  ;;  %v4504_v27 = vshll.u32 %v15768_v38, 16 }
 0x4fb   : > { %v4468_v28 = vrot.slane %v4467_v39, 4  ;;  %v15786_v29 = vmax.bf16 %v4401_v41, %v15651_v12  ;;  %v15790_v48 = vrot.slane %v4494_v40, 5  ;;  %v15793_v58 = vmax.bf16 %v4411_v24, %v15676_v57  ;;  %v15803_v12 = vld [vmem:[#allocation2 + $0xa8] sm:$0xe] }
 0x4fc   : > { %v15788_v26 = vrot.slane %v4477_v61, 4  ;;  %v4491_v35 = vor.u32 %v4490_v33, %v4487_v16  ;;  %v4500_v10 = vrot.slane %v4498_v18, 4  ;;  %v4506_v9 = vrot.slane %v4504_v27, 5  ;;  %v15814_v33 = vld [vmem:[#allocation2 + $0xb0] sm:$0x3] }
 0x4fd   : > { %v4473_v52 = vsel %vm11433_vm9, %v4468_v28, %v15772_v30  ;;  %v15801_v39 = vmax.bf16 %v4425_v15, %v15684_v36  ;;  %v15809_v24 = vmax.bf16 %v4435_v5, %v15686_v2  ;;  %v15812_v61 = vmax.bf16 %v4449_v47, %v15704_v43  ;;  %18150 = vst [vmem:[#allocation50_spill] sm:$0xff] %v15814_v33 }
 0x4fe   : > { %v4483_v41 = vsel %vm11433_vm9, %v15788_v26, %v4482_v17  ;;  %v4492_v16 = vrot.slane %v4491_v35, 4  ;;  %v4501_v27 = vor.u32 %v4500_v10, %v15790_v48  ;;  %v15818_v36 = vmax.bf16 %v4459_v0, %v15710_v8  ;;  %v15843_v35 = vld [vmem:[#allocation2 + $0xb4] sm:$0xe]  ;;  %v15850_v10 = vld [vmem:[#allocation2 + $0xbc] sm:$0x3] }
 0x4ff   : > { %v15821_v15 = vmax.bf16 %v4473_v52, %v15729_v1  ;;  %v15824_v40 = vmax.bf16 %v4483_v41, %v15740_v34  ;;  %v15832_v43 = vrot.slane %v4799_v59, 4  ;;  %v4803_v47 = vshll.u32 %v15795_v6, 16  ;;  %18151 = vst [vmem:[#allocation77_spill] sm:$0xff] %v15850_v10 }
 0x500   : > { %v4497_v5 = vsel %vm11433_vm9, %v4492_v16, %v15790_v48  ;;  %v4807_v17 = vshrl.u32 %v15795_v6, 16  ;;  %v15836_v0 = vrot.slane %v4501_v27, 4  ;;  %v4813_v28 = vshrl.u32 %v15803_v12, 16 }
 0x501   : > { %v15839_v1 = vmax.bf16 %v4497_v5, %v15734_v54  ;;  %v4816_v18 = vshll.u32 %v15803_v12, 16  ;;  %v4801_v22 = vsel %vm11433_vm9, %v15832_v43, %v15712_v50  ;;  %v4805_v46 = vrot.slane %v4803_v47, 5 }
 0x502   : > { %v4809_v59 = vrot.slane %v4807_v17, 4  ;;  %v4823_v52 = vshll.u32 %v15814_v33, 16  ;;  %v4507_v54 = vsel %vm11433_vm9, %v15836_v0, %v4506_v9  ;;  %v4815_v41 = vrot.slane %v4813_v28, 4  ;;  %v4090_v17 = vld [vmem:[#allocation2 + $0xc0] sm:$0xe] }
 0x503   : > { %v4818_v16 = vrot.slane %v4816_v18, 5  ;;  %v4827_v27 = vshrl.u32 %v15814_v33, 16  ;;  %v15857_v5 = vmax.bf16 %v4507_v54, %v15764_v31  ;;  %v4806_v50 = vsel %vm11433_vm9, %v15736_v11, %v4805_v46  ;;  %v15864_v28 = vld [vmem:[#allocation2 + $0xc8] sm:$0x3] }
 0x504   : > { %v4810_v43 = vor.u32 %v4809_v59, %v4805_v46  ;;  %v4825_v47 = vrot.slane %v4823_v52, 5  ;;  %v4833_v3 = vshrl.u32 %v15843_v35, 16  ;;  %v4836_v9 = vshll.u32 %v15843_v35, 16 }
 0x505   : > { %v4819_v44 = vor.u32 %v4818_v16, %v4815_v41  ;;  %v4829_v51 = vrot.slane %v4827_v27, 4  ;;  %v4843_v32 = vshll.u32 %v15850_v10, 16  ;;  %v4847_v11 = vshrl.u32 %v15850_v10, 16  ;;  %v4091_v16 = vld [vmem:[#allocation2 + $0xcc] sm:$0xe] }
 0x506   : > { %v15866_v18 = vrot.slane %v4810_v43, 4  ;;  %v4826_v54 = vsel %vm11433_vm9, %v15742_v49, %v4825_v47  ;;  %v4835_v52 = vrot.slane %v4833_v3, 4  ;;  %v4838_v41 = vrot.slane %v4836_v9, 5 }
 0x507   : > { %v4820_v46 = vrot.slane %v4819_v44, 4  ;;  %v4830_v59 = vor.u32 %v4829_v51, %v4825_v47  ;;  %v4845_v27 = vrot.slane %v4843_v32, 5  ;;  %v4849_v55 = vrot.slane %v4847_v11, 4 }
 0x508   : > { %v4853_v4 = vshrl.u32 %v4090_v17, 16  ;;  %v4856_v53 = vshll.u32 %v4090_v17, 16  ;;  %v4839_v60 = vor.u32 %v4838_v41, %v4835_v52  ;;  %v4863_v23 = vshll.u32 %v15864_v28, 16 }
 0x509   : > { %v4821_v43 = vsel %vm11433_vm9, %v4820_v46, %v15719_v56  ;;  %v4831_v49 = vrot.slane %v4830_v59, 4  ;;  %v4846_v51 = vsel %vm11433_vm9, %v15770_v13, %v4845_v27  ;;  %v4850_v3 = vor.u32 %v4849_v55, %v4845_v27 }
 0x50a   : > { %v4855_v44 = vrot.slane %v4853_v4, 4  ;;  %v4858_v32 = vrot.slane %v4856_v53, 5  ;;  %v4840_v47 = vrot.slane %v4839_v60, 4  ;;  %v4865_v9 = vrot.slane %v4863_v23, 5 }
 0x50b   : > { %v4867_v11 = vshrl.u32 %v15864_v28, 16  ;;  %v4873_v10 = vshrl.u32 %v4091_v16, 16  ;;  %v4851_v33 = vrot.slane %v4850_v3, 4  ;;  %v4876_v25 = vshll.u32 %v4091_v16, 16 }
 0x50c   : > { %v4859_v7 = vor.u32 %v4858_v32, %v4855_v44  ;;  %v4883_v56 = vshll.u32 %v15873_v21, 16  ;;  %v4841_v46 = vsel %vm11433_vm9, %v4840_v47, %v15744_v62  ;;  %v4866_v55 = vsel %vm11433_vm9, %v15788_v26, %v4865_v9 }
 0x50d   : > { %v4869_v4 = vrot.slane %v4867_v11, 4  ;;  %v4875_v53 = vrot.slane %v4873_v10, 4  ;;  %v4878_v23 = vrot.slane %v4876_v25, 5  ;;  %v4887_v59 = vshrl.u32 %v15873_v21, 16 }
 0x50e   : > { %v4860_v60 = vrot.slane %v4859_v7, 4  ;;  %v4885_v13 = vrot.slane %v4883_v56, 5  ;;  %v4973_v41 = vmax.bf16 %v4801_v22, %v15655_v19  ;;  %v4974_v27 = vmax.bf16 %v4806_v50, %v15676_v57 }
 0x50f   : > { %v4870_v52 = vor.u32 %v4869_v4, %v4865_v9  ;;  %v4975_v3 = vmax.bf16 %v15866_v18, %v15678_v14  ;;  %v4879_v26 = vor.u32 %v4878_v23, %v4875_v53  ;;  %v4889_v25 = vrot.slane %v4887_v59, 4 }
 0x510   : > { %v4861_v62 = vsel %vm11433_vm9, %v4860_v60, %v15772_v30  ;;  %v4886_v7 = vsel %vm11433_vm9, %v15836_v0, %v4885_v13  ;;  %v4976_v44 = vmax.bf16 %v4821_v43, %v15803_v12  ;;  %v4977_v19 = vmax.bf16 %v4826_v54, %v15686_v2 }
 0x511   : > { %v4871_v10 = vrot.slane %v4870_v52, 4  ;;  %v4978_v22 = vmax.bf16 %v4831_v49, %v15694_v42  ;;  %v4880_v50 = vrot.slane %v4879_v26, 4  ;;  %v4890_v32 = vor.u32 %v4889_v25, %v4885_v13 }
 0x512   : > { %v4979_v14 = vmax.bf16 %v4841_v46, %v15843_v35  ;;  %v4980_v18 = vmax.bf16 %v4846_v51, %v15710_v8  ;;  %v4981_v30 = vmax.bf16 %v4851_v33, %v15717_v20  ;;  %v4982_v47 = vmax.bf16 %v4861_v62, %v4090_v17 }
 0x513   : > { %v4983_v9 = vmax.bf16 %v4866_v55, %v15740_v34  ;;  %v4984_v0 = vmax.bf16 %v4871_v10, %v15746_v37  ;;  %v4881_v12 = vsel %vm11433_vm9, %v4880_v50, %v15790_v48  ;;  %v4891_v54 = vrot.slane %v4890_v32, 4  ;;  %v4120_v10 = vld [vmem:[#allocation2 + $0xa8] sm:$0xc] }
 0x514   : > { %v4986_v42 = vmax.bf16 %v4886_v7, %v15764_v31  ;;  %v9197_v43 = vrot.slane %v4973_v41, 9  ;;  %v4985_v49 = vmax.bf16 %v4881_v12, %v4091_v16  ;;  %v5115_v11 = vrot.slane %v4974_v27, 5 }
 0x515   : > { %v5118_v35 = vrot.slane %v4975_v3, 5  ;;  %v9198_v56 = vrot.slane %v4976_v44, 9  ;;  %v4987_v51 = vmax.bf16 %v4891_v54, %v15768_v38  ;;  %v5122_v20 = vrot.slane %v4977_v19, 5 }
 0x516   : > { %v5125_v33 = vrot.slane %v4978_v22, 5  ;;  %v9199_v17 = vrot.slane %v4979_v14, 9  ;;  %v15916_v37 = vsel %vm11463_vm10, %v9197_v43, %v5115_v11  ;;  %v5117_v46 = vrot.slane %v5115_v11, 4 }
 0x517   : > { %v5129_v55 = vrot.slane %v4980_v18, 5  ;;  %v5132_v48 = vrot.slane %v4981_v30, 5  ;;  %v15920_v4 = vsel %vm11463_vm10, %v9198_v56, %v5122_v20  ;;  %v5124_v16 = vrot.slane %v5122_v20, 4 }
 0x518   : > { %v9200_v53 = vrot.slane %v4982_v47, 9  ;;  %v5136_v60 = vrot.slane %v4983_v9, 5  ;;  %v5119_v38 = vsel %vm11463_vm10, %v5117_v46, %v5118_v35  ;;  %v5139_v59 = vrot.slane %v4984_v0, 5 }
 0x519   : > { %v5130_v23 = vsel %vm11463_vm10, %v9199_v17, %v5129_v55  ;;  %v5131_v13 = vrot.slane %v5129_v55, 4  ;;  %v5126_v52 = vsel %vm11463_vm10, %v5124_v16, %v5125_v33  ;;  %v9201_v3 = vrot.slane %v4985_v49, 9 }
 0x51a   : > { %v5137_v41 = vsel %vm11463_vm10, %v9200_v53, %v5136_v60  ;;  %v5138_v27 = vrot.slane %v5136_v60, 4  ;;  %v5143_v26 = vrot.slane %v4986_v42, 5  ;;  %v5146_v7 = vrot.slane %v4987_v51, 5  ;;  %v18152_v42 = vld [vmem:[#allocation74_spill] sm:$0xff] }
 0x51b   : > { %v5133_v62 = vsel %vm11463_vm10, %v5131_v13, %v5132_v48  ;;  %v5202_v25 = vmax.bf16 %v15916_v37, %v15786_v29  ;;  %v5203_v19 = vmax.bf16 %v5119_v38, %v15793_v58  ;;  %v5204_v22 = vmax.bf16 %v15920_v4, %v15801_v39  ;;  %v4121_v29 = vld [vmem:[#allocation2 + $0xb4] sm:$0xc]  ;;  %v4122_v39 = vld [vmem:[#allocation2 + $0xc0] sm:$0xc] }
 0x51c   : > { %v5140_v44 = vsel %vm11463_vm10, %v5138_v27, %v5139_v59  ;;  %v5205_v50 = vmax.bf16 %v5126_v52, %v15809_v24  ;;  %v5144_v32 = vsel %vm11463_vm10, %v9201_v3, %v5143_v26  ;;  %v5145_v14 = vrot.slane %v5143_v26, 4 }
 0x51d   : > { %v5206_v18 = vmax.bf16 %v5130_v23, %v15812_v61  ;;  %v5207_v30 = vmax.bf16 %v5133_v62, %v15818_v36  ;;  %v5208_v47 = vmax.bf16 %v5137_v41, %v15821_v15  ;;  %v5209_v9 = vmax.bf16 %v5140_v44, %v15824_v40 }
 0x51e   : > { %v5210_v58 = vmax.bf16 %v5144_v32, %v15839_v1  ;;  %v5339_v0 = vrot.slane %v15676_v57, 6  ;;  %v5147_v24 = vsel %vm11463_vm10, %v5145_v14, %v5146_v7  ;;  %v5342_v12 = vrot.slane %v15795_v6, 6  ;;  %v18155_v1 = vld [vmem:[#allocation50_spill] sm:$0xff] }
 0x51f   : > { %v9214_v54 = vrot.slane %v4120_v10, 10  ;;  %v5346_v61 = vrot.slane %v15686_v2, 6  ;;  %v5211_v36 = vmax.bf16 %v5147_v24, %v15857_v5  ;;  %v18153_v43 = vrot.slane %v18152_v42, 10  ;;  %v4123_v57 = vld [vmem:[#allocation2 + $0xcc] sm:$0xc]  ;;  %v18156_v5 = vld [vmem:[#allocation77_spill] sm:$0xff] }
 0x520   : > { %v5341_v49 = vrot.slane %v5339_v0, 4  ;;  %v5349_v11 = vrot.slane %v18155_v1, 6  ;;  %v9215_v51 = vrot.slane %v4121_v29, 10  ;;  %v5353_v6 = vrot.slane %v15710_v8, 6  ;;  %v18161_v1 = vld [vmem:[#allocation36_spill] sm:$0xff] }
 0x521   : > { %v5340_v40 = vsel %vm11478_vm11, %v18153_v43, %v5339_v0  ;;  %v5347_v35 = vsel %vm11478_vm11, %v9214_v54, %v5346_v61  ;;  %v5348_v56 = vrot.slane %v5346_v61, 4  ;;  %v5356_v20 = vrot.slane %v18156_v5, 6  ;;  %v18159_v43 = vld [vmem:[#allocation51_spill] sm:$0xff] }
 0x522   : > { %v5343_v2 = vsel %vm11478_vm11, %v5341_v49, %v5342_v12  ;;  %v9216_v33 = vrot.slane %v4122_v39, 10  ;;  %v5360_v17 = vrot.slane %v15740_v34, 6  ;;  %v5354_v46 = vsel %vm11478_vm11, %v9215_v51, %v5353_v6  ;;  %v15984_v12 = vld [vmem:[#allocation2 + $0x74] sm:$0x3]  ;;  %v18163_v51 = vld [vmem:[#allocation56_spill] sm:$0xff] }
 0x523   : > { %v5350_v37 = vsel %vm11478_vm11, %v5348_v56, %v5349_v11  ;;  %v5355_v55 = vrot.slane %v5353_v6, 4  ;;  %v5363_v48 = vrot.slane %v15864_v28, 6  ;;  %v9217_v16 = vrot.slane %v4123_v57, 10  ;;  %18158 = vst [vmem:[#allocation105_spill] sm:$0xff] %v15984_v12  ;;  %v18162_v11 = vld [vmem:[#allocation31_spill] sm:$0xff] }
 0x524   : > { %v5361_v8 = vsel %vm11478_vm11, %v9216_v33, %v5360_v17  ;;  %v5362_v4 = vrot.slane %v5360_v17, 4  ;;  %v5367_v53 = vrot.slane %v15764_v31, 6  ;;  %v5370_v34 = vrot.slane %v15873_v21, 6 }
 0x525   : > { %v5357_v60 = vsel %vm11478_vm11, %v5355_v55, %v5356_v20  ;;  %v5426_v38 = vmax.bf16 %v5340_v40, %v5202_v25  ;;  %v5427_v23 = vmax.bf16 %v5343_v2, %v5203_v19  ;;  %v5428_v52 = vmax.bf16 %v5347_v35, %v5204_v22  ;;  %v18160_v40 = vld [vmem:[#allocation75_spill] sm:$0xff]  ;;  %v18166_v55 = vld [vmem:[#allocation73_spill] sm:$0xff] }
 0x526   : > { %v5364_v13 = vsel %vm11478_vm11, %v5362_v4, %v5363_v48  ;;  %v5368_v28 = vsel %vm11478_vm11, %v9217_v16, %v5367_v53  ;;  %v5369_v59 = vrot.slane %v5367_v53, 4  ;;  %v5429_v41 = vmax.bf16 %v5350_v37, %v5205_v50  ;;  %v18164_v37 = vld [vmem:[#allocation76_spill] sm:$0xff]  ;;  %v5848_v4 = vld [vmem:[#allocation2 + $0x94] sm:$0xf] }
 0x527   : > { %v5430_v27 = vmax.bf16 %v5354_v46, %v5206_v18  ;;  %v5431_v3 = vmax.bf16 %v5357_v60, %v5207_v30  ;;  %v5432_v62 = vmax.bf16 %v5361_v8, %v5208_v47  ;;  %5458 = vst [vmem:[#allocation3 + $0x168] sm:$0xf] %v5426_v38  ;;  %5459 = vst [vmem:[#allocation3 + $0x178] sm:$0xf] %v5427_v23  ;;  %v5555_v7 = vrot.slane %v5426_v38, 7 }
 0x528   : > { %v5371_v31 = vsel %vm11478_vm11, %v5369_v59, %v5370_v34  ;;  %v5433_v21 = vmax.bf16 %v5364_v13, %v5209_v9  ;;  %v5434_v26 = vmax.bf16 %v5368_v28, %v5210_v58  ;;  %5460 = vst [vmem:[#allocation3 + $0x188] sm:$0xf] %v5428_v52  ;;  %5461 = vst [vmem:[#allocation3 + $0x198] sm:$0xf] %v5429_v41  ;;  %v5557_v10 = vrot.slane %v5427_v23, 7 }
 0x529   : > { %v5435_v25 = vmax.bf16 %v5371_v31, %v5211_v36  ;;  %5462 = vst [vmem:[#allocation3 + $0x1a8] sm:$0xf] %v5430_v27  ;;  %5463 = vst [vmem:[#allocation3 + $0x1b8] sm:$0xf] %v5431_v3  ;;  %v5560_v44 = vrot.slane %v5428_v52, 7  ;;  %v5562_v19 = vrot.slane %v5429_v41, 7  ;;  %v6427_v49 = vor.u32 %v18160_v40, %v18159_v43 }
 0x52a   : > { %5464 = vst [vmem:[#allocation3 + $0x1c8] sm:$0xf] %v5432_v62  ;;  %5465 = vst [vmem:[#allocation3 + $0x1d8] sm:$0xf] %v5433_v21  ;;  %v5556_v22 = vrot.slane %v5555_v7, 4  ;;  %v5565_v50 = vrot.slane %v5430_v27, 7  ;;  %v6437_v57 = vor.u32 %v18162_v11, %v18161_v1  ;;  %v6849_v6 = vsel %vm11433_vm9, %v18163_v51, %v18161_v1 }
 0x52b   : > { %5466 = vst [vmem:[#allocation3 + $0x1e8] sm:$0xf] %v5434_v26  ;;  %v5567_v32 = vrot.slane %v5431_v3, 7  ;;  %v5570_v14 = vrot.slane %v5432_v62, 7  ;;  %5661 = vst [vmem:[#allocation2 + $0x9c] sm:$0xe] %v5555_v7  ;;  %v16010_v48 = vmax.bf16 %v6849_v6, %v18166_v55 }
 0x52c   : > { %5467 = vst [vmem:[#allocation3 + $0x1f8] sm:$0xf] %v5435_v25  ;;  %v5559_v18 = vrot.slane %v5557_v10, 4  ;;  %v5561_v30 = vrot.slane %v5560_v44, 4  ;;  %v5564_v29 = vrot.slane %v5562_v19, 4  ;;  %v5572_v47 = vrot.slane %v5433_v21, 7 }
 0x52d   : > { %5664 = vst [vmem:[#allocation2 + $0xa8] sm:$0xe] %v5560_v44  ;;  %v5558_v58 = vsel %vm11308_vm2, %v5556_v22, %v5557_v10  ;;  %v5566_v0 = vrot.slane %v5565_v50, 4  ;;  %v5569_v39 = vrot.slane %v5567_v32, 4  ;;  %v5571_v24 = vrot.slane %v5570_v14, 4  ;;  %18167 = vst [vmem:[#allocation40_spill] sm:$0xff] %v16010_v48 }
 0x52e   : > { %5667 = vst [vmem:[#allocation2 + $0xb4] sm:$0xe] %v5565_v50  ;;  %5670 = vst [vmem:[#allocation2 + $0xc0] sm:$0xe] %v5570_v14  ;;  %v5563_v54 = vsel %vm11308_vm2, %v5561_v30, %v5562_v19  ;;  %v5574_v61 = vrot.slane %v5572_v47, 4  ;;  %v5575_v36 = vrot.slane %v5434_v26, 7 }
 0x52f   : > { %v5577_v42 = vrot.slane %v5435_v25, 7  ;;  %5662 = vst [vmem:[#allocation2 + $0xa0] sm:$0xf] %v5558_v58  ;;  %5663 = vst [vmem:[#allocation2 + $0xa4] sm:$0x1] %v5559_v18  ;;  %v5568_v35 = vsel %vm11308_vm2, %v5566_v0, %v5567_v32  ;;  %v5573_v56 = vsel %vm11308_vm2, %v5571_v24, %v5572_v47  ;;  %v7442_v20 = vrot.slane %v15984_v12, 6 }
 0x530   : > { %5666 = vst [vmem:[#allocation2 + $0xb0] sm:$0x1] %v5564_v29  ;;  %5665 = vst [vmem:[#allocation2 + $0xac] sm:$0xf] %v5563_v54  ;;  %v5576_v2 = vrot.slane %v5575_v36, 4  ;;  %v6851_v17 = vshll.u32 %v15984_v12, 16 }
 0x531   : > { %5669 = vst [vmem:[#allocation2 + $0xbc] sm:$0x1] %v5569_v39  ;;  %v5579_v5 = vrot.slane %v5577_v42, 4  ;;  %5668 = vst [vmem:[#allocation2 + $0xb8] sm:$0xf] %v5568_v35  ;;  %v16007_v46 = vsel %vm11478_vm11, %v18164_v37, %v7442_v20  ;;  %v16012_v16 = vrot.slane %v6427_v49, 4 }
 0x532   : > { %5671 = vst [vmem:[#allocation2 + $0xc4] sm:$0xf] %v5573_v56  ;;  %5672 = vst [vmem:[#allocation2 + $0xc8] sm:$0x1] %v5574_v61  ;;  %v5578_v33 = vsel %vm11308_vm2, %v5576_v2, %v5577_v42  ;;  %v5847_v8 = vld [vmem:[#allocation2 + $0x90] sm:$0xf] }
 0x533   : > { %5673 = vst [vmem:[#allocation2 + $0xcc] sm:$0xe] %v5575_v36  ;;  %5675 = vst [vmem:[#allocation2 + $0xd4] sm:$0x1] %v5579_v5  ;;  %v16014_v53 = vrot.slane %v6437_v57, 4  ;;  %v16032_v26 = vrot.slane %v6851_v17, 5 }
 0x534   : > { %18165 = vst [vmem:[#allocation78_spill] sm:$0xff] %v16007_v46  ;;  %5674 = vst [vmem:[#allocation2 + $0xd0] sm:$0xf] %v5578_v33  ;;  %v16016_v60 = vld [vmem:[#allocation2 + $0x90] sm:$0xf]  ;;  %v18173_v11 = vld [vmem:[#allocation84_spill] sm:$0xff] }
 0x535   : > { %18168 = vst [vmem:[#allocation79_spill] sm:$0xff] %v16012_v16  ;;  %18169 = vst [vmem:[#allocation80_spill] sm:$0xff] %v16014_v53  ;;  %v5849_v34 = vld [vmem:[#allocation2 + $0x98] sm:$0x3]  ;;  %v16018_v38 = vld [vmem:[#allocation2 + $0x94] sm:$0xf]  ;;  %v6854_v24 = vsel %vm11433_vm9, %v16014_v53, %v16032_v26 }
 0x536   : > { %v5799_v23 = vld [vmem:[#allocation2 + $0x84] sm:$0xf]  ;;  %v5800_v13 = vld [vmem:[#allocation2 + $0x88] sm:$0xf]  ;;  %v16022_v59 = vld [vmem:[#allocation2 + $0x90] sm:$0xf] }
 0x537   : > { %v16020_v28 = vld [vmem:[#allocation2 + $0x84] sm:$0xf]  ;;  %v16026_v41 = vld [vmem:[#allocation2 + $0x88] sm:$0xf]  ;;  %v16028_v27 = vld [vmem:[#allocation2 + $0x8c] sm:$0x3]  ;;  %v5991_v31 = vmax.bf16 %v5847_v8, %v5799_v23  ;;  %v5992_v21 = vmax.bf16 %v5848_v4, %v5800_v13 }
 0x538   : > { %v16024_v52 = vld [vmem:[#allocation2 + $0x84] sm:$0xf]  ;;  %v16030_v3 = vld [vmem:[#allocation2 + $0x98] sm:$0x3]  ;;  %v5801_v62 = vld [vmem:[#allocation2 + $0x8c] sm:$0x3] }
 0x539   : > { %18170 = vst [vmem:[#allocation89_spill] sm:$0xff] %v16032_v26  ;;  %v18171_v7 = vld [vmem:[#allocation39_spill] sm:$0xff]  ;;  %v16037_v19 = vld [vmem:[#allocation2 + $0x88] sm:$0xf]  ;;  %v16039_v22 = vld [vmem:[#allocation2 + $0x8c] sm:$0x3]  ;;  %v5993_v30 = vmax.bf16 %v5849_v34, %v5801_v62 }
 0x53a   : > { %v18172_v25 = vld [vmem:[#allocation83_spill] sm:$0xff]  ;;  %v16043_v32 = vld [vmem:[#allocation2 + $0x98] sm:$0x3]  ;;  %v16045_v14 = vld [vmem:[#allocation2 + $0x9c] sm:$0xf] }
 0x53b   : > { %v5945_v10 = vmax.bf16 %v18172_v25, %v18171_v7  ;;  %v16041_v50 = vld [vmem:[#allocation2 + $0x94] sm:$0xf]  ;;  %v16047_v18 = vld [vmem:[#allocation2 + $0xa8] sm:$0xf]  ;;  %v16054_v9 = vld [vmem:[#allocation2 + $0xa0] sm:$0xf] }
 0x53c   : > { %v16056_v58 = vld [vmem:[#allocation2 + $0x9c] sm:$0xf]  ;;  %v16058_v0 = vld [vmem:[#allocation2 + $0xb4] sm:$0xf]  ;;  %v16060_v39 = vld [vmem:[#allocation2 + $0xc0] sm:$0xf] }
 0x53d   : > { %v16066_v54 = vld [vmem:[#allocation2 + $0xd8] sm:$0xf]  ;;  %v16068_v61 = vld [vmem:[#allocation2 + $0xa4] sm:$0x3]  ;;  %v16070_v36 = vld [vmem:[#allocation2 + $0xa8] sm:$0xf] }
 0x53e   : > { %v16072_v42 = vld [vmem:[#allocation2 + $0xb4] sm:$0xf]  ;;  %v16074_v43 = vld [vmem:[#allocation2 + $0xa0] sm:$0xf]  ;;  %v16076_v40 = vld [vmem:[#allocation2 + $0xac] sm:$0xf] }
 0x53f   : > { %v16078_v49 = vld [vmem:[#allocation2 + $0xdc] sm:$0xf]  ;;  %v18174_v35 = vld [vmem:[#allocation86_spill] sm:$0xff]  ;;  %v16090_v20 = vld [vmem:[#allocation2 + $0xb0] sm:$0x3] }
 0x540   : > { %v18175_v51 = vld [vmem:[#allocation82_spill] sm:$0xff]  ;;  %18177 = vst [vmem:[#allocation45_spill] sm:$0xff] %v16090_v20  ;;  %v16092_v33 = vld [vmem:[#allocation2 + $0xb0] sm:$0x3]  ;;  %v16094_v17 = vld [vmem:[#allocation2 + $0xb8] sm:$0xf] }
 0x541   : > { %v16088_v5 = vld [vmem:[#allocation2 + $0xac] sm:$0xf]  ;;  %18178 = vst [vmem:[#allocation70_spill] sm:$0xff] %v16094_v17  ;;  %v16096_v37 = vld [vmem:[#allocation2 + $0xbc] sm:$0x3]  ;;  %v18181_v7 = vld [vmem:[#allocation55_spill] sm:$0xff] }
 0x542   : > { %18176 = vst [vmem:[#allocation90_spill] sm:$0xff] %v16088_v5  ;;  %18179 = vst [vmem:[#allocation91_spill] sm:$0xff] %v16096_v37  ;;  %v16098_v55 = vld [vmem:[#allocation2 + $0x90] sm:$0xf]  ;;  %v16100_v8 = vld [vmem:[#allocation2 + $0x94] sm:$0xf] }
 0x543   : > { %v16102_v4 = vld [vmem:[#allocation2 + $0x98] sm:$0x3]  ;;  %v16104_v34 = vld [vmem:[#allocation2 + $0xe0] sm:$0x3]  ;;  %v18185_v29 = vld [vmem:[#allocation99_spill] sm:$0xff] }
 0x544   : > { %v18180_v62 = vld [vmem:[#allocation52_spill] sm:$0xff]  ;;  %v16122_v57 = vld [vmem:[#allocation2 + $0xa4] sm:$0x3]  ;;  %v16126_v23 = vld [vmem:[#allocation2 + $0xc8] sm:$0x3] }
 0x545   : > { %v18182_v25 = vmax.bf16 %v18180_v62, %v18181_v7  ;;  %v18184_v47 = vld [vmem:[#allocation104_spill] sm:$0xff]  ;;  %v16124_v46 = vld [vmem:[#allocation2 + $0xc4] sm:$0xf]  ;;  %18190 = vst [vmem:[#allocation68_spill] sm:$0xff] %v16126_v23  ;;  %v16134_v7 = vmax.bf16 %v5993_v30, %v5945_v10  ;;  %v5961_v10 = vmax.bf16 %v16060_v39, %v16072_v42  ;;  %v5817_v30 = vld [vmem:[#allocation2 + $0xcc] sm:$0xf] }
 0x546   : > { %v18186_v2 = vmax.bf16 %v18184_v47, %v18185_v29  ;;  %v16120_v56 = vld [vmem:[#allocation2 + $0xbc] sm:$0x3]  ;;  %18189 = vst [vmem:[#allocation47_spill] sm:$0xff] %v16124_v46  ;;  %v16139_v47 = vld [vmem:[#allocation2 + $0xb8] sm:$0xf] }
 0x547   : > { %v16113_v44 = vmax.bf16 %v5991_v31, %v18182_v25  ;;  %18188 = vst [vmem:[#allocation88_spill] sm:$0xff] %v16120_v56  ;;  %v16128_v53 = vld [vmem:[#allocation2 + $0x9c] sm:$0xf]  ;;  %18191 = vst [vmem:[#allocation95_spill] sm:$0xff] %v16134_v7  ;;  %v16143_v25 = vld [vmem:[#allocation2 + $0xa4] sm:$0x3]  ;;  %v6009_v31 = vmax.bf16 %v16066_v54, %v5817_v30 }
 0x548   : > { %v16118_v6 = vmax.bf16 %v5992_v21, %v18186_v2  ;;  %v18192_v21 = vld [vmem:[#allocation107_spill] sm:$0xff]  ;;  %18194 = vst [vmem:[#allocation100_spill] sm:$0xff] %v16139_v47  ;;  %v16141_v2 = vld [vmem:[#allocation2 + $0xa0] sm:$0xf]  ;;  %v5808_v45 = vld [vmem:[#allocation2 + $0xa8] sm:$0xf] }
 0x549   : > { %18183 = vst [vmem:[#allocation85_spill] sm:$0xff] %v16113_v44  ;;  %v16137_v29 = vmax.bf16 %v6854_v24, %v18192_v21  ;;  %v16153_v24 = vld [vmem:[#allocation2 + $0xd0] sm:$0xf]  ;;  %v16155_v15 = vld [vmem:[#allocation2 + $0xd4] sm:$0x3]  ;;  %v5956_v21 = vmax.bf16 %v16076_v40, %v16054_v9  ;;  %v16186_v47 = vmax.bf16 %v6009_v31, %v5961_v10  ;;  %v18208_v10 = vld [vmem:[#allocation90_spill] sm:$0xff] }
 0x54a   : > { %18187 = vst [vmem:[#allocation92_spill] sm:$0xff] %v16118_v6  ;;  %v5809_v48 = vld [vmem:[#allocation2 + $0xac] sm:$0xf]  ;;  %v5810_v39 = vld [vmem:[#allocation2 + $0xb0] sm:$0x3]  ;;  %v6010_v63 = vmax.bf16 %v16078_v49, %v16153_v24  ;;  %v6011_v62 = vmax.bf16 %v16104_v34, %v16155_v15  ;;  %v18195_v15 = vmax.bf16 %v16024_v52, %v18173_v11  ;;  %v18197_v52 = vmax.bf16 %v16028_v27, %v18175_v51 }
 0x54b   : > { %18193 = vst [vmem:[#allocation97_spill] sm:$0xff] %v16137_v29  ;;  %v16165_v42 = vld [vmem:[#allocation2 + $0xc0] sm:$0xf]  ;;  %v16167_v26 = vld [vmem:[#allocation2 + $0xc4] sm:$0xf]  ;;  %v18202_v51 = vmax.bf16 %v16074_v43, %v16041_v50  ;;  %v18205_v50 = vmax.bf16 %v16092_v33, %v16068_v61 }
 0x54c   : > { %v16169_v1 = vld [vmem:[#allocation2 + $0xc8] sm:$0x3]  ;;  %v5850_v16 = vld [vmem:[#allocation2 + $0x9c] sm:$0xf]  ;;  %v5851_v9 = vld [vmem:[#allocation2 + $0xa0] sm:$0xf] }
 0x54d   : > { %v5852_v40 = vld [vmem:[#allocation2 + $0xa4] sm:$0x3]  ;;  %v5811_v29 = vld [vmem:[#allocation2 + $0xb4] sm:$0xf]  ;;  %v5812_v12 = vld [vmem:[#allocation2 + $0xb8] sm:$0xf]  ;;  %v5994_v37 = vmax.bf16 %v5850_v16, %v16098_v55  ;;  %v5995_v5 = vmax.bf16 %v5851_v9, %v16100_v8 }
 0x54e   : > { %v5813_v7 = vld [vmem:[#allocation2 + $0xbc] sm:$0x3]  ;;  %v5853_v6 = vld [vmem:[#allocation2 + $0xa8] sm:$0xf]  ;;  %v5854_v44 = vld [vmem:[#allocation2 + $0xac] sm:$0xf]  ;;  %v5996_v13 = vmax.bf16 %v5852_v40, %v16102_v4 }
 0x54f   : > { %v5855_v20 = vld [vmem:[#allocation2 + $0xb0] sm:$0x3]  ;;  %v5856_v56 = vld [vmem:[#allocation2 + $0xb4] sm:$0xf]  ;;  %v5857_v54 = vld [vmem:[#allocation2 + $0xb8] sm:$0xf]  ;;  %v5997_v49 = vmax.bf16 %v5853_v6, %v16128_v53  ;;  %v5998_v24 = vmax.bf16 %v5854_v44, %v16141_v2  ;;  %v16191_v34 = vmax.bf16 %v5994_v37, %v18195_v15  ;;  %v18199_v37 = vmax.bf16 %v16018_v38, %v16037_v19 }
 0x550   : > { %v5858_v30 = vld [vmem:[#allocation2 + $0xbc] sm:$0x3]  ;;  %v5999_v23 = vmax.bf16 %v5855_v20, %v16143_v25  ;;  %v5859_v46 = vld [vmem:[#allocation2 + $0xc0] sm:$0xf]  ;;  %v5860_v16 = vld [vmem:[#allocation2 + $0xc4] sm:$0xf]  ;;  %v6000_v8 = vmax.bf16 %v5856_v56, %v5808_v45  ;;  %v6001_v9 = vmax.bf16 %v5857_v54, %v5809_v48  ;;  %v18196_v20 = vmax.bf16 %v16026_v41, %v18174_v35 }
 0x551   : > { %v5861_v55 = vld [vmem:[#allocation2 + $0xc8] sm:$0x3]  ;;  %v6002_v4 = vmax.bf16 %v5858_v30, %v5810_v39  ;;  %v5862_v40 = vld [vmem:[#allocation2 + $0xcc] sm:$0xf]  ;;  %v5863_v17 = vld [vmem:[#allocation2 + $0xd0] sm:$0xf]  ;;  %v6003_v6 = vmax.bf16 %v5859_v46, %v5811_v29  ;;  %v6004_v44 = vmax.bf16 %v5860_v16, %v5812_v12  ;;  %v6044_v11 = vmax.bf16 %v5996_v13, %v18197_v52 }
 0x552   : > { %v5864_v53 = vld [vmem:[#allocation2 + $0xd4] sm:$0x3]  ;;  %v6005_v2 = vmax.bf16 %v5861_v55, %v5813_v7  ;;  %v16196_v31 = vmax.bf16 %v5995_v5, %v18196_v20  ;;  %v6006_v45 = vmax.bf16 %v5862_v40, %v16165_v42  ;;  %v6007_v48 = vmax.bf16 %v5863_v17, %v16167_v26  ;;  %v5895_v17 = vld [vmem:[#allocation2 + $0x9c] sm:$0xf]  ;;  %v5896_v27 = vld [vmem:[#allocation2 + $0xa0] sm:$0xf] }
 0x553   : > { %v6008_v56 = vmax.bf16 %v5864_v53, %v16169_v1  ;;  %v18198_v46 = vmax.bf16 %v16016_v60, %v16020_v28  ;;  %v6046_v41 = vmax.bf16 %v5998_v24, %v18199_v37  ;;  %v18200_v35 = vmax.bf16 %v16030_v3, %v16039_v22  ;;  %v5910_v13 = vld [vmem:[#allocation2 + $0xd8] sm:$0xf]  ;;  %v5911_v7 = vld [vmem:[#allocation2 + $0xdc] sm:$0xf]  ;;  %v5912_v29 = vld [vmem:[#allocation2 + $0xe0] sm:$0x3] }
 0x554   : > { %v18201_v26 = vmax.bf16 %v16056_v58, %v16022_v59  ;;  %v16221_v60 = vmax.bf16 %v6001_v9, %v18202_v51  ;;  %v18203_v38 = vmax.bf16 %v16122_v57, %v16043_v32  ;;  %v18204_v3 = vmax.bf16 %v16047_v18, %v16045_v14  ;;  %v5898_v59 = vld [vmem:[#allocation2 + $0xa8] sm:$0xf]  ;;  %v5899_v58 = vld [vmem:[#allocation2 + $0xac] sm:$0xf]  ;;  %v18210_v18 = vld [vmem:[#allocation91_spill] sm:$0xff] }
 0x555   : > { %v6045_v12 = vmax.bf16 %v5997_v49, %v18198_v46  ;;  %v6047_v5 = vmax.bf16 %v5999_v23, %v18200_v35  ;;  %v6052_v22 = vmax.bf16 %v6004_v44, %v5956_v21  ;;  %v5897_v23 = vld [vmem:[#allocation2 + $0xa4] sm:$0x3]  ;;  %v6053_v43 = vmax.bf16 %v6005_v2, %v18205_v50  ;;  %v18207_v57 = vld [vmem:[#allocation70_spill] sm:$0xff]  ;;  %v5900_v49 = vld [vmem:[#allocation2 + $0xb0] sm:$0x3] }
 0x556   : > { %v16216_v1 = vmax.bf16 %v6000_v8, %v18201_v26  ;;  %v6050_v28 = vmax.bf16 %v6002_v4, %v18203_v38  ;;  %v6051_v19 = vmax.bf16 %v6003_v6, %v18204_v3  ;;  %v18206_v25 = vmax.bf16 %v16058_v0, %v16070_v36  ;;  %v18211_v21 = vld [vmem:[#allocation45_spill] sm:$0xff]  ;;  %v5901_v24 = vld [vmem:[#allocation2 + $0xb4] sm:$0xf]  ;;  %v5902_v16 = vld [vmem:[#allocation2 + $0xb8] sm:$0xf] }
 0x557   : > { %v18209_v39 = vmax.bf16 %v18207_v57, %v18208_v10  ;;  %v18212_v42 = vmax.bf16 %v18210_v18, %v18211_v21  ;;  %v5913_v30 = vld [vmem:[#allocation2 + $0xe4] sm:$0xf]  ;;  %v5914_v55 = vld [vmem:[#allocation2 + $0xe8] sm:$0xf]  ;;  %v5915_v8 = vld [vmem:[#allocation2 + $0xec] sm:$0x3]  ;;  %v6090_v46 = vmax.bf16 %v16191_v34, %v5898_v59  ;;  %v6091_v37 = vmax.bf16 %v16196_v31, %v5899_v58 }
 0x558   : > { %v6054_v32 = vmax.bf16 %v6006_v45, %v18206_v25  ;;  %v18213_v61 = vld [vmem:[#allocation47_spill] sm:$0xff]  ;;  %v18214_v33 = vld [vmem:[#allocation100_spill] sm:$0xff]  ;;  %v18219_v53 = vld [vmem:[#allocation85_spill] sm:$0xff]  ;;  %v6092_v35 = vmax.bf16 %v6044_v11, %v5900_v49  ;;  %v6093_v38 = vmax.bf16 %v6045_v12, %v5901_v24  ;;  %v6094_v3 = vmax.bf16 %v6046_v41, %v5902_v16 }
 0x559   : > { %v6055_v14 = vmax.bf16 %v6007_v48, %v18209_v39  ;;  %v6056_v54 = vmax.bf16 %v6008_v56, %v18212_v42  ;;  %v18215_v9 = vmax.bf16 %v18213_v61, %v18214_v33  ;;  %v18216_v0 = vld [vmem:[#allocation68_spill] sm:$0xff]  ;;  %v6087_v6 = vmax.bf16 %v18219_v53, %v5895_v17  ;;  %v5904_v45 = vld [vmem:[#allocation2 + $0xc0] sm:$0xf]  ;;  %v5905_v48 = vld [vmem:[#allocation2 + $0xc4] sm:$0xf] }
 0x55a   : > { %v18217_v36 = vld [vmem:[#allocation88_spill] sm:$0xff]  ;;  %v18221_v56 = vld [vmem:[#allocation95_spill] sm:$0xff]  ;;  %v5906_v26 = vld [vmem:[#allocation2 + $0xc8] sm:$0x3]  ;;  %v6096_v17 = vmax.bf16 %v16216_v1, %v5904_v45  ;;  %v6097_v50 = vmax.bf16 %v16221_v60, %v5905_v48  ;;  %6140 = vst [vmem:[#allocation2 + $0x98] sm:$0x3] %v6092_v35  ;;  %v6102_v31 = vmax.bf16 %v6054_v32, %v5910_v13  ;;  %v6105_v41 = vmax.bf16 %v16186_v47, %v5913_v30 }
 0x55b   : > { %v6058_v4 = vmax.bf16 %v6010_v63, %v18215_v9  ;;  %v18218_v15 = vmax.bf16 %v18216_v0, %v18217_v36  ;;  %v18220_v44 = vld [vmem:[#allocation92_spill] sm:$0xff]  ;;  %v6089_v52 = vmax.bf16 %v18221_v56, %v5897_v23  ;;  %v5907_v63 = vld [vmem:[#allocation2 + $0xcc] sm:$0xf]  ;;  %v5908_v51 = vld [vmem:[#allocation2 + $0xd0] sm:$0xf]  ;;  %v6098_v25 = vmax.bf16 %v6050_v28, %v5906_v26 }
 0x55c   : > { %v6088_v2 = vmax.bf16 %v18220_v44, %v5896_v27  ;;  %v5903_v20 = vld [vmem:[#allocation2 + $0xbc] sm:$0x3]  ;;  %6135 = vst [vmem:[#allocation2 + $0x84] sm:$0xf] %v6087_v6  ;;  %v5909_v27 = vld [vmem:[#allocation2 + $0xd4] sm:$0x3]  ;;  %v6099_v23 = vmax.bf16 %v6051_v19, %v5907_v63  ;;  %v6100_v57 = vmax.bf16 %v6052_v22, %v5908_v51  ;;  %v6103_v11 = vmax.bf16 %v6055_v14, %v5911_v7 }
 0x55d   : > { %v6059_v40 = vmax.bf16 %v6011_v62, %v18218_v15  ;;  %v6095_v62 = vmax.bf16 %v6047_v5, %v5903_v20  ;;  %6137 = vst [vmem:[#allocation2 + $0x8c] sm:$0x3] %v6089_v52  ;;  %v6101_v34 = vmax.bf16 %v6053_v43, %v5909_v27  ;;  %v6104_v59 = vmax.bf16 %v6056_v54, %v5912_v29  ;;  %v6243_v12 = vld [vmem:[#allocation2 + $0x6c] sm:$0xc]  ;;  %v18222_v19 = vld [vmem:[#allocation105_spill] sm:$0xff]  ;;  %v18226_v47 = vld [vmem:[#allocation79_spill] sm:$0xff] }
 0x55e   : > { %6136 = vst [vmem:[#allocation2 + $0x88] sm:$0xf] %v6088_v2  ;;  %6141 = vst [vmem:[#allocation2 + $0x9c] sm:$0xf] %v6093_v38  ;;  %v6106_v5 = vmax.bf16 %v6058_v4, %v5914_v55  ;;  %v9688_v58 = vcombine.low %v6090_v46, %v6091_v37  ;;  %v9690_v60 = vcombine.low %v6096_v17, %v6097_v50  ;;  %v18223_v22 = vshrl.u32 %v18222_v19, 16  ;;  %v18224_v7 = vld [vmem:[#allocation97_spill] sm:$0xff] }
 0x55f   : > { %6142 = vst [vmem:[#allocation2 + $0xa0] sm:$0xf] %v6094_v3  ;;  %6143 = vst [vmem:[#allocation2 + $0xa4] sm:$0x3] %v6095_v62  ;;  %v6107_v1 = vmax.bf16 %v6059_v40, %v5915_v8  ;;  %v9692_v28 = vcombine.low %v6102_v31, %v6103_v11  ;;  %v7215_v29 = vrot.slane %v18224_v7, 5  ;;  %v18227_v10 = vld [vmem:[#allocation36_spill] sm:$0xff] }
 0x560   : > { %6146 = vst [vmem:[#allocation2 + $0xb0] sm:$0x3] %v6098_v25  ;;  %6147 = vst [vmem:[#allocation2 + $0xb4] sm:$0xf] %v6099_v23  ;;  %v16257_v13 = vrot.slane %v18223_v22, 4  ;;  %v18228_v39 = vsel %vm11433_vm9, %v18226_v47, %v18227_v10  ;;  %v9241_v18 = vrot.slane %v6243_v12, 10 }
 0x561   : > { %6148 = vst [vmem:[#allocation2 + $0xb8] sm:$0xf] %v6100_v57  ;;  %6149 = vst [vmem:[#allocation2 + $0xbc] sm:$0x3] %v6101_v34  ;;  %v10406_v43 = vld [vmem:[#allocation2 + $0x6c] sm:$0xf] }
 0x562   : > { %6152 = vst [vmem:[#allocation2 + $0xc8] sm:$0x3] %v6104_v59  ;;  %v6682_v14 = vmax.bf16 %v10406_v43, %v18228_v39  ;;  %9689 = vst [vmem:[#allocation2 + $0x90] sm:$0xff] %v9688_v58   ;;  %v18229_v21 = vld [vmem:[#allocation89_spill] sm:$0xff]  ;;  %v18230_v54 = vld [vmem:[#allocation40_spill] sm:$0xff]  ;;  %v16293_v56 = vrot.slane %v7215_v29, 4 }
 0x563   : > { %6153 = vst [vmem:[#allocation2 + $0xcc] sm:$0xf] %v6105_v41  ;;  %6154 = vst [vmem:[#allocation2 + $0xd0] sm:$0xf] %v6106_v5  ;;  %v18231_v30 = vrot.slane %v18230_v54, 9  ;;  %v18233_v55 = vld [vmem:[#allocation107_spill] sm:$0xff] }
 0x564   : > { %6155 = vst [vmem:[#allocation2 + $0xd4] sm:$0x3] %v6107_v1  ;;  %9691 = vst [vmem:[#allocation2 + $0xa8] sm:$0xff] %v9690_v60   ;;  %v18234_v8 = vrot.slane %v18233_v55, 6  ;;  %v16275_v9 = vld [vmem:[#allocation2 + $0x74] sm:$0x1] }
 0x565   : > { %9693 = vst [vmem:[#allocation2 + $0xc0] sm:$0xff] %v9692_v28   ;;  %v7216_v24 = vsel %vm11463_vm10, %v18231_v30, %v7215_v29  ;;  %v6440_v0 = vshll.u32 %v16275_v9, 16  ;;  %v18236_v15 = vld [vmem:[#allocation80_spill] sm:$0xff]  ;;  %v16281_v53 = vld [vmem:[#allocation2 + $0x84] sm:$0xf]  ;;  %18238 = vst [vmem:[#allocation93_spill] sm:$0xff] %v16293_v56 }
 0x566   : > { %v7322_v16 = vmax.bf16 %v7216_v24, %v6682_v14  ;;  %v7440_v33 = vsel %vm11478_vm11, %v9241_v18, %v18234_v8  ;;  %v16283_v6 = vld [vmem:[#allocation2 + $0x88] sm:$0xf]  ;;  %v16289_v20 = vld [vmem:[#allocation2 + $0x8c] sm:$0x1]  ;;  %v10407_v45 = vld [vmem:[#allocation2 + $0x70] sm:$0xf] }
 0x567   : > { %v6442_v36 = vrot.slane %v6440_v0, 5  ;;  %v16295_v52 = vld [vmem:[#allocation2 + $0x98] sm:$0x1]  ;;  %v6469_v46 = vshrl.u32 %v16281_v53, 16  ;;  %v6472_v37 = vshll.u32 %v16281_v53, 16  ;;  %v6478_v35 = vshll.u32 %v16283_v6, 16 }
 0x568   : > { %v7546_v4 = vmax.bf16 %v7440_v33, %v7322_v16  ;;  %v6482_v26 = vshrl.u32 %v16283_v6, 16  ;;  %v16301_v63 = vld [vmem:[#allocation2 + $0x9c] sm:$0xf]  ;;  %v6488_v51 = vshll.u32 %v16289_v20, 16  ;;  %v16307_v17 = vld [vmem:[#allocation2 + $0xa0] sm:$0xf] }
 0x569   : > { %v6443_v40 = vsel %vm11433_vm9, %v18236_v15, %v6442_v36  ;;  %v16285_v44 = vld [vmem:[#allocation2 + $0x90] sm:$0xf]  ;;  %v16287_v2 = vld [vmem:[#allocation2 + $0x94] sm:$0xf]  ;;  %v6471_v27 = vrot.slane %v6469_v46, 4  ;;  %v6474_v50 = vrot.slane %v6472_v37, 5 }
 0x56a   : > { %7578 = vst [vmem:[#allocation3 + $0xec] sm:$0xf] %v7546_v4  ;;  %v16291_v48 = vmax.bf16 %v10407_v45, %v6443_v40  ;;  %v6493_v38 = vshrl.u32 %v16285_v44, 16  ;;  %v6496_v3 = vshll.u32 %v16285_v44, 16  ;;  %v6502_v62 = vshll.u32 %v16287_v2, 16 }
 0x56b   : > { %v16309_v25 = vrot.slane %v6478_v35, 5  ;;  %v6484_v23 = vrot.slane %v6482_v26, 4  ;;  %v16311_v57 = vrot.slane %v6488_v51, 5  ;;  %v6475_v59 = vor.u32 %v6474_v50, %v6471_v27  ;;  %v16318_v1 = vld [vmem:[#allocation2 + $0xa4] sm:$0x1] }
 0x56c   : > { %18237 = vst [vmem:[#allocation71_spill] sm:$0xff] %v16291_v48  ;;  %v6495_v34 = vrot.slane %v6493_v38, 4  ;;  %v6498_v31 = vrot.slane %v6496_v3, 5  ;;  %v16313_v11 = vrot.slane %v6502_v62, 5  ;;  %v6506_v41 = vshrl.u32 %v16287_v2, 16 }
 0x56d   : > { %v6485_v12 = vor.u32 %v6484_v23, %v16309_v25  ;;  %v6512_v5 = vshll.u32 %v16295_v52, 16  ;;  %v6517_v60 = vshrl.u32 %v16301_v63, 16  ;;  %v6520_v28 = vshll.u32 %v16301_v63, 16  ;;  %v16323_v22 = vld [vmem:[#allocation2 + $0xa8] sm:$0xf] }
 0x56e   : > { %v6499_v58 = vor.u32 %v6498_v31, %v6495_v34  ;;  %v6526_v19 = vshll.u32 %v16307_v17, 16  ;;  %v16325_v7 = vrot.slane %v6475_v59, 4  ;;  %v6508_v43 = vrot.slane %v6506_v41, 4  ;;  %v16331_v10 = vld [vmem:[#allocation2 + $0xac] sm:$0xf] }
 0x56f   : > { %v16327_v29 = vrot.slane %v6485_v12, 4  ;;  %v16329_v47 = vrot.slane %v6512_v5, 5  ;;  %v6519_v14 = vrot.slane %v6517_v60, 4  ;;  %v6522_v18 = vrot.slane %v6520_v28, 5  ;;  %v16347_v8 = vld [vmem:[#allocation2 + $0xb4] sm:$0xf] }
 0x570   : > { %v16333_v39 = vrot.slane %v6499_v58, 4  ;;  %v16335_v54 = vrot.slane %v6526_v19, 5  ;;  %v6509_v16 = vor.u32 %v6508_v43, %v16313_v11  ;;  %v6530_v55 = vshrl.u32 %v16307_v17, 16  ;;  %v16355_v15 = vld [vmem:[#allocation2 + $0xb0] sm:$0x1] }
 0x571   : > { %v6523_v4 = vor.u32 %v6522_v18, %v6519_v14  ;;  %v6536_v0 = vshll.u32 %v16318_v1, 16  ;;  %v6541_v36 = vshrl.u32 %v16323_v22, 16  ;;  %v6544_v46 = vshll.u32 %v16323_v22, 16  ;;  %v16361_v35 = vld [vmem:[#allocation2 + $0xb8] sm:$0xf] }
 0x572   : > { %v16357_v40 = vrot.slane %v6509_v16, 4  ;;  %v6532_v45 = vrot.slane %v6530_v55, 4  ;;  %v6550_v37 = vshll.u32 %v16331_v10, 16  ;;  %v6554_v3 = vshrl.u32 %v16331_v10, 16  ;;  %v16375_v34 = vld [vmem:[#allocation2 + $0xbc] sm:$0x1] }
 0x573   : > { %v16363_v26 = vrot.slane %v6523_v4, 4  ;;  %v16365_v51 = vrot.slane %v6536_v0, 5  ;;  %v6543_v38 = vrot.slane %v6541_v36, 4  ;;  %v6546_v50 = vrot.slane %v6544_v46, 5  ;;  %v16383_v5 = vld [vmem:[#allocation2 + $0xc0] sm:$0xf] }
 0x574   : > { %v6533_v27 = vor.u32 %v6532_v45, %v16335_v54  ;;  %v16373_v23 = vrot.slane %v6550_v37, 5  ;;  %v6556_v59 = vrot.slane %v6554_v3, 4  ;;  %v6560_v12 = vshll.u32 %v16355_v15, 16  ;;  %v16389_v43 = vld [vmem:[#allocation2 + $0xc4] sm:$0xf] }
 0x575   : > { %v6565_v41 = vshrl.u32 %v16347_v8, 16  ;;  %v6547_v60 = vor.u32 %v6546_v50, %v6543_v38  ;;  %v6568_v28 = vshll.u32 %v16347_v8, 16  ;;  %v6574_v19 = vshll.u32 %v16361_v35, 16  ;;  %18239 = vst [vmem:[#allocation37_spill] sm:$0xff] %v16389_v43  ;;  %v16405_v50 = vld [vmem:[#allocation2 + $0xc8] sm:$0x1] }
 0x576   : > { %v16385_v58 = vrot.slane %v6533_v27, 4  ;;  %v6557_v14 = vor.u32 %v6556_v59, %v16373_v23  ;;  %v16392_v18 = vrot.slane %v6560_v12, 5  ;;  %v6578_v55 = vshrl.u32 %v16361_v35, 16  ;;  %v6186_v27 = vld [vmem:[#allocation2 + $0xcc] sm:$0xf]  ;;  %18240 = vst [vmem:[#allocation96_spill] sm:$0xff] %v16405_v50 }
 0x577   : > { %v6567_v16 = vrot.slane %v6565_v41, 4  ;;  %v6548_v0 = vrot.slane %v6547_v60, 4  ;;  %v6570_v36 = vrot.slane %v6568_v28, 5  ;;  %v16399_v45 = vrot.slane %v6574_v19, 5  ;;  %v16412_v60 = vld [vmem:[#allocation2 + $0xd0] sm:$0xf] }
 0x578   : > { %v6539_v4 = vsel %vm11433_vm9, %v16385_v58, %v16365_v51  ;;  %v16401_v46 = vrot.slane %v6557_v14, 4  ;;  %v6580_v37 = vrot.slane %v6578_v55, 4  ;;  %v6584_v38 = vshll.u32 %v16375_v34, 16  ;;  %18241 = vst [vmem:[#allocation106_spill] sm:$0xff] %v16412_v60  ;;  %v16425_v30 = vld [vmem:[#allocation2 + $0xd4] sm:$0x1] }
 0x579   : > { %v6589_v3 = vshrl.u32 %v16383_v5, 16  ;;  %v6553_v59 = vsel %vm11433_vm9, %v6548_v0, %v16373_v23  ;;  %v6571_v12 = vor.u32 %v6570_v36, %v6567_v16  ;;  %v6592_v51 = vshll.u32 %v16383_v5, 16  ;;  %18242 = vst [vmem:[#allocation59_spill] sm:$0xff] %v16425_v30 }
 0x57a   : > { %v6598_v41 = vshll.u32 %v16389_v43, 16  ;;  %v6563_v28 = vsel %vm11433_vm9, %v16401_v46, %v16392_v18  ;;  %v6581_v19 = vor.u32 %v6580_v37, %v16399_v45  ;;  %v6586_v14 = vrot.slane %v6584_v38, 5 }
 0x57b   : > { %v6591_v55 = vrot.slane %v6589_v3, 4  ;;  %v6572_v42 = vrot.slane %v6571_v12, 4  ;;  %v6594_v31 = vrot.slane %v6592_v51, 5  ;;  %v6602_v16 = vshrl.u32 %v16389_v43, 16 }
 0x57c   : > { %v16419_v62 = vrot.slane %v6598_v41, 5  ;;  %v16422_v0 = vrot.slane %v6581_v19, 4  ;;  %v6608_v36 = vshll.u32 %v16405_v50, 16  ;;  %v6613_v33 = vshrl.u32 %v6186_v27, 16 }
 0x57d   : > { %v6616_v24 = vshll.u32 %v6186_v27, 16  ;;  %v6577_v18 = vsel %vm11433_vm9, %v6572_v42, %v16399_v45  ;;  %v6595_v37 = vor.u32 %v6594_v31, %v6591_v55  ;;  %v6604_v38 = vrot.slane %v6602_v16, 4 }
 0x57e   : > { %v6622_v3 = vshll.u32 %v16412_v60, 16  ;;  %v6587_v12 = vsel %vm11433_vm9, %v16422_v0, %v6586_v14  ;;  %v6610_v51 = vrot.slane %v6608_v36, 5  ;;  %v6615_v41 = vrot.slane %v6613_v33, 4 }
 0x57f   : > { %v6618_v19 = vrot.slane %v6616_v24, 5  ;;  %v6596_v61 = vrot.slane %v6595_v37, 4  ;;  %v6605_v48 = vor.u32 %v6604_v38, %v16419_v62  ;;  %v6626_v56 = vshrl.u32 %v16412_v60, 16 }
 0x580   : > { %v16435_v49 = vrot.slane %v6622_v3, 5  ;;  %v6632_v42 = vshll.u32 %v16425_v30, 16  ;;  %v18243_v31 = vsel %vm11433_vm9, %v16325_v7, %v16309_v25  ;;  %v18245_v24 = vsel %vm11433_vm9, %v16327_v29, %v16311_v57 }
 0x581   : > { %v6619_v50 = vor.u32 %v6618_v19, %v6615_v41  ;;  %v16445_v14 = vmax.bf16 %v18243_v31, %v16281_v53  ;;  %v16453_v33 = vmax.bf16 %v18245_v24, %v16283_v6  ;;  %v6601_v55 = vsel %vm11433_vm9, %v6596_v61, %v16419_v62  ;;  %v16498_v19 = vld [vmem:[#allocation2 + $0x90] sm:$0xe]  ;;  %v16522_v24 = vld [vmem:[#allocation2 + $0x98] sm:$0x3] }
 0x582   : > { %v16458_v16 = vrot.slane %v6605_v48, 4  ;;  %v6628_v36 = vrot.slane %v6626_v56, 4  ;;  %v18247_v53 = vsel %vm11433_vm9, %v16333_v39, %v16313_v11  ;;  %v6634_v38 = vrot.slane %v6632_v42, 5  ;;  %v16486_v39 = vld [vmem:[#allocation2 + $0x8c] sm:$0x3]  ;;  %18262 = vst [vmem:[#allocation53_spill] sm:$0xff] %v16522_v24 }
 0x583   : > { %18244 = vst [vmem:[#allocation49_spill] sm:$0xff] %v16445_v14  ;;  %18246 = vst [vmem:[#allocation38_spill] sm:$0xff] %v16453_v33  ;;  %v16466_v7 = vmax.bf16 %v18247_v53, %v16285_v44  ;;  %v6620_v37 = vrot.slane %v6619_v50, 4  ;;  %v18249_v57 = vsel %vm11433_vm9, %v16357_v40, %v16329_v47  ;;  %v18251_v48 = vsel %vm11433_vm9, %v16363_v26, %v16335_v54  ;;  %v16484_v44 = vld [vmem:[#allocation2 + $0x84] sm:$0xe] }
 0x584   : > { %v16474_v61 = vmax.bf16 %v18249_v57, %v16287_v2  ;;  %v16482_v56 = vmax.bf16 %v18251_v48, %v16301_v63  ;;  %18253 = vst [vmem:[#allocation102_spill] sm:$0xff] %v16486_v39  ;;  %v6611_v50 = vsel %vm11433_vm9, %v16458_v16, %v6610_v51  ;;  %v6629_v47 = vor.u32 %v6628_v36, %v16435_v49 }
 0x585   : > { %18248 = vst [vmem:[#allocation54_spill] sm:$0xff] %v16466_v7  ;;  %v16493_v3 = vmax.bf16 %v6539_v4, %v16307_v17  ;;  %v16496_v41 = vmax.bf16 %v6553_v59, %v16323_v22  ;;  %v6625_v63 = vsel %vm11433_vm9, %v6620_v37, %v16435_v49  ;;  %v16504_v26 = vmax.bf16 %v6563_v28, %v16331_v10 }
 0x586   : > { %18250 = vst [vmem:[#allocation108_spill] sm:$0xff] %v16474_v61  ;;  %18252 = vst [vmem:[#allocation64_spill] sm:$0xff] %v16482_v56  ;;  %v16507_v42 = vmax.bf16 %v6577_v18, %v16347_v8  ;;  %v16510_v51 = vmax.bf16 %v6587_v12, %v16361_v35  ;;  %v16512_v4 = vrot.slane %v6629_v47, 4  ;;  %v16515_v22 = vmax.bf16 %v6601_v55, %v16383_v5  ;;  %v16532_v5 = vld [vmem:[#allocation2 + $0x9c] sm:$0xe] }
 0x587   : > { %18254 = vst [vmem:[#allocation103_spill] sm:$0xff] %v16493_v3  ;;  %18255 = vst [vmem:[#allocation41_spill] sm:$0xff] %v16496_v41  ;;  %v16518_v59 = vmax.bf16 %v6611_v50, %v16389_v43  ;;  %v16520_v31 = vmax.bf16 %v6625_v63, %v6186_v27  ;;  %v18263_v28 = vor.u32 %v16257_v13, %v18229_v21  ;;  %v6881_v18 = vshrl.u32 %v16484_v44, 16  ;;  %v16545_v50 = vld [vmem:[#allocation2 + $0xa4] sm:$0x3] }
 0x588   : > { %18256 = vst [vmem:[#allocation69_spill] sm:$0xff] %v16504_v26  ;;  %18257 = vst [vmem:[#allocation101_spill] sm:$0xff] %v16507_v42  ;;  %v6884_v12 = vshll.u32 %v16484_v44, 16  ;;  %v6891_v36 = vshll.u32 %v16486_v39, 16  ;;  %v6635_v27 = vsel %vm11433_vm9, %v16512_v4, %v6634_v38  ;;  %v6895_v55 = vshrl.u32 %v16486_v39, 16 }
 0x589   : > { %18258 = vst [vmem:[#allocation98_spill] sm:$0xff] %v16510_v51  ;;  %18259 = vst [vmem:[#allocation42_spill] sm:$0xff] %v16515_v22  ;;  %v16527_v8 = vrot.slane %v18263_v28, 4  ;;  %v6901_v53 = vshrl.u32 %v16498_v19, 16  ;;  %v6904_v13 = vshll.u32 %v16498_v19, 16  ;;  %v16541_v21 = vmax.bf16 %v6635_v27, %v16412_v60 }
 0x58a   : > { %18260 = vst [vmem:[#allocation94_spill] sm:$0xff] %v16518_v59  ;;  %18261 = vst [vmem:[#allocation87_spill] sm:$0xff] %v16520_v31  ;;  %v6883_v37 = vrot.slane %v6881_v18, 4  ;;  %v6886_v57 = vrot.slane %v6884_v12, 5  ;;  %v16543_v48 = vrot.slane %v6891_v36, 5  ;;  %v6897_v47 = vrot.slane %v6895_v55, 4 }
 0x58b   : > { %18264 = vst [vmem:[#allocation72_spill] sm:$0xff] %v16541_v21  ;;  %18265 = vst [vmem:[#allocation66_spill] sm:$0xff] %v16545_v50  ;;  %v6903_v63 = vrot.slane %v6901_v53, 4  ;;  %v6906_v28 = vrot.slane %v6904_v13, 5  ;;  %v6911_v38 = vshll.u32 %v16522_v24, 16  ;;  %v6915_v27 = vshrl.u32 %v16522_v24, 16 }
 0x58c   : > { %v6887_v31 = vor.u32 %v6886_v57, %v6883_v37  ;;  %v6921_v18 = vshrl.u32 %v16532_v5, 16  ;;  %v6898_v12 = vor.u32 %v6897_v47, %v16543_v48  ;;  %v6924_v55 = vshll.u32 %v16532_v5, 16  ;;  %v16558_v53 = vld [vmem:[#allocation2 + $0xa8] sm:$0xe]  ;;  %v16563_v39 = vld [vmem:[#allocation2 + $0xb0] sm:$0x3] }
 0x58d   : > { %v6907_v36 = vor.u32 %v6906_v28, %v6903_v63  ;;  %v16555_v21 = vrot.slane %v6911_v38, 5  ;;  %v6917_v37 = vrot.slane %v6915_v27, 4  ;;  %v6931_v59 = vshll.u32 %v16545_v50, 16  ;;  %18266 = vst [vmem:[#allocation34_spill] sm:$0xff] %v16563_v39  ;;  %v16589_v51 = vld [vmem:[#allocation2 + $0xbc] sm:$0x3] }
 0x58e   : > { %v16560_v13 = vrot.slane %v6887_v31, 4  ;;  %v6923_v57 = vrot.slane %v6921_v18, 4  ;;  %v16565_v24 = vrot.slane %v6898_v12, 4  ;;  %v6926_v63 = vrot.slane %v6924_v55, 5  ;;  %v16581_v18 = vld [vmem:[#allocation2 + $0xb4] sm:$0xe] }
 0x58f   : > { %v16567_v22 = vrot.slane %v6907_v36, 4  ;;  %v6918_v28 = vor.u32 %v6917_v37, %v16555_v21  ;;  %v16578_v38 = vrot.slane %v6931_v59, 5  ;;  %v6935_v27 = vshrl.u32 %v16545_v50, 16  ;;  %18267 = vst [vmem:[#allocation57_spill] sm:$0xff] %v16589_v51  ;;  %v16606_v56 = vld [vmem:[#allocation2 + $0xc0] sm:$0xe] }
 0x590   : > { %v6927_v36 = vor.u32 %v6926_v63, %v6923_v57  ;;  %v6941_v55 = vshrl.u32 %v16558_v53, 16  ;;  %v6944_v47 = vshll.u32 %v16558_v53, 16  ;;  %v6951_v50 = vshll.u32 %v16563_v39, 16  ;;  %v16608_v59 = vld [vmem:[#allocation2 + $0xc8] sm:$0x3] }
 0x591   : > { %v16591_v31 = vrot.slane %v6918_v28, 4  ;;  %v6937_v37 = vrot.slane %v6935_v27, 4  ;;  %v6955_v63 = vshrl.u32 %v16563_v39, 16  ;;  %v6961_v28 = vshrl.u32 %v16581_v18, 16  ;;  %18268 = vst [vmem:[#allocation67_spill] sm:$0xff] %v16608_v59 }
 0x592   : > { %v16598_v42 = vrot.slane %v6927_v36, 4  ;;  %v6943_v12 = vrot.slane %v6941_v55, 4  ;;  %v6946_v57 = vrot.slane %v6944_v47, 5  ;;  %v16602_v41 = vrot.slane %v6951_v50, 5 }
 0x593   : > { %v6938_v26 = vor.u32 %v6937_v37, %v16578_v38  ;;  %v6964_v3 = vshll.u32 %v16581_v18, 16  ;;  %v6957_v36 = vrot.slane %v6955_v63, 4  ;;  %v6971_v55 = vshll.u32 %v16589_v51, 16  ;;  %v16626_v63 = vld [vmem:[#allocation2 + $0xd4] sm:$0x3] }
 0x594   : > { %v6929_v27 = vsel %vm11433_vm9, %v16598_v42, %v16335_v54  ;;  %v6947_v47 = vor.u32 %v6946_v57, %v6943_v12  ;;  %v6954_v50 = vsel %vm11433_vm9, %v16401_v46, %v16602_v41  ;;  %v6963_v39 = vrot.slane %v6961_v28, 4  ;;  %v6219_v54 = vld [vmem:[#allocation2 + $0xcc] sm:$0xe] }
 0x595   : > { %v16615_v37 = vrot.slane %v6938_v26, 4  ;;  %v6966_v61 = vrot.slane %v6964_v3, 5  ;;  %v6958_v33 = vor.u32 %v6957_v36, %v16602_v41  ;;  %v6973_v14 = vrot.slane %v6971_v55, 5 }
 0x596   : > { %v6948_v7 = vrot.slane %v6947_v47, 4  ;;  %v6975_v30 = vshrl.u32 %v16589_v51, 16  ;;  %v6981_v12 = vshrl.u32 %v16606_v56, 16  ;;  %v6984_v26 = vshll.u32 %v16606_v56, 16 }
 0x597   : > { %v6967_v42 = vor.u32 %v6966_v61, %v6963_v39  ;;  %v6991_v57 = vshll.u32 %v16608_v59, 16  ;;  %v16631_v3 = vrot.slane %v6958_v33, 4  ;;  %v6974_v41 = vsel %vm11433_vm9, %v16422_v0, %v6973_v14 }
 0x598   : > { %v6949_v46 = vsel %vm11433_vm9, %v6948_v7, %v16373_v23  ;;  %v6977_v28 = vrot.slane %v6975_v30, 4  ;;  %v6983_v39 = vrot.slane %v6981_v12, 4  ;;  %v6986_v47 = vrot.slane %v6984_v26, 5 }
 0x599   : > { %v6968_v61 = vrot.slane %v6967_v42, 4  ;;  %v6993_v36 = vrot.slane %v6991_v57, 5  ;;  %v6995_v51 = vshrl.u32 %v16608_v59, 16  ;;  %v7001_v60 = vshrl.u32 %v6219_v54, 16 }
 0x59a   : > { %v6978_v55 = vor.u32 %v6977_v28, %v6973_v14  ;;  %v7004_v43 = vshll.u32 %v6219_v54, 16  ;;  %v6987_v33 = vor.u32 %v6986_v47, %v6983_v39  ;;  %v7011_v30 = vshll.u32 %v16626_v63, 16 }
 0x59b   : > { %v6969_v23 = vsel %vm11433_vm9, %v6968_v61, %v16399_v45  ;;  %v6994_v7 = vsel %vm11433_vm9, %v16458_v16, %v6993_v36  ;;  %v6997_v42 = vrot.slane %v6995_v51, 4  ;;  %v7003_v12 = vrot.slane %v7001_v60, 4 }
 0x59c   : > { %v16644_v0 = vrot.slane %v6978_v55, 4  ;;  %v7006_v14 = vrot.slane %v7004_v43, 5  ;;  %v6988_v26 = vrot.slane %v6987_v33, 4  ;;  %v7013_v57 = vrot.slane %v7011_v30, 5  ;;  %v18277_v55 = vld [vmem:[#allocation59_spill] sm:$0xff] }
 0x59d   : > { %v7015_v28 = vshrl.u32 %v16626_v63, 16  ;;  %v7091_v59 = vmax.bf16 %v16527_v8, %v16275_v9  ;;  %v6998_v45 = vor.u32 %v6997_v42, %v6993_v36  ;;  %v18269_v16 = vsel %vm11433_vm9, %v16560_v13, %v16309_v25 }
 0x59e   : > { %v7007_v61 = vor.u32 %v7006_v14, %v7003_v12  ;;  %v7095_v39 = vmax.bf16 %v18269_v16, %v16484_v44  ;;  %v18270_v43 = vsel %vm11433_vm9, %v16327_v29, %v16543_v48  ;;  %v6989_v9 = vsel %vm11433_vm9, %v6988_v26, %v16419_v62 }
 0x59f   : > { %v7096_v60 = vmax.bf16 %v18270_v43, %v16283_v6  ;;  %v7014_v51 = vsel %vm11433_vm9, %v16512_v4, %v7013_v57  ;;  %v7017_v8 = vrot.slane %v7015_v28, 4  ;;  %v7097_v25 = vmax.bf16 %v16565_v24, %v16289_v20 }
 0x5a0   : > { %v6999_v44 = vrot.slane %v6998_v45, 4  ;;  %v7008_v13 = vrot.slane %v7007_v61, 4  ;;  %v18271_v29 = vsel %vm11433_vm9, %v16567_v22, %v16313_v11  ;;  %v18272_v62 = vsel %vm11433_vm9, %v16357_v40, %v16555_v21 }
 0x5a1   : > { %v7098_v48 = vmax.bf16 %v18271_v29, %v16498_v19  ;;  %v7099_v4 = vmax.bf16 %v18272_v62, %v16287_v2  ;;  %v7018_v47 = vor.u32 %v7017_v8, %v7013_v57  ;;  %v7100_v20 = vmax.bf16 %v16591_v31, %v16295_v52 }
 0x5a2   : > { %v7101_v24 = vmax.bf16 %v6929_v27, %v16532_v5  ;;  %v18273_v11 = vsel %vm11433_vm9, %v16385_v58, %v16578_v38  ;;  %v7009_v22 = vsel %vm11433_vm9, %v7008_v13, %v16435_v49  ;;  %v7103_v40 = vmax.bf16 %v16615_v37, %v16318_v1  ;;  %v18274_v49 = vld [vmem:[#allocation37_spill] sm:$0xff]  ;;  %v18275_v1 = vld [vmem:[#allocation96_spill] sm:$0xff] }
 0x5a3   : > { %v7102_v19 = vmax.bf16 %v18273_v11, %v16307_v17  ;;  %v7104_v21 = vmax.bf16 %v6949_v46, %v16558_v53  ;;  %v7105_v52 = vmax.bf16 %v6954_v50, %v16331_v10  ;;  %v7019_v31 = vrot.slane %v7018_v47, 4  ;;  %v18276_v46 = vld [vmem:[#allocation106_spill] sm:$0xff] }
 0x5a4   : > { %v7106_v5 = vmax.bf16 %v16631_v3, %v16355_v15  ;;  %v7107_v27 = vmax.bf16 %v6969_v23, %v16581_v18  ;;  %v7108_v58 = vmax.bf16 %v6974_v41, %v16361_v35  ;;  %v7109_v38 = vmax.bf16 %v16644_v0, %v16375_v34  ;;  %v18278_v41 = vld [vmem:[#allocation93_spill] sm:$0xff] }
 0x5a5   : > { %v7110_v32 = vmax.bf16 %v6989_v9, %v16606_v56  ;;  %v7111_v36 = vmax.bf16 %v6994_v7, %v18274_v49  ;;  %v7112_v37 = vmax.bf16 %v6999_v44, %v18275_v1  ;;  %v7113_v53 = vmax.bf16 %v7009_v22, %v6219_v54  ;;  %v6245_v1 = vld [vmem:[#allocation2 + $0x84] sm:$0xc] }
 0x5a6   : > { %v7114_v50 = vmax.bf16 %v7014_v51, %v18276_v46  ;;  %v7115_v33 = vmax.bf16 %v7019_v31, %v18277_v55  ;;  %v7218_v30 = vrot.slane %v7091_v59, 5  ;;  %v9227_v15 = vrot.slane %v7095_v39, 9  ;;  %v18281_v31 = vld [vmem:[#allocation49_spill] sm:$0xff]  ;;  %v18284_v55 = vld [vmem:[#allocation108_spill] sm:$0xff] }
 0x5a7   : > { %v7229_v3 = vrot.slane %v7096_v60, 5  ;;  %v7232_v18 = vrot.slane %v7097_v25, 5  ;;  %v9228_v23 = vrot.slane %v7098_v48, 9  ;;  %v7236_v0 = vrot.slane %v7099_v4, 5 }
 0x5a8   : > { %v7219_v34 = vsel %vm11463_vm10, %v18278_v41, %v7218_v30  ;;  %v7239_v56 = vrot.slane %v7100_v20, 5  ;;  %v9229_v12 = vrot.slane %v7101_v24, 9  ;;  %v7243_v14 = vrot.slane %v7102_v19, 5  ;;  %v18285_v30 = vld [vmem:[#allocation64_spill] sm:$0xff] }
 0x5a9   : > { %v16713_v7 = vsel %vm11463_vm10, %v9227_v15, %v7229_v3  ;;  %v7231_v54 = vrot.slane %v7229_v3, 4  ;;  %v7246_v26 = vrot.slane %v7103_v40, 5  ;;  %v16717_v59 = vsel %vm11463_vm10, %v9228_v23, %v7236_v0  ;;  %v6246_v3 = vld [vmem:[#allocation2 + $0x90] sm:$0xc] }
 0x5aa   : > { %v7238_v57 = vrot.slane %v7236_v0, 4  ;;  %v9230_v28 = vrot.slane %v7104_v21, 9  ;;  %v7250_v45 = vrot.slane %v7105_v52, 5  ;;  %v16723_v16 = vsel %vm11463_vm10, %v9229_v12, %v7243_v14  ;;  %v18280_v21 = vld [vmem:[#allocation71_spill] sm:$0xff] }
 0x5ab   : > { %v7233_v61 = vsel %vm11463_vm10, %v7231_v54, %v7232_v18  ;;  %v7245_v39 = vrot.slane %v7243_v14, 4  ;;  %v7253_v43 = vrot.slane %v7106_v5, 5  ;;  %v9231_v8 = vrot.slane %v7107_v27, 9  ;;  %v18286_v23 = vld [vmem:[#allocation103_spill] sm:$0xff]  ;;  %v6247_v54 = vld [vmem:[#allocation2 + $0x9c] sm:$0xc] }
 0x5ac   : > { %v7240_v60 = vsel %vm11463_vm10, %v7238_v57, %v7239_v56  ;;  %v16729_v9 = vsel %vm11463_vm10, %v9230_v28, %v7250_v45  ;;  %v7252_v51 = vrot.slane %v7250_v45, 4  ;;  %v7257_v44 = vrot.slane %v7108_v58, 5  ;;  %v18288_v56 = vld [vmem:[#allocation69_spill] sm:$0xff]  ;;  %v18290_v57 = vld [vmem:[#allocation98_spill] sm:$0xff] }
 0x5ad   : > { %v7247_v25 = vsel %vm11463_vm10, %v7245_v39, %v7246_v26  ;;  %v7260_v13 = vrot.slane %v7109_v38, 5  ;;  %v9232_v29 = vrot.slane %v7110_v32, 9  ;;  %v7264_v62 = vrot.slane %v7111_v36, 5  ;;  %v18282_v32 = vld [vmem:[#allocation38_spill] sm:$0xff]  ;;  %v18289_v14 = vld [vmem:[#allocation101_spill] sm:$0xff] }
 0x5ae   : > { %v7254_v48 = vsel %vm11463_vm10, %v7252_v51, %v7253_v43  ;;  %v7267_v4 = vrot.slane %v7112_v37, 5  ;;  %v9233_v47 = vrot.slane %v7113_v53, 9  ;;  %v16737_v20 = vsel %vm11463_vm10, %v9231_v8, %v7257_v44  ;;  %v18283_v53 = vld [vmem:[#allocation54_spill] sm:$0xff]  ;;  %v18294_v51 = vld [vmem:[#allocation72_spill] sm:$0xff] }
 0x5af   : > { %v7259_v24 = vrot.slane %v7257_v44, 4  ;;  %v7271_v11 = vrot.slane %v7114_v50, 5  ;;  %v7274_v19 = vrot.slane %v7115_v33, 5  ;;  %v16741_v22 = vsel %vm11463_vm10, %v9232_v29, %v7264_v62  ;;  %v18291_v45 = vld [vmem:[#allocation42_spill] sm:$0xff] }
 0x5b0   : > { %v7266_v40 = vrot.slane %v7264_v62, 4  ;;  %v16744_v52 = vmax.bf16 %v7219_v34, %v18280_v21  ;;  %v7326_v5 = vmax.bf16 %v16713_v7, %v18281_v31  ;;  %v16755_v36 = vmax.bf16 %v7233_v61, %v18282_v32  ;;  %v18287_v34 = vld [vmem:[#allocation41_spill] sm:$0xff]  ;;  %v18292_v61 = vld [vmem:[#allocation94_spill] sm:$0xff] }
 0x5b1   : > { %v7261_v27 = vsel %vm11463_vm10, %v7259_v24, %v7260_v13  ;;  %v16752_v58 = vsel %vm11463_vm10, %v9233_v47, %v7271_v11  ;;  %v7273_v38 = vrot.slane %v7271_v11, 4  ;;  %v7328_v50 = vmax.bf16 %v16717_v59, %v18283_v53  ;;  %v6248_v43 = vld [vmem:[#allocation2 + $0xa8] sm:$0xc]  ;;  %v6249_v24 = vld [vmem:[#allocation2 + $0xb4] sm:$0xc] }
 0x5b2   : > { %v7268_v37 = vsel %vm11463_vm10, %v7266_v40, %v7267_v4  ;;  %v16762_v33 = vmax.bf16 %v7240_v60, %v18284_v55  ;;  %v7330_v15 = vmax.bf16 %v16723_v16, %v18285_v30  ;;  %v16769_v41 = vmax.bf16 %v7247_v25, %v18286_v23  ;;  %v18293_v60 = vld [vmem:[#allocation87_spill] sm:$0xff]  ;;  %v18295_v13 = vld [vmem:[#allocation102_spill] sm:$0xff]  ;;  %v18296_v4 = vld [vmem:[#allocation53_spill] sm:$0xff] }
 0x5b3   : > { %v7275_v18 = vsel %vm11463_vm10, %v7273_v38, %v7274_v19  ;;  %v7332_v0 = vmax.bf16 %v16729_v9, %v18287_v34  ;;  %v16774_v12 = vmax.bf16 %v7254_v48, %v18288_v56  ;;  %v7334_v26 = vmax.bf16 %v16737_v20, %v18289_v14  ;;  %v6250_v55 = vld [vmem:[#allocation2 + $0xc0] sm:$0xc]  ;;  %v6251_v34 = vld [vmem:[#allocation2 + $0xcc] sm:$0xc] }
 0x5b4   : > { %v16779_v28 = vmax.bf16 %v7261_v27, %v18290_v57  ;;  %v7336_v42 = vmax.bf16 %v16741_v22, %v18291_v45  ;;  %v16784_v39 = vmax.bf16 %v7268_v37, %v18292_v61  ;;  %v7338_v9 = vmax.bf16 %v16752_v58, %v18293_v60  ;;  %v18299_v56 = vld [vmem:[#allocation34_spill] sm:$0xff] }
 0x5b5   : > { %v16789_v8 = vmax.bf16 %v7275_v18, %v18294_v51  ;;  %v9243_v25 = vrot.slane %v6245_v1, 10  ;;  %v7453_v44 = vrot.slane %v16283_v6, 6  ;;  %v7456_v29 = vrot.slane %v18295_v13, 6  ;;  %v18298_v6 = vld [vmem:[#allocation66_spill] sm:$0xff] }
 0x5b6   : > { %v9244_v48 = vrot.slane %v6246_v3, 10  ;;  %v7460_v62 = vrot.slane %v16287_v2, 6  ;;  %v7463_v47 = vrot.slane %v18296_v4, 6  ;;  %v9245_v21 = vrot.slane %v6247_v54, 10 }
 0x5b7   : > { %v7454_v19 = vsel %vm11478_vm11, %v9243_v25, %v7453_v44  ;;  %v7455_v40 = vrot.slane %v7453_v44, 4  ;;  %v7467_v27 = vrot.slane %v16307_v17, 6  ;;  %v7470_v1 = vrot.slane %v18298_v6, 6  ;;  %v18300_v44 = vld [vmem:[#allocation57_spill] sm:$0xff] }
 0x5b8   : > { %v7461_v38 = vsel %vm11478_vm11, %v9244_v48, %v7460_v62  ;;  %v7462_v32 = vrot.slane %v7460_v62, 4  ;;  %v9246_v37 = vrot.slane %v6248_v43, 10  ;;  %v7474_v23 = vrot.slane %v16331_v10, 6 }
 0x5b9   : > { %v7457_v2 = vsel %vm11478_vm11, %v7455_v40, %v7456_v29  ;;  %v7468_v3 = vsel %vm11478_vm11, %v9245_v21, %v7467_v27  ;;  %v7469_v18 = vrot.slane %v7467_v27, 4  ;;  %v7477_v54 = vrot.slane %v18299_v56, 6 }
 0x5ba   : > { %v7464_v17 = vsel %vm11478_vm11, %v7462_v32, %v7463_v47  ;;  %v9247_v57 = vrot.slane %v6249_v24, 10  ;;  %v7481_v61 = vrot.slane %v16361_v35, 6  ;;  %v7475_v51 = vsel %vm11478_vm11, %v9246_v37, %v7474_v23  ;;  %v18301_v35 = vld [vmem:[#allocation67_spill] sm:$0xff]  ;;  %v18302_v37 = vld [vmem:[#allocation78_spill] sm:$0xff] }
 0x5bb   : > { %v7471_v43 = vsel %vm11478_vm11, %v7469_v18, %v7470_v1  ;;  %v7476_v25 = vrot.slane %v7474_v23, 4  ;;  %v7484_v13 = vrot.slane %v18300_v44, 6  ;;  %v9248_v48 = vrot.slane %v6250_v55, 10 }
 0x5bc   : > { %v7482_v10 = vsel %vm11478_vm11, %v9247_v57, %v7481_v61  ;;  %v7483_v29 = vrot.slane %v7481_v61, 4  ;;  %v7488_v62 = vrot.slane %v18274_v49, 6  ;;  %v7491_v47 = vrot.slane %v18301_v35, 6 }
 0x5bd   : > { %v7478_v4 = vsel %vm11478_vm11, %v7476_v25, %v7477_v54  ;;  %v9249_v24 = vrot.slane %v6251_v34, 10  ;;  %v7495_v40 = vrot.slane %v18276_v46, 6  ;;  %v7498_v6 = vrot.slane %v16626_v63, 6 }
 0x5be   : > { %v7485_v21 = vsel %vm11478_vm11, %v7483_v29, %v7484_v13  ;;  %v7489_v27 = vsel %vm11478_vm11, %v9248_v48, %v7488_v62  ;;  %v7490_v32 = vrot.slane %v7488_v62, 4  ;;  %v7547_v55 = vmax.bf16 %v18302_v37, %v16744_v52 }
 0x5bf   : > { %v7496_v49 = vsel %vm11478_vm11, %v9249_v24, %v7495_v40  ;;  %v7497_v1 = vrot.slane %v7495_v40, 4  ;;  %v7550_v46 = vmax.bf16 %v7454_v19, %v7326_v5  ;;  %v7551_v23 = vmax.bf16 %v7457_v2, %v16755_v36 }
 0x5c0   : > { %v7492_v18 = vsel %vm11478_vm11, %v7490_v32, %v7491_v47  ;;  %v7552_v63 = vmax.bf16 %v7461_v38, %v7328_v50  ;;  %v7553_v34 = vmax.bf16 %v7464_v17, %v16762_v33  ;;  %v7554_v52 = vmax.bf16 %v7468_v3, %v7330_v15  ;;  %7579 = vst [vmem:[#allocation3 + $0xfc] sm:$0xf] %v7547_v55 }
 0x5c1   : > { %v7499_v56 = vsel %vm11478_vm11, %v7497_v1, %v7498_v6  ;;  %v7555_v7 = vmax.bf16 %v7471_v43, %v16769_v41  ;;  %v7556_v31 = vmax.bf16 %v7475_v51, %v7332_v0  ;;  %7582 = vst [vmem:[#allocation3 + $0x12c] sm:$0xf] %v7550_v46  ;;  %v7557_v5 = vmax.bf16 %v7478_v4, %v16774_v12 }
 0x5c2   : > { %v7558_v59 = vmax.bf16 %v7482_v10, %v7334_v26  ;;  %v7559_v36 = vmax.bf16 %v7485_v21, %v16779_v28  ;;  %v7560_v53 = vmax.bf16 %v7489_v27, %v7336_v42  ;;  %7583 = vst [vmem:[#allocation3 + $0x13c] sm:$0xf] %v7551_v23  ;;  %7584 = vst [vmem:[#allocation3 + $0x14c] sm:$0xf] %v7552_v63 }
 0x5c3   : > { %7585 = vst [vmem:[#allocation3 + $0x15c] sm:$0xf] %v7553_v34  ;;  %v7561_v16 = vmax.bf16 %v7492_v18, %v16784_v39  ;;  %v7562_v50 = vmax.bf16 %v7496_v49, %v7338_v9  ;;  %v7563_v33 = vmax.bf16 %v7499_v56, %v16789_v8  ;;  %7586 = vst [vmem:[#allocation3 + $0x16c] sm:$0xf] %v7554_v52 }
 0x5c4   : > { %7587 = vst [vmem:[#allocation3 + $0x17c] sm:$0xf] %v7555_v7  ;;  %7588 = vst [vmem:[#allocation3 + $0x18c] sm:$0xf] %v7556_v31 }
 0x5c5   : > { %7589 = vst [vmem:[#allocation3 + $0x19c] sm:$0xf] %v7557_v5  ;;  %7590 = vst [vmem:[#allocation3 + $0x1ac] sm:$0xf] %v7558_v59 }
 0x5c6   : > { %7591 = vst [vmem:[#allocation3 + $0x1bc] sm:$0xf] %v7559_v36  ;;  %7592 = vst [vmem:[#allocation3 + $0x1cc] sm:$0xf] %v7560_v53 }
 0x5c7   : > { %7593 = vst [vmem:[#allocation3 + $0x1dc] sm:$0xf] %v7561_v16  ;;  %7594 = vst [vmem:[#allocation3 + $0x1ec] sm:$0xf] %v7562_v50 }
 0x5c8   : > { %7595 = vst [vmem:[#allocation3 + $0x1fc] sm:$0xf] %v7563_v33 }
 0x5c9 PF: > { %v10408_v20 = vld [vmem:[%s11171_s9 + $0x78] sm:$0xff]   ;;  %v10412_v15 = vld [vmem:[%s11171_s9 + $0x70] sm:$0xff]   ;;  %v10416_v14 = vld [vmem:[%s11171_s9 + $0x68] sm:$0xff]   ;;  %s18304_s17 = sld [smem:[#allocation19_spill]]  ;;  %s8932_s5 = sshll.u32 %s11188_s13, 4  ;;  %s17078_s5 = int_to_ptr.vmem [resolvable:$true] %s8932_s5 }
 0x5ca   : > { %v10409_v22 = vld [vmem:[%s11171_s9 + $0xf8] sm:$0xff]   ;;  %9821 = vmatprep.subr.bf16.mxu0 %v10408_v20  ;;  %v10413_v41 = vld [vmem:[%s11171_s9 + $0xf0] sm:$0xff]   ;;  %v10417_v26 = vld [vmem:[%s11171_s9 + $0xe8] sm:$0xff]   ;;  %s18305_s20 = sld [smem:[#allocation18_spill]]  ;;  %s17083_s2 = scalar_lea.sflag [#allocation6], %s316_s15 }
 0x5cb   : > { %v10410_v58 = vld [vmem:[%s11171_s9 + $0x38] sm:$0xff]   ;;  %9933 = vmatprep.subr.bf16.mxu1 %v10409_v22  ;;  %v10414_v0 = vld [vmem:[%s11171_s9 + $0x30] sm:$0xff]   ;;  %v10418_v28 = vld [vmem:[%s11171_s9 + $0x28] sm:$0xff]   ;;  %s18306_s11 = sld [smem:[#allocation114_spill]]  ;;  %p18307_p8 = scmp.ne.s32.totalorder %s17458_s21, 0 }
 0x5cc   : > { %v10411_v30 = vld [vmem:[%s11171_s9 + $0xb8] sm:$0xff]   ;;  %9822 = vmatpush3.bf16.msra.mxu0 %v10410_v58  ;;  %v10415_v12 = vld [vmem:[%s11171_s9 + $0xb0] sm:$0xff]   ;;  %v10419_v45 = vld [vmem:[%s11171_s9 + $0xa8] sm:$0xff]   ;;  %s10908_s24 = smov [#allocation10]  }
 0x5cd   : > { %9934 = vmatpush3.bf16.msra.mxu1 %v10411_v30  ;;  %9823 = vmatprep.subr.bf16.mxu0 %v10412_v15  ;;  %v10420_v42 = vld [vmem:[%s11171_s9 + $0x60] sm:$0xff]   ;;  %v10424_v8 = vld [vmem:[%s11171_s9 + $0x58] sm:$0xff]   ;;  %v10428_v2 = vld [vmem:[%s11171_s9 + $0x50] sm:$0xff]   ;;  %s10750_s27 = sshll.u32 %s10908_s24, 4  ;;  %s10751_s27 = int_to_ptr.vmem [resolvable:$false] %s10750_s27 }
 0x5ce   : > { %9935 = vmatprep.subr.bf16.mxu1 %v10413_v41  ;;  %v10421_v39 = vld [vmem:[%s11171_s9 + $0xe0] sm:$0xff]   ;;  %v10425_v11 = vld [vmem:[%s11171_s9 + $0xd8] sm:$0xff]   ;;  %v10429_v3 = vld [vmem:[%s11171_s9 + $0xd0] sm:$0xff]   ;;  %s10752_s4 = scalar_lea.vmem %s10751_s27, 4096  ;;  %p10753_p7 = scmp.lt.s32.totalorder %s17078_s5, %s10751_s27 }
 0x5cf   : > { %v10422_v60 = vld [vmem:[%s11171_s9 + $0x20] sm:$0xff]   ;;  %v10426_v19 = vld [vmem:[%s11171_s9 + $0x18] sm:$0xff]   ;;  %v10430_v17 = vld [vmem:[%s11171_s9 + $0x10] sm:$0xff]   ;;  %s9380_s23 = sshll.u32 %s18304_s17, 6 }
 0x5d0   : > { %9824 = vmatpush3.bf16.msra.mxu0 %v10414_v0  ;;  %v10423_v9 = vld [vmem:[%s11171_s9 + $0xa0] sm:$0xff]   ;;  %v10427_v38 = vld [vmem:[%s11171_s9 + $0x98] sm:$0xff]   ;;  %v10431_v54 = vld [vmem:[%s11171_s9 + $0x90] sm:$0xff]   ;;  %s8929_s26 = sadd.s32 %s18305_s20, %s9380_s23 }
 0x5d1   : > { %9936 = vmatpush3.bf16.msra.mxu1 %v10415_v12  ;;  %9825 = vmatprep.subr.bf16.mxu0 %v10416_v14  ;;  %v10432_v57 = vld [vmem:[%s11171_s9 + $0x48] sm:$0xff]   ;;  %v10436_v25 = vld [vmem:[%s11171_s9 + $0x40] sm:$0xff]  }
 0x5d2   : > { %9937 = vmatprep.subr.bf16.mxu1 %v10417_v26  ;;  %v10433_v61 = vld [vmem:[%s11171_s9 + $0xc8] sm:$0xff]   ;;  %v10437_v44 = vld [vmem:[%s11171_s9 + $0xc0] sm:$0xff]  }
 0x5d3   : > { %v10434_v43 = vld [vmem:[%s11171_s9 + $0x8] sm:$0xff]   ;;  %v10438_v13 = vld [vmem:[%s11171_s9] sm:$0xff]  }
 0x5d4   : > { %9826 = vmatpush3.bf16.msra.mxu0 %v10418_v28  ;;  %v10435_v51 = vld [vmem:[%s11171_s9 + $0x88] sm:$0xff]   ;;  %v10439_v10 = vld [vmem:[%s11171_s9 + $0x80] sm:$0xff]   ;;  %s9381_s9 = sshll.u32 %s8929_s26, 6 }
 0x5d5   : > { %9938 = vmatpush3.bf16.msra.mxu1 %v10419_v45  ;;  %9827 = vmatprep.subr.bf16.mxu0 %v10420_v42  ;;  %v10440_v29 = vld [vmem:[#allocation3] ss:$16 sps:$4 sm:$0xff]   ;;  %v10442_v48 = vld [vmem:[#allocation3 + $0x4] ss:$16 sps:$4 sm:$0xff]   ;;  %v10443_v62 = vld [vmem:[#allocation3 + $0x8] ss:$16 sps:$4 sm:$0xff]   ;;  %s17076_s12 = scalar_lea.hbm %s18306_s11, %s9381_s9 }
 0x5d6   : > { %9939 = vmatprep.subr.bf16.mxu1 %v10421_v39  ;;  %v10445_v4 = vld [vmem:[#allocation3 + $0xc] ss:$16 sps:$4 sm:$0xff]   ;;  %8275 = vmatprep.mubr.bf16.mxu0 %v10442_v48  ;;  %v10446_v35 = vld [vmem:[#allocation3 + $0x24] ss:$16 sps:$4 sm:$0xff]   ;;  %v10450_v24 = vld [vmem:[#allocation3 + $0x20] ss:$16 sps:$4 sm:$0xff]  }
 0x5d7   : > { %8436 = vmatprep.mubr.bf16.mxu1 %v10445_v4  ;;  %v10448_v47 = vld [vmem:[#allocation3 + $0x2c] ss:$16 sps:$4 sm:$0xff]   ;;  %v10451_v40 = vld [vmem:[#allocation3 + $0x28] ss:$16 sps:$4 sm:$0xff]   ;;  %v10452_v21 = vld [vmem:[#allocation3 + $0x44] ss:$16 sps:$4 sm:$0xff]  }
 0x5d8   : > { %9828 = vmatpush3.bf16.msra.mxu0 %v10422_v60  ;;  %v10454_v27 = vld [vmem:[#allocation3 + $0x4c] ss:$16 sps:$4 sm:$0xff]   ;;  %v10456_v32 = vld [vmem:[#allocation3 + $0x40] ss:$16 sps:$4 sm:$0xff]   ;;  %v10457_v6 = vld [vmem:[#allocation3 + $0x48] ss:$16 sps:$4 sm:$0xff]  }
 0x5d9   : > { %9940 = vmatpush3.bf16.msra.mxu1 %v10423_v9  ;;  %9829 = vmatprep.subr.bf16.mxu0 %v10424_v8  ;;  %v10458_v49 = vld [vmem:[#allocation3 + $0x64] ss:$16 sps:$4 sm:$0xff]   ;;  %v10460_v1 = vld [vmem:[#allocation3 + $0x6c] ss:$16 sps:$4 sm:$0xff]   ;;  %v10462_v37 = vld [vmem:[#allocation3 + $0x60] ss:$16 sps:$4 sm:$0xff]  }
 0x5da   : > { %9941 = vmatprep.subr.bf16.mxu1 %v10425_v11  ;;  %v10463_v55 = vld [vmem:[#allocation3 + $0x68] ss:$16 sps:$4 sm:$0xff]   ;;  %v10464_v46 = vld [vmem:[#allocation3 + $0x84] ss:$16 sps:$4 sm:$0xff]   ;;  %v10466_v18 = vld [vmem:[#allocation3 + $0x8c] ss:$16 sps:$4 sm:$0xff]  }
 0x5db   : > { %v10468_v23 = vld [vmem:[#allocation3 + $0x80] ss:$16 sps:$4 sm:$0xff]   ;;  %v10469_v63 = vld [vmem:[#allocation3 + $0x88] ss:$16 sps:$4 sm:$0xff]   ;;  %v10470_v34 = vld [vmem:[#allocation3 + $0xa4] ss:$16 sps:$4 sm:$0xff]  }
 0x5dc   : > { %9830 = vmatpush3.bf16.msra.mxu0 %v10426_v19  ;;  %v10472_v56 = vld [vmem:[#allocation3 + $0xac] ss:$16 sps:$4 sm:$0xff]   ;;  %v10474_v52 = vld [vmem:[#allocation3 + $0xa0] ss:$16 sps:$4 sm:$0xff]   ;;  %v10475_v7 = vld [vmem:[#allocation3 + $0xa8] ss:$16 sps:$4 sm:$0xff]  }
 0x5dd   : > { %9942 = vmatpush3.bf16.msra.mxu1 %v10427_v38  ;;  %9831 = vmatprep.subr.bf16.mxu0 %v10428_v2  ;;  %v10476_v31 = vld [vmem:[#allocation3 + $0xc4] ss:$16 sps:$4 sm:$0xff]   ;;  %v10478_v5 = vld [vmem:[#allocation3 + $0xcc] ss:$16 sps:$4 sm:$0xff]   ;;  %v10480_v59 = vld [vmem:[#allocation3 + $0xc0] ss:$16 sps:$4 sm:$0xff]  }
 0x5de   : > { %9943 = vmatprep.subr.bf16.mxu1 %v10429_v3  ;;  %v10481_v36 = vld [vmem:[#allocation3 + $0xc8] ss:$16 sps:$4 sm:$0xff]   ;;  %v10482_v53 = vld [vmem:[#allocation3 + $0xe4] ss:$16 sps:$4 sm:$0xff]   ;;  %v10484_v16 = vld [vmem:[#allocation3 + $0xec] ss:$16 sps:$4 sm:$0xff]  }
 0x5df   : > { %v10486_v50 = vld [vmem:[#allocation3 + $0xe0] ss:$16 sps:$4 sm:$0xff]   ;;  %v10487_v33 = vld [vmem:[#allocation3 + $0xe8] ss:$16 sps:$4 sm:$0xff]   ;;  %v10488_v20 = vld [vmem:[#allocation3 + $0x104] ss:$16 sps:$4 sm:$0xff]  }
 0x5e0   : > { %9832 = vmatpush3.bf16.msra.mxu0 %v10430_v17  ;;  %v10490_v22 = vld [vmem:[#allocation3 + $0x10c] ss:$16 sps:$4 sm:$0xff]   ;;  %v10492_v58 = vld [vmem:[#allocation3 + $0x100] ss:$16 sps:$4 sm:$0xff]   ;;  %v10493_v30 = vld [vmem:[#allocation3 + $0x108] ss:$16 sps:$4 sm:$0xff]  }
 0x5e1   : > { %9944 = vmatpush3.bf16.msra.mxu1 %v10431_v54  ;;  %9833 = vmatprep.subr.bf16.mxu0 %v10432_v57  ;;  %v10494_v15 = vld [vmem:[#allocation3 + $0x124] ss:$16 sps:$4 sm:$0xff]   ;;  %v10496_v41 = vld [vmem:[#allocation3 + $0x12c] ss:$16 sps:$4 sm:$0xff]   ;;  %v10498_v0 = vld [vmem:[#allocation3 + $0x120] ss:$16 sps:$4 sm:$0xff]  }
 0x5e2   : > { %9945 = vmatprep.subr.bf16.mxu1 %v10433_v61  ;;  %v10499_v12 = vld [vmem:[#allocation3 + $0x128] ss:$16 sps:$4 sm:$0xff]   ;;  %v10500_v14 = vld [vmem:[#allocation3 + $0x144] ss:$16 sps:$4 sm:$0xff]   ;;  %v10502_v26 = vld [vmem:[#allocation3 + $0x14c] ss:$16 sps:$4 sm:$0xff]  }
 0x5e3   : > { %v10504_v28 = vld [vmem:[#allocation3 + $0x140] ss:$16 sps:$4 sm:$0xff]   ;;  %v10505_v45 = vld [vmem:[#allocation3 + $0x148] ss:$16 sps:$4 sm:$0xff]   ;;  %v10506_v42 = vld [vmem:[#allocation3 + $0x164] ss:$16 sps:$4 sm:$0xff]  }
 0x5e4   : > { %9834 = vmatpush3.bf16.msra.mxu0 %v10434_v43  ;;  %v10508_v39 = vld [vmem:[#allocation3 + $0x16c] ss:$16 sps:$4 sm:$0xff]   ;;  %v10510_v60 = vld [vmem:[#allocation3 + $0x160] ss:$16 sps:$4 sm:$0xff]   ;;  %v10511_v9 = vld [vmem:[#allocation3 + $0x168] ss:$16 sps:$4 sm:$0xff]  }
 0x5e5   : > { %9946 = vmatpush3.bf16.msra.mxu1 %v10435_v51  ;;  %9835 = vmatprep.subr.bf16.mxu0 %v10436_v25  ;;  %v10512_v8 = vld [vmem:[#allocation3 + $0x184] ss:$16 sps:$4 sm:$0xff]   ;;  %v10514_v11 = vld [vmem:[#allocation3 + $0x18c] ss:$16 sps:$4 sm:$0xff]   ;;  %v10516_v19 = vld [vmem:[#allocation3 + $0x180] ss:$16 sps:$4 sm:$0xff]  }
 0x5e6   : > { %9947 = vmatprep.subr.bf16.mxu1 %v10437_v44  ;;  %v10517_v38 = vld [vmem:[#allocation3 + $0x188] ss:$16 sps:$4 sm:$0xff]   ;;  %v10518_v2 = vld [vmem:[#allocation3 + $0x1a4] ss:$16 sps:$4 sm:$0xff]   ;;  %v10520_v3 = vld [vmem:[#allocation3 + $0x1ac] ss:$16 sps:$4 sm:$0xff]  }
 0x5e7   : > { %v10522_v17 = vld [vmem:[#allocation3 + $0x1a0] ss:$16 sps:$4 sm:$0xff]   ;;  %v10523_v54 = vld [vmem:[#allocation3 + $0x1a8] ss:$16 sps:$4 sm:$0xff]   ;;  %v10524_v57 = vld [vmem:[#allocation3 + $0x1c4] ss:$16 sps:$4 sm:$0xff]  }
 0x5e8   : > { %9836 = vmatpush3.bf16.msra.mxu0 %v10438_v13  ;;  %v10526_v61 = vld [vmem:[#allocation3 + $0x1cc] ss:$16 sps:$4 sm:$0xff]   ;;  %v10528_v43 = vld [vmem:[#allocation3 + $0x1c0] ss:$16 sps:$4 sm:$0xff]   ;;  %v10529_v51 = vld [vmem:[#allocation3 + $0x1c8] ss:$16 sps:$4 sm:$0xff]  }
 0x5e9   : > { %9948 = vmatpush3.bf16.msra.mxu1 %v10439_v10  ;;  %v10530_v25 = vld [vmem:[#allocation3 + $0x1e4] ss:$16 sps:$4 sm:$0xff]   ;;  %v10532_v44 = vld [vmem:[#allocation3 + $0x1ec] ss:$16 sps:$4 sm:$0xff]   ;;  %v10534_v13 = vld [vmem:[#allocation3 + $0x1e0] ss:$16 sps:$4 sm:$0xff]  }
 0x5ea   : > { %v10535_v10 = vld [vmem:[#allocation3 + $0x1e8] ss:$16 sps:$4 sm:$0xff]  }
 0x5eb   : > { %8276 = vmatmul.mubr.bf16.vlgmr.msra.gmra.mxu0 %v10440_v29 }
 0x5ec   : > { %8437 = vmatmul.mubr.bf16.vlgmr.msra.gmra.mxu1 %v10443_v62  ;;  %8283 = vmatprep.mubr.bf16.mxu0 %v10446_v35  ;;  %v16897_v62 = vld [vmem:[%s321_s28] ss:$0 sm:$0xff]  ;;  %s10746_s28 = scalar_lea.vmem %s17078_s5, 2048 }
 0x5ed   : > { %8444 = vmatprep.mubr.bf16.mxu1 %v10448_v47  ;;  %p10747_p9 = scmp.ne.s32.totalorder %s17078_s5, %s10746_s28  ;;  %p10754_p1 = scmp.lt.s32.totalorder %s10752_s4, %s10746_s28 }
 0x5ef   : > { %p10748_p13 = pnand %p10747_p9, %p18307_p8  ;;  %p10755_p5 = por %p10754_p1, %p10753_p7 }
 0x5f1   : > { %p10749_p4 = pneg %p10748_p13 }
 0x5f3   : > { %8284 = vmatmul.mubr.bf16.gmra.mxu0 %v10450_v24  ;;  %p10756_p3 = pnand %p10755_p5, %p10749_p4 }
 0x5f4   : > { %8445 = vmatmul.mubr.bf16.gmra.mxu1 %v10451_v40  ;;  %8291 = vmatprep.mubr.bf16.mxu0 %v10452_v21 }
 0x5f5   : > { %8452 = vmatprep.mubr.bf16.mxu1 %v10454_v27 }
 0x5fb   : > { %8292 = vmatmul.mubr.bf16.gmra.mxu0 %v10456_v32 }
 0x5fc   : > { %8453 = vmatmul.mubr.bf16.gmra.mxu1 %v10457_v6  ;;  %8299 = vmatprep.mubr.bf16.mxu0 %v10458_v49 }
 0x5fd   : > { %8460 = vmatprep.mubr.bf16.mxu1 %v10460_v1 }
 0x603   : > { %8300 = vmatmul.mubr.bf16.gmra.mxu0 %v10462_v37 }
 0x604   : > { %8461 = vmatmul.mubr.bf16.gmra.mxu1 %v10463_v55  ;;  %8307 = vmatprep.mubr.bf16.mxu0 %v10464_v46 }
 0x605   : > { %8468 = vmatprep.mubr.bf16.mxu1 %v10466_v18 }
 0x60b   : > { %8308 = vmatmul.mubr.bf16.gmra.mxu0 %v10468_v23 }
 0x60c   : > { %8469 = vmatmul.mubr.bf16.gmra.mxu1 %v10469_v63  ;;  %8315 = vmatprep.mubr.bf16.mxu0 %v10470_v34 }
 0x60d   : > { %8476 = vmatprep.mubr.bf16.mxu1 %v10472_v56 }
 0x613   : > { %8316 = vmatmul.mubr.bf16.gmra.mxu0 %v10474_v52 }
 0x614   : > { %8477 = vmatmul.mubr.bf16.gmra.mxu1 %v10475_v7  ;;  %8323 = vmatprep.mubr.bf16.mxu0 %v10476_v31 }
 0x615   : > { %8484 = vmatprep.mubr.bf16.mxu1 %v10478_v5 }
 0x61b   : > { %8324 = vmatmul.mubr.bf16.gmra.mxu0 %v10480_v59 }
 0x61c   : > { %8485 = vmatmul.mubr.bf16.gmra.mxu1 %v10481_v36  ;;  %8331 = vmatprep.mubr.bf16.mxu0 %v10482_v53 }
 0x61d   : > { %8492 = vmatprep.mubr.bf16.mxu1 %v10484_v16 }
 0x623   : > { %8332 = vmatmul.mubr.bf16.gmra.mxu0 %v10486_v50 }
 0x624   : > { %8493 = vmatmul.mubr.bf16.gmra.mxu1 %v10487_v33  ;;  %8339 = vmatprep.mubr.bf16.mxu0 %v10488_v20 }
 0x625   : > { %8500 = vmatprep.mubr.bf16.mxu1 %v10490_v22 }
 0x62b   : > { %8340 = vmatmul.mubr.bf16.gmra.mxu0 %v10492_v58 }
 0x62c   : > { %8501 = vmatmul.mubr.bf16.gmra.mxu1 %v10493_v30  ;;  %8347 = vmatprep.mubr.bf16.mxu0 %v10494_v15 }
 0x62d   : > { %8508 = vmatprep.mubr.bf16.mxu1 %v10496_v41 }
 0x633   : > { %8348 = vmatmul.mubr.bf16.gmra.mxu0 %v10498_v0 }
 0x634   : > { %8509 = vmatmul.mubr.bf16.gmra.mxu1 %v10499_v12  ;;  %8355 = vmatprep.mubr.bf16.mxu0 %v10500_v14 }
 0x635   : > { %8516 = vmatprep.mubr.bf16.mxu1 %v10502_v26 }
 0x63b   : > { %8356 = vmatmul.mubr.bf16.gmra.mxu0 %v10504_v28 }
 0x63c   : > { %8517 = vmatmul.mubr.bf16.gmra.mxu1 %v10505_v45  ;;  %8363 = vmatprep.mubr.bf16.mxu0 %v10506_v42 }
 0x63d   : > { %8524 = vmatprep.mubr.bf16.mxu1 %v10508_v39 }
 0x643   : > { %8364 = vmatmul.mubr.bf16.gmra.mxu0 %v10510_v60 }
 0x644   : > { %8525 = vmatmul.mubr.bf16.gmra.mxu1 %v10511_v9  ;;  %8371 = vmatprep.mubr.bf16.mxu0 %v10512_v8 }
 0x645   : > { %8532 = vmatprep.mubr.bf16.mxu1 %v10514_v11 }
 0x64b   : > { %8372 = vmatmul.mubr.bf16.gmra.mxu0 %v10516_v19 }
 0x64c   : > { %8533 = vmatmul.mubr.bf16.gmra.mxu1 %v10517_v38  ;;  %8379 = vmatprep.mubr.bf16.mxu0 %v10518_v2 }
 0x64d   : > { %8540 = vmatprep.mubr.bf16.mxu1 %v10520_v3 }
 0x653   : > { %8380 = vmatmul.mubr.bf16.gmra.mxu0 %v10522_v17 }
 0x654   : > { %8541 = vmatmul.mubr.bf16.gmra.mxu1 %v10523_v54  ;;  %8387 = vmatprep.mubr.bf16.mxu0 %v10524_v57 }
 0x655   : > { %8548 = vmatprep.mubr.bf16.mxu1 %v10526_v61 }
 0x65b   : > { %8388 = vmatmul.mubr.bf16.gmra.mxu0 %v10528_v43 }
 0x65c   : > { %8549 = vmatmul.mubr.bf16.gmra.mxu1 %v10529_v51  ;;  %8395 = vmatprep.mubr.bf16.mxu0 %v10530_v25 }
 0x65d   : > { %8556 = vmatprep.mubr.bf16.mxu1 %v10532_v44 }
 0x663   : > { %8396 = vmatmul.mubr.bf16.gmra.mxu0 %v10534_v13 }
 0x664   : > { %8557 = vmatmul.mubr.bf16.gmra.mxu1 %v10535_v10 }
 0x6ab   : > { %v9837_v29 = vpop.f32.mrf.mxu0 }
 0x6ac   : > { %v9949_v48 = vpop.f32.mrf.mxu1 }
 0x6ad   : > { %v9838_v4 = vpop.f32.mrf.mxu0 }
 0x6ae   : > { %v9839_v35 = vadd.f32 %v9838_v4, %v9837_v29  ;;  %v9950_v47 = vpop.f32.mrf.mxu1 }
 0x6af   : > { %v9840_v24 = vpop.f32.mrf.mxu0  ;;  %v9951_v21 = vadd.f32 %v9950_v47, %v9949_v48 }
 0x6b0   : > { %v8278_v40 = vadd.f32 %v9839_v35, %v16897_v62  ;;  %v9952_v27 = vpop.f32.mrf.mxu1 }
 0x6b1   : > { %v9841_v32 = vpop.f32.mrf.mxu0 }
 0x6b2   : > { %v16900_v6 = vadd.f32 %v9951_v21, %v8278_v40  ;;  %v9842_v49 = vadd.f32 %v9841_v32, %v9840_v24  ;;  %v9953_v1 = vpop.f32.mrf.mxu1 }
 0x6b3   : > { %v9843_v37 = vpop.f32.mrf.mxu0  ;;  %v9954_v18 = vadd.f32 %v9953_v1, %v9952_v27 }
 0x6b4   : > { %v8565_v55 = vsub.f32 0.0, %v16900_v6  ;;  %v8281_v46 = vadd.f32 %v9842_v49, %v16897_v62  ;;  %v9955_v23 = vpop.f32.mrf.mxu1 }
 0x6b5   : > { %v9844_v63 = vpop.f32.mrf.mxu0 }
 0x6b6   : > { %v8597_v34 = vmul.f32 1.442695, %v8565_v55  ;;  %v16904_v56 = vadd.f32 %v9954_v18, %v8281_v46  ;;  %v9845_v52 = vadd.f32 %v9844_v63, %v9843_v37  ;;  %v9956_v7 = vpop.f32.mrf.mxu1 }
 0x6b7   : > { %v9846_v31 = vpop.f32.mrf.mxu0  ;;  %v9957_v36 = vadd.f32 %v9956_v7, %v9955_v23 }
 0x6b8   : > { %10536 = vpow2.f32 %v8597_v34  ;;  %v8566_v5 = vsub.f32 0.0, %v16904_v56  ;;  %v8286_v59 = vadd.f32 %v9845_v52, %v16897_v62  ;;  %v9958_v53 = vpop.f32.mrf.mxu1 }
 0x6b9   : > { %v9847_v16 = vpop.f32.mrf.mxu0 }
 0x6ba   : > { %v8599_v50 = vmul.f32 1.442695, %v8566_v5  ;;  %v16908_v33 = vadd.f32 %v9957_v36, %v8286_v59  ;;  %v9848_v20 = vadd.f32 %v9847_v16, %v9846_v31  ;;  %v9959_v22 = vpop.f32.mrf.mxu1 }
 0x6bb   : > { %v9849_v58 = vpop.f32.mrf.mxu0  ;;  %v9960_v41 = vadd.f32 %v9959_v22, %v9958_v53 }
 0x6bc   : > { %10538 = vpow2.f32 %v8599_v50  ;;  %v8567_v30 = vsub.f32 0.0, %v16908_v33  ;;  %v8289_v15 = vadd.f32 %v9848_v20, %v16897_v62  ;;  %v9961_v0 = vpop.f32.mrf.mxu1 }
 0x6bd   : > { %v9850_v12 = vpop.f32.mrf.mxu0 }
 0x6be   : > { %v8601_v14 = vmul.f32 1.442695, %v8567_v30  ;;  %v16912_v26 = vadd.f32 %v9960_v41, %v8289_v15  ;;  %v9851_v28 = vadd.f32 %v9850_v12, %v9849_v58  ;;  %v9962_v45 = vpop.f32.mrf.mxu1 }
 0x6bf   : > { %v9852_v42 = vpop.f32.mrf.mxu0  ;;  %v9963_v9 = vadd.f32 %v9962_v45, %v9961_v0 }
 0x6c0   : > { %10540 = vpow2.f32 %v8601_v14  ;;  %v8568_v39 = vsub.f32 0.0, %v16912_v26  ;;  %v8294_v60 = vadd.f32 %v9851_v28, %v16897_v62  ;;  %v9964_v8 = vpop.f32.mrf.mxu1 }
 0x6c1   : > { %v9853_v11 = vpop.f32.mrf.mxu0 }
 0x6c2   : > { %v8603_v19 = vmul.f32 1.442695, %v8568_v39  ;;  %v16916_v38 = vadd.f32 %v9963_v9, %v8294_v60  ;;  %v9854_v2 = vadd.f32 %v9853_v11, %v9852_v42  ;;  %v9965_v3 = vpop.f32.mrf.mxu1 }
 0x6c3   : > { %v9855_v17 = vpop.f32.mrf.mxu0  ;;  %v9966_v61 = vadd.f32 %v9965_v3, %v9964_v8 }
 0x6c4   : > { %10542 = vpow2.f32 %v8603_v19  ;;  %v8569_v54 = vsub.f32 0.0, %v16916_v38  ;;  %v8297_v57 = vadd.f32 %v9854_v2, %v16897_v62  ;;  %v9967_v43 = vpop.f32.mrf.mxu1 }
 0x6c5   : > { %v10537_v51 = vpop.eup %10536  ;;  %v9856_v25 = vpop.f32.mrf.mxu0 }
 0x6c6   : > { %v8661_v44 = vadd.f32 1.0, %v10537_v51  ;;  %v8605_v13 = vmul.f32 1.442695, %v8569_v54  ;;  %v16920_v10 = vadd.f32 %v9966_v61, %v8297_v57  ;;  %v9857_v29 = vadd.f32 %v9856_v25, %v9855_v17  ;;  %v9968_v48 = vpop.f32.mrf.mxu1 }
 0x6c7   : > { %v9858_v4 = vpop.f32.mrf.mxu0  ;;  %v9969_v24 = vadd.f32 %v9968_v48, %v9967_v43 }
 0x6c8   : > { %10544 = vrcp.f32 %v8661_v44  ;;  %v8570_v35 = vsub.f32 0.0, %v16920_v10  ;;  %v8302_v47 = vadd.f32 %v9857_v29, %v16897_v62  ;;  %v9970_v40 = vpop.f32.mrf.mxu1 }
 0x6c9   : > { %v10539_v21 = vpop.eup %10538  ;;  %10546 = vpow2.f32 %v8605_v13  ;;  %v9859_v27 = vpop.f32.mrf.mxu0 }
 0x6ca   : > { %v8662_v32 = vadd.f32 1.0, %v10539_v21  ;;  %v8607_v49 = vmul.f32 1.442695, %v8570_v35  ;;  %v16924_v1 = vadd.f32 %v9969_v24, %v8302_v47  ;;  %v9860_v37 = vadd.f32 %v9859_v27, %v9858_v4  ;;  %v9971_v55 = vpop.f32.mrf.mxu1 }
 0x6cb   : > { %v9861_v46 = vpop.f32.mrf.mxu0  ;;  %v9972_v63 = vadd.f32 %v9971_v55, %v9970_v40 }
 0x6cc   : > { %10548 = vrcp.f32 %v8662_v32  ;;  %v8571_v18 = vsub.f32 0.0, %v16924_v1  ;;  %v8305_v23 = vadd.f32 %v9860_v37, %v16897_v62  ;;  %v9973_v34 = vpop.f32.mrf.mxu1 }
 0x6cd   : > { %v10541_v52 = vpop.eup %10540  ;;  %10550 = vpow2.f32 %v8607_v49  ;;  %v9862_v7 = vpop.f32.mrf.mxu0 }
 0x6ce   : > { %v8663_v31 = vadd.f32 1.0, %v10541_v52  ;;  %v8609_v5 = vmul.f32 1.442695, %v8571_v18  ;;  %v16928_v59 = vadd.f32 %v9972_v63, %v8305_v23  ;;  %v9863_v36 = vadd.f32 %v9862_v7, %v9861_v46  ;;  %v9974_v53 = vpop.f32.mrf.mxu1 }
 0x6cf   : > { %v9864_v16 = vpop.f32.mrf.mxu0  ;;  %v9975_v22 = vadd.f32 %v9974_v53, %v9973_v34 }
 0x6d0   : > { %10552 = vrcp.f32 %v8663_v31  ;;  %v8572_v50 = vsub.f32 0.0, %v16928_v59  ;;  %v8310_v20 = vadd.f32 %v9863_v36, %v16897_v62  ;;  %v9976_v58 = vpop.f32.mrf.mxu1 }
 0x6d1   : > { %v10543_v30 = vpop.eup %10542  ;;  %10554 = vpow2.f32 %v8609_v5  ;;  %v9865_v15 = vpop.f32.mrf.mxu0 }
 0x6d2   : > { %v8664_v41 = vadd.f32 1.0, %v10543_v30  ;;  %v8611_v0 = vmul.f32 1.442695, %v8572_v50  ;;  %v16932_v12 = vadd.f32 %v9975_v22, %v8310_v20  ;;  %v9866_v14 = vadd.f32 %v9865_v15, %v9864_v16  ;;  %v9977_v28 = vpop.f32.mrf.mxu1 }
 0x6d3   : > { %v9867_v45 = vpop.f32.mrf.mxu0  ;;  %v9978_v60 = vadd.f32 %v9977_v28, %v9976_v58 }
 0x6d4   : > { %10556 = vrcp.f32 %v8664_v41  ;;  %v8573_v42 = vsub.f32 0.0, %v16932_v12  ;;  %v8313_v39 = vadd.f32 %v9866_v14, %v16897_v62  ;;  %v9979_v9 = vpop.f32.mrf.mxu1 }
 0x6d5   : > { %v10545_v8 = vpop.eup %10544  ;;  %10558 = vpow2.f32 %v8611_v0  ;;  %v9868_v11 = vpop.f32.mrf.mxu0 }
 0x6d6   : > { %v10547_v19 = vpop.eup %10546  ;;  %v8613_v2 = vmul.f32 1.442695, %v8573_v42  ;;  %v16936_v3 = vadd.f32 %v9978_v60, %v8313_v39  ;;  %v9869_v17 = vadd.f32 %v9868_v11, %v9867_v45  ;;  %v9980_v54 = vpop.f32.mrf.mxu1  ;;  %v8725_v29 = vmul.f32 %v10545_v8, %v16900_v6 }
 0x6d7   : > { %v8665_v57 = vadd.f32 1.0, %v10547_v19  ;;  %v9870_v61 = vpop.f32.mrf.mxu0  ;;  %v9981_v25 = vadd.f32 %v9980_v54, %v9979_v9 }
 0x6d8   : > { %10560 = vpow2.f32 %v8613_v2  ;;  %v8574_v43 = vsub.f32 0.0, %v16936_v3  ;;  %v8318_v51 = vadd.f32 %v9869_v17, %v16897_v62  ;;  %v9982_v44 = vpop.f32.mrf.mxu1 }
 0x6d9   : > { %v10549_v13 = vpop.eup %10548  ;;  %v9871_v48 = vpop.f32.mrf.mxu0  ;;  %10562 = vrcp.f32 %v8665_v57 }
 0x6da   : > { %v10551_v4 = vpop.eup %10550  ;;  %v8726_v35 = vmul.f32 %v10549_v13, %v16904_v56  ;;  %v8615_v47 = vmul.f32 1.442695, %v8574_v43  ;;  %v16942_v24 = vadd.f32 %v9981_v25, %v8318_v51  ;;  %v9872_v40 = vadd.f32 %v9871_v48, %v9870_v61  ;;  %v9983_v21 = vpop.f32.mrf.mxu1 }
 0x6db   : > { %v8666_v27 = vadd.f32 1.0, %v10551_v4  ;;  %v9984_v32 = vadd.f32 %v9983_v21, %v9982_v44  ;;  %v9873_v49 = vpop.f32.mrf.mxu0 }
 0x6dc   : > { %v9572_v37 = vpack.c.bf16 %v8726_v35, %v8725_v29  ;;  %10564 = vpow2.f32 %v8615_v47  ;;  %v8575_v55 = vsub.f32 0.0, %v16942_v24  ;;  %v8321_v6 = vadd.f32 %v9872_v40, %v16897_v62  ;;  %v9985_v46 = vpop.f32.mrf.mxu1 }
 0x6dd   : > { %v10553_v18 = vpop.eup %10552  ;;  %10566 = vrcp.f32 %v8666_v27  ;;  %v9874_v56 = vpop.f32.mrf.mxu0 }
 0x6de   : > { %v10555_v23 = vpop.eup %10554  ;;  %9573 = vst [vmem:[%s11188_s13] sm:$0xff] %v9572_v37   ;;  %v8617_v63 = vmul.f32 1.442695, %v8575_v55  ;;  %v16947_v34 = vadd.f32 %v9984_v32, %v8321_v6  ;;  %v9875_v52 = vadd.f32 %v9874_v56, %v9873_v49  ;;  %v9986_v7 = vpop.f32.mrf.mxu1  ;;  %v8727_v22 = vmul.f32 %v10553_v18, %v16908_v33 }
 0x6df   : > { %v8667_v31 = vadd.f32 1.0, %v10555_v23  ;;  %v9876_v5 = vpop.f32.mrf.mxu0  ;;  %v9987_v16 = vadd.f32 %v9986_v7, %v9985_v46 }
 0x6e0   : > { %10568 = vpow2.f32 %v8617_v63  ;;  %v8576_v36 = vsub.f32 0.0, %v16947_v34  ;;  %v8326_v53 = vadd.f32 %v9875_v52, %v16897_v62  ;;  %v9988_v50 = vpop.f32.mrf.mxu1 }
 0x6e1   : > { %v10557_v20 = vpop.eup %10556  ;;  %v9877_v58 = vpop.f32.mrf.mxu0  ;;  %10570 = vrcp.f32 %v8667_v31 }
 0x6e2   : > { %v10559_v30 = vpop.eup %10558  ;;  %v8728_v15 = vmul.f32 %v10557_v20, %v16912_v26  ;;  %v8619_v41 = vmul.f32 1.442695, %v8576_v36  ;;  %v16953_v0 = vadd.f32 %v9987_v16, %v8326_v53  ;;  %v9878_v14 = vadd.f32 %v9877_v58, %v9876_v5  ;;  %v9989_v28 = vpop.f32.mrf.mxu1 }
 0x6e3   : > { %v8668_v45 = vadd.f32 1.0, %v10559_v30  ;;  %v9990_v42 = vadd.f32 %v9989_v28, %v9988_v50  ;;  %v9879_v39 = vpop.f32.mrf.mxu0 }
 0x6e4   : > { %v9577_v60 = vpack.c.bf16 %v8728_v15, %v8727_v22  ;;  %10572 = vpow2.f32 %v8619_v41  ;;  %v8577_v9 = vsub.f32 0.0, %v16953_v0  ;;  %v8329_v33 = vadd.f32 %v9878_v14, %v16897_v62  ;;  %v9991_v8 = vpop.f32.mrf.mxu1 }
 0x6e5   : > { %v10561_v11 = vpop.eup %10560  ;;  %10574 = vrcp.f32 %v8668_v45  ;;  %v9880_v26 = vpop.f32.mrf.mxu0 }
 0x6e6   : > { %9694 = vst [vmem:[%s11188_s13 + $0x8] sm:$0xff] %v9577_v60   ;;  %v8669_v19 = vadd.f32 1.0, %v10561_v11  ;;  %v8621_v2 = vmul.f32 1.442695, %v8577_v9  ;;  %v16958_v17 = vadd.f32 %v9990_v42, %v8329_v33  ;;  %v9881_v54 = vadd.f32 %v9880_v26, %v9879_v39  ;;  %v9992_v57 = vpop.f32.mrf.mxu1  ;;  %v10563_v43 = vpop.eup %10562 }
 0x6e7   : > { %v9882_v61 = vpop.f32.mrf.mxu0  ;;  %v9993_v44 = vadd.f32 %v9992_v57, %v9991_v8  ;;  %v8729_v32 = vmul.f32 %v10563_v43, %v16916_v38 }
 0x6e8   : > { %10576 = vrcp.f32 %v8669_v19  ;;  %v8578_v51 = vsub.f32 0.0, %v16958_v17  ;;  %v8334_v25 = vadd.f32 %v9881_v54, %v16897_v62  ;;  %v9994_v13 = vpop.f32.mrf.mxu1 }
 0x6e9   : > { %v10565_v29 = vpop.eup %10564  ;;  %10578 = vpow2.f32 %v8621_v2  ;;  %v9883_v48 = vpop.f32.mrf.mxu0 }
 0x6ea   : > { %v10567_v4 = vpop.eup %10566  ;;  %v8670_v35 = vadd.f32 1.0, %v10565_v29  ;;  %v8623_v47 = vmul.f32 1.442695, %v8578_v51  ;;  %v16962_v40 = vadd.f32 %v9993_v44, %v8334_v25  ;;  %v9884_v21 = vadd.f32 %v9883_v48, %v9882_v61  ;;  %v9995_v27 = vpop.f32.mrf.mxu1 }
 0x6eb   : > { %v8730_v49 = vmul.f32 %v10567_v4, %v16920_v10  ;;  %v9885_v37 = vpop.f32.mrf.mxu0  ;;  %v9996_v46 = vadd.f32 %v9995_v27, %v9994_v13 }
 0x6ec   : > { %10580 = vrcp.f32 %v8670_v35  ;;  %v8579_v55 = vsub.f32 0.0, %v16962_v40  ;;  %v8337_v6 = vadd.f32 %v9884_v21, %v16897_v62  ;;  %v9997_v18 = vpop.f32.mrf.mxu1 }
 0x6ed   : > { %v10569_v56 = vpop.eup %10568  ;;  %v9582_v23 = vpack.c.bf16 %v8730_v49, %v8729_v32  ;;  %10582 = vpow2.f32 %v8623_v47  ;;  %v9886_v63 = vpop.f32.mrf.mxu0 }
 0x6ee   : > { %v8671_v52 = vadd.f32 1.0, %v10569_v56  ;;  %v8625_v7 = vmul.f32 1.442695, %v8579_v55  ;;  %v16968_v31 = vadd.f32 %v9996_v46, %v8337_v6  ;;  %v9887_v38 = vadd.f32 %v9886_v63, %v9885_v37  ;;  %v9998_v5 = vpop.f32.mrf.mxu1  ;;  %v10571_v36 = vpop.eup %10570 }
 0x6ef   : > { %9695 = vst [vmem:[%s11188_s13 + $0x10] sm:$0xff] %v9582_v23   ;;  %v9888_v10 = vpop.f32.mrf.mxu0  ;;  %v9999_v50 = vadd.f32 %v9998_v5, %v9997_v18  ;;  %v8731_v42 = vmul.f32 %v10571_v36, %v16924_v1 }
 0x6f0   : > { %10584 = vrcp.f32 %v8671_v52  ;;  %v8580_v53 = vsub.f32 0.0, %v16968_v31  ;;  %v8342_v16 = vadd.f32 %v9887_v38, %v16897_v62  ;;  %v10000_v20 = vpop.f32.mrf.mxu1 }
 0x6f1   : > { %v10573_v22 = vpop.eup %10572  ;;  %10586 = vpow2.f32 %v8625_v7  ;;  %v9889_v58 = vpop.f32.mrf.mxu0 }
 0x6f2   : > { %v10575_v30 = vpop.eup %10574  ;;  %v8672_v15 = vadd.f32 1.0, %v10573_v22  ;;  %v8627_v41 = vmul.f32 1.442695, %v8580_v53  ;;  %v16973_v14 = vadd.f32 %v9999_v50, %v8342_v16  ;;  %v9890_v28 = vadd.f32 %v9889_v58, %v9888_v10  ;;  %v10001_v45 = vpop.f32.mrf.mxu1 }
 0x6f3   : > { %v8732_v39 = vmul.f32 %v10575_v30, %v16928_v59  ;;  %v9891_v60 = vpop.f32.mrf.mxu0  ;;  %v10002_v8 = vadd.f32 %v10001_v45, %v10000_v20 }
 0x6f4   : > { %10588 = vrcp.f32 %v8672_v15  ;;  %v8581_v9 = vsub.f32 0.0, %v16973_v14  ;;  %v8345_v33 = vadd.f32 %v9890_v28, %v16897_v62  ;;  %v10003_v11 = vpop.f32.mrf.mxu1 }
 0x6f5   : > { %v10577_v26 = vpop.eup %10576  ;;  %v9587_v19 = vpack.c.bf16 %v8732_v39, %v8731_v42  ;;  %10590 = vpow2.f32 %v8627_v41  ;;  %v9892_v2 = vpop.f32.mrf.mxu0 }
 0x6f6   : > { %v10579_v54 = vpop.eup %10578  ;;  %v8629_v57 = vmul.f32 1.442695, %v8581_v9  ;;  %v16979_v61 = vadd.f32 %v10002_v8, %v8345_v33  ;;  %v9893_v1 = vadd.f32 %v9892_v2, %v9891_v60  ;;  %v10004_v43 = vpop.f32.mrf.mxu1  ;;  %v8733_v4 = vmul.f32 %v10577_v26, %v16932_v12 }
 0x6f7   : > { %9696 = vst [vmem:[%s11188_s13 + $0x18] sm:$0xff] %v9587_v19   ;;  %v8673_v59 = vadd.f32 1.0, %v10579_v54  ;;  %v9894_v51 = vpop.f32.mrf.mxu0  ;;  %v10005_v13 = vadd.f32 %v10004_v43, %v10003_v11 }
 0x6f8   : > { %10592 = vpow2.f32 %v8629_v57  ;;  %v8582_v25 = vsub.f32 0.0, %v16979_v61  ;;  %v8350_v44 = vadd.f32 %v9893_v1, %v16897_v62  ;;  %v10006_v29 = vpop.f32.mrf.mxu1 }
 0x6f9   : > { %v10581_v48 = vpop.eup %10580  ;;  %v9895_v35 = vpop.f32.mrf.mxu0  ;;  %10594 = vrcp.f32 %v8673_v59 }
 0x6fa   : > { %v10583_v47 = vpop.eup %10582  ;;  %v8734_v21 = vmul.f32 %v10581_v48, %v16936_v3  ;;  %v8631_v27 = vmul.f32 1.442695, %v8582_v25  ;;  %v16986_v32 = vadd.f32 %v10005_v13, %v8350_v44  ;;  %v9896_v49 = vadd.f32 %v9895_v35, %v9894_v51  ;;  %v10007_v37 = vpop.f32.mrf.mxu1 }
 0x6fb   : > { %v8674_v55 = vadd.f32 1.0, %v10583_v47  ;;  %v10008_v6 = vadd.f32 %v10007_v37, %v10006_v29  ;;  %v9897_v46 = vpop.f32.mrf.mxu0 }
 0x6fc   : > { %v9592_v18 = vpack.c.bf16 %v8734_v21, %v8733_v4  ;;  %10596 = vpow2.f32 %v8631_v27  ;;  %v8583_v56 = vsub.f32 0.0, %v16986_v32  ;;  %v8353_v12 = vadd.f32 %v9896_v49, %v16897_v62  ;;  %v10009_v23 = vpop.f32.mrf.mxu1 }
 0x6fd   : > { %v10585_v63 = vpop.eup %10584  ;;  %10598 = vrcp.f32 %v8674_v55  ;;  %v9898_v3 = vpop.f32.mrf.mxu0 }
 0x6fe   : > { %v10587_v52 = vpop.eup %10586  ;;  %9697 = vst [vmem:[%s11188_s13 + $0x20] sm:$0xff] %v9592_v18   ;;  %v8633_v7 = vmul.f32 1.442695, %v8583_v56  ;;  %v16991_v38 = vadd.f32 %v10008_v6, %v8353_v12  ;;  %v9899_v5 = vadd.f32 %v9898_v3, %v9897_v46  ;;  %v10010_v10 = vpop.f32.mrf.mxu1  ;;  %v8735_v30 = vmul.f32 %v10585_v63, %v16942_v24 }
 0x6ff   : > { %v8675_v36 = vadd.f32 1.0, %v10587_v52  ;;  %v9900_v53 = vpop.f32.mrf.mxu0  ;;  %v10011_v20 = vadd.f32 %v10010_v10, %v10009_v23 }
 0x700   : > { %10600 = vpow2.f32 %v8633_v7  ;;  %v8584_v16 = vsub.f32 0.0, %v16991_v38  ;;  %v8358_v50 = vadd.f32 %v9899_v5, %v16897_v62  ;;  %v10012_v22 = vpop.f32.mrf.mxu1 }
 0x701   : > { %v10589_v58 = vpop.eup %10588  ;;  %v9901_v15 = vpop.f32.mrf.mxu0  ;;  %10602 = vrcp.f32 %v8675_v36 }
 0x702   : > { %v10591_v41 = vpop.eup %10590  ;;  %v8736_v28 = vmul.f32 %v10589_v58, %v16947_v34  ;;  %v8635_v45 = vmul.f32 1.442695, %v8584_v16  ;;  %v16997_v42 = vadd.f32 %v10011_v20, %v8358_v50  ;;  %v9902_v39 = vadd.f32 %v9901_v15, %v9900_v53  ;;  %v10013_v60 = vpop.f32.mrf.mxu1 }
 0x703   : > { %v8676_v9 = vadd.f32 1.0, %v10591_v41  ;;  %v10014_v33 = vadd.f32 %v10013_v60, %v10012_v22  ;;  %v9903_v8 = vpop.f32.mrf.mxu0 }
 0x704   : > { %v9597_v11 = vpack.c.bf16 %v8736_v28, %v8735_v30  ;;  %10604 = vpow2.f32 %v8635_v45  ;;  %v8585_v26 = vsub.f32 0.0, %v16997_v42  ;;  %v8361_v24 = vadd.f32 %v9902_v39, %v16897_v62  ;;  %v10015_v19 = vpop.f32.mrf.mxu1 }
 0x705   : > { %v10593_v2 = vpop.eup %10592  ;;  %10606 = vrcp.f32 %v8676_v9  ;;  %v9904_v34 = vpop.f32.mrf.mxu0 }
 0x706   : > { %9698 = vst [vmem:[%s11188_s13 + $0x28] sm:$0xff] %v9597_v11   ;;  %v8677_v54 = vadd.f32 1.0, %v10593_v2  ;;  %v8637_v57 = vmul.f32 1.442695, %v8585_v26  ;;  %v17002_v1 = vadd.f32 %v10014_v33, %v8361_v24  ;;  %v9905_v43 = vadd.f32 %v9904_v34, %v9903_v8  ;;  %v10016_v59 = vpop.f32.mrf.mxu1  ;;  %v10595_v25 = vpop.eup %10594 }
 0x707   : > { %v9906_v51 = vpop.f32.mrf.mxu0  ;;  %v10017_v29 = vadd.f32 %v10016_v59, %v10015_v19  ;;  %v8737_v6 = vmul.f32 %v10595_v25, %v16953_v0 }
 0x708   : > { %10608 = vrcp.f32 %v8677_v54  ;;  %v8586_v44 = vsub.f32 0.0, %v17002_v1  ;;  %v8366_v13 = vadd.f32 %v9905_v43, %v16897_v62  ;;  %v10018_v48 = vpop.f32.mrf.mxu1 }
 0x709   : > { %v10597_v4 = vpop.eup %10596  ;;  %10610 = vpow2.f32 %v8637_v57  ;;  %v9907_v35 = vpop.f32.mrf.mxu0 }
 0x70a   : > { %v10599_v47 = vpop.eup %10598  ;;  %v8678_v21 = vadd.f32 1.0, %v10597_v4  ;;  %v8639_v27 = vmul.f32 1.442695, %v8586_v44  ;;  %v17006_v49 = vadd.f32 %v10017_v29, %v8366_v13  ;;  %v9908_v37 = vadd.f32 %v9907_v35, %v9906_v51  ;;  %v10019_v55 = vpop.f32.mrf.mxu1 }
 0x70b   : > { %v8738_v46 = vmul.f32 %v10599_v47, %v16958_v17  ;;  %v9909_v18 = vpop.f32.mrf.mxu0  ;;  %v10020_v23 = vadd.f32 %v10019_v55, %v10018_v48 }
 0x70c   : > { %10612 = vrcp.f32 %v8678_v21  ;;  %v8587_v56 = vsub.f32 0.0, %v17006_v49  ;;  %v8369_v12 = vadd.f32 %v9908_v37, %v16897_v62  ;;  %v10021_v63 = vpop.f32.mrf.mxu1 }
 0x70d   : > { %v10601_v3 = vpop.eup %10600  ;;  %v9602_v52 = vpack.c.bf16 %v8738_v46, %v8737_v6  ;;  %10614 = vpow2.f32 %v8639_v27  ;;  %v9910_v7 = vpop.f32.mrf.mxu0 }
 0x70e   : > { %v8679_v5 = vadd.f32 1.0, %v10601_v3  ;;  %v8641_v10 = vmul.f32 1.442695, %v8587_v56  ;;  %v17012_v36 = vadd.f32 %v10020_v23, %v8369_v12  ;;  %v9911_v0 = vadd.f32 %v9910_v7, %v9909_v18  ;;  %v10022_v53 = vpop.f32.mrf.mxu1  ;;  %v10603_v16 = vpop.eup %10602 }
 0x70f   : > { %9699 = vst [vmem:[%s11188_s13 + $0x30] sm:$0xff] %v9602_v52   ;;  %v9912_v17 = vpop.f32.mrf.mxu0  ;;  %v10023_v22 = vadd.f32 %v10022_v53, %v10021_v63  ;;  %v8739_v33 = vmul.f32 %v10603_v16, %v16962_v40 }
 0x710   : > { %10616 = vrcp.f32 %v8679_v5  ;;  %v8588_v50 = vsub.f32 0.0, %v17012_v36  ;;  %v8374_v20 = vadd.f32 %v9911_v0, %v16897_v62  ;;  %v10024_v58 = vpop.f32.mrf.mxu1 }
 0x711   : > { %v10605_v30 = vpop.eup %10604  ;;  %10618 = vpow2.f32 %v8641_v10  ;;  %v9913_v15 = vpop.f32.mrf.mxu0 }
 0x712   : > { %v10607_v41 = vpop.eup %10606  ;;  %v8680_v28 = vadd.f32 1.0, %v10605_v30  ;;  %v8643_v45 = vmul.f32 1.442695, %v8588_v50  ;;  %v17017_v39 = vadd.f32 %v10023_v22, %v8374_v20  ;;  %v9914_v60 = vadd.f32 %v9913_v15, %v9912_v17  ;;  %v10025_v9 = vpop.f32.mrf.mxu1 }
 0x713   : > { %v8740_v8 = vmul.f32 %v10607_v41, %v16968_v31  ;;  %v9915_v11 = vpop.f32.mrf.mxu0  ;;  %v10026_v19 = vadd.f32 %v10025_v9, %v10024_v58 }
 0x714   : > { %10620 = vrcp.f32 %v8680_v28  ;;  %v8589_v26 = vsub.f32 0.0, %v17017_v39  ;;  %v8377_v24 = vadd.f32 %v9914_v60, %v16897_v62  ;;  %v10027_v2 = vpop.f32.mrf.mxu1 }
 0x715   : > { %v10609_v34 = vpop.eup %10608  ;;  %v9607_v54 = vpack.c.bf16 %v8740_v8, %v8739_v33  ;;  %10622 = vpow2.f32 %v8643_v45  ;;  %v9916_v57 = vpop.f32.mrf.mxu0 }
 0x716   : > { %v10611_v43 = vpop.eup %10610  ;;  %v8645_v59 = vmul.f32 1.442695, %v8589_v26  ;;  %v17023_v51 = vadd.f32 %v10026_v19, %v8377_v24  ;;  %v9917_v40 = vadd.f32 %v9916_v57, %v9915_v11  ;;  %v10028_v25 = vpop.f32.mrf.mxu1  ;;  %v8741_v47 = vmul.f32 %v10609_v34, %v16973_v14 }
 0x717   : > { %9700 = vst [vmem:[%s11188_s13 + $0x38] sm:$0xff] %v9607_v54   ;;  %v8681_v31 = vadd.f32 1.0, %v10611_v43  ;;  %v9918_v44 = vpop.f32.mrf.mxu0  ;;  %v10029_v48 = vadd.f32 %v10028_v25, %v10027_v2 }
 0x718   : > { %10624 = vpow2.f32 %v8645_v59  ;;  %v8590_v13 = vsub.f32 0.0, %v17023_v51  ;;  %v8382_v29 = vadd.f32 %v9917_v40, %v16897_v62  ;;  %v10030_v4 = vpop.f32.mrf.mxu1 }
 0x719   : > { %v10613_v35 = vpop.eup %10612  ;;  %v9919_v21 = vpop.f32.mrf.mxu0  ;;  %10626 = vrcp.f32 %v8681_v31 }
 0x71a   : > { %v10615_v27 = vpop.eup %10614  ;;  %v8742_v37 = vmul.f32 %v10613_v35, %v16979_v61  ;;  %v8647_v55 = vmul.f32 1.442695, %v8590_v13  ;;  %v17030_v6 = vadd.f32 %v10029_v48, %v8382_v29  ;;  %v9920_v46 = vadd.f32 %v9919_v21, %v9918_v44  ;;  %v10031_v18 = vpop.f32.mrf.mxu1 }
 0x71b   : > { %v8682_v56 = vadd.f32 1.0, %v10615_v27  ;;  %v10032_v12 = vadd.f32 %v10031_v18, %v10030_v4  ;;  %v9921_v23 = vpop.f32.mrf.mxu0 }
 0x71c   : > { %v9612_v63 = vpack.c.bf16 %v8742_v37, %v8741_v47  ;;  %10628 = vpow2.f32 %v8647_v55  ;;  %v8591_v3 = vsub.f32 0.0, %v17030_v6  ;;  %v8385_v14 = vadd.f32 %v9920_v46, %v16897_v62  ;;  %v10033_v52 = vpop.f32.mrf.mxu1 }
 0x71d   : > { %v10617_v7 = vpop.eup %10616  ;;  %10630 = vrcp.f32 %v8682_v56  ;;  %v9922_v61 = vpop.f32.mrf.mxu0 }
 0x71e   : > { %v10619_v5 = vpop.eup %10618  ;;  %9701 = vst [vmem:[%s11188_s13 + $0x40] sm:$0xff] %v9612_v63   ;;  %v8649_v10 = vmul.f32 1.442695, %v8591_v3  ;;  %v17035_v0 = vadd.f32 %v10032_v12, %v8385_v14  ;;  %v9923_v53 = vadd.f32 %v9922_v61, %v9921_v23  ;;  %v10034_v17 = vpop.f32.mrf.mxu1  ;;  %v8743_v41 = vmul.f32 %v10617_v7, %v16986_v32 }
 0x71f   : > { %v8683_v16 = vadd.f32 1.0, %v10619_v5  ;;  %v9924_v50 = vpop.f32.mrf.mxu0  ;;  %v10035_v58 = vadd.f32 %v10034_v17, %v10033_v52 }
 0x720   : > { %10632 = vpow2.f32 %v8649_v10  ;;  %v8592_v20 = vsub.f32 0.0, %v17035_v0  ;;  %v8390_v22 = vadd.f32 %v9923_v53, %v16897_v62  ;;  %v10036_v30 = vpop.f32.mrf.mxu1 }
 0x721   : > { %v10621_v15 = vpop.eup %10620  ;;  %v9925_v28 = vpop.f32.mrf.mxu0  ;;  %10634 = vrcp.f32 %v8683_v16 }
 0x722   : > { %v10623_v45 = vpop.eup %10622  ;;  %v8744_v60 = vmul.f32 %v10621_v15, %v16991_v38  ;;  %v8651_v9 = vmul.f32 1.442695, %v8592_v20  ;;  %v17041_v33 = vadd.f32 %v10035_v58, %v8390_v22  ;;  %v9926_v8 = vadd.f32 %v9925_v28, %v9924_v50  ;;  %v10037_v11 = vpop.f32.mrf.mxu1 }
 0x723   : > { %v8684_v26 = vadd.f32 1.0, %v10623_v45  ;;  %v10038_v24 = vadd.f32 %v10037_v11, %v10036_v30  ;;  %v9927_v19 = vpop.f32.mrf.mxu0 }
 0x724   : > { %v9617_v2 = vpack.c.bf16 %v8744_v60, %v8743_v41  ;;  %10636 = vpow2.f32 %v8651_v9  ;;  %v8593_v34 = vsub.f32 0.0, %v17041_v33  ;;  %v8393_v32 = vadd.f32 %v9926_v8, %v16897_v62  ;;  %v10039_v54 = vpop.f32.mrf.mxu1 }
 0x725   : > { %v10625_v57 = vpop.eup %10624  ;;  %10638 = vrcp.f32 %v8684_v26  ;;  %v9928_v38 = vpop.f32.mrf.mxu0 }
 0x726   : > { %9702 = vst [vmem:[%s11188_s13 + $0x48] sm:$0xff] %v9617_v2   ;;  %v8685_v43 = vadd.f32 1.0, %v10625_v57  ;;  %v8653_v59 = vmul.f32 1.442695, %v8593_v34  ;;  %v17046_v40 = vadd.f32 %v10038_v24, %v8393_v32  ;;  %v9929_v25 = vadd.f32 %v9928_v38, %v9927_v19  ;;  %v10040_v31 = vpop.f32.mrf.mxu1  ;;  %v10627_v13 = vpop.eup %10626 }
 0x727   : > { %v9930_v44 = vpop.f32.mrf.mxu0  ;;  %v10041_v4 = vadd.f32 %v10040_v31, %v10039_v54  ;;  %v8745_v12 = vmul.f32 %v10627_v13, %v16997_v42 }
 0x728   : > { %10640 = vrcp.f32 %v8685_v43  ;;  %v8594_v29 = vsub.f32 0.0, %v17046_v40  ;;  %v8398_v48 = vadd.f32 %v9929_v25, %v16897_v62  ;;  %v10042_v35 = vpop.f32.mrf.mxu1 }
 0x729   : > { %v10629_v47 = vpop.eup %10628  ;;  %10642 = vpow2.f32 %v8653_v59  ;;  %v9931_v21 = vpop.f32.mrf.mxu0 }
 0x72a   : > { %v10631_v27 = vpop.eup %10630  ;;  %v8686_v37 = vadd.f32 1.0, %v10629_v47  ;;  %v8655_v55 = vmul.f32 1.442695, %v8594_v29  ;;  %v17050_v46 = vadd.f32 %v10041_v4, %v8398_v48  ;;  %v9932_v18 = vadd.f32 %v9931_v21, %v9930_v44  ;;  %v10043_v56 = vpop.f32.mrf.mxu1 }
 0x72b   : > { %v8746_v23 = vmul.f32 %v10631_v27, %v17002_v1  ;;  %v10044_v14 = vadd.f32 %v10043_v56, %v10042_v35 }
 0x72c   : > { %10644 = vrcp.f32 %v8686_v37  ;;  %v8595_v63 = vsub.f32 0.0, %v17050_v46  ;;  %v8401_v3 = vadd.f32 %v9932_v18, %v16897_v62 }
 0x72d   : > { %v10633_v52 = vpop.eup %10632  ;;  %v9622_v7 = vpack.c.bf16 %v8746_v23, %v8745_v12  ;;  %10646 = vpow2.f32 %v8655_v55 }
 0x72e   : > { %v8687_v61 = vadd.f32 1.0, %v10633_v52  ;;  %v8657_v5 = vmul.f32 1.442695, %v8595_v63  ;;  %v8562_v10 = vadd.f32 %v10044_v14, %v8401_v3  ;;  %v10635_v53 = vpop.eup %10634 }
 0x72f   : > { %9703 = vst [vmem:[%s11188_s13 + $0x50] sm:$0xff] %v9622_v7   ;;  %v8747_v20 = vmul.f32 %v10635_v53, %v17006_v49 }
 0x730   : > { %v8596_v17 = vsub.f32 0.0, %v8562_v10  ;;  %10648 = vpow2.f32 %v8657_v5 }
 0x731   : > { %v10637_v16 = vpop.eup %10636  ;;  %10650 = vrcp.f32 %v8687_v61 }
 0x732   : > { %v10639_v42 = vpop.eup %10638  ;;  %v8688_v1 = vadd.f32 1.0, %v10637_v16  ;;  %v8659_v50 = vmul.f32 1.442695, %v8596_v17 }
 0x733   : > { %v8748_v62 = vmul.f32 %v10639_v42, %v17012_v36 }
 0x734   : > { %10652 = vrcp.f32 %v8688_v1 }
 0x735   : > { %v10641_v22 = vpop.eup %10640  ;;  %v9627_v58 = vpack.c.bf16 %v8748_v62, %v8747_v20  ;;  %10654 = vpow2.f32 %v8659_v50 }
 0x736   : > { %v10643_v30 = vpop.eup %10642  ;;  %v8749_v45 = vmul.f32 %v10641_v22, %v17017_v39 }
 0x737   : > { %9704 = vst [vmem:[%s11188_s13 + $0x58] sm:$0xff] %v9627_v58   ;;  %v8689_v15 = vadd.f32 1.0, %v10643_v30 }
 0x739   : > { %v10645_v41 = vpop.eup %10644  ;;  %10656 = vrcp.f32 %v8689_v15 }
 0x73a   : > { %v10647_v28 = vpop.eup %10646  ;;  %v8750_v60 = vmul.f32 %v10645_v41, %v17023_v51 }
 0x73b   : > { %v8690_v9 = vadd.f32 1.0, %v10647_v28 }
 0x73c   : > { %v9632_v49 = vpack.c.bf16 %v8750_v60, %v8749_v45 }
 0x73d   : > { %10658 = vrcp.f32 %v8690_v9  ;;  %v10649_v36 = vpop.eup %10648 }
 0x73e   : > { %9705 = vst [vmem:[%s11188_s13 + $0x60] sm:$0xff] %v9632_v49   ;;  %v10651_v8 = vpop.eup %10650  ;;  %v8691_v11 = vadd.f32 1.0, %v10649_v36 }
 0x73f   : > { %v8751_v19 = vmul.f32 %v10651_v8, %v17030_v6 }
 0x740   : > { %10660 = vrcp.f32 %v8691_v11 }
 0x741   : > { %v10653_v26 = vpop.eup %10652 }
 0x742   : > { %v10655_v24 = vpop.eup %10654  ;;  %v8752_v39 = vmul.f32 %v10653_v26, %v17035_v0 }
 0x743   : > { %v8692_v51 = vadd.f32 1.0, %v10655_v24 }
 0x744   : > { %v9637_v2 = vpack.c.bf16 %v8752_v39, %v8751_v19 }
 0x745   : > { %10662 = vrcp.f32 %v8692_v51 }
 0x746   : > { %9706 = vst [vmem:[%s11188_s13 + $0x68] sm:$0xff] %v9637_v2   ;;  %v10657_v34 = vpop.eup %10656 }
 0x747   : > { %v8753_v54 = vmul.f32 %v10657_v34, %v17041_v33 }
 0x74a   : > { %v10659_v32 = vpop.eup %10658 }
 0x74b   : > { %v8754_v57 = vmul.f32 %v10659_v32, %v17046_v40 }
 0x74d   : > { %v9642_v38 = vpack.c.bf16 %v8754_v57, %v8753_v54  ;;  %v10661_v6 = vpop.eup %10660 }
 0x74e   : > { %v8755_v43 = vmul.f32 %v10661_v6, %v17050_v46 }
 0x74f   : > { %9707 = vst [vmem:[%s11188_s13 + $0x70] sm:$0xff] %v9642_v38  }
 0x752   : > { %v10663_v0 = vpop.eup %10662 }
 0x753   : > { %v8756_v59 = vmul.f32 %v10663_v0, %v8562_v10 }
 0x755   : > { %v9647_v33 = vpack.c.bf16 %v8756_v59, %v8755_v43 }
 0x757   : > { %9708 = vst [vmem:[%s11188_s13 + $0x78] sm:$0xff] %v9647_v33  }
 0x758   : > { %10759 = shalt.err (!%p10756_p3)
}
 0x759   : > { %s10760_s15 = scalar_lea.hbm %s17076_s12, 2048  ;;  %s10764_s3 = scalar_lea.hbm %s18306_s11, 8192 }
 0x75a   : > { %p10761_p2 = scmp.ne.s32.totalorder %s17076_s12, %s10760_s15  ;;  %p10765_p12 = scmp.lt.s32.totalorder %s17076_s12, %s18306_s11 }
 0x75b   : > { %p10766_p11 = scmp.lt.s32.totalorder %s10764_s3, %s10760_s15 }
 0x75c   : > { %p10762_p10 = pnand %p10761_p2, %p18307_p8 }
 0x75d   : > { %p10767_p6 = por %p10766_p11, %p10765_p12 }
 0x75e   : > { %p10763_p0 = pneg %p10762_p10 }
 0x760   : > { %p10768_p9 = pnand %p10767_p6, %p10763_p0 }
 0x762   : > { %10771 = shalt.err (!%p10768_p9)
}
 0x763   : > { %s10909_s30 = smov 64   ;;  %s10910_s7 = smov 128  }
 0x764   : > { %s10911_s17 = smov 4  }
 0x765   : > { %10069 = dma.vmem_to_hbm [thread:$0]  (%p18307_p8), %s17078_s5, 2048, %s17076_s12, %s17083_s2, %s10909_s30, %s10910_s7, %s10911_s17  }
 0x766 PF: > { %p10089_p13 = scmp.ge.s32.totalorder %s10898_s6, 2  ;;  %s8947_s20 = sand.u32 1, %s10846_s18  }
 0x767   : > { %p18308_p4 = scmp.ne.s32.totalorder %s17459_s8, 0  ;;  %s8948_s23 = scalar_lea.sflag [#allocation6], %s8947_s20 }
 0x769   : > { %p10083_p7 = pnand %p10089_p13, %p18308_p4 }
 0x76b   : > { %p10084_p1 = pneg %p10083_p7 }
 0x76d   : > { %10841 = dma.done.wait (%p10084_p1), %s8948_s23, 2048  }
 0x76e   : > { %10843 = vsyncadd (%p10084_p1), %s8948_s23, 4294965248  ;;  %s22_s6 = sadd.s32 1, %s10898_s6   ;;  %s18310_s21 = sld [smem:[#allocation15_spill]] }
 0x76f   : > { %p17111_p5 = scmp.ge.s32.totalorder %s22_s6, 6   ;;  %s18311_s20 = sld [smem:[#allocation25_spill]] }
 0x770   : > { %s18312_s9 = sld [smem:[#allocation16_spill]]  ;;  %s18321_s18 = smov %s10850_s19 }
 0x771   : > { %s18313_s23 = sld [smem:[#allocation26_spill]]  ;;  %s18325_s24 = smov %s10874_s25 }
 0x772   : > { %s18314_s5 = sld [smem:[#allocation17_spill]] }
 0x773   : > { %s18315_s8 = sld [smem:[#allocation24_spill]] }
 0x774   : > { %s18316_s27 = sld [smem:[#allocation20_spill]]  ;;  %s18322_s19 = smov %s18310_s21 }
 0x775   : > { %s18317_s28 = sld [smem:[#allocation21_spill]]  ;;  %s18323_s21 = smov %s10862_s22 }
 0x776   : > { %s18318_s29 = sld [smem:[#allocation22_spill]]  ;;  %s18324_s22 = smov %s18312_s9 }
 0x777   : > { %s18319_s30 = sld [smem:[#allocation23_spill]]  ;;  %21 = sbr.rel (!%p17111_p5) target bundleno = 18 (0x12), region = 111 }
 0x778   : > { %s18326_s25 = smov %s18314_s5 }
 0x779   : > { %s18327_s26 = smov %s18315_s8 }
 0x77c   :  { %8953 = vsyncpa [#allocation5], 1 }
 0x77d   :  { %8955 = vsyncpa [#allocation5 + $0x1], 1 }
 0x77e   :  { %8956 = vsyncpa [#allocation8], 1 }
 0x77f   :  { %8957 = vsyncpa [#allocation6], 1 }
 0x780   :  { %8959 = vsyncpa [#allocation6 + $0x1], 1 }

</bundles_post_ra>
